<compile_context>
chip_gen: v6e
topology: v6e:2x2x1
jax: 0.10.0
libtpu: 0.0.40
codegen_flags: <defaults>
</compile_context>

<pallas_src>
import functools

import jax
import jax.numpy as jnp
from jax import lax
from jax.experimental import pallas as pl
from jax.experimental.pallas import tpu as pltpu

NEG_SLOPE = 0.01   # nn.LeakyReLU default
BN_EPS = 1e-5
TM_MAX = 1024      # max GEMM M-tile (rows of the im2col matrix)


def _round_up(v, m):
    return ((v + m - 1) // m) * m


# --------------------------------------------------------------------------
# Pallas kernels
# --------------------------------------------------------------------------
def _gemm_bias_kernel(x_ref, w_ref, shift_ref, o_ref, *, apply_act):
    """out = leaky_relu(x @ w + shift)  (activation optional, f32 epilogue)."""
    acc = jnp.dot(x_ref[...], w_ref[...], preferred_element_type=jnp.float32)
    out = acc + shift_ref[...]
    if apply_act:
        out = jnp.where(out >= 0, out, NEG_SLOPE * out)
    o_ref[...] = out.astype(o_ref.dtype)


def gemm_bias_act(x, w, shift, apply_act):
    """x:(M,K) f32, w:(K,N) f32 (BN scale already folded), shift:(N,) -> (M,N) f32.

    K and N are zero-padded to multiples of 128 (lane-dense loads / stores),
    M is padded to an adaptive tile TM = min(round_up(M, 8), TM_MAX).
    Operands are cast to bf16; accumulation and epilogue stay in f32.
    """
    M, K = x.shape
    N = w.shape[1]
    Kp = _round_up(K, 128)
    Np = _round_up(N, 128)
    tm = min(_round_up(M, 8), TM_MAX)
    Mp = _round_up(M, tm)

    x_p = jnp.pad(x, ((0, Mp - M), (0, Kp - K))).astype(jnp.bfloat16)
    w_p = jnp.pad(w.astype(jnp.float32),
                  ((0, Kp - K), (0, Np - N))).astype(jnp.bfloat16)
    shift_p = jnp.pad(shift.astype(jnp.float32), (0, Np - N)).reshape(1, Np)

    out = pl.pallas_call(
        functools.partial(_gemm_bias_kernel, apply_act=apply_act),
        out_shape=jax.ShapeDtypeStruct((Mp, Np), jnp.float32),
        grid=(Mp // tm,),
        in_specs=[
            pl.BlockSpec((tm, Kp), lambda i: (i, 0)),
            pl.BlockSpec((Kp, Np), lambda i: (0, 0)),
            pl.BlockSpec((1, Np), lambda i: (0, 0)),
        ],
        out_specs=pl.BlockSpec((tm, Np), lambda i: (i, 0)),
        compiler_params=pltpu.CompilerParams(dimension_semantics=("parallel",)),
    )(x_p, w_p, shift_p)
    return out[:M, :N]


def _latent_kernel(flat_ref, w_enc_ref, b_enc_ref, eps_ref, w_dec_ref, b_dec_ref,
                   mu_ref, lv_ref, d_ref, *, np_lat):
    """Fused: [mu|logvar] = flat @ W_enc + b_enc; z = eps*exp(0.5*lv) + mu;
    d = z @ W_dec + b_dec.  All f32 (tiny GEMMs; epilogue precision matters)."""
    acc = jnp.dot(flat_ref[...], w_enc_ref[...],
                  preferred_element_type=jnp.float32) + b_enc_ref[...]
    mu = acc[:, :np_lat]
    lv = acc[:, np_lat:]
    std = jnp.exp(0.5 * lv)
    z = eps_ref[...] * std + mu
    d = jnp.dot(z, w_dec_ref[...],
                preferred_element_type=jnp.float32) + b_dec_ref[...]
    mu_ref[...] = mu
    lv_ref[...] = lv
    d_ref[...] = d


def latent_path(flat, eps, params):
    """Fused fc_mu + fc_var + reparameterize + decoder_input in one pallas_call."""
    B, D = flat.shape
    w_mu, b_mu = params["fc_mu"]          # (L, 240), (L,)
    w_var, b_var = params["fc_var"]       # (L, 240), (L,)
    w_dec, b_dec = params["dec_in"]       # (240, L), (240,)
    L = w_mu.shape[0]
    Dd = w_dec.shape[0]

    Np = _round_up(L, 128)                # padded latent width
    Kp = _round_up(D, 128)                # padded flatten width
    Dp = _round_up(Dd, 128)               # padded decoder-input width

    # Concatenated encoder head:  columns [0,Np) -> mu, [Np,2Np) -> logvar.
    w_enc = jnp.zeros((Kp, 2 * Np), jnp.float32)
    w_enc = w_enc.at[:D, :L].set(w_mu.T)
    w_enc = w_enc.at[:D, Np:Np + L].set(w_var.T)
    b_enc = jnp.zeros((1, 2 * Np), jnp.float32)
    b_enc = b_enc.at[0, :L].set(b_mu)
    b_enc = b_enc.at[0, Np:Np + L].set(b_var)

    w_d = jnp.zeros((Np, Dp), jnp.float32).at[:L, :Dd].set(w_dec.T)
    b_d = jnp.zeros((1, Dp), jnp.float32).at[0, :Dd].set(b_dec)

    flat_p = jnp.pad(flat, ((0, 0), (0, Kp - D)))
    eps_p = jnp.pad(eps, ((0, 0), (0, Np - L)))

    mu_p, lv_p, d_p = pl.pallas_call(
        functools.partial(_latent_kernel, np_lat=Np),
        out_shape=(jax.ShapeDtypeStruct((B, Np), jnp.float32),
                   jax.ShapeDtypeStruct((B, Np), jnp.float32),
                   jax.ShapeDtypeStruct((B, Dp), jnp.float32)),
    )(flat_p, w_enc, b_enc, eps_p, w_d, b_d)
    return mu_p[:, :L], lv_p[:, :L], d_p[:, :Dd]


# --------------------------------------------------------------------------
# JAX glue: im2col, conv / deconv blocks
# --------------------------------------------------------------------------
def _im2col(x_nhwc, ksize, stride):
    B, H, W, C = x_nhwc.shape
    Ho = (H - ksize) // stride + 1
    Wo = (W - ksize) // stride + 1
    patches = []
    for ky in range(ksize):
        for kx in range(ksize):
            patches.append(
                x_nhwc[:, ky:ky + stride * Ho:stride, kx:kx + stride * Wo:stride, :])
    p = jnp.stack(patches, axis=3)               # (B, Ho, Wo, k*k, C)
    return p.reshape(B * Ho * Wo, ksize * ksize * C), (B, Ho, Wo)


def _bn_fold(b, gamma, beta, mean, var):
    s = gamma / jnp.sqrt(var + BN_EPS)
    return s, (b - mean) * s + beta


def conv_block_fwd(x_nhwc, params):
    """Conv2d(k=3,s=2,p=1) + BN(eval) + LeakyReLU.  w:(Cout,Cin,3,3)."""
    w, b, gamma, beta, mean, var = params
    cout = w.shape[0]
    xp = jnp.pad(x_nhwc, ((0, 0), (1, 1), (1, 1), (0, 0)))
    cols, (B, Ho, Wo) = _im2col(xp, 3, 2)
    wm = jnp.transpose(w, (2, 3, 1, 0)).reshape(-1, cout)   # (ky,kx,cin) x cout
    scale, shift = _bn_fold(b, gamma, beta, mean, var)
    wm = wm * scale[None, :]                                # fold BN scale into W
    y = gemm_bias_act(cols, wm, shift, apply_act=True)
    return y.reshape(B, Ho, Wo, cout)


def deconv_block_fwd(x_nhwc, params):
    """ConvTranspose2d(k=3,s=2,p=1,op=1) + BN(eval) + LeakyReLU.  w:(Cin,Cout,3,3)."""
    w, b, gamma, beta, mean, var = params
    cin, cout = w.shape[0], w.shape[1]
    # input dilation (stride-1 zeros) + asymmetric padding (1 top/left, 2 bottom/right)
    xd = lax.pad(x_nhwc, jnp.float32(0.0),
                 ((0, 0, 0), (1, 2, 1), (1, 2, 1), (0, 0, 0)))
    cols, (B, Ho, Wo) = _im2col(xd, 3, 1)
    wf = w[:, :, ::-1, ::-1]                                 # spatial flip
    wm = jnp.transpose(wf, (2, 3, 0, 1)).reshape(9 * cin, cout)
    scale, shift = _bn_fold(b, gamma, beta, mean, var)
    wm = wm * scale[None, :]                                 # fold BN scale into W
    y = gemm_bias_act(cols, wm, shift, apply_act=True)
    return y.reshape(B, Ho, Wo, cout)


# --------------------------------------------------------------------------
# Parameter init (deterministic, synthetic)
# --------------------------------------------------------------------------
def init_params(key, in_channels, latent_dim):
    keys = iter(jax.random.split(key, 128))

    def nrm(shape, scale=0.05):
        return scale * jax.random.normal(next(keys), shape, dtype=jnp.float32)

    def bn_params(c):
        gamma = 1.0 + 0.1 * jax.random.normal(next(keys), (c,), dtype=jnp.float32)
        beta = nrm((c,))
        mean = nrm((c,))
        var = jnp.abs(nrm((c,))) + 1.0
        return gamma, beta, mean, var

    enc_chans = [in_channels, 8, 16, 32, 48, 60]
    enc = []
    for cin, cout in zip(enc_chans[:-1], enc_chans[1:]):
        w = nrm((cout, cin, 3, 3))
        b = nrm((cout,))
        enc.append((w, b) + bn_params(cout))

    dec_chans = [60, 48, 32, 16, 8, in_channels]
    dec = []
    for cin, cout in zip(dec_chans[:-1], dec_chans[1:]):
        w = nrm((cin, cout, 3, 3))          # ConvTranspose weight layout
        b = nrm((cout,))
        dec.append((w, b) + bn_params(cout))

    params = {
        "enc": enc,
        "dec": dec,
        "fc_mu": (nrm((latent_dim, 240)), nrm((latent_dim,))),
        "fc_var": (nrm((latent_dim, 240)), nrm((latent_dim,))),
        "dec_in": (nrm((240, latent_dim)), nrm((240,))),
    }
    return params


# --------------------------------------------------------------------------
# Full VAE forward
# --------------------------------------------------------------------------
def vae_forward(x_nchw, params, eps):
    B = x_nchw.shape[0]
    h = jnp.transpose(x_nchw, (0, 2, 3, 1)).astype(jnp.float32)   # NCHW -> NHWC

    for p in params["enc"]:
        h = conv_block_fwd(h, p)

    # torch.flatten(start_dim=1) on NCHW => channel-major flatten
    flat = jnp.transpose(h, (0, 3, 1, 2)).reshape(B, -1)          # (B, 240)

    # fused fc_mu / fc_var / reparameterize / decoder_input
    mu, log_var, d = latent_path(flat, eps, params)

    d = d.reshape(B, 60, 2, 2)                                    # NCHW view
    h = jnp.transpose(d, (0, 2, 3, 1))                            # -> NHWC
    for p in params["dec"]:
        h = deconv_block_fwd(h, p)

    recon = jnp.transpose(h, (0, 3, 1, 2))                        # back to NCHW
    return recon, x_nchw, mu, log_var


# --------------------------------------------------------------------------
if __name__ == "__main__":
    IN_CHANNELS = 3
    LATENT_DIM = 16
    IMG_SIZE = 64      # required so the encoder output flattens to 60*2*2 = 240
    BATCH = 2

    root = jax.random.PRNGKey(0)
    k_params, k_x, k_eps = jax.random.split(root, 3)

    params = init_params(k_params, IN_CHANNELS, LATENT_DIM)
    x = jax.random.normal(k_x, (BATCH, IN_CHANNELS, IMG_SIZE, IMG_SIZE),
                          dtype=jnp.float32)
    # torch.randn_like(std) in reparameterize -> deterministic JAX normal here
    eps = jax.random.normal(k_eps, (BATCH, LATENT_DIM), dtype=jnp.float32)

    fwd = jax.jit(vae_forward)
    recon, x_out, mu, log_var = fwd(x, params, eps)
    jax.block_until_ready((recon, x_out, mu, log_var))

    assert recon.shape == (BATCH, IN_CHANNELS, IMG_SIZE, IMG_SIZE), recon.shape
    assert mu.shape == (BATCH, LATENT_DIM) and log_var.shape == (BATCH, LATENT_DIM)
    print("KERNEL_OK")
</pallas_src>

<mosaic_0001>
module attributes {stable_mosaic.version = 11 : i64} {
  func.func @_gemm_bias_kernel(%arg0: i32, %arg1: memref<1024x128xbf16, #tpu.memory_space<vmem>>, %arg2: memref<128x128xbf16, #tpu.memory_space<vmem>>, %arg3: memref<1x128xf32, #tpu.memory_space<vmem>>, %arg4: memref<1024x128xf32, #tpu.memory_space<vmem>>) attributes {dimension_semantics = [#tpu.dimension_semantics<parallel>], iteration_bounds = array<i64: 2>, scalar_prefetch = 0 : i64, scratch_operands = 0 : i64, tpu.core_type = #tpu.core_type<tc>, window_params = [{transform_indices = @transform_0, window_bounds = array<i64: 1024, 128>}, {pipeline_mode = #tpu.pipeline_mode<synchronous>, transform_indices = @transform_1, window_bounds = array<i64: 128, 128>}, {pipeline_mode = #tpu.pipeline_mode<synchronous>, transform_indices = @transform_2, window_bounds = array<i64: 1, 128>}, {transform_indices = @transform_3, window_bounds = array<i64: 1024, 128>}]} {
    %c0 = arith.constant 0 : index
    %c0_0 = arith.constant 0 : index
    %0 = vector.load %arg1[%c0, %c0_0] : memref<1024x128xbf16, #tpu.memory_space<vmem>>, vector<1024x128xbf16>
    %c0_1 = arith.constant 0 : index
    %c0_2 = arith.constant 0 : index
    %1 = vector.load %arg2[%c0_1, %c0_2] : memref<128x128xbf16, #tpu.memory_space<vmem>>, vector<128x128xbf16>
    %cst = arith.constant dense<0.000000e+00> : vector<1024x128xf32>
    %2 = tpu.matmul %0, %1, %cst {dimension_numbers = #tpu.dot_dimension_numbers<[1], [0], [0], [1], [0, 0, 1, 1], [], []>} : vector<1024x128xbf16>, vector<128x128xbf16>, vector<1024x128xf32> -> vector<1024x128xf32>
    %c0_3 = arith.constant 0 : index
    %c0_4 = arith.constant 0 : index
    %3 = vector.load %arg3[%c0_3, %c0_4] : memref<1x128xf32, #tpu.memory_space<vmem>>, vector<1x128xf32>
    %4 = vector.broadcast %3 : vector<1x128xf32> to vector<1024x128xf32>
    %5 = arith.addf %2, %4 : vector<1024x128xf32>
    %cst_5 = arith.constant 0.000000e+00 : f32
    %6 = vector.broadcast %cst_5 : f32 to vector<1024x128xf32>
    %7 = arith.cmpf oge, %5, %6 : vector<1024x128xf32>
    %cst_6 = arith.constant 0.00999999977 : f32
    %8 = vector.broadcast %cst_6 : f32 to vector<1024x128xf32>
    %9 = arith.mulf %8, %5 : vector<1024x128xf32>
    %10 = arith.select %7, %5, %9 : vector<1024x128xi1>, vector<1024x128xf32>
    %c0_7 = arith.constant 0 : index
    %c0_8 = arith.constant 0 : index
    %11 = vector.load %arg4[%c0_7, %c0_8] : memref<1024x128xf32, #tpu.memory_space<vmem>>, vector<1024x128xf32>
    tpu.vector_store %arg4[%c0_7, %c0_8], %10 {strides = array<i32>} : memref<1024x128xf32, #tpu.memory_space<vmem>>, vector<1024x128xf32>,
    return
  }
  func.func @transform_0(%arg0: i32) -> (i32, i32) {
    %c0_i32 = arith.constant 0 : i32
    %c0_i32_0 = arith.constant 0 : i32
    return %arg0, %c0_i32 : i32, i32
  }
  func.func @transform_1(%arg0: i32) -> (i32, i32) {
    %c0_i32 = arith.constant 0 : i32
    %c0_i32_0 = arith.constant 0 : i32
    %c0_i32_1 = arith.constant 0 : i32
    return %c0_i32, %c0_i32_0 : i32, i32
  }
  func.func @transform_2(%arg0: i32) -> (i32, i32) {
    %c0_i32 = arith.constant 0 : i32
    %c0_i32_0 = arith.constant 0 : i32
    %c0_i32_1 = arith.constant 0 : i32
    return %c0_i32, %c0_i32_0 : i32, i32
  }
  func.func @transform_3(%arg0: i32) -> (i32, i32) {
    %c0_i32 = arith.constant 0 : i32
    %c0_i32_0 = arith.constant 0 : i32
    return %arg0, %c0_i32 : i32, i32
  }
}

module attributes {stable_mosaic.version = 11 : i64} {
  func.func @_gemm_bias_kernel(%arg0: i32, %arg1: memref<512x128xbf16, #tpu.memory_space<vmem>>, %arg2: memref<128x128xbf16, #tpu.memory_space<vmem>>, %arg3: memref<1x128xf32, #tpu.memory_space<vmem>>, %arg4: memref<512x128xf32, #tpu.memory_space<vmem>>) attributes {dimension_semantics = [#tpu.dimension_semantics<parallel>], iteration_bounds = array<i64: 1>, scalar_prefetch = 0 : i64, scratch_operands = 0 : i64, tpu.core_type = #tpu.core_type<tc>, window_params = [{transform_indices = @transform_0, window_bounds = array<i64: 512, 128>}, {pipeline_mode = #tpu.pipeline_mode<synchronous>, transform_indices = @transform_1, window_bounds = array<i64: 128, 128>}, {pipeline_mode = #tpu.pipeline_mode<synchronous>, transform_indices = @transform_2, window_bounds = array<i64: 1, 128>}, {transform_indices = @transform_3, window_bounds = array<i64: 512, 128>}]} {
    %c0 = arith.constant 0 : index
    %c0_0 = arith.constant 0 : index
    %0 = vector.load %arg1[%c0, %c0_0] : memref<512x128xbf16, #tpu.memory_space<vmem>>, vector<512x128xbf16>
    %c0_1 = arith.constant 0 : index
    %c0_2 = arith.constant 0 : index
    %1 = vector.load %arg2[%c0_1, %c0_2] : memref<128x128xbf16, #tpu.memory_space<vmem>>, vector<128x128xbf16>
    %cst = arith.constant dense<0.000000e+00> : vector<512x128xf32>
    %2 = tpu.matmul %0, %1, %cst {dimension_numbers = #tpu.dot_dimension_numbers<[1], [0], [0], [1], [0, 0, 1, 1], [], []>} : vector<512x128xbf16>, vector<128x128xbf16>, vector<512x128xf32> -> vector<512x128xf32>
    %c0_3 = arith.constant 0 : index
    %c0_4 = arith.constant 0 : index
    %3 = vector.load %arg3[%c0_3, %c0_4] : memref<1x128xf32, #tpu.memory_space<vmem>>, vector<1x128xf32>
    %4 = vector.broadcast %3 : vector<1x128xf32> to vector<512x128xf32>
    %5 = arith.addf %2, %4 : vector<512x128xf32>
    %cst_5 = arith.constant 0.000000e+00 : f32
    %6 = vector.broadcast %cst_5 : f32 to vector<512x128xf32>
    %7 = arith.cmpf oge, %5, %6 : vector<512x128xf32>
    %cst_6 = arith.constant 0.00999999977 : f32
    %8 = vector.broadcast %cst_6 : f32 to vector<512x128xf32>
    %9 = arith.mulf %8, %5 : vector<512x128xf32>
    %10 = arith.select %7, %5, %9 : vector<512x128xi1>, vector<512x128xf32>
    %c0_7 = arith.constant 0 : index
    %c0_8 = arith.constant 0 : index
    %11 = vector.load %arg4[%c0_7, %c0_8] : memref<512x128xf32, #tpu.memory_space<vmem>>, vector<512x128xf32>
    tpu.vector_store %arg4[%c0_7, %c0_8], %10 {strides = array<i32>} : memref<512x128xf32, #tpu.memory_space<vmem>>, vector<512x128xf32>,
    return
  }
  func.func @transform_0(%arg0: i32) -> (i32, i32) {
    %c0_i32 = arith.constant 0 : i32
    %c0_i32_0 = arith.constant 0 : i32
    return %arg0, %c0_i32 : i32, i32
  }
  func.func @transform_1(%arg0: i32) -> (i32, i32) {
    %c0_i32 = arith.constant 0 : i32
    %c0_i32_0 = arith.constant 0 : i32
    %c0_i32_1 = arith.constant 0 : i32
    return %c0_i32, %c0_i32_0 : i32, i32
  }
  func.func @transform_2(%arg0: i32) -> (i32, i32) {
    %c0_i32 = arith.constant 0 : i32
    %c0_i32_0 = arith.constant 0 : i32
    %c0_i32_1 = arith.constant 0 : i32
    return %c0_i32, %c0_i32_0 : i32, i32
  }
  func.func @transform_3(%arg0: i32) -> (i32, i32) {
    %c0_i32 = arith.constant 0 : i32
    %c0_i32_0 = arith.constant 0 : i32
    return %arg0, %c0_i32 : i32, i32
  }
}

module attributes {stable_mosaic.version = 11 : i64} {
  func.func @_gemm_bias_kernel(%arg0: i32, %arg1: memref<128x256xbf16, #tpu.memory_space<vmem>>, %arg2: memref<256x128xbf16, #tpu.memory_space<vmem>>, %arg3: memref<1x128xf32, #tpu.memory_space<vmem>>, %arg4: memref<128x128xf32, #tpu.memory_space<vmem>>) attributes {dimension_semantics = [#tpu.dimension_semantics<parallel>], iteration_bounds = array<i64: 1>, scalar_prefetch = 0 : i64, scratch_operands = 0 : i64, tpu.core_type = #tpu.core_type<tc>, window_params = [{transform_indices = @transform_0, window_bounds = array<i64: 128, 256>}, {pipeline_mode = #tpu.pipeline_mode<synchronous>, transform_indices = @transform_1, window_bounds = array<i64: 256, 128>}, {pipeline_mode = #tpu.pipeline_mode<synchronous>, transform_indices = @transform_2, window_bounds = array<i64: 1, 128>}, {transform_indices = @transform_3, window_bounds = array<i64: 128, 128>}]} {
    %c0 = arith.constant 0 : index
    %c0_0 = arith.constant 0 : index
    %0 = vector.load %arg1[%c0, %c0_0] : memref<128x256xbf16, #tpu.memory_space<vmem>>, vector<128x256xbf16>
    %c0_1 = arith.constant 0 : index
    %c0_2 = arith.constant 0 : index
    %1 = vector.load %arg2[%c0_1, %c0_2] : memref<256x128xbf16, #tpu.memory_space<vmem>>, vector<256x128xbf16>
    %cst = arith.constant dense<0.000000e+00> : vector<128x128xf32>
    %2 = tpu.matmul %0, %1, %cst {dimension_numbers = #tpu.dot_dimension_numbers<[1], [0], [0], [1], [0, 0, 1, 1], [], []>} : vector<128x256xbf16>, vector<256x128xbf16>, vector<128x128xf32> -> vector<128x128xf32>
    %c0_3 = arith.constant 0 : index
    %c0_4 = arith.constant 0 : index
    %3 = vector.load %arg3[%c0_3, %c0_4] : memref<1x128xf32, #tpu.memory_space<vmem>>, vector<1x128xf32>
    %4 = vector.broadcast %3 : vector<1x128xf32> to vector<128x128xf32>
    %5 = arith.addf %2, %4 : vector<128x128xf32>
    %cst_5 = arith.constant 0.000000e+00 : f32
    %6 = vector.broadcast %cst_5 : f32 to vector<128x128xf32>
    %7 = arith.cmpf oge, %5, %6 : vector<128x128xf32>
    %cst_6 = arith.constant 0.00999999977 : f32
    %8 = vector.broadcast %cst_6 : f32 to vector<128x128xf32>
    %9 = arith.mulf %8, %5 : vector<128x128xf32>
    %10 = arith.select %7, %5, %9 : vector<128x128xi1>, vector<128x128xf32>
    %c0_7 = arith.constant 0 : index
    %c0_8 = arith.constant 0 : index
    %11 = vector.load %arg4[%c0_7, %c0_8] : memref<128x128xf32, #tpu.memory_space<vmem>>, vector<128x128xf32>
    tpu.vector_store %arg4[%c0_7, %c0_8], %10 {strides = array<i32>} : memref<128x128xf32, #tpu.memory_space<vmem>>, vector<128x128xf32>,
    return
  }
  func.func @transform_0(%arg0: i32) -> (i32, i32) {
    %c0_i32 = arith.constant 0 : i32
    %c0_i32_0 = arith.constant 0 : i32
    return %arg0, %c0_i32 : i32, i32
  }
  func.func @transform_1(%arg0: i32) -> (i32, i32) {
    %c0_i32 = arith.constant 0 : i32
    %c0_i32_0 = arith.constant 0 : i32
    %c0_i32_1 = arith.constant 0 : i32
    return %c0_i32, %c0_i32_0 : i32, i32
  }
  func.func @transform_2(%arg0: i32) -> (i32, i32) {
    %c0_i32 = arith.constant 0 : i32
    %c0_i32_0 = arith.constant 0 : i32
    %c0_i32_1 = arith.constant 0 : i32
    return %c0_i32, %c0_i32_0 : i32, i32
  }
  func.func @transform_3(%arg0: i32) -> (i32, i32) {
    %c0_i32 = arith.constant 0 : i32
    %c0_i32_0 = arith.constant 0 : i32
    return %arg0, %c0_i32 : i32, i32
  }
}

module attributes {stable_mosaic.version = 11 : i64} {
  func.func @_gemm_bias_kernel(%arg0: i32, %arg1: memref<32x384xbf16, #tpu.memory_space<vmem>>, %arg2: memref<384x128xbf16, #tpu.memory_space<vmem>>, %arg3: memref<1x128xf32, #tpu.memory_space<vmem>>, %arg4: memref<32x128xf32, #tpu.memory_space<vmem>>) attributes {dimension_semantics = [#tpu.dimension_semantics<parallel>], iteration_bounds = array<i64: 1>, scalar_prefetch = 0 : i64, scratch_operands = 0 : i64, tpu.core_type = #tpu.core_type<tc>, window_params = [{transform_indices = @transform_0, window_bounds = array<i64: 32, 384>}, {pipeline_mode = #tpu.pipeline_mode<synchronous>, transform_indices = @transform_1, window_bounds = array<i64: 384, 128>}, {pipeline_mode = #tpu.pipeline_mode<synchronous>, transform_indices = @transform_2, window_bounds = array<i64: 1, 128>}, {transform_indices = @transform_3, window_bounds = array<i64: 32, 128>}]} {
    %c0 = arith.constant 0 : index
    %c0_0 = arith.constant 0 : index
    %0 = vector.load %arg1[%c0, %c0_0] : memref<32x384xbf16, #tpu.memory_space<vmem>>, vector<32x384xbf16>
    %c0_1 = arith.constant 0 : index
    %c0_2 = arith.constant 0 : index
    %1 = vector.load %arg2[%c0_1, %c0_2] : memref<384x128xbf16, #tpu.memory_space<vmem>>, vector<384x128xbf16>
    %cst = arith.constant dense<0.000000e+00> : vector<32x128xf32>
    %2 = tpu.matmul %0, %1, %cst {dimension_numbers = #tpu.dot_dimension_numbers<[1], [0], [0], [1], [0, 0, 1, 1], [], []>} : vector<32x384xbf16>, vector<384x128xbf16>, vector<32x128xf32> -> vector<32x128xf32>
    %c0_3 = arith.constant 0 : index
    %c0_4 = arith.constant 0 : index
    %3 = vector.load %arg3[%c0_3, %c0_4] : memref<1x128xf32, #tpu.memory_space<vmem>>, vector<1x128xf32>
    %4 = vector.broadcast %3 : vector<1x128xf32> to vector<32x128xf32>
    %5 = arith.addf %2, %4 : vector<32x128xf32>
    %cst_5 = arith.constant 0.000000e+00 : f32
    %6 = vector.broadcast %cst_5 : f32 to vector<32x128xf32>
    %7 = arith.cmpf oge, %5, %6 : vector<32x128xf32>
    %cst_6 = arith.constant 0.00999999977 : f32
    %8 = vector.broadcast %cst_6 : f32 to vector<32x128xf32>
    %9 = arith.mulf %8, %5 : vector<32x128xf32>
    %10 = arith.select %7, %5, %9 : vector<32x128xi1>, vector<32x128xf32>
    %c0_7 = arith.constant 0 : index
    %c0_8 = arith.constant 0 : index
    %11 = vector.load %arg4[%c0_7, %c0_8] : memref<32x128xf32, #tpu.memory_space<vmem>>, vector<32x128xf32>
    tpu.vector_store %arg4[%c0_7, %c0_8], %10 {strides = array<i32>} : memref<32x128xf32, #tpu.memory_space<vmem>>, vector<32x128xf32>,
    return
  }
  func.func @transform_0(%arg0: i32) -> (i32, i32) {
    %c0_i32 = arith.constant 0 : i32
    %c0_i32_0 = arith.constant 0 : i32
    return %arg0, %c0_i32 : i32, i32
  }
  func.func @transform_1(%arg0: i32) -> (i32, i32) {
    %c0_i32 = arith.constant 0 : i32
    %c0_i32_0 = arith.constant 0 : i32
    %c0_i32_1 = arith.constant 0 : i32
    return %c0_i32, %c0_i32_0 : i32, i32
  }
  func.func @transform_2(%arg0: i32) -> (i32, i32) {
    %c0_i32 = arith.constant 0 : i32
    %c0_i32_0 = arith.constant 0 : i32
    %c0_i32_1 = arith.constant 0 : i32
    return %c0_i32, %c0_i32_0 : i32, i32
  }
  func.func @transform_3(%arg0: i32) -> (i32, i32) {
    %c0_i32 = arith.constant 0 : i32
    %c0_i32_0 = arith.constant 0 : i32
    return %arg0, %c0_i32 : i32, i32
  }
}

module attributes {stable_mosaic.version = 11 : i64} {
  func.func @_gemm_bias_kernel(%arg0: i32, %arg1: memref<8x512xbf16, #tpu.memory_space<vmem>>, %arg2: memref<512x128xbf16, #tpu.memory_space<vmem>>, %arg3: memref<1x128xf32, #tpu.memory_space<vmem>>, %arg4: memref<8x128xf32, #tpu.memory_space<vmem>>) attributes {dimension_semantics = [#tpu.dimension_semantics<parallel>], iteration_bounds = array<i64: 1>, scalar_prefetch = 0 : i64, scratch_operands = 0 : i64, tpu.core_type = #tpu.core_type<tc>, window_params = [{transform_indices = @transform_0, window_bounds = array<i64: 8, 512>}, {pipeline_mode = #tpu.pipeline_mode<synchronous>, transform_indices = @transform_1, window_bounds = array<i64: 512, 128>}, {pipeline_mode = #tpu.pipeline_mode<synchronous>, transform_indices = @transform_2, window_bounds = array<i64: 1, 128>}, {transform_indices = @transform_3, window_bounds = array<i64: 8, 128>}]} {
    %c0 = arith.constant 0 : index
    %c0_0 = arith.constant 0 : index
    %0 = vector.load %arg1[%c0, %c0_0] : memref<8x512xbf16, #tpu.memory_space<vmem>>, vector<8x512xbf16>
    %c0_1 = arith.constant 0 : index
    %c0_2 = arith.constant 0 : index
    %1 = vector.load %arg2[%c0_1, %c0_2] : memref<512x128xbf16, #tpu.memory_space<vmem>>, vector<512x128xbf16>
    %cst = arith.constant dense<0.000000e+00> : vector<8x128xf32>
    %2 = tpu.matmul %0, %1, %cst {dimension_numbers = #tpu.dot_dimension_numbers<[1], [0], [0], [1], [0, 0, 1, 1], [], []>} : vector<8x512xbf16>, vector<512x128xbf16>, vector<8x128xf32> -> vector<8x128xf32>
    %c0_3 = arith.constant 0 : index
    %c0_4 = arith.constant 0 : index
    %3 = vector.load %arg3[%c0_3, %c0_4] : memref<1x128xf32, #tpu.memory_space<vmem>>, vector<1x128xf32>
    %4 = vector.broadcast %3 : vector<1x128xf32> to vector<8x128xf32>
    %5 = arith.addf %2, %4 : vector<8x128xf32>
    %cst_5 = arith.constant 0.000000e+00 : f32
    %6 = vector.broadcast %cst_5 : f32 to vector<8x128xf32>
    %7 = arith.cmpf oge, %5, %6 : vector<8x128xf32>
    %cst_6 = arith.constant 0.00999999977 : f32
    %8 = vector.broadcast %cst_6 : f32 to vector<8x128xf32>
    %9 = arith.mulf %8, %5 : vector<8x128xf32>
    %10 = arith.select %7, %5, %9 : vector<8x128xi1>, vector<8x128xf32>
    %c0_7 = arith.constant 0 : index
    %c0_8 = arith.constant 0 : index
    %11 = vector.load %arg4[%c0_7, %c0_8] : memref<8x128xf32, #tpu.memory_space<vmem>>, vector<8x128xf32>
    tpu.vector_store %arg4[%c0_7, %c0_8], %10 {strides = array<i32>} : memref<8x128xf32, #tpu.memory_space<vmem>>, vector<8x128xf32>,
    return
  }
  func.func @transform_0(%arg0: i32) -> (i32, i32) {
    %c0_i32 = arith.constant 0 : i32
    %c0_i32_0 = arith.constant 0 : i32
    return %arg0, %c0_i32 : i32, i32
  }
  func.func @transform_1(%arg0: i32) -> (i32, i32) {
    %c0_i32 = arith.constant 0 : i32
    %c0_i32_0 = arith.constant 0 : i32
    %c0_i32_1 = arith.constant 0 : i32
    return %c0_i32, %c0_i32_0 : i32, i32
  }
  func.func @transform_2(%arg0: i32) -> (i32, i32) {
    %c0_i32 = arith.constant 0 : i32
    %c0_i32_0 = arith.constant 0 : i32
    %c0_i32_1 = arith.constant 0 : i32
    return %c0_i32, %c0_i32_0 : i32, i32
  }
  func.func @transform_3(%arg0: i32) -> (i32, i32) {
    %c0_i32 = arith.constant 0 : i32
    %c0_i32_0 = arith.constant 0 : i32
    return %arg0, %c0_i32 : i32, i32
  }
}

module attributes {stable_mosaic.version = 11 : i64} {
  func.func @_latent_kernel(%arg0: memref<2x256xf32, #tpu.memory_space<vmem>>, %arg1: memref<256x256xf32, #tpu.memory_space<vmem>>, %arg2: memref<1x256xf32, #tpu.memory_space<vmem>>, %arg3: memref<2x128xf32, #tpu.memory_space<vmem>>, %arg4: memref<128x256xf32, #tpu.memory_space<vmem>>, %arg5: memref<1x256xf32, #tpu.memory_space<vmem>>, %arg6: memref<2x128xf32, #tpu.memory_space<vmem>>, %arg7: memref<2x128xf32, #tpu.memory_space<vmem>>, %arg8: memref<2x256xf32, #tpu.memory_space<vmem>>) attributes {dimension_semantics = [], scalar_prefetch = 0 : i64, scratch_operands = 0 : i64, tpu.core_type = #tpu.core_type<tc>} {
    %c0 = arith.constant 0 : index
    %c0_0 = arith.constant 0 : index
    %0 = vector.load %arg0[%c0, %c0_0] : memref<2x256xf32, #tpu.memory_space<vmem>>, vector<2x256xf32>
    %c0_1 = arith.constant 0 : index
    %c0_2 = arith.constant 0 : index
    %1 = vector.load %arg1[%c0_1, %c0_2] : memref<256x256xf32, #tpu.memory_space<vmem>>, vector<256x256xf32>
    %cst = arith.constant dense<0.000000e+00> : vector<2x256xf32>
    %2 = tpu.matmul %0, %1, %cst {dimension_numbers = #tpu.dot_dimension_numbers<[1], [0], [0], [1], [0, 0, 1, 1], [], []>} : vector<2x256xf32>, vector<256x256xf32>, vector<2x256xf32> -> vector<2x256xf32>
    %c0_3 = arith.constant 0 : index
    %c0_4 = arith.constant 0 : index
    %3 = vector.load %arg2[%c0_3, %c0_4] : memref<1x256xf32, #tpu.memory_space<vmem>>, vector<1x256xf32>
    %4 = vector.broadcast %3 : vector<1x256xf32> to vector<2x256xf32>
    %5 = arith.addf %2, %4 : vector<2x256xf32>
    %6 = vector.extract_strided_slice %5 {offsets = [0, 0], sizes = [2, 128], strides = [1, 1]} : vector<2x256xf32> to vector<2x128xf32>
    %7 = vector.extract_strided_slice %5 {offsets = [0, 128], sizes = [2, 128], strides = [1, 1]} : vector<2x256xf32> to vector<2x128xf32>
    %cst_5 = arith.constant 5.000000e-01 : f32
    %8 = vector.broadcast %cst_5 : f32 to vector<2x128xf32>
    %9 = arith.mulf %8, %7 : vector<2x128xf32>
    %10 = math.exp %9 : vector<2x128xf32>
    %c0_6 = arith.constant 0 : index
    %c0_7 = arith.constant 0 : index
    %11 = vector.load %arg3[%c0_6, %c0_7] : memref<2x128xf32, #tpu.memory_space<vmem>>, vector<2x128xf32>
    %12 = arith.mulf %11, %10 : vector<2x128xf32>
    %13 = arith.addf %12, %6 : vector<2x128xf32>
    %c0_8 = arith.constant 0 : index
    %c0_9 = arith.constant 0 : index
    %14 = vector.load %arg4[%c0_8, %c0_9] : memref<128x256xf32, #tpu.memory_space<vmem>>, vector<128x256xf32>
    %cst_10 = arith.constant dense<0.000000e+00> : vector<2x256xf32>
    %15 = tpu.matmul %13, %14, %cst_10 {dimension_numbers = #tpu.dot_dimension_numbers<[1], [0], [0], [1], [0, 0, 1, 1], [], []>} : vector<2x128xf32>, vector<128x256xf32>, vector<2x256xf32> -> vector<2x256xf32>
    %c0_11 = arith.constant 0 : index
    %c0_12 = arith.constant 0 : index
    %16 = vector.load %arg5[%c0_11, %c0_12] : memref<1x256xf32, #tpu.memory_space<vmem>>, vector<1x256xf32>
    %17 = vector.broadcast %16 : vector<1x256xf32> to vector<2x256xf32>
    %18 = arith.addf %15, %17 : vector<2x256xf32>
    %c0_13 = arith.constant 0 : index
    %c0_14 = arith.constant 0 : index
    %19 = vector.load %arg6[%c0_13, %c0_14] : memref<2x128xf32, #tpu.memory_space<vmem>>, vector<2x128xf32>
    tpu.vector_store %arg6[%c0_13, %c0_14], %6 {strides = array<i32>} : memref<2x128xf32, #tpu.memory_space<vmem>>, vector<2x128xf32>,
    %c0_15 = arith.constant 0 : index
    %c0_16 = arith.constant 0 : index
    %20 = vector.load %arg7[%c0_15, %c0_16] : memref<2x128xf32, #tpu.memory_space<vmem>>, vector<2x128xf32>
    tpu.vector_store %arg7[%c0_15, %c0_16], %7 {strides = array<i32>} : memref<2x128xf32, #tpu.memory_space<vmem>>, vector<2x128xf32>,
    %c0_17 = arith.constant 0 : index
    %c0_18 = arith.constant 0 : index
    %21 = vector.load %arg8[%c0_17, %c0_18] : memref<2x256xf32, #tpu.memory_space<vmem>>, vector<2x256xf32>
    tpu.vector_store %arg8[%c0_17, %c0_18], %18 {strides = array<i32>} : memref<2x256xf32, #tpu.memory_space<vmem>>, vector<2x256xf32>,
    return
  }
}

module attributes {stable_mosaic.version = 11 : i64} {
  func.func @_gemm_bias_kernel(%arg0: i32, %arg1: memref<32x640xbf16, #tpu.memory_space<vmem>>, %arg2: memref<640x128xbf16, #tpu.memory_space<vmem>>, %arg3: memref<1x128xf32, #tpu.memory_space<vmem>>, %arg4: memref<32x128xf32, #tpu.memory_space<vmem>>) attributes {dimension_semantics = [#tpu.dimension_semantics<parallel>], iteration_bounds = array<i64: 1>, scalar_prefetch = 0 : i64, scratch_operands = 0 : i64, tpu.core_type = #tpu.core_type<tc>, window_params = [{transform_indices = @transform_0, window_bounds = array<i64: 32, 640>}, {pipeline_mode = #tpu.pipeline_mode<synchronous>, transform_indices = @transform_1, window_bounds = array<i64: 640, 128>}, {pipeline_mode = #tpu.pipeline_mode<synchronous>, transform_indices = @transform_2, window_bounds = array<i64: 1, 128>}, {transform_indices = @transform_3, window_bounds = array<i64: 32, 128>}]} {
    %c0 = arith.constant 0 : index
    %c0_0 = arith.constant 0 : index
    %0 = vector.load %arg1[%c0, %c0_0] : memref<32x640xbf16, #tpu.memory_space<vmem>>, vector<32x640xbf16>
    %c0_1 = arith.constant 0 : index
    %c0_2 = arith.constant 0 : index
    %1 = vector.load %arg2[%c0_1, %c0_2] : memref<640x128xbf16, #tpu.memory_space<vmem>>, vector<640x128xbf16>
    %cst = arith.constant dense<0.000000e+00> : vector<32x128xf32>
    %2 = tpu.matmul %0, %1, %cst {dimension_numbers = #tpu.dot_dimension_numbers<[1], [0], [0], [1], [0, 0, 1, 1], [], []>} : vector<32x640xbf16>, vector<640x128xbf16>, vector<32x128xf32> -> vector<32x128xf32>
    %c0_3 = arith.constant 0 : index
    %c0_4 = arith.constant 0 : index
    %3 = vector.load %arg3[%c0_3, %c0_4] : memref<1x128xf32, #tpu.memory_space<vmem>>, vector<1x128xf32>
    %4 = vector.broadcast %3 : vector<1x128xf32> to vector<32x128xf32>
    %5 = arith.addf %2, %4 : vector<32x128xf32>
    %cst_5 = arith.constant 0.000000e+00 : f32
    %6 = vector.broadcast %cst_5 : f32 to vector<32x128xf32>
    %7 = arith.cmpf oge, %5, %6 : vector<32x128xf32>
    %cst_6 = arith.constant 0.00999999977 : f32
    %8 = vector.broadcast %cst_6 : f32 to vector<32x128xf32>
    %9 = arith.mulf %8, %5 : vector<32x128xf32>
    %10 = arith.select %7, %5, %9 : vector<32x128xi1>, vector<32x128xf32>
    %c0_7 = arith.constant 0 : index
    %c0_8 = arith.constant 0 : index
    %11 = vector.load %arg4[%c0_7, %c0_8] : memref<32x128xf32, #tpu.memory_space<vmem>>, vector<32x128xf32>
    tpu.vector_store %arg4[%c0_7, %c0_8], %10 {strides = array<i32>} : memref<32x128xf32, #tpu.memory_space<vmem>>, vector<32x128xf32>,
    return
  }
  func.func @transform_0(%arg0: i32) -> (i32, i32) {
    %c0_i32 = arith.constant 0 : i32
    %c0_i32_0 = arith.constant 0 : i32
    return %arg0, %c0_i32 : i32, i32
  }
  func.func @transform_1(%arg0: i32) -> (i32, i32) {
    %c0_i32 = arith.constant 0 : i32
    %c0_i32_0 = arith.constant 0 : i32
    %c0_i32_1 = arith.constant 0 : i32
    return %c0_i32, %c0_i32_0 : i32, i32
  }
  func.func @transform_2(%arg0: i32) -> (i32, i32) {
    %c0_i32 = arith.constant 0 : i32
    %c0_i32_0 = arith.constant 0 : i32
    %c0_i32_1 = arith.constant 0 : i32
    return %c0_i32, %c0_i32_0 : i32, i32
  }
  func.func @transform_3(%arg0: i32) -> (i32, i32) {
    %c0_i32 = arith.constant 0 : i32
    %c0_i32_0 = arith.constant 0 : i32
    return %arg0, %c0_i32 : i32, i32
  }
}

module attributes {stable_mosaic.version = 11 : i64} {
  func.func @_gemm_bias_kernel(%arg0: i32, %arg1: memref<128x512xbf16, #tpu.memory_space<vmem>>, %arg2: memref<512x128xbf16, #tpu.memory_space<vmem>>, %arg3: memref<1x128xf32, #tpu.memory_space<vmem>>, %arg4: memref<128x128xf32, #tpu.memory_space<vmem>>) attributes {dimension_semantics = [#tpu.dimension_semantics<parallel>], iteration_bounds = array<i64: 1>, scalar_prefetch = 0 : i64, scratch_operands = 0 : i64, tpu.core_type = #tpu.core_type<tc>, window_params = [{transform_indices = @transform_0, window_bounds = array<i64: 128, 512>}, {pipeline_mode = #tpu.pipeline_mode<synchronous>, transform_indices = @transform_1, window_bounds = array<i64: 512, 128>}, {pipeline_mode = #tpu.pipeline_mode<synchronous>, transform_indices = @transform_2, window_bounds = array<i64: 1, 128>}, {transform_indices = @transform_3, window_bounds = array<i64: 128, 128>}]} {
    %c0 = arith.constant 0 : index
    %c0_0 = arith.constant 0 : index
    %0 = vector.load %arg1[%c0, %c0_0] : memref<128x512xbf16, #tpu.memory_space<vmem>>, vector<128x512xbf16>
    %c0_1 = arith.constant 0 : index
    %c0_2 = arith.constant 0 : index
    %1 = vector.load %arg2[%c0_1, %c0_2] : memref<512x128xbf16, #tpu.memory_space<vmem>>, vector<512x128xbf16>
    %cst = arith.constant dense<0.000000e+00> : vector<128x128xf32>
    %2 = tpu.matmul %0, %1, %cst {dimension_numbers = #tpu.dot_dimension_numbers<[1], [0], [0], [1], [0, 0, 1, 1], [], []>} : vector<128x512xbf16>, vector<512x128xbf16>, vector<128x128xf32> -> vector<128x128xf32>
    %c0_3 = arith.constant 0 : index
    %c0_4 = arith.constant 0 : index
    %3 = vector.load %arg3[%c0_3, %c0_4] : memref<1x128xf32, #tpu.memory_space<vmem>>, vector<1x128xf32>
    %4 = vector.broadcast %3 : vector<1x128xf32> to vector<128x128xf32>
    %5 = arith.addf %2, %4 : vector<128x128xf32>
    %cst_5 = arith.constant 0.000000e+00 : f32
    %6 = vector.broadcast %cst_5 : f32 to vector<128x128xf32>
    %7 = arith.cmpf oge, %5, %6 : vector<128x128xf32>
    %cst_6 = arith.constant 0.00999999977 : f32
    %8 = vector.broadcast %cst_6 : f32 to vector<128x128xf32>
    %9 = arith.mulf %8, %5 : vector<128x128xf32>
    %10 = arith.select %7, %5, %9 : vector<128x128xi1>, vector<128x128xf32>
    %c0_7 = arith.constant 0 : index
    %c0_8 = arith.constant 0 : index
    %11 = vector.load %arg4[%c0_7, %c0_8] : memref<128x128xf32, #tpu.memory_space<vmem>>, vector<128x128xf32>
    tpu.vector_store %arg4[%c0_7, %c0_8], %10 {strides = array<i32>} : memref<128x128xf32, #tpu.memory_space<vmem>>, vector<128x128xf32>,
    return
  }
  func.func @transform_0(%arg0: i32) -> (i32, i32) {
    %c0_i32 = arith.constant 0 : i32
    %c0_i32_0 = arith.constant 0 : i32
    return %arg0, %c0_i32 : i32, i32
  }
  func.func @transform_1(%arg0: i32) -> (i32, i32) {
    %c0_i32 = arith.constant 0 : i32
    %c0_i32_0 = arith.constant 0 : i32
    %c0_i32_1 = arith.constant 0 : i32
    return %c0_i32, %c0_i32_0 : i32, i32
  }
  func.func @transform_2(%arg0: i32) -> (i32, i32) {
    %c0_i32 = arith.constant 0 : i32
    %c0_i32_0 = arith.constant 0 : i32
    %c0_i32_1 = arith.constant 0 : i32
    return %c0_i32, %c0_i32_0 : i32, i32
  }
  func.func @transform_3(%arg0: i32) -> (i32, i32) {
    %c0_i32 = arith.constant 0 : i32
    %c0_i32_0 = arith.constant 0 : i32
    return %arg0, %c0_i32 : i32, i32
  }
}

module attributes {stable_mosaic.version = 11 : i64} {
  func.func @_gemm_bias_kernel(%arg0: i32, %arg1: memref<512x384xbf16, #tpu.memory_space<vmem>>, %arg2: memref<384x128xbf16, #tpu.memory_space<vmem>>, %arg3: memref<1x128xf32, #tpu.memory_space<vmem>>, %arg4: memref<512x128xf32, #tpu.memory_space<vmem>>) attributes {dimension_semantics = [#tpu.dimension_semantics<parallel>], iteration_bounds = array<i64: 1>, scalar_prefetch = 0 : i64, scratch_operands = 0 : i64, tpu.core_type = #tpu.core_type<tc>, window_params = [{transform_indices = @transform_0, window_bounds = array<i64: 512, 384>}, {pipeline_mode = #tpu.pipeline_mode<synchronous>, transform_indices = @transform_1, window_bounds = array<i64: 384, 128>}, {pipeline_mode = #tpu.pipeline_mode<synchronous>, transform_indices = @transform_2, window_bounds = array<i64: 1, 128>}, {transform_indices = @transform_3, window_bounds = array<i64: 512, 128>}]} {
    %c0 = arith.constant 0 : index
    %c0_0 = arith.constant 0 : index
    %0 = vector.load %arg1[%c0, %c0_0] : memref<512x384xbf16, #tpu.memory_space<vmem>>, vector<512x384xbf16>
    %c0_1 = arith.constant 0 : index
    %c0_2 = arith.constant 0 : index
    %1 = vector.load %arg2[%c0_1, %c0_2] : memref<384x128xbf16, #tpu.memory_space<vmem>>, vector<384x128xbf16>
    %cst = arith.constant dense<0.000000e+00> : vector<512x128xf32>
    %2 = tpu.matmul %0, %1, %cst {dimension_numbers = #tpu.dot_dimension_numbers<[1], [0], [0], [1], [0, 0, 1, 1], [], []>} : vector<512x384xbf16>, vector<384x128xbf16>, vector<512x128xf32> -> vector<512x128xf32>
    %c0_3 = arith.constant 0 : index
    %c0_4 = arith.constant 0 : index
    %3 = vector.load %arg3[%c0_3, %c0_4] : memref<1x128xf32, #tpu.memory_space<vmem>>, vector<1x128xf32>
    %4 = vector.broadcast %3 : vector<1x128xf32> to vector<512x128xf32>
    %5 = arith.addf %2, %4 : vector<512x128xf32>
    %cst_5 = arith.constant 0.000000e+00 : f32
    %6 = vector.broadcast %cst_5 : f32 to vector<512x128xf32>
    %7 = arith.cmpf oge, %5, %6 : vector<512x128xf32>
    %cst_6 = arith.constant 0.00999999977 : f32
    %8 = vector.broadcast %cst_6 : f32 to vector<512x128xf32>
    %9 = arith.mulf %8, %5 : vector<512x128xf32>
    %10 = arith.select %7, %5, %9 : vector<512x128xi1>, vector<512x128xf32>
    %c0_7 = arith.constant 0 : index
    %c0_8 = arith.constant 0 : index
    %11 = vector.load %arg4[%c0_7, %c0_8] : memref<512x128xf32, #tpu.memory_space<vmem>>, vector<512x128xf32>
    tpu.vector_store %arg4[%c0_7, %c0_8], %10 {strides = array<i32>} : memref<512x128xf32, #tpu.memory_space<vmem>>, vector<512x128xf32>,
    return
  }
  func.func @transform_0(%arg0: i32) -> (i32, i32) {
    %c0_i32 = arith.constant 0 : i32
    %c0_i32_0 = arith.constant 0 : i32
    return %arg0, %c0_i32 : i32, i32
  }
  func.func @transform_1(%arg0: i32) -> (i32, i32) {
    %c0_i32 = arith.constant 0 : i32
    %c0_i32_0 = arith.constant 0 : i32
    %c0_i32_1 = arith.constant 0 : i32
    return %c0_i32, %c0_i32_0 : i32, i32
  }
  func.func @transform_2(%arg0: i32) -> (i32, i32) {
    %c0_i32 = arith.constant 0 : i32
    %c0_i32_0 = arith.constant 0 : i32
    %c0_i32_1 = arith.constant 0 : i32
    return %c0_i32, %c0_i32_0 : i32, i32
  }
  func.func @transform_3(%arg0: i32) -> (i32, i32) {
    %c0_i32 = arith.constant 0 : i32
    %c0_i32_0 = arith.constant 0 : i32
    return %arg0, %c0_i32 : i32, i32
  }
}

module attributes {stable_mosaic.version = 11 : i64} {
  func.func @_gemm_bias_kernel(%arg0: i32, %arg1: memref<1024x256xbf16, #tpu.memory_space<vmem>>, %arg2: memref<256x128xbf16, #tpu.memory_space<vmem>>, %arg3: memref<1x128xf32, #tpu.memory_space<vmem>>, %arg4: memref<1024x128xf32, #tpu.memory_space<vmem>>) attributes {dimension_semantics = [#tpu.dimension_semantics<parallel>], iteration_bounds = array<i64: 2>, scalar_prefetch = 0 : i64, scratch_operands = 0 : i64, tpu.core_type = #tpu.core_type<tc>, window_params = [{transform_indices = @transform_0, window_bounds = array<i64: 1024, 256>}, {pipeline_mode = #tpu.pipeline_mode<synchronous>, transform_indices = @transform_1, window_bounds = array<i64: 256, 128>}, {pipeline_mode = #tpu.pipeline_mode<synchronous>, transform_indices = @transform_2, window_bounds = array<i64: 1, 128>}, {transform_indices = @transform_3, window_bounds = array<i64: 1024, 128>}]} {
    %c0 = arith.constant 0 : index
    %c0_0 = arith.constant 0 : index
    %0 = vector.load %arg1[%c0, %c0_0] : memref<1024x256xbf16, #tpu.memory_space<vmem>>, vector<1024x256xbf16>
    %c0_1 = arith.constant 0 : index
    %c0_2 = arith.constant 0 : index
    %1 = vector.load %arg2[%c0_1, %c0_2] : memref<256x128xbf16, #tpu.memory_space<vmem>>, vector<256x128xbf16>
    %cst = arith.constant dense<0.000000e+00> : vector<1024x128xf32>
    %2 = tpu.matmul %0, %1, %cst {dimension_numbers = #tpu.dot_dimension_numbers<[1], [0], [0], [1], [0, 0, 1, 1], [], []>} : vector<1024x256xbf16>, vector<256x128xbf16>, vector<1024x128xf32> -> vector<1024x128xf32>
    %c0_3 = arith.constant 0 : index
    %c0_4 = arith.constant 0 : index
    %3 = vector.load %arg3[%c0_3, %c0_4] : memref<1x128xf32, #tpu.memory_space<vmem>>, vector<1x128xf32>
    %4 = vector.broadcast %3 : vector<1x128xf32> to vector<1024x128xf32>
    %5 = arith.addf %2, %4 : vector<1024x128xf32>
    %cst_5 = arith.constant 0.000000e+00 : f32
    %6 = vector.broadcast %cst_5 : f32 to vector<1024x128xf32>
    %7 = arith.cmpf oge, %5, %6 : vector<1024x128xf32>
    %cst_6 = arith.constant 0.00999999977 : f32
    %8 = vector.broadcast %cst_6 : f32 to vector<1024x128xf32>
    %9 = arith.mulf %8, %5 : vector<1024x128xf32>
    %10 = arith.select %7, %5, %9 : vector<1024x128xi1>, vector<1024x128xf32>
    %c0_7 = arith.constant 0 : index
    %c0_8 = arith.constant 0 : index
    %11 = vector.load %arg4[%c0_7, %c0_8] : memref<1024x128xf32, #tpu.memory_space<vmem>>, vector<1024x128xf32>
    tpu.vector_store %arg4[%c0_7, %c0_8], %10 {strides = array<i32>} : memref<1024x128xf32, #tpu.memory_space<vmem>>, vector<1024x128xf32>,
    return
  }
  func.func @transform_0(%arg0: i32) -> (i32, i32) {
    %c0_i32 = arith.constant 0 : i32
    %c0_i32_0 = arith.constant 0 : i32
    return %arg0, %c0_i32 : i32, i32
  }
  func.func @transform_1(%arg0: i32) -> (i32, i32) {
    %c0_i32 = arith.constant 0 : i32
    %c0_i32_0 = arith.constant 0 : i32
    %c0_i32_1 = arith.constant 0 : i32
    return %c0_i32, %c0_i32_0 : i32, i32
  }
  func.func @transform_2(%arg0: i32) -> (i32, i32) {
    %c0_i32 = arith.constant 0 : i32
    %c0_i32_0 = arith.constant 0 : i32
    %c0_i32_1 = arith.constant 0 : i32
    return %c0_i32, %c0_i32_0 : i32, i32
  }
  func.func @transform_3(%arg0: i32) -> (i32, i32) {
    %c0_i32 = arith.constant 0 : i32
    %c0_i32_0 = arith.constant 0 : i32
    return %arg0, %c0_i32 : i32, i32
  }
}

module attributes {stable_mosaic.version = 11 : i64} {
  func.func @_gemm_bias_kernel(%arg0: i32, %arg1: memref<1024x128xbf16, #tpu.memory_space<vmem>>, %arg2: memref<128x128xbf16, #tpu.memory_space<vmem>>, %arg3: memref<1x128xf32, #tpu.memory_space<vmem>>, %arg4: memref<1024x128xf32, #tpu.memory_space<vmem>>) attributes {dimension_semantics = [#tpu.dimension_semantics<parallel>], iteration_bounds = array<i64: 8>, scalar_prefetch = 0 : i64, scratch_operands = 0 : i64, tpu.core_type = #tpu.core_type<tc>, window_params = [{transform_indices = @transform_0, window_bounds = array<i64: 1024, 128>}, {pipeline_mode = #tpu.pipeline_mode<synchronous>, transform_indices = @transform_1, window_bounds = array<i64: 128, 128>}, {pipeline_mode = #tpu.pipeline_mode<synchronous>, transform_indices = @transform_2, window_bounds = array<i64: 1, 128>}, {transform_indices = @transform_3, window_bounds = array<i64: 1024, 128>}]} {
    %c0 = arith.constant 0 : index
    %c0_0 = arith.constant 0 : index
    %0 = vector.load %arg1[%c0, %c0_0] : memref<1024x128xbf16, #tpu.memory_space<vmem>>, vector<1024x128xbf16>
    %c0_1 = arith.constant 0 : index
    %c0_2 = arith.constant 0 : index
    %1 = vector.load %arg2[%c0_1, %c0_2] : memref<128x128xbf16, #tpu.memory_space<vmem>>, vector<128x128xbf16>
    %cst = arith.constant dense<0.000000e+00> : vector<1024x128xf32>
    %2 = tpu.matmul %0, %1, %cst {dimension_numbers = #tpu.dot_dimension_numbers<[1], [0], [0], [1], [0, 0, 1, 1], [], []>} : vector<1024x128xbf16>, vector<128x128xbf16>, vector<1024x128xf32> -> vector<1024x128xf32>
    %c0_3 = arith.constant 0 : index
    %c0_4 = arith.constant 0 : index
    %3 = vector.load %arg3[%c0_3, %c0_4] : memref<1x128xf32, #tpu.memory_space<vmem>>, vector<1x128xf32>
    %4 = vector.broadcast %3 : vector<1x128xf32> to vector<1024x128xf32>
    %5 = arith.addf %2, %4 : vector<1024x128xf32>
    %cst_5 = arith.constant 0.000000e+00 : f32
    %6 = vector.broadcast %cst_5 : f32 to vector<1024x128xf32>
    %7 = arith.cmpf oge, %5, %6 : vector<1024x128xf32>
    %cst_6 = arith.constant 0.00999999977 : f32
    %8 = vector.broadcast %cst_6 : f32 to vector<1024x128xf32>
    %9 = arith.mulf %8, %5 : vector<1024x128xf32>
    %10 = arith.select %7, %5, %9 : vector<1024x128xi1>, vector<1024x128xf32>
    %c0_7 = arith.constant 0 : index
    %c0_8 = arith.constant 0 : index
    %11 = vector.load %arg4[%c0_7, %c0_8] : memref<1024x128xf32, #tpu.memory_space<vmem>>, vector<1024x128xf32>
    tpu.vector_store %arg4[%c0_7, %c0_8], %10 {strides = array<i32>} : memref<1024x128xf32, #tpu.memory_space<vmem>>, vector<1024x128xf32>,
    return
  }
  func.func @transform_0(%arg0: i32) -> (i32, i32) {
    %c0_i32 = arith.constant 0 : i32
    %c0_i32_0 = arith.constant 0 : i32
    return %arg0, %c0_i32 : i32, i32
  }
  func.func @transform_1(%arg0: i32) -> (i32, i32) {
    %c0_i32 = arith.constant 0 : i32
    %c0_i32_0 = arith.constant 0 : i32
    %c0_i32_1 = arith.constant 0 : i32
    return %c0_i32, %c0_i32_0 : i32, i32
  }
  func.func @transform_2(%arg0: i32) -> (i32, i32) {
    %c0_i32 = arith.constant 0 : i32
    %c0_i32_0 = arith.constant 0 : i32
    %c0_i32_1 = arith.constant 0 : i32
    return %c0_i32, %c0_i32_0 : i32, i32
  }
  func.func @transform_3(%arg0: i32) -> (i32, i32) {
    %c0_i32 = arith.constant 0 : i32
    %c0_i32_0 = arith.constant 0 : i32
    return %arg0, %c0_i32 : i32, i32
  }
}

</mosaic_0001>

<bundles_post_ra>
// kernel: vae_forward.11
= control target key start
LH: loop header
LB: loop body
LE: loop exit
PB: predicated region body
PF: predicated region fallthrough
CT: control target
= control target key end

     0   :  { %s2296_s12 = smov 0   ;;  %s2675_s0 = inlined_call_operand.vmem [shape: bf16[2048,128], index: 0, kind: input, shape index: {}]   ;;  %s2676_s1 = inlined_call_operand.vmem [shape: bf16[128,128], index: 1, kind: input, shape index: {}]   ;;  %s2677_s2 = inlined_call_operand.vmem [shape: f32[1,128], index: 2, kind: input, shape index: {}]   ;;  %s2678_s3 = inlined_call_operand.vmem [shape: f32[2048,128], index: 3, kind: output, shape index: {}]  }
   0x1 LB: > { %s1871_s13 = sadd.s32 4294967295, %s2274_s12   ;;  %p1875_p0 = scmp.ge.s32.totalorder %s2274_s12, 1  ;;  %s2274_s12 = sphi %s2296_s12, %s13_s12  }
   0x2   : > { %p138_p1 = scmp.lt.s32.totalorder %s2274_s12, 3 }
   0x4   : > { %p139_p2 = pnand %p1875_p0, %p138_p1 }
   0x5   : > { %s1876_s16 = sshll.u32 (!%p139_p2), %s1871_s13, 7 }
   0x6   : > { %142 = sbr.rel (%p139_p2) target bundleno = 370 (0x172), region = 32  ;;  %p163_p3 = scmp.lt.s32.totalorder (!%p139_p2), %s1876_s16, 255 }
   0xb   : > { %v2195_v0 = vld [vmem:[%s2676_s1 + $0x38] sm:$0xff]   ;;  %v2196_v1 = vld [vmem:[%s2676_s1 + $0x30] sm:$0xff]   ;;  %s2680_s16 = smov (!%p163_p3, %s1876_s16), 255  ;;  %v2197_v2 = vld [vmem:[%s2676_s1 + $0x28] sm:$0xff]  }
   0xc   : > { %2027 = vmatprep.subr.bf16.mxu0 %v2195_v0  ;;  %2171 = vmatprep.subr.bf16.mxu1 %v2195_v0  ;;  %s1877_s21 = sshll.u32 %s2680_s16, 2  ;;  %v2198_v3 = vld [vmem:[%s2676_s1 + $0x20] sm:$0xff]   ;;  %v2199_v6 = vld [vmem:[%s2676_s1 + $0x18] sm:$0xff]   ;;  %v2200_v7 = vld [vmem:[%s2676_s1 + $0x10] sm:$0xff]   ;;  %s1879_s10 = sshll.u32 %s2680_s16, 3 }
   0xd   : > { %2028 = vmatpush3.bf16.msra.mxu0 %v2195_v0  ;;  %2179 = vmatpush3.bf16.msra.mxu1 %v2195_v0  ;;  %s2319_s24 = scalar_lea.vmem %s2675_s0, %s1877_s21  ;;  %v2201_v8 = vld [vmem:[%s2676_s1 + $0x8] sm:$0xff]   ;;  %v2202_v9 = vld [vmem:[%s2676_s1] sm:$0xff]   ;;  %s2411_s14 = scalar_lea.vmem %s2678_s3, %s1879_s10 }
   0xe   : > { %2029 = vmatprep.subr.bf16.mxu0 %v2196_v1  ;;  %2172 = vmatprep.subr.bf16.mxu1 %v2196_v1  ;;  %v2203_v4 = vld [vmem:[%s2319_s24] sm:$0xff]   ;;  %v2205_v10 = vld [vmem:[%s2319_s24 + $0x8] sm:$0xff]   ;;  %v2207_v12 = vld [vmem:[%s2319_s24 + $0x10] sm:$0xff]  }
   0xf   : > { %v2204_v5 = vld [vmem:[%s2319_s24 + $0x100] sm:$0xff]   ;;  %2043 = vmatprep.mubr.bf16.mxu0 %v2203_v4  ;;  %v2206_v11 = vld [vmem:[%s2319_s24 + $0x108] sm:$0xff]   ;;  %v2208_v13 = vld [vmem:[%s2319_s24 + $0x110] sm:$0xff]  }
  0x10   : > { %2107 = vmatprep.mubr.bf16.mxu1 %v2204_v5  ;;  %v2209_v14 = vld [vmem:[%s2319_s24 + $0x18] sm:$0xff]   ;;  %v2211_v16 = vld [vmem:[%s2319_s24 + $0x20] sm:$0xff]   ;;  %v2213_v18 = vld [vmem:[%s2319_s24 + $0x28] sm:$0xff]  }
  0x11   : > { %2030 = vmatpush3.bf16.msra.mxu0 %v2196_v1  ;;  %2180 = vmatpush3.bf16.msra.mxu1 %v2196_v1  ;;  %v2210_v15 = vld [vmem:[%s2319_s24 + $0x118] sm:$0xff]   ;;  %v2212_v17 = vld [vmem:[%s2319_s24 + $0x120] sm:$0xff]   ;;  %v2214_v19 = vld [vmem:[%s2319_s24 + $0x128] sm:$0xff]  }
  0x12   : > { %2031 = vmatprep.subr.bf16.mxu0 %v2197_v2  ;;  %2173 = vmatprep.subr.bf16.mxu1 %v2197_v2  ;;  %v2215_v20 = vld [vmem:[%s2319_s24 + $0x30] sm:$0xff]   ;;  %v2217_v22 = vld [vmem:[%s2319_s24 + $0x38] sm:$0xff]   ;;  %v2219_v24 = vld [vmem:[%s2319_s24 + $0x40] sm:$0xff]  }
  0x13   : > { %v2216_v21 = vld [vmem:[%s2319_s24 + $0x130] sm:$0xff]   ;;  %v2218_v23 = vld [vmem:[%s2319_s24 + $0x138] sm:$0xff]   ;;  %v2220_v25 = vld [vmem:[%s2319_s24 + $0x140] sm:$0xff]  }
  0x14   : > { %v2221_v26 = vld [vmem:[%s2319_s24 + $0x48] sm:$0xff]   ;;  %v2223_v28 = vld [vmem:[%s2319_s24 + $0x50] sm:$0xff]   ;;  %v2225_v30 = vld [vmem:[%s2319_s24 + $0x58] sm:$0xff]  }
  0x15   : > { %2032 = vmatpush3.bf16.msra.mxu0 %v2197_v2  ;;  %2181 = vmatpush3.bf16.msra.mxu1 %v2197_v2  ;;  %v2222_v27 = vld [vmem:[%s2319_s24 + $0x148] sm:$0xff]   ;;  %v2224_v29 = vld [vmem:[%s2319_s24 + $0x150] sm:$0xff]   ;;  %v2226_v31 = vld [vmem:[%s2319_s24 + $0x158] sm:$0xff]  }
  0x16   : > { %2033 = vmatprep.subr.bf16.mxu0 %v2198_v3  ;;  %2174 = vmatprep.subr.bf16.mxu1 %v2198_v3  ;;  %v2227_v32 = vld [vmem:[%s2319_s24 + $0x60] sm:$0xff]   ;;  %v2229_v34 = vld [vmem:[%s2319_s24 + $0x68] sm:$0xff]   ;;  %v2231_v36 = vld [vmem:[%s2319_s24 + $0x70] sm:$0xff]  }
  0x17   : > { %v2228_v33 = vld [vmem:[%s2319_s24 + $0x160] sm:$0xff]   ;;  %v2230_v35 = vld [vmem:[%s2319_s24 + $0x168] sm:$0xff]   ;;  %v2232_v37 = vld [vmem:[%s2319_s24 + $0x170] sm:$0xff]  }
  0x18   : > { %v2233_v38 = vld [vmem:[%s2319_s24 + $0x78] sm:$0xff]   ;;  %v2235_v40 = vld [vmem:[%s2319_s24 + $0x80] sm:$0xff]   ;;  %v2237_v42 = vld [vmem:[%s2319_s24 + $0x88] sm:$0xff]  }
  0x19   : > { %2034 = vmatpush3.bf16.msra.mxu0 %v2198_v3  ;;  %2182 = vmatpush3.bf16.msra.mxu1 %v2198_v3  ;;  %v2234_v39 = vld [vmem:[%s2319_s24 + $0x178] sm:$0xff]   ;;  %v2236_v41 = vld [vmem:[%s2319_s24 + $0x180] sm:$0xff]   ;;  %v2238_v43 = vld [vmem:[%s2319_s24 + $0x188] sm:$0xff]  }
  0x1a   : > { %2035 = vmatprep.subr.bf16.mxu0 %v2199_v6  ;;  %2175 = vmatprep.subr.bf16.mxu1 %v2199_v6  ;;  %v2239_v44 = vld [vmem:[%s2319_s24 + $0x90] sm:$0xff]   ;;  %v2241_v46 = vld [vmem:[%s2319_s24 + $0x98] sm:$0xff]   ;;  %v2243_v48 = vld [vmem:[%s2319_s24 + $0xa0] sm:$0xff]  }
  0x1b   : > { %v2240_v45 = vld [vmem:[%s2319_s24 + $0x190] sm:$0xff]   ;;  %v2242_v47 = vld [vmem:[%s2319_s24 + $0x198] sm:$0xff]   ;;  %v2244_v49 = vld [vmem:[%s2319_s24 + $0x1a0] sm:$0xff]  }
  0x1c   : > { %v2245_v50 = vld [vmem:[%s2319_s24 + $0xa8] sm:$0xff]   ;;  %v2247_v52 = vld [vmem:[%s2319_s24 + $0xb0] sm:$0xff]   ;;  %v2249_v54 = vld [vmem:[%s2319_s24 + $0xb8] sm:$0xff]  }
  0x1d   : > { %2036 = vmatpush3.bf16.msra.mxu0 %v2199_v6  ;;  %2183 = vmatpush3.bf16.msra.mxu1 %v2199_v6  ;;  %v2246_v51 = vld [vmem:[%s2319_s24 + $0x1a8] sm:$0xff]   ;;  %v2248_v53 = vld [vmem:[%s2319_s24 + $0x1b0] sm:$0xff]   ;;  %v2250_v55 = vld [vmem:[%s2319_s24 + $0x1b8] sm:$0xff]  }
  0x1e   : > { %2037 = vmatprep.subr.bf16.mxu0 %v2200_v7  ;;  %2176 = vmatprep.subr.bf16.mxu1 %v2200_v7  ;;  %v2251_v56 = vld [vmem:[%s2319_s24 + $0xc0] sm:$0xff]   ;;  %v2253_v58 = vld [vmem:[%s2319_s24 + $0xc8] sm:$0xff]   ;;  %v2255_v60 = vld [vmem:[%s2319_s24 + $0xd0] sm:$0xff]  }
  0x1f   : > { %v2252_v57 = vld [vmem:[%s2319_s24 + $0x1c0] sm:$0xff]   ;;  %v2254_v59 = vld [vmem:[%s2319_s24 + $0x1c8] sm:$0xff]   ;;  %v2256_v61 = vld [vmem:[%s2319_s24 + $0x1d0] sm:$0xff]  }
  0x20   : > { %v2257_v62 = vld [vmem:[%s2319_s24 + $0xd8] sm:$0xff]   ;;  %v2259_v0 = vld [vmem:[%s2319_s24 + $0xe0] sm:$0xff]   ;;  %v2261_v2 = vld [vmem:[%s2319_s24 + $0xe8] sm:$0xff]  }
  0x21   : > { %2038 = vmatpush3.bf16.msra.mxu0 %v2200_v7  ;;  %2184 = vmatpush3.bf16.msra.mxu1 %v2200_v7  ;;  %v2258_v63 = vld [vmem:[%s2319_s24 + $0x1d8] sm:$0xff]   ;;  %v2260_v1 = vld [vmem:[%s2319_s24 + $0x1e0] sm:$0xff]   ;;  %v2262_v3 = vld [vmem:[%s2319_s24 + $0x1e8] sm:$0xff]  }
  0x22   : > { %2039 = vmatprep.subr.bf16.mxu0 %v2201_v8  ;;  %2177 = vmatprep.subr.bf16.mxu1 %v2201_v8  ;;  %v2263_v4 = vld [vmem:[%s2319_s24 + $0xf0] sm:$0xff]   ;;  %v2265_v6 = vld [vmem:[%s2319_s24 + $0xf8] sm:$0xff]  }
  0x23   : > { %v2264_v5 = vld [vmem:[%s2319_s24 + $0x1f0] sm:$0xff]   ;;  %v2266_v7 = vld [vmem:[%s2319_s24 + $0x1f8] sm:$0xff]  }
  0x25   : > { %2040 = vmatpush3.bf16.msra.mxu0 %v2201_v8  ;;  %2185 = vmatpush3.bf16.msra.mxu1 %v2201_v8  ;;  %v2403_v8 = vld [vmem:[%s2677_s2] ss:$0 sm:$0xff] }
  0x26   : > { %2041 = vmatprep.subr.bf16.mxu0 %v2202_v9  ;;  %2178 = vmatprep.subr.bf16.mxu1 %v2202_v9 }
  0x29   : > { %2042 = vmatpush3.bf16.msra.mxu0 %v2202_v9  ;;  %2186 = vmatpush3.bf16.msra.mxu1 %v2202_v9 }
  0x2c   : > { %2044 = vmatmul.mubr.bf16.vlgmr.msra.gmra.mxu0 %v2205_v10  ;;  %2108 = vmatmul.mubr.bf16.vlgmr.msra.gmra.mxu1 %v2206_v11 }
  0x2d   : > { %2047 = vmatprep.mubr.bf16.mxu0 %v2207_v12  ;;  %2111 = vmatprep.mubr.bf16.mxu1 %v2208_v13 }
  0x34   : > { %2048 = vmatmul.mubr.bf16.gmra.mxu0 %v2209_v14  ;;  %2112 = vmatmul.mubr.bf16.gmra.mxu1 %v2210_v15 }
  0x35   : > { %2051 = vmatprep.mubr.bf16.mxu0 %v2211_v16  ;;  %2115 = vmatprep.mubr.bf16.mxu1 %v2212_v17 }
  0x3c   : > { %2052 = vmatmul.mubr.bf16.gmra.mxu0 %v2213_v18  ;;  %2116 = vmatmul.mubr.bf16.gmra.mxu1 %v2214_v19 }
  0x3d   : > { %2055 = vmatprep.mubr.bf16.mxu0 %v2215_v20  ;;  %2119 = vmatprep.mubr.bf16.mxu1 %v2216_v21 }
  0x44   : > { %2056 = vmatmul.mubr.bf16.gmra.mxu0 %v2217_v22  ;;  %2120 = vmatmul.mubr.bf16.gmra.mxu1 %v2218_v23 }
  0x45   : > { %2059 = vmatprep.mubr.bf16.mxu0 %v2219_v24  ;;  %2123 = vmatprep.mubr.bf16.mxu1 %v2220_v25 }
  0x4c   : > { %2060 = vmatmul.mubr.bf16.gmra.mxu0 %v2221_v26  ;;  %2124 = vmatmul.mubr.bf16.gmra.mxu1 %v2222_v27 }
  0x4d   : > { %2063 = vmatprep.mubr.bf16.mxu0 %v2223_v28  ;;  %2127 = vmatprep.mubr.bf16.mxu1 %v2224_v29 }
  0x54   : > { %2064 = vmatmul.mubr.bf16.gmra.mxu0 %v2225_v30  ;;  %2128 = vmatmul.mubr.bf16.gmra.mxu1 %v2226_v31 }
  0x55   : > { %2067 = vmatprep.mubr.bf16.mxu0 %v2227_v32  ;;  %2131 = vmatprep.mubr.bf16.mxu1 %v2228_v33 }
  0x5c   : > { %2068 = vmatmul.mubr.bf16.gmra.mxu0 %v2229_v34  ;;  %2132 = vmatmul.mubr.bf16.gmra.mxu1 %v2230_v35 }
  0x5d   : > { %2071 = vmatprep.mubr.bf16.mxu0 %v2231_v36  ;;  %2135 = vmatprep.mubr.bf16.mxu1 %v2232_v37 }
  0x64   : > { %2072 = vmatmul.mubr.bf16.gmra.mxu0 %v2233_v38  ;;  %2136 = vmatmul.mubr.bf16.gmra.mxu1 %v2234_v39 }
  0x65   : > { %2075 = vmatprep.mubr.bf16.mxu0 %v2235_v40  ;;  %2139 = vmatprep.mubr.bf16.mxu1 %v2236_v41 }
  0x6c   : > { %2076 = vmatmul.mubr.bf16.gmra.mxu0 %v2237_v42  ;;  %2140 = vmatmul.mubr.bf16.gmra.mxu1 %v2238_v43 }
  0x6d   : > { %2079 = vmatprep.mubr.bf16.mxu0 %v2239_v44  ;;  %2143 = vmatprep.mubr.bf16.mxu1 %v2240_v45 }
  0x74   : > { %2080 = vmatmul.mubr.bf16.gmra.mxu0 %v2241_v46  ;;  %2144 = vmatmul.mubr.bf16.gmra.mxu1 %v2242_v47 }
  0x75   : > { %2083 = vmatprep.mubr.bf16.mxu0 %v2243_v48  ;;  %2147 = vmatprep.mubr.bf16.mxu1 %v2244_v49 }
  0x7c   : > { %2084 = vmatmul.mubr.bf16.gmra.mxu0 %v2245_v50  ;;  %2148 = vmatmul.mubr.bf16.gmra.mxu1 %v2246_v51 }
  0x7d   : > { %2087 = vmatprep.mubr.bf16.mxu0 %v2247_v52  ;;  %2151 = vmatprep.mubr.bf16.mxu1 %v2248_v53 }
  0x84   : > { %2088 = vmatmul.mubr.bf16.gmra.mxu0 %v2249_v54  ;;  %2152 = vmatmul.mubr.bf16.gmra.mxu1 %v2250_v55 }
  0x85   : > { %2091 = vmatprep.mubr.bf16.mxu0 %v2251_v56  ;;  %2155 = vmatprep.mubr.bf16.mxu1 %v2252_v57 }
  0x8c   : > { %2092 = vmatmul.mubr.bf16.gmra.mxu0 %v2253_v58  ;;  %2156 = vmatmul.mubr.bf16.gmra.mxu1 %v2254_v59 }
  0x8d   : > { %2095 = vmatprep.mubr.bf16.mxu0 %v2255_v60  ;;  %2159 = vmatprep.mubr.bf16.mxu1 %v2256_v61 }
  0x94   : > { %2096 = vmatmul.mubr.bf16.gmra.mxu0 %v2257_v62  ;;  %2160 = vmatmul.mubr.bf16.gmra.mxu1 %v2258_v63 }
  0x95   : > { %2099 = vmatprep.mubr.bf16.mxu0 %v2259_v0  ;;  %2163 = vmatprep.mubr.bf16.mxu1 %v2260_v1 }
  0x9c   : > { %2100 = vmatmul.mubr.bf16.gmra.mxu0 %v2261_v2  ;;  %2164 = vmatmul.mubr.bf16.gmra.mxu1 %v2262_v3 }
  0x9d   : > { %2103 = vmatprep.mubr.bf16.mxu0 %v2263_v4  ;;  %2167 = vmatprep.mubr.bf16.mxu1 %v2264_v5 }
  0xa4   : > { %2104 = vmatmul.mubr.bf16.gmra.mxu0 %v2265_v6  ;;  %2168 = vmatmul.mubr.bf16.gmra.mxu1 %v2266_v7 }
  0xec   : > { %v2045_v9 = vpop.f32.mrf.mxu0  ;;  %v2109_v10 = vpop.f32.mrf.mxu1 }
  0xed   : > { %v801_v11 = vadd.f32 %v2045_v9, %v2403_v8  ;;  %v1057_v12 = vadd.f32 %v2109_v10, %v2403_v8 }
  0xee   : > { %v792_v13 = vpop.f32.mrf.mxu0  ;;  %v1048_v14 = vpop.f32.mrf.mxu1 }
  0xef   : > { %vm1305_vm0 = vcmp.ge.f32.partialorder %v801_v11, 0.0  ;;  %v1433_v15 = vmul.f32 0.01, %v801_v11  ;;  %vm1369_vm1 = vcmp.ge.f32.partialorder %v1057_v12, 0.0  ;;  %v1497_v16 = vmul.f32 0.01, %v1057_v12 }
  0xf0   : > { %v793_v17 = vadd.f32 %v2403_v8, %v792_v13  ;;  %v1049_v18 = vadd.f32 %v2403_v8, %v1048_v14  ;;  %v2046_v19 = vpop.f32.mrf.mxu0  ;;  %v2110_v20 = vpop.f32.mrf.mxu1 }
  0xf1   : > { %v1561_v21 = vsel %vm1305_vm0, %v801_v11, %v1433_v15  ;;  %v1625_v22 = vsel %vm1369_vm1, %v1057_v12, %v1497_v16  ;;  %v804_v23 = vadd.f32 %v2046_v19, %v2403_v8  ;;  %v1060_v24 = vadd.f32 %v2110_v20, %v2403_v8 }
  0xf2   : > { %1689 = vst [vmem:[%s2411_s14 + $0x10] sm:$0xff] %v1561_v21  ;;  %1753 = vst [vmem:[%s2411_s14 + $0x210] sm:$0xff] %v1625_v22  ;;  %vm1303_vm2 = vcmp.ge.f32.partialorder %v793_v17, 0.0  ;;  %v1431_v25 = vmul.f32 0.01, %v793_v17  ;;  %vm1367_vm3 = vcmp.ge.f32.partialorder %v1049_v18, 0.0  ;;  %v795_v27 = vpop.f32.mrf.mxu0  ;;  %v1051_v28 = vpop.f32.mrf.mxu1 }
  0xf3   : > { %v1495_v26 = vmul.f32 0.01, %v1049_v18  ;;  %vm1306_vm4 = vcmp.ge.f32.partialorder %v804_v23, 0.0  ;;  %v1434_v29 = vmul.f32 0.01, %v804_v23  ;;  %vm1370_vm5 = vcmp.ge.f32.partialorder %v1060_v24, 0.0 }
  0xf4   : > { %v1498_v30 = vmul.f32 0.01, %v1060_v24  ;;  %v1559_v31 = vsel %vm1303_vm2, %v793_v17, %v1431_v25  ;;  %v796_v33 = vadd.f32 %v2403_v8, %v795_v27  ;;  %v1052_v34 = vadd.f32 %v2403_v8, %v1051_v28  ;;  %v2049_v35 = vpop.f32.mrf.mxu0  ;;  %v2113_v36 = vpop.f32.mrf.mxu1 }
  0xf5   : > { %v1623_v32 = vsel %vm1367_vm3, %v1049_v18, %v1495_v26  ;;  %1687 = vst [vmem:[%s2411_s14] sm:$0xff] %v1559_v31  ;;  %v1562_v37 = vsel %vm1306_vm4, %v804_v23, %v1434_v29  ;;  %v817_v39 = vadd.f32 %v2049_v35, %v2403_v8  ;;  %v1073_v40 = vadd.f32 %v2113_v36, %v2403_v8 }
  0xf6   : > { %1751 = vst [vmem:[%s2411_s14 + $0x200] sm:$0xff] %v1623_v32  ;;  %v1626_v38 = vsel %vm1370_vm5, %v1060_v24, %v1498_v30  ;;  %1690 = vst [vmem:[%s2411_s14 + $0x18] sm:$0xff] %v1562_v37  ;;  %vm1304_vm6 = vcmp.ge.f32.partialorder %v796_v33, 0.0  ;;  %v1432_v41 = vmul.f32 0.01, %v796_v33  ;;  %vm1368_vm7 = vcmp.ge.f32.partialorder %v1052_v34, 0.0  ;;  %v808_v43 = vpop.f32.mrf.mxu0  ;;  %v1064_v44 = vpop.f32.mrf.mxu1 }
  0xf7   : > { %1754 = vst [vmem:[%s2411_s14 + $0x218] sm:$0xff] %v1626_v38  ;;  %v1496_v42 = vmul.f32 0.01, %v1052_v34  ;;  %vm1309_vm8 = vcmp.ge.f32.partialorder %v817_v39, 0.0  ;;  %v1437_v45 = vmul.f32 0.01, %v817_v39  ;;  %v809_v49 = vadd.f32 %v2403_v8, %v808_v43 }
  0xf8   : > { %vm1373_vm9 = vcmp.ge.f32.partialorder %v1073_v40, 0.0  ;;  %v1501_v46 = vmul.f32 0.01, %v1073_v40  ;;  %v1560_v47 = vsel %vm1304_vm6, %v796_v33, %v1432_v41  ;;  %v1065_v50 = vadd.f32 %v2403_v8, %v1064_v44  ;;  %v2050_v51 = vpop.f32.mrf.mxu0  ;;  %v2114_v52 = vpop.f32.mrf.mxu1 }
  0xf9   : > { %v1624_v48 = vsel %vm1368_vm7, %v1052_v34, %v1496_v42  ;;  %1688 = vst [vmem:[%s2411_s14 + $0x8] sm:$0xff] %v1560_v47  ;;  %v1565_v53 = vsel %vm1309_vm8, %v817_v39, %v1437_v45  ;;  %v820_v55 = vadd.f32 %v2050_v51, %v2403_v8  ;;  %v1076_v56 = vadd.f32 %v2114_v52, %v2403_v8 }
  0xfa   : > { %1752 = vst [vmem:[%s2411_s14 + $0x208] sm:$0xff] %v1624_v48  ;;  %v1629_v54 = vsel %vm1373_vm9, %v1073_v40, %v1501_v46  ;;  %1693 = vst [vmem:[%s2411_s14 + $0x30] sm:$0xff] %v1565_v53  ;;  %vm1307_vm10 = vcmp.ge.f32.partialorder %v809_v49, 0.0  ;;  %v1435_v57 = vmul.f32 0.01, %v809_v49  ;;  %vm1371_vm11 = vcmp.ge.f32.partialorder %v1065_v50, 0.0  ;;  %v811_v59 = vpop.f32.mrf.mxu0  ;;  %v1067_v60 = vpop.f32.mrf.mxu1 }
  0xfb   : > { %1757 = vst [vmem:[%s2411_s14 + $0x230] sm:$0xff] %v1629_v54  ;;  %v1499_v58 = vmul.f32 0.01, %v1065_v50  ;;  %vm1310_vm12 = vcmp.ge.f32.partialorder %v820_v55, 0.0  ;;  %v1438_v61 = vmul.f32 0.01, %v820_v55  ;;  %v812_v1 = vadd.f32 %v2403_v8, %v811_v59 }
  0xfc   : > { %vm1374_vm13 = vcmp.ge.f32.partialorder %v1076_v56, 0.0  ;;  %v1502_v62 = vmul.f32 0.01, %v1076_v56  ;;  %v1563_v63 = vsel %vm1307_vm10, %v809_v49, %v1435_v57  ;;  %v1068_v2 = vadd.f32 %v2403_v8, %v1067_v60  ;;  %v2053_v3 = vpop.f32.mrf.mxu0  ;;  %v2117_v4 = vpop.f32.mrf.mxu1 }
  0xfd   : > { %v1627_v0 = vsel %vm1371_vm11, %v1065_v50, %v1499_v58  ;;  %1691 = vst [vmem:[%s2411_s14 + $0x20] sm:$0xff] %v1563_v63  ;;  %v1566_v5 = vsel %vm1310_vm12, %v820_v55, %v1438_v61  ;;  %v833_v7 = vadd.f32 %v2053_v3, %v2403_v8  ;;  %v1089_v9 = vadd.f32 %v2117_v4, %v2403_v8 }
  0xfe   : > { %1755 = vst [vmem:[%s2411_s14 + $0x220] sm:$0xff] %v1627_v0  ;;  %v1630_v6 = vsel %vm1374_vm13, %v1076_v56, %v1502_v62  ;;  %1694 = vst [vmem:[%s2411_s14 + $0x38] sm:$0xff] %v1566_v5  ;;  %vm1308_vm14 = vcmp.ge.f32.partialorder %v812_v1, 0.0  ;;  %v1436_v10 = vmul.f32 0.01, %v812_v1  ;;  %vm1372_vm15 = vcmp.ge.f32.partialorder %v1068_v2, 0.0  ;;  %v824_v12 = vpop.f32.mrf.mxu0  ;;  %v1080_v13 = vpop.f32.mrf.mxu1 }
  0xff   : > { %1758 = vst [vmem:[%s2411_s14 + $0x238] sm:$0xff] %v1630_v6  ;;  %v1500_v11 = vmul.f32 0.01, %v1068_v2  ;;  %vm1313_vm0 = vcmp.ge.f32.partialorder %v833_v7, 0.0  ;;  %v1441_v14 = vmul.f32 0.01, %v833_v7  ;;  %v825_v18 = vadd.f32 %v2403_v8, %v824_v12 }
 0x100   : > { %vm1377_vm1 = vcmp.ge.f32.partialorder %v1089_v9, 0.0  ;;  %v1505_v15 = vmul.f32 0.01, %v1089_v9  ;;  %v1564_v16 = vsel %vm1308_vm14, %v812_v1, %v1436_v10  ;;  %v1081_v19 = vadd.f32 %v2403_v8, %v1080_v13  ;;  %v2054_v20 = vpop.f32.mrf.mxu0  ;;  %v2118_v21 = vpop.f32.mrf.mxu1 }
 0x101   : > { %v1628_v17 = vsel %vm1372_vm15, %v1068_v2, %v1500_v11  ;;  %1692 = vst [vmem:[%s2411_s14 + $0x28] sm:$0xff] %v1564_v16  ;;  %v1569_v22 = vsel %vm1313_vm0, %v833_v7, %v1441_v14  ;;  %v836_v24 = vadd.f32 %v2054_v20, %v2403_v8  ;;  %v1092_v25 = vadd.f32 %v2118_v21, %v2403_v8 }
 0x102   : > { %1756 = vst [vmem:[%s2411_s14 + $0x228] sm:$0xff] %v1628_v17  ;;  %v1633_v23 = vsel %vm1377_vm1, %v1089_v9, %v1505_v15  ;;  %1697 = vst [vmem:[%s2411_s14 + $0x50] sm:$0xff] %v1569_v22  ;;  %vm1311_vm2 = vcmp.ge.f32.partialorder %v825_v18, 0.0  ;;  %v1439_v26 = vmul.f32 0.01, %v825_v18  ;;  %vm1375_vm3 = vcmp.ge.f32.partialorder %v1081_v19, 0.0  ;;  %v827_v28 = vpop.f32.mrf.mxu0  ;;  %v1083_v29 = vpop.f32.mrf.mxu1 }
 0x103   : > { %1761 = vst [vmem:[%s2411_s14 + $0x250] sm:$0xff] %v1633_v23  ;;  %v1503_v27 = vmul.f32 0.01, %v1081_v19  ;;  %vm1314_vm4 = vcmp.ge.f32.partialorder %v836_v24, 0.0  ;;  %v1442_v30 = vmul.f32 0.01, %v836_v24  ;;  %v828_v34 = vadd.f32 %v2403_v8, %v827_v28 }
 0x104   : > { %vm1378_vm5 = vcmp.ge.f32.partialorder %v1092_v25, 0.0  ;;  %v1506_v31 = vmul.f32 0.01, %v1092_v25  ;;  %v1567_v32 = vsel %vm1311_vm2, %v825_v18, %v1439_v26  ;;  %v1084_v35 = vadd.f32 %v2403_v8, %v1083_v29  ;;  %v2057_v36 = vpop.f32.mrf.mxu0  ;;  %v2121_v37 = vpop.f32.mrf.mxu1 }
 0x105   : > { %v1631_v33 = vsel %vm1375_vm3, %v1081_v19, %v1503_v27  ;;  %1695 = vst [vmem:[%s2411_s14 + $0x40] sm:$0xff] %v1567_v32  ;;  %v1570_v38 = vsel %vm1314_vm4, %v836_v24, %v1442_v30  ;;  %v849_v40 = vadd.f32 %v2057_v36, %v2403_v8  ;;  %v1105_v41 = vadd.f32 %v2121_v37, %v2403_v8 }
 0x106   : > { %1759 = vst [vmem:[%s2411_s14 + $0x240] sm:$0xff] %v1631_v33  ;;  %v1634_v39 = vsel %vm1378_vm5, %v1092_v25, %v1506_v31  ;;  %1698 = vst [vmem:[%s2411_s14 + $0x58] sm:$0xff] %v1570_v38  ;;  %vm1312_vm6 = vcmp.ge.f32.partialorder %v828_v34, 0.0  ;;  %v1440_v42 = vmul.f32 0.01, %v828_v34  ;;  %vm1376_vm7 = vcmp.ge.f32.partialorder %v1084_v35, 0.0  ;;  %v840_v44 = vpop.f32.mrf.mxu0  ;;  %v1096_v45 = vpop.f32.mrf.mxu1 }
 0x107   : > { %1762 = vst [vmem:[%s2411_s14 + $0x258] sm:$0xff] %v1634_v39  ;;  %v1504_v43 = vmul.f32 0.01, %v1084_v35  ;;  %vm1317_vm8 = vcmp.ge.f32.partialorder %v849_v40, 0.0  ;;  %v1445_v46 = vmul.f32 0.01, %v849_v40  ;;  %v841_v50 = vadd.f32 %v2403_v8, %v840_v44 }
 0x108   : > { %vm1381_vm9 = vcmp.ge.f32.partialorder %v1105_v41, 0.0  ;;  %v1509_v47 = vmul.f32 0.01, %v1105_v41  ;;  %v1568_v48 = vsel %vm1312_vm6, %v828_v34, %v1440_v42  ;;  %v1097_v51 = vadd.f32 %v2403_v8, %v1096_v45  ;;  %v2058_v52 = vpop.f32.mrf.mxu0  ;;  %v2122_v53 = vpop.f32.mrf.mxu1 }
 0x109   : > { %v1632_v49 = vsel %vm1376_vm7, %v1084_v35, %v1504_v43  ;;  %1696 = vst [vmem:[%s2411_s14 + $0x48] sm:$0xff] %v1568_v48  ;;  %v1573_v54 = vsel %vm1317_vm8, %v849_v40, %v1445_v46  ;;  %v852_v56 = vadd.f32 %v2058_v52, %v2403_v8  ;;  %v1108_v57 = vadd.f32 %v2122_v53, %v2403_v8 }
 0x10a   : > { %1760 = vst [vmem:[%s2411_s14 + $0x248] sm:$0xff] %v1632_v49  ;;  %v1637_v55 = vsel %vm1381_vm9, %v1105_v41, %v1509_v47  ;;  %1701 = vst [vmem:[%s2411_s14 + $0x70] sm:$0xff] %v1573_v54  ;;  %vm1315_vm10 = vcmp.ge.f32.partialorder %v841_v50, 0.0  ;;  %v1443_v58 = vmul.f32 0.01, %v841_v50  ;;  %vm1379_vm11 = vcmp.ge.f32.partialorder %v1097_v51, 0.0  ;;  %v843_v60 = vpop.f32.mrf.mxu0  ;;  %v1099_v61 = vpop.f32.mrf.mxu1 }
 0x10b   : > { %1765 = vst [vmem:[%s2411_s14 + $0x270] sm:$0xff] %v1637_v55  ;;  %v1507_v59 = vmul.f32 0.01, %v1097_v51  ;;  %vm1318_vm12 = vcmp.ge.f32.partialorder %v852_v56, 0.0  ;;  %v1446_v62 = vmul.f32 0.01, %v852_v56  ;;  %v844_v2 = vadd.f32 %v2403_v8, %v843_v60 }
 0x10c   : > { %vm1382_vm13 = vcmp.ge.f32.partialorder %v1108_v57, 0.0  ;;  %v1510_v63 = vmul.f32 0.01, %v1108_v57  ;;  %v1571_v0 = vsel %vm1315_vm10, %v841_v50, %v1443_v58  ;;  %v1100_v3 = vadd.f32 %v2403_v8, %v1099_v61  ;;  %v2061_v4 = vpop.f32.mrf.mxu0  ;;  %v2125_v5 = vpop.f32.mrf.mxu1 }
 0x10d   : > { %v1635_v1 = vsel %vm1379_vm11, %v1097_v51, %v1507_v59  ;;  %1699 = vst [vmem:[%s2411_s14 + $0x60] sm:$0xff] %v1571_v0  ;;  %v1574_v6 = vsel %vm1318_vm12, %v852_v56, %v1446_v62  ;;  %v865_v9 = vadd.f32 %v2061_v4, %v2403_v8  ;;  %v1121_v10 = vadd.f32 %v2125_v5, %v2403_v8 }
 0x10e   : > { %1763 = vst [vmem:[%s2411_s14 + $0x260] sm:$0xff] %v1635_v1  ;;  %v1638_v7 = vsel %vm1382_vm13, %v1108_v57, %v1510_v63  ;;  %1702 = vst [vmem:[%s2411_s14 + $0x78] sm:$0xff] %v1574_v6  ;;  %vm1316_vm14 = vcmp.ge.f32.partialorder %v844_v2, 0.0  ;;  %v1444_v11 = vmul.f32 0.01, %v844_v2  ;;  %vm1380_vm15 = vcmp.ge.f32.partialorder %v1100_v3, 0.0  ;;  %v856_v13 = vpop.f32.mrf.mxu0  ;;  %v1112_v14 = vpop.f32.mrf.mxu1 }
 0x10f   : > { %1766 = vst [vmem:[%s2411_s14 + $0x278] sm:$0xff] %v1638_v7  ;;  %v1508_v12 = vmul.f32 0.01, %v1100_v3  ;;  %vm1321_vm0 = vcmp.ge.f32.partialorder %v865_v9, 0.0  ;;  %v1449_v15 = vmul.f32 0.01, %v865_v9  ;;  %v857_v19 = vadd.f32 %v2403_v8, %v856_v13 }
 0x110   : > { %vm1385_vm1 = vcmp.ge.f32.partialorder %v1121_v10, 0.0  ;;  %v1513_v16 = vmul.f32 0.01, %v1121_v10  ;;  %v1572_v17 = vsel %vm1316_vm14, %v844_v2, %v1444_v11  ;;  %v1113_v20 = vadd.f32 %v2403_v8, %v1112_v14  ;;  %v2062_v21 = vpop.f32.mrf.mxu0  ;;  %v2126_v22 = vpop.f32.mrf.mxu1 }
 0x111   : > { %v1636_v18 = vsel %vm1380_vm15, %v1100_v3, %v1508_v12  ;;  %1700 = vst [vmem:[%s2411_s14 + $0x68] sm:$0xff] %v1572_v17  ;;  %v1577_v23 = vsel %vm1321_vm0, %v865_v9, %v1449_v15  ;;  %v868_v25 = vadd.f32 %v2062_v21, %v2403_v8  ;;  %v1124_v26 = vadd.f32 %v2126_v22, %v2403_v8 }
 0x112   : > { %1764 = vst [vmem:[%s2411_s14 + $0x268] sm:$0xff] %v1636_v18  ;;  %v1641_v24 = vsel %vm1385_vm1, %v1121_v10, %v1513_v16  ;;  %1705 = vst [vmem:[%s2411_s14 + $0x90] sm:$0xff] %v1577_v23  ;;  %vm1319_vm2 = vcmp.ge.f32.partialorder %v857_v19, 0.0  ;;  %v1447_v27 = vmul.f32 0.01, %v857_v19  ;;  %vm1383_vm3 = vcmp.ge.f32.partialorder %v1113_v20, 0.0  ;;  %v859_v29 = vpop.f32.mrf.mxu0  ;;  %v1115_v30 = vpop.f32.mrf.mxu1 }
 0x113   : > { %1769 = vst [vmem:[%s2411_s14 + $0x290] sm:$0xff] %v1641_v24  ;;  %v1511_v28 = vmul.f32 0.01, %v1113_v20  ;;  %vm1322_vm4 = vcmp.ge.f32.partialorder %v868_v25, 0.0  ;;  %v1450_v31 = vmul.f32 0.01, %v868_v25  ;;  %v860_v35 = vadd.f32 %v2403_v8, %v859_v29 }
 0x114   : > { %vm1386_vm5 = vcmp.ge.f32.partialorder %v1124_v26, 0.0  ;;  %v1514_v32 = vmul.f32 0.01, %v1124_v26  ;;  %v1575_v33 = vsel %vm1319_vm2, %v857_v19, %v1447_v27  ;;  %v1116_v36 = vadd.f32 %v2403_v8, %v1115_v30  ;;  %v2065_v37 = vpop.f32.mrf.mxu0  ;;  %v2129_v38 = vpop.f32.mrf.mxu1 }
 0x115   : > { %v1639_v34 = vsel %vm1383_vm3, %v1113_v20, %v1511_v28  ;;  %1703 = vst [vmem:[%s2411_s14 + $0x80] sm:$0xff] %v1575_v33  ;;  %v1578_v39 = vsel %vm1322_vm4, %v868_v25, %v1450_v31  ;;  %v881_v41 = vadd.f32 %v2065_v37, %v2403_v8  ;;  %v1137_v42 = vadd.f32 %v2129_v38, %v2403_v8 }
 0x116   : > { %1767 = vst [vmem:[%s2411_s14 + $0x280] sm:$0xff] %v1639_v34  ;;  %v1642_v40 = vsel %vm1386_vm5, %v1124_v26, %v1514_v32  ;;  %1706 = vst [vmem:[%s2411_s14 + $0x98] sm:$0xff] %v1578_v39  ;;  %vm1320_vm6 = vcmp.ge.f32.partialorder %v860_v35, 0.0  ;;  %v1448_v43 = vmul.f32 0.01, %v860_v35  ;;  %vm1384_vm7 = vcmp.ge.f32.partialorder %v1116_v36, 0.0  ;;  %v872_v45 = vpop.f32.mrf.mxu0  ;;  %v1128_v46 = vpop.f32.mrf.mxu1 }
 0x117   : > { %1770 = vst [vmem:[%s2411_s14 + $0x298] sm:$0xff] %v1642_v40  ;;  %v1512_v44 = vmul.f32 0.01, %v1116_v36  ;;  %vm1325_vm8 = vcmp.ge.f32.partialorder %v881_v41, 0.0  ;;  %v1453_v47 = vmul.f32 0.01, %v881_v41  ;;  %v873_v51 = vadd.f32 %v2403_v8, %v872_v45 }
 0x118   : > { %vm1389_vm9 = vcmp.ge.f32.partialorder %v1137_v42, 0.0  ;;  %v1517_v48 = vmul.f32 0.01, %v1137_v42  ;;  %v1576_v49 = vsel %vm1320_vm6, %v860_v35, %v1448_v43  ;;  %v1129_v52 = vadd.f32 %v2403_v8, %v1128_v46  ;;  %v2066_v53 = vpop.f32.mrf.mxu0  ;;  %v2130_v54 = vpop.f32.mrf.mxu1 }
 0x119   : > { %v1640_v50 = vsel %vm1384_vm7, %v1116_v36, %v1512_v44  ;;  %1704 = vst [vmem:[%s2411_s14 + $0x88] sm:$0xff] %v1576_v49  ;;  %v1581_v55 = vsel %vm1325_vm8, %v881_v41, %v1453_v47  ;;  %v884_v57 = vadd.f32 %v2066_v53, %v2403_v8  ;;  %v1140_v58 = vadd.f32 %v2130_v54, %v2403_v8 }
 0x11a   : > { %1768 = vst [vmem:[%s2411_s14 + $0x288] sm:$0xff] %v1640_v50  ;;  %v1645_v56 = vsel %vm1389_vm9, %v1137_v42, %v1517_v48  ;;  %1709 = vst [vmem:[%s2411_s14 + $0xb0] sm:$0xff] %v1581_v55  ;;  %vm1323_vm10 = vcmp.ge.f32.partialorder %v873_v51, 0.0  ;;  %v1451_v59 = vmul.f32 0.01, %v873_v51  ;;  %vm1387_vm11 = vcmp.ge.f32.partialorder %v1129_v52, 0.0  ;;  %v875_v61 = vpop.f32.mrf.mxu0  ;;  %v1131_v62 = vpop.f32.mrf.mxu1 }
 0x11b   : > { %1773 = vst [vmem:[%s2411_s14 + $0x2b0] sm:$0xff] %v1645_v56  ;;  %v1515_v60 = vmul.f32 0.01, %v1129_v52  ;;  %vm1326_vm12 = vcmp.ge.f32.partialorder %v884_v57, 0.0  ;;  %v1454_v63 = vmul.f32 0.01, %v884_v57  ;;  %v876_v3 = vadd.f32 %v2403_v8, %v875_v61 }
 0x11c   : > { %vm1390_vm13 = vcmp.ge.f32.partialorder %v1140_v58, 0.0  ;;  %v1518_v0 = vmul.f32 0.01, %v1140_v58  ;;  %v1579_v1 = vsel %vm1323_vm10, %v873_v51, %v1451_v59  ;;  %v1132_v4 = vadd.f32 %v2403_v8, %v1131_v62  ;;  %v2069_v5 = vpop.f32.mrf.mxu0  ;;  %v2133_v6 = vpop.f32.mrf.mxu1 }
 0x11d   : > { %v1643_v2 = vsel %vm1387_vm11, %v1129_v52, %v1515_v60  ;;  %1707 = vst [vmem:[%s2411_s14 + $0xa0] sm:$0xff] %v1579_v1  ;;  %v1582_v7 = vsel %vm1326_vm12, %v884_v57, %v1454_v63  ;;  %v897_v10 = vadd.f32 %v2069_v5, %v2403_v8  ;;  %v1153_v11 = vadd.f32 %v2133_v6, %v2403_v8 }
 0x11e   : > { %1771 = vst [vmem:[%s2411_s14 + $0x2a0] sm:$0xff] %v1643_v2  ;;  %v1646_v9 = vsel %vm1390_vm13, %v1140_v58, %v1518_v0  ;;  %1710 = vst [vmem:[%s2411_s14 + $0xb8] sm:$0xff] %v1582_v7  ;;  %vm1324_vm14 = vcmp.ge.f32.partialorder %v876_v3, 0.0  ;;  %v1452_v12 = vmul.f32 0.01, %v876_v3  ;;  %vm1388_vm15 = vcmp.ge.f32.partialorder %v1132_v4, 0.0  ;;  %v888_v14 = vpop.f32.mrf.mxu0  ;;  %v1144_v15 = vpop.f32.mrf.mxu1 }
 0x11f   : > { %1774 = vst [vmem:[%s2411_s14 + $0x2b8] sm:$0xff] %v1646_v9  ;;  %v1516_v13 = vmul.f32 0.01, %v1132_v4  ;;  %vm1329_vm0 = vcmp.ge.f32.partialorder %v897_v10, 0.0  ;;  %v1457_v16 = vmul.f32 0.01, %v897_v10  ;;  %v889_v20 = vadd.f32 %v2403_v8, %v888_v14 }
 0x120   : > { %vm1393_vm1 = vcmp.ge.f32.partialorder %v1153_v11, 0.0  ;;  %v1521_v17 = vmul.f32 0.01, %v1153_v11  ;;  %v1580_v18 = vsel %vm1324_vm14, %v876_v3, %v1452_v12  ;;  %v1145_v21 = vadd.f32 %v2403_v8, %v1144_v15  ;;  %v2070_v22 = vpop.f32.mrf.mxu0  ;;  %v2134_v23 = vpop.f32.mrf.mxu1 }
 0x121   : > { %v1644_v19 = vsel %vm1388_vm15, %v1132_v4, %v1516_v13  ;;  %1708 = vst [vmem:[%s2411_s14 + $0xa8] sm:$0xff] %v1580_v18  ;;  %v1585_v24 = vsel %vm1329_vm0, %v897_v10, %v1457_v16  ;;  %v900_v26 = vadd.f32 %v2070_v22, %v2403_v8  ;;  %v1156_v27 = vadd.f32 %v2134_v23, %v2403_v8 }
 0x122   : > { %1772 = vst [vmem:[%s2411_s14 + $0x2a8] sm:$0xff] %v1644_v19  ;;  %v1649_v25 = vsel %vm1393_vm1, %v1153_v11, %v1521_v17  ;;  %1713 = vst [vmem:[%s2411_s14 + $0xd0] sm:$0xff] %v1585_v24  ;;  %vm1327_vm2 = vcmp.ge.f32.partialorder %v889_v20, 0.0  ;;  %v1455_v28 = vmul.f32 0.01, %v889_v20  ;;  %vm1391_vm3 = vcmp.ge.f32.partialorder %v1145_v21, 0.0  ;;  %v891_v30 = vpop.f32.mrf.mxu0  ;;  %v1147_v31 = vpop.f32.mrf.mxu1 }
 0x123   : > { %1777 = vst [vmem:[%s2411_s14 + $0x2d0] sm:$0xff] %v1649_v25  ;;  %v1519_v29 = vmul.f32 0.01, %v1145_v21  ;;  %vm1330_vm4 = vcmp.ge.f32.partialorder %v900_v26, 0.0  ;;  %v1458_v32 = vmul.f32 0.01, %v900_v26  ;;  %v892_v36 = vadd.f32 %v2403_v8, %v891_v30 }
 0x124   : > { %vm1394_vm5 = vcmp.ge.f32.partialorder %v1156_v27, 0.0  ;;  %v1522_v33 = vmul.f32 0.01, %v1156_v27  ;;  %v1583_v34 = vsel %vm1327_vm2, %v889_v20, %v1455_v28  ;;  %v1148_v37 = vadd.f32 %v2403_v8, %v1147_v31  ;;  %v2073_v38 = vpop.f32.mrf.mxu0  ;;  %v2137_v39 = vpop.f32.mrf.mxu1 }
 0x125   : > { %v1647_v35 = vsel %vm1391_vm3, %v1145_v21, %v1519_v29  ;;  %1711 = vst [vmem:[%s2411_s14 + $0xc0] sm:$0xff] %v1583_v34  ;;  %v1586_v40 = vsel %vm1330_vm4, %v900_v26, %v1458_v32  ;;  %v913_v42 = vadd.f32 %v2073_v38, %v2403_v8  ;;  %v1169_v43 = vadd.f32 %v2137_v39, %v2403_v8 }
 0x126   : > { %1775 = vst [vmem:[%s2411_s14 + $0x2c0] sm:$0xff] %v1647_v35  ;;  %v1650_v41 = vsel %vm1394_vm5, %v1156_v27, %v1522_v33  ;;  %1714 = vst [vmem:[%s2411_s14 + $0xd8] sm:$0xff] %v1586_v40  ;;  %vm1328_vm6 = vcmp.ge.f32.partialorder %v892_v36, 0.0  ;;  %v1456_v44 = vmul.f32 0.01, %v892_v36  ;;  %vm1392_vm7 = vcmp.ge.f32.partialorder %v1148_v37, 0.0  ;;  %v904_v46 = vpop.f32.mrf.mxu0  ;;  %v1160_v47 = vpop.f32.mrf.mxu1 }
 0x127   : > { %1778 = vst [vmem:[%s2411_s14 + $0x2d8] sm:$0xff] %v1650_v41  ;;  %v1520_v45 = vmul.f32 0.01, %v1148_v37  ;;  %vm1333_vm8 = vcmp.ge.f32.partialorder %v913_v42, 0.0  ;;  %v1461_v48 = vmul.f32 0.01, %v913_v42  ;;  %v905_v52 = vadd.f32 %v2403_v8, %v904_v46 }
 0x128   : > { %vm1397_vm9 = vcmp.ge.f32.partialorder %v1169_v43, 0.0  ;;  %v1525_v49 = vmul.f32 0.01, %v1169_v43  ;;  %v1584_v50 = vsel %vm1328_vm6, %v892_v36, %v1456_v44  ;;  %v1161_v53 = vadd.f32 %v2403_v8, %v1160_v47  ;;  %v2074_v54 = vpop.f32.mrf.mxu0  ;;  %v2138_v55 = vpop.f32.mrf.mxu1 }
 0x129   : > { %v1648_v51 = vsel %vm1392_vm7, %v1148_v37, %v1520_v45  ;;  %1712 = vst [vmem:[%s2411_s14 + $0xc8] sm:$0xff] %v1584_v50  ;;  %v1589_v56 = vsel %vm1333_vm8, %v913_v42, %v1461_v48  ;;  %v916_v58 = vadd.f32 %v2074_v54, %v2403_v8  ;;  %v1172_v59 = vadd.f32 %v2138_v55, %v2403_v8 }
 0x12a   : > { %1776 = vst [vmem:[%s2411_s14 + $0x2c8] sm:$0xff] %v1648_v51  ;;  %v1653_v57 = vsel %vm1397_vm9, %v1169_v43, %v1525_v49  ;;  %1717 = vst [vmem:[%s2411_s14 + $0xf0] sm:$0xff] %v1589_v56  ;;  %vm1331_vm10 = vcmp.ge.f32.partialorder %v905_v52, 0.0  ;;  %v1459_v60 = vmul.f32 0.01, %v905_v52  ;;  %vm1395_vm11 = vcmp.ge.f32.partialorder %v1161_v53, 0.0  ;;  %v907_v62 = vpop.f32.mrf.mxu0  ;;  %v1163_v63 = vpop.f32.mrf.mxu1 }
 0x12b   : > { %1781 = vst [vmem:[%s2411_s14 + $0x2f0] sm:$0xff] %v1653_v57  ;;  %v1523_v61 = vmul.f32 0.01, %v1161_v53  ;;  %vm1334_vm12 = vcmp.ge.f32.partialorder %v916_v58, 0.0  ;;  %v1462_v0 = vmul.f32 0.01, %v916_v58  ;;  %v908_v4 = vadd.f32 %v2403_v8, %v907_v62 }
 0x12c   : > { %vm1398_vm13 = vcmp.ge.f32.partialorder %v1172_v59, 0.0  ;;  %v1526_v1 = vmul.f32 0.01, %v1172_v59  ;;  %v1587_v2 = vsel %vm1331_vm10, %v905_v52, %v1459_v60  ;;  %v1164_v5 = vadd.f32 %v2403_v8, %v1163_v63  ;;  %v2077_v6 = vpop.f32.mrf.mxu0  ;;  %v2141_v7 = vpop.f32.mrf.mxu1 }
 0x12d   : > { %v1651_v3 = vsel %vm1395_vm11, %v1161_v53, %v1523_v61  ;;  %1715 = vst [vmem:[%s2411_s14 + $0xe0] sm:$0xff] %v1587_v2  ;;  %v1590_v9 = vsel %vm1334_vm12, %v916_v58, %v1462_v0  ;;  %v929_v11 = vadd.f32 %v2077_v6, %v2403_v8  ;;  %v1185_v12 = vadd.f32 %v2141_v7, %v2403_v8 }
 0x12e   : > { %1779 = vst [vmem:[%s2411_s14 + $0x2e0] sm:$0xff] %v1651_v3  ;;  %v1654_v10 = vsel %vm1398_vm13, %v1172_v59, %v1526_v1  ;;  %1718 = vst [vmem:[%s2411_s14 + $0xf8] sm:$0xff] %v1590_v9  ;;  %vm1332_vm14 = vcmp.ge.f32.partialorder %v908_v4, 0.0  ;;  %v1460_v13 = vmul.f32 0.01, %v908_v4  ;;  %vm1396_vm15 = vcmp.ge.f32.partialorder %v1164_v5, 0.0  ;;  %v920_v15 = vpop.f32.mrf.mxu0  ;;  %v1176_v16 = vpop.f32.mrf.mxu1 }
 0x12f   : > { %1782 = vst [vmem:[%s2411_s14 + $0x2f8] sm:$0xff] %v1654_v10  ;;  %v1524_v14 = vmul.f32 0.01, %v1164_v5  ;;  %vm1337_vm0 = vcmp.ge.f32.partialorder %v929_v11, 0.0  ;;  %v1465_v17 = vmul.f32 0.01, %v929_v11  ;;  %v921_v21 = vadd.f32 %v2403_v8, %v920_v15 }
 0x130   : > { %vm1401_vm1 = vcmp.ge.f32.partialorder %v1185_v12, 0.0  ;;  %v1529_v18 = vmul.f32 0.01, %v1185_v12  ;;  %v1588_v19 = vsel %vm1332_vm14, %v908_v4, %v1460_v13  ;;  %v1177_v22 = vadd.f32 %v2403_v8, %v1176_v16  ;;  %v2078_v23 = vpop.f32.mrf.mxu0  ;;  %v2142_v24 = vpop.f32.mrf.mxu1 }
 0x131   : > { %v1652_v20 = vsel %vm1396_vm15, %v1164_v5, %v1524_v14  ;;  %1716 = vst [vmem:[%s2411_s14 + $0xe8] sm:$0xff] %v1588_v19  ;;  %v1593_v25 = vsel %vm1337_vm0, %v929_v11, %v1465_v17  ;;  %v932_v27 = vadd.f32 %v2078_v23, %v2403_v8  ;;  %v1188_v28 = vadd.f32 %v2142_v24, %v2403_v8 }
 0x132   : > { %1780 = vst [vmem:[%s2411_s14 + $0x2e8] sm:$0xff] %v1652_v20  ;;  %v1657_v26 = vsel %vm1401_vm1, %v1185_v12, %v1529_v18  ;;  %1721 = vst [vmem:[%s2411_s14 + $0x110] sm:$0xff] %v1593_v25  ;;  %vm1335_vm2 = vcmp.ge.f32.partialorder %v921_v21, 0.0  ;;  %v1463_v29 = vmul.f32 0.01, %v921_v21  ;;  %vm1399_vm3 = vcmp.ge.f32.partialorder %v1177_v22, 0.0  ;;  %v923_v31 = vpop.f32.mrf.mxu0  ;;  %v1179_v32 = vpop.f32.mrf.mxu1 }
 0x133   : > { %1785 = vst [vmem:[%s2411_s14 + $0x310] sm:$0xff] %v1657_v26  ;;  %v1527_v30 = vmul.f32 0.01, %v1177_v22  ;;  %vm1338_vm4 = vcmp.ge.f32.partialorder %v932_v27, 0.0  ;;  %v1466_v33 = vmul.f32 0.01, %v932_v27  ;;  %v924_v37 = vadd.f32 %v2403_v8, %v923_v31 }
 0x134   : > { %vm1402_vm5 = vcmp.ge.f32.partialorder %v1188_v28, 0.0  ;;  %v1530_v34 = vmul.f32 0.01, %v1188_v28  ;;  %v1591_v35 = vsel %vm1335_vm2, %v921_v21, %v1463_v29  ;;  %v1180_v38 = vadd.f32 %v2403_v8, %v1179_v32  ;;  %v2081_v39 = vpop.f32.mrf.mxu0  ;;  %v2145_v40 = vpop.f32.mrf.mxu1 }
 0x135   : > { %v1655_v36 = vsel %vm1399_vm3, %v1177_v22, %v1527_v30  ;;  %1719 = vst [vmem:[%s2411_s14 + $0x100] sm:$0xff] %v1591_v35  ;;  %v1594_v41 = vsel %vm1338_vm4, %v932_v27, %v1466_v33  ;;  %v945_v43 = vadd.f32 %v2081_v39, %v2403_v8  ;;  %v1201_v44 = vadd.f32 %v2145_v40, %v2403_v8 }
 0x136   : > { %1783 = vst [vmem:[%s2411_s14 + $0x300] sm:$0xff] %v1655_v36  ;;  %v1658_v42 = vsel %vm1402_vm5, %v1188_v28, %v1530_v34  ;;  %1722 = vst [vmem:[%s2411_s14 + $0x118] sm:$0xff] %v1594_v41  ;;  %vm1336_vm6 = vcmp.ge.f32.partialorder %v924_v37, 0.0  ;;  %v1464_v45 = vmul.f32 0.01, %v924_v37  ;;  %vm1400_vm7 = vcmp.ge.f32.partialorder %v1180_v38, 0.0  ;;  %v936_v47 = vpop.f32.mrf.mxu0  ;;  %v1192_v48 = vpop.f32.mrf.mxu1 }
 0x137   : > { %1786 = vst [vmem:[%s2411_s14 + $0x318] sm:$0xff] %v1658_v42  ;;  %v1528_v46 = vmul.f32 0.01, %v1180_v38  ;;  %vm1341_vm8 = vcmp.ge.f32.partialorder %v945_v43, 0.0  ;;  %v1469_v49 = vmul.f32 0.01, %v945_v43  ;;  %v937_v53 = vadd.f32 %v2403_v8, %v936_v47 }
 0x138   : > { %vm1405_vm9 = vcmp.ge.f32.partialorder %v1201_v44, 0.0  ;;  %v1533_v50 = vmul.f32 0.01, %v1201_v44  ;;  %v1592_v51 = vsel %vm1336_vm6, %v924_v37, %v1464_v45  ;;  %v1193_v54 = vadd.f32 %v2403_v8, %v1192_v48  ;;  %v2082_v55 = vpop.f32.mrf.mxu0  ;;  %v2146_v56 = vpop.f32.mrf.mxu1 }
 0x139   : > { %v1656_v52 = vsel %vm1400_vm7, %v1180_v38, %v1528_v46  ;;  %1720 = vst [vmem:[%s2411_s14 + $0x108] sm:$0xff] %v1592_v51  ;;  %v1597_v57 = vsel %vm1341_vm8, %v945_v43, %v1469_v49  ;;  %v948_v59 = vadd.f32 %v2082_v55, %v2403_v8  ;;  %v1204_v60 = vadd.f32 %v2146_v56, %v2403_v8 }
 0x13a   : > { %1784 = vst [vmem:[%s2411_s14 + $0x308] sm:$0xff] %v1656_v52  ;;  %v1661_v58 = vsel %vm1405_vm9, %v1201_v44, %v1533_v50  ;;  %1725 = vst [vmem:[%s2411_s14 + $0x130] sm:$0xff] %v1597_v57  ;;  %vm1339_vm10 = vcmp.ge.f32.partialorder %v937_v53, 0.0  ;;  %v1467_v61 = vmul.f32 0.01, %v937_v53  ;;  %vm1403_vm11 = vcmp.ge.f32.partialorder %v1193_v54, 0.0  ;;  %v939_v63 = vpop.f32.mrf.mxu0  ;;  %v1195_v0 = vpop.f32.mrf.mxu1 }
 0x13b   : > { %1789 = vst [vmem:[%s2411_s14 + $0x330] sm:$0xff] %v1661_v58  ;;  %v1531_v62 = vmul.f32 0.01, %v1193_v54  ;;  %vm1342_vm12 = vcmp.ge.f32.partialorder %v948_v59, 0.0  ;;  %v1470_v1 = vmul.f32 0.01, %v948_v59  ;;  %v940_v5 = vadd.f32 %v2403_v8, %v939_v63 }
 0x13c   : > { %vm1406_vm13 = vcmp.ge.f32.partialorder %v1204_v60, 0.0  ;;  %v1534_v2 = vmul.f32 0.01, %v1204_v60  ;;  %v1595_v3 = vsel %vm1339_vm10, %v937_v53, %v1467_v61  ;;  %v1196_v6 = vadd.f32 %v2403_v8, %v1195_v0  ;;  %v2085_v7 = vpop.f32.mrf.mxu0  ;;  %v2149_v9 = vpop.f32.mrf.mxu1 }
 0x13d   : > { %v1659_v4 = vsel %vm1403_vm11, %v1193_v54, %v1531_v62  ;;  %1723 = vst [vmem:[%s2411_s14 + $0x120] sm:$0xff] %v1595_v3  ;;  %v1598_v10 = vsel %vm1342_vm12, %v948_v59, %v1470_v1  ;;  %v961_v12 = vadd.f32 %v2085_v7, %v2403_v8  ;;  %v1217_v13 = vadd.f32 %v2149_v9, %v2403_v8 }
 0x13e   : > { %1787 = vst [vmem:[%s2411_s14 + $0x320] sm:$0xff] %v1659_v4  ;;  %v1662_v11 = vsel %vm1406_vm13, %v1204_v60, %v1534_v2  ;;  %1726 = vst [vmem:[%s2411_s14 + $0x138] sm:$0xff] %v1598_v10  ;;  %vm1340_vm14 = vcmp.ge.f32.partialorder %v940_v5, 0.0  ;;  %v1468_v14 = vmul.f32 0.01, %v940_v5  ;;  %vm1404_vm15 = vcmp.ge.f32.partialorder %v1196_v6, 0.0  ;;  %v952_v16 = vpop.f32.mrf.mxu0  ;;  %v1208_v17 = vpop.f32.mrf.mxu1 }
 0x13f   : > { %1790 = vst [vmem:[%s2411_s14 + $0x338] sm:$0xff] %v1662_v11  ;;  %v1532_v15 = vmul.f32 0.01, %v1196_v6  ;;  %vm1345_vm0 = vcmp.ge.f32.partialorder %v961_v12, 0.0  ;;  %v1473_v18 = vmul.f32 0.01, %v961_v12  ;;  %v953_v22 = vadd.f32 %v2403_v8, %v952_v16 }
 0x140   : > { %vm1409_vm1 = vcmp.ge.f32.partialorder %v1217_v13, 0.0  ;;  %v1537_v19 = vmul.f32 0.01, %v1217_v13  ;;  %v1596_v20 = vsel %vm1340_vm14, %v940_v5, %v1468_v14  ;;  %v1209_v23 = vadd.f32 %v2403_v8, %v1208_v17  ;;  %v2086_v24 = vpop.f32.mrf.mxu0  ;;  %v2150_v25 = vpop.f32.mrf.mxu1 }
 0x141   : > { %v1660_v21 = vsel %vm1404_vm15, %v1196_v6, %v1532_v15  ;;  %1724 = vst [vmem:[%s2411_s14 + $0x128] sm:$0xff] %v1596_v20  ;;  %v1601_v26 = vsel %vm1345_vm0, %v961_v12, %v1473_v18  ;;  %v964_v28 = vadd.f32 %v2086_v24, %v2403_v8  ;;  %v1220_v29 = vadd.f32 %v2150_v25, %v2403_v8  ;;  %v2582_v8 = vld [vmem:[%s2677_s2] ss:$0 sm:$0xff] }
 0x142   : > { %1788 = vst [vmem:[%s2411_s14 + $0x328] sm:$0xff] %v1660_v21  ;;  %v1665_v27 = vsel %vm1409_vm1, %v1217_v13, %v1537_v19  ;;  %1729 = vst [vmem:[%s2411_s14 + $0x150] sm:$0xff] %v1601_v26  ;;  %vm1343_vm2 = vcmp.ge.f32.partialorder %v953_v22, 0.0  ;;  %v1471_v30 = vmul.f32 0.01, %v953_v22  ;;  %vm1407_vm3 = vcmp.ge.f32.partialorder %v1209_v23, 0.0  ;;  %v955_v32 = vpop.f32.mrf.mxu0  ;;  %v1211_v33 = vpop.f32.mrf.mxu1 }
 0x143   : > { %1793 = vst [vmem:[%s2411_s14 + $0x350] sm:$0xff] %v1665_v27  ;;  %v1535_v31 = vmul.f32 0.01, %v1209_v23  ;;  %vm1346_vm4 = vcmp.ge.f32.partialorder %v964_v28, 0.0  ;;  %v1474_v34 = vmul.f32 0.01, %v964_v28  ;;  %v956_v38 = vadd.f32 %v2582_v8, %v955_v32 }
 0x144   : > { %vm1410_vm5 = vcmp.ge.f32.partialorder %v1220_v29, 0.0  ;;  %v1538_v35 = vmul.f32 0.01, %v1220_v29  ;;  %v1599_v36 = vsel %vm1343_vm2, %v953_v22, %v1471_v30  ;;  %v1212_v39 = vadd.f32 %v2582_v8, %v1211_v33  ;;  %v2089_v40 = vpop.f32.mrf.mxu0  ;;  %v2153_v41 = vpop.f32.mrf.mxu1 }
 0x145   : > { %v1663_v37 = vsel %vm1407_vm3, %v1209_v23, %v1535_v31  ;;  %1727 = vst [vmem:[%s2411_s14 + $0x140] sm:$0xff] %v1599_v36  ;;  %v1602_v42 = vsel %vm1346_vm4, %v964_v28, %v1474_v34  ;;  %v977_v44 = vadd.f32 %v2582_v8, %v2089_v40  ;;  %v1233_v45 = vadd.f32 %v2582_v8, %v2153_v41 }
 0x146   : > { %1791 = vst [vmem:[%s2411_s14 + $0x340] sm:$0xff] %v1663_v37  ;;  %v1666_v43 = vsel %vm1410_vm5, %v1220_v29, %v1538_v35  ;;  %1730 = vst [vmem:[%s2411_s14 + $0x158] sm:$0xff] %v1602_v42  ;;  %vm1344_vm6 = vcmp.ge.f32.partialorder %v956_v38, 0.0  ;;  %v1472_v46 = vmul.f32 0.01, %v956_v38  ;;  %vm1408_vm7 = vcmp.ge.f32.partialorder %v1212_v39, 0.0  ;;  %v968_v48 = vpop.f32.mrf.mxu0  ;;  %v1224_v49 = vpop.f32.mrf.mxu1 }
 0x147   : > { %1794 = vst [vmem:[%s2411_s14 + $0x358] sm:$0xff] %v1666_v43  ;;  %v1536_v47 = vmul.f32 0.01, %v1212_v39  ;;  %vm1349_vm8 = vcmp.ge.f32.partialorder %v977_v44, 0.0  ;;  %v1477_v50 = vmul.f32 0.01, %v977_v44  ;;  %v969_v54 = vadd.f32 %v2582_v8, %v968_v48 }
 0x148   : > { %vm1413_vm9 = vcmp.ge.f32.partialorder %v1233_v45, 0.0  ;;  %v1541_v51 = vmul.f32 0.01, %v1233_v45  ;;  %v1600_v52 = vsel %vm1344_vm6, %v956_v38, %v1472_v46  ;;  %v1225_v55 = vadd.f32 %v2582_v8, %v1224_v49  ;;  %v2090_v56 = vpop.f32.mrf.mxu0  ;;  %v2154_v57 = vpop.f32.mrf.mxu1 }
 0x149   : > { %v1664_v53 = vsel %vm1408_vm7, %v1212_v39, %v1536_v47  ;;  %1728 = vst [vmem:[%s2411_s14 + $0x148] sm:$0xff] %v1600_v52  ;;  %v1605_v58 = vsel %vm1349_vm8, %v977_v44, %v1477_v50  ;;  %v980_v60 = vadd.f32 %v2582_v8, %v2090_v56  ;;  %v1236_v61 = vadd.f32 %v2582_v8, %v2154_v57 }
 0x14a   : > { %1792 = vst [vmem:[%s2411_s14 + $0x348] sm:$0xff] %v1664_v53  ;;  %v1669_v59 = vsel %vm1413_vm9, %v1233_v45, %v1541_v51  ;;  %1733 = vst [vmem:[%s2411_s14 + $0x170] sm:$0xff] %v1605_v58  ;;  %vm1347_vm10 = vcmp.ge.f32.partialorder %v969_v54, 0.0  ;;  %v1475_v62 = vmul.f32 0.01, %v969_v54  ;;  %vm1411_vm11 = vcmp.ge.f32.partialorder %v1225_v55, 0.0  ;;  %v971_v0 = vpop.f32.mrf.mxu0  ;;  %v1227_v1 = vpop.f32.mrf.mxu1 }
 0x14b   : > { %1797 = vst [vmem:[%s2411_s14 + $0x370] sm:$0xff] %v1669_v59  ;;  %v1539_v63 = vmul.f32 0.01, %v1225_v55  ;;  %vm1350_vm12 = vcmp.ge.f32.partialorder %v980_v60, 0.0  ;;  %v1478_v2 = vmul.f32 0.01, %v980_v60  ;;  %v972_v6 = vadd.f32 %v2582_v8, %v971_v0 }
 0x14c   : > { %vm1414_vm13 = vcmp.ge.f32.partialorder %v1236_v61, 0.0  ;;  %v1542_v3 = vmul.f32 0.01, %v1236_v61  ;;  %v1603_v4 = vsel %vm1347_vm10, %v969_v54, %v1475_v62  ;;  %v1228_v7 = vadd.f32 %v2582_v8, %v1227_v1  ;;  %v2093_v9 = vpop.f32.mrf.mxu0  ;;  %v2157_v10 = vpop.f32.mrf.mxu1 }
 0x14d   : > { %v1667_v5 = vsel %vm1411_vm11, %v1225_v55, %v1539_v63  ;;  %1731 = vst [vmem:[%s2411_s14 + $0x160] sm:$0xff] %v1603_v4  ;;  %v1606_v11 = vsel %vm1350_vm12, %v980_v60, %v1478_v2  ;;  %v993_v13 = vadd.f32 %v2582_v8, %v2093_v9  ;;  %v1249_v14 = vadd.f32 %v2582_v8, %v2157_v10 }
 0x14e   : > { %1795 = vst [vmem:[%s2411_s14 + $0x360] sm:$0xff] %v1667_v5  ;;  %v1670_v12 = vsel %vm1414_vm13, %v1236_v61, %v1542_v3  ;;  %1734 = vst [vmem:[%s2411_s14 + $0x178] sm:$0xff] %v1606_v11  ;;  %vm1348_vm14 = vcmp.ge.f32.partialorder %v972_v6, 0.0  ;;  %v1476_v15 = vmul.f32 0.01, %v972_v6  ;;  %vm1412_vm15 = vcmp.ge.f32.partialorder %v1228_v7, 0.0  ;;  %v984_v17 = vpop.f32.mrf.mxu0  ;;  %v1240_v18 = vpop.f32.mrf.mxu1 }
 0x14f   : > { %1798 = vst [vmem:[%s2411_s14 + $0x378] sm:$0xff] %v1670_v12  ;;  %v1540_v16 = vmul.f32 0.01, %v1228_v7  ;;  %vm1353_vm0 = vcmp.ge.f32.partialorder %v993_v13, 0.0  ;;  %v1481_v19 = vmul.f32 0.01, %v993_v13  ;;  %v985_v23 = vadd.f32 %v2582_v8, %v984_v17 }
 0x150   : > { %vm1417_vm1 = vcmp.ge.f32.partialorder %v1249_v14, 0.0  ;;  %v1545_v20 = vmul.f32 0.01, %v1249_v14  ;;  %v1604_v21 = vsel %vm1348_vm14, %v972_v6, %v1476_v15  ;;  %v1241_v24 = vadd.f32 %v2582_v8, %v1240_v18  ;;  %v2094_v25 = vpop.f32.mrf.mxu0  ;;  %v2158_v26 = vpop.f32.mrf.mxu1 }
 0x151   : > { %v1668_v22 = vsel %vm1412_vm15, %v1228_v7, %v1540_v16  ;;  %1732 = vst [vmem:[%s2411_s14 + $0x168] sm:$0xff] %v1604_v21  ;;  %v1609_v27 = vsel %vm1353_vm0, %v993_v13, %v1481_v19  ;;  %v996_v29 = vadd.f32 %v2582_v8, %v2094_v25  ;;  %v1252_v30 = vadd.f32 %v2582_v8, %v2158_v26 }
 0x152   : > { %1796 = vst [vmem:[%s2411_s14 + $0x368] sm:$0xff] %v1668_v22  ;;  %v1673_v28 = vsel %vm1417_vm1, %v1249_v14, %v1545_v20  ;;  %1737 = vst [vmem:[%s2411_s14 + $0x190] sm:$0xff] %v1609_v27  ;;  %vm1351_vm2 = vcmp.ge.f32.partialorder %v985_v23, 0.0  ;;  %v1479_v31 = vmul.f32 0.01, %v985_v23  ;;  %vm1415_vm3 = vcmp.ge.f32.partialorder %v1241_v24, 0.0  ;;  %v987_v33 = vpop.f32.mrf.mxu0  ;;  %v1243_v34 = vpop.f32.mrf.mxu1 }
 0x153   : > { %1801 = vst [vmem:[%s2411_s14 + $0x390] sm:$0xff] %v1673_v28  ;;  %v1543_v32 = vmul.f32 0.01, %v1241_v24  ;;  %vm1354_vm4 = vcmp.ge.f32.partialorder %v996_v29, 0.0  ;;  %v1482_v35 = vmul.f32 0.01, %v996_v29  ;;  %v988_v39 = vadd.f32 %v2582_v8, %v987_v33 }
 0x154   : > { %vm1418_vm5 = vcmp.ge.f32.partialorder %v1252_v30, 0.0  ;;  %v1546_v36 = vmul.f32 0.01, %v1252_v30  ;;  %v1607_v37 = vsel %vm1351_vm2, %v985_v23, %v1479_v31  ;;  %v1244_v40 = vadd.f32 %v2582_v8, %v1243_v34  ;;  %v2097_v41 = vpop.f32.mrf.mxu0  ;;  %v2161_v42 = vpop.f32.mrf.mxu1 }
 0x155   : > { %v1671_v38 = vsel %vm1415_vm3, %v1241_v24, %v1543_v32  ;;  %1735 = vst [vmem:[%s2411_s14 + $0x180] sm:$0xff] %v1607_v37  ;;  %v1610_v43 = vsel %vm1354_vm4, %v996_v29, %v1482_v35  ;;  %v1009_v45 = vadd.f32 %v2582_v8, %v2097_v41  ;;  %v1265_v46 = vadd.f32 %v2582_v8, %v2161_v42 }
 0x156   : > { %1799 = vst [vmem:[%s2411_s14 + $0x380] sm:$0xff] %v1671_v38  ;;  %v1674_v44 = vsel %vm1418_vm5, %v1252_v30, %v1546_v36  ;;  %1738 = vst [vmem:[%s2411_s14 + $0x198] sm:$0xff] %v1610_v43  ;;  %vm1352_vm6 = vcmp.ge.f32.partialorder %v988_v39, 0.0  ;;  %v1480_v47 = vmul.f32 0.01, %v988_v39  ;;  %vm1416_vm7 = vcmp.ge.f32.partialorder %v1244_v40, 0.0  ;;  %v1000_v49 = vpop.f32.mrf.mxu0  ;;  %v1256_v50 = vpop.f32.mrf.mxu1 }
 0x157   : > { %1802 = vst [vmem:[%s2411_s14 + $0x398] sm:$0xff] %v1674_v44  ;;  %v1544_v48 = vmul.f32 0.01, %v1244_v40  ;;  %vm1357_vm8 = vcmp.ge.f32.partialorder %v1009_v45, 0.0  ;;  %v1485_v51 = vmul.f32 0.01, %v1009_v45  ;;  %v1001_v55 = vadd.f32 %v2582_v8, %v1000_v49 }
 0x158   : > { %vm1421_vm9 = vcmp.ge.f32.partialorder %v1265_v46, 0.0  ;;  %v1549_v52 = vmul.f32 0.01, %v1265_v46  ;;  %v1608_v53 = vsel %vm1352_vm6, %v988_v39, %v1480_v47  ;;  %v1257_v56 = vadd.f32 %v2582_v8, %v1256_v50  ;;  %v2098_v57 = vpop.f32.mrf.mxu0  ;;  %v2162_v58 = vpop.f32.mrf.mxu1 }
 0x159   : > { %v1672_v54 = vsel %vm1416_vm7, %v1244_v40, %v1544_v48  ;;  %1736 = vst [vmem:[%s2411_s14 + $0x188] sm:$0xff] %v1608_v53  ;;  %v1613_v59 = vsel %vm1357_vm8, %v1009_v45, %v1485_v51  ;;  %v1012_v61 = vadd.f32 %v2582_v8, %v2098_v57  ;;  %v1268_v62 = vadd.f32 %v2582_v8, %v2162_v58 }
 0x15a   : > { %1800 = vst [vmem:[%s2411_s14 + $0x388] sm:$0xff] %v1672_v54  ;;  %v1677_v60 = vsel %vm1421_vm9, %v1265_v46, %v1549_v52  ;;  %1741 = vst [vmem:[%s2411_s14 + $0x1b0] sm:$0xff] %v1613_v59  ;;  %vm1355_vm10 = vcmp.ge.f32.partialorder %v1001_v55, 0.0  ;;  %v1483_v63 = vmul.f32 0.01, %v1001_v55  ;;  %vm1419_vm11 = vcmp.ge.f32.partialorder %v1257_v56, 0.0  ;;  %v1003_v1 = vpop.f32.mrf.mxu0  ;;  %v1259_v2 = vpop.f32.mrf.mxu1 }
 0x15b   : > { %1805 = vst [vmem:[%s2411_s14 + $0x3b0] sm:$0xff] %v1677_v60  ;;  %v1547_v0 = vmul.f32 0.01, %v1257_v56  ;;  %vm1358_vm12 = vcmp.ge.f32.partialorder %v1012_v61, 0.0  ;;  %v1486_v3 = vmul.f32 0.01, %v1012_v61  ;;  %v1004_v7 = vadd.f32 %v2582_v8, %v1003_v1 }
 0x15c   : > { %vm1422_vm13 = vcmp.ge.f32.partialorder %v1268_v62, 0.0  ;;  %v1550_v4 = vmul.f32 0.01, %v1268_v62  ;;  %v1611_v5 = vsel %vm1355_vm10, %v1001_v55, %v1483_v63  ;;  %v1260_v9 = vadd.f32 %v2582_v8, %v1259_v2  ;;  %v2101_v10 = vpop.f32.mrf.mxu0  ;;  %v2165_v11 = vpop.f32.mrf.mxu1 }
 0x15d   : > { %v1675_v6 = vsel %vm1419_vm11, %v1257_v56, %v1547_v0  ;;  %1739 = vst [vmem:[%s2411_s14 + $0x1a0] sm:$0xff] %v1611_v5  ;;  %v1614_v12 = vsel %vm1358_vm12, %v1012_v61, %v1486_v3  ;;  %v1025_v14 = vadd.f32 %v2582_v8, %v2101_v10  ;;  %v1281_v15 = vadd.f32 %v2582_v8, %v2165_v11 }
 0x15e   : > { %1803 = vst [vmem:[%s2411_s14 + $0x3a0] sm:$0xff] %v1675_v6  ;;  %v1678_v13 = vsel %vm1422_vm13, %v1268_v62, %v1550_v4  ;;  %1742 = vst [vmem:[%s2411_s14 + $0x1b8] sm:$0xff] %v1614_v12  ;;  %vm1356_vm14 = vcmp.ge.f32.partialorder %v1004_v7, 0.0  ;;  %v1484_v16 = vmul.f32 0.01, %v1004_v7  ;;  %vm1420_vm15 = vcmp.ge.f32.partialorder %v1260_v9, 0.0  ;;  %v1016_v18 = vpop.f32.mrf.mxu0  ;;  %v1272_v19 = vpop.f32.mrf.mxu1 }
 0x15f   : > { %1806 = vst [vmem:[%s2411_s14 + $0x3b8] sm:$0xff] %v1678_v13  ;;  %v1548_v17 = vmul.f32 0.01, %v1260_v9  ;;  %vm1361_vm0 = vcmp.ge.f32.partialorder %v1025_v14, 0.0  ;;  %v1489_v20 = vmul.f32 0.01, %v1025_v14  ;;  %v1017_v24 = vadd.f32 %v2582_v8, %v1016_v18 }
 0x160   : > { %vm1425_vm1 = vcmp.ge.f32.partialorder %v1281_v15, 0.0  ;;  %v1553_v21 = vmul.f32 0.01, %v1281_v15  ;;  %v1612_v22 = vsel %vm1356_vm14, %v1004_v7, %v1484_v16  ;;  %v1273_v25 = vadd.f32 %v2582_v8, %v1272_v19  ;;  %v2102_v26 = vpop.f32.mrf.mxu0  ;;  %v2166_v27 = vpop.f32.mrf.mxu1 }
 0x161   : > { %v1676_v23 = vsel %vm1420_vm15, %v1260_v9, %v1548_v17  ;;  %1740 = vst [vmem:[%s2411_s14 + $0x1a8] sm:$0xff] %v1612_v22  ;;  %v1617_v28 = vsel %vm1361_vm0, %v1025_v14, %v1489_v20  ;;  %v1028_v30 = vadd.f32 %v2582_v8, %v2102_v26  ;;  %v1284_v31 = vadd.f32 %v2582_v8, %v2166_v27 }
 0x162   : > { %1804 = vst [vmem:[%s2411_s14 + $0x3a8] sm:$0xff] %v1676_v23  ;;  %v1681_v29 = vsel %vm1425_vm1, %v1281_v15, %v1553_v21  ;;  %1745 = vst [vmem:[%s2411_s14 + $0x1d0] sm:$0xff] %v1617_v28  ;;  %vm1359_vm2 = vcmp.ge.f32.partialorder %v1017_v24, 0.0  ;;  %v1487_v32 = vmul.f32 0.01, %v1017_v24  ;;  %vm1423_vm3 = vcmp.ge.f32.partialorder %v1273_v25, 0.0  ;;  %v1019_v34 = vpop.f32.mrf.mxu0  ;;  %v1275_v35 = vpop.f32.mrf.mxu1 }
 0x163   : > { %1809 = vst [vmem:[%s2411_s14 + $0x3d0] sm:$0xff] %v1681_v29  ;;  %v1551_v33 = vmul.f32 0.01, %v1273_v25  ;;  %vm1362_vm4 = vcmp.ge.f32.partialorder %v1028_v30, 0.0  ;;  %v1490_v36 = vmul.f32 0.01, %v1028_v30  ;;  %v1020_v40 = vadd.f32 %v2582_v8, %v1019_v34 }
 0x164   : > { %vm1426_vm5 = vcmp.ge.f32.partialorder %v1284_v31, 0.0  ;;  %v1554_v37 = vmul.f32 0.01, %v1284_v31  ;;  %v1615_v38 = vsel %vm1359_vm2, %v1017_v24, %v1487_v32  ;;  %v1276_v41 = vadd.f32 %v2582_v8, %v1275_v35  ;;  %v2105_v42 = vpop.f32.mrf.mxu0  ;;  %v2169_v43 = vpop.f32.mrf.mxu1 }
 0x165   : > { %v1679_v39 = vsel %vm1423_vm3, %v1273_v25, %v1551_v33  ;;  %1743 = vst [vmem:[%s2411_s14 + $0x1c0] sm:$0xff] %v1615_v38  ;;  %v1618_v44 = vsel %vm1362_vm4, %v1028_v30, %v1490_v36  ;;  %v1041_v46 = vadd.f32 %v2582_v8, %v2105_v42  ;;  %v1297_v47 = vadd.f32 %v2582_v8, %v2169_v43 }
 0x166   : > { %1807 = vst [vmem:[%s2411_s14 + $0x3c0] sm:$0xff] %v1679_v39  ;;  %v1682_v45 = vsel %vm1426_vm5, %v1284_v31, %v1554_v37  ;;  %1746 = vst [vmem:[%s2411_s14 + $0x1d8] sm:$0xff] %v1618_v44  ;;  %vm1360_vm6 = vcmp.ge.f32.partialorder %v1020_v40, 0.0  ;;  %v1488_v48 = vmul.f32 0.01, %v1020_v40  ;;  %vm1424_vm7 = vcmp.ge.f32.partialorder %v1276_v41, 0.0  ;;  %v1032_v50 = vpop.f32.mrf.mxu0  ;;  %v1288_v51 = vpop.f32.mrf.mxu1 }
 0x167   : > { %1810 = vst [vmem:[%s2411_s14 + $0x3d8] sm:$0xff] %v1682_v45  ;;  %v1552_v49 = vmul.f32 0.01, %v1276_v41  ;;  %vm1365_vm8 = vcmp.ge.f32.partialorder %v1041_v46, 0.0  ;;  %v1493_v52 = vmul.f32 0.01, %v1041_v46  ;;  %v1033_v56 = vadd.f32 %v2582_v8, %v1032_v50 }
 0x168   : > { %vm1429_vm9 = vcmp.ge.f32.partialorder %v1297_v47, 0.0  ;;  %v1557_v53 = vmul.f32 0.01, %v1297_v47  ;;  %v1616_v54 = vsel %vm1360_vm6, %v1020_v40, %v1488_v48  ;;  %v1289_v57 = vadd.f32 %v2582_v8, %v1288_v51  ;;  %v2106_v58 = vpop.f32.mrf.mxu0  ;;  %v2170_v59 = vpop.f32.mrf.mxu1 }
 0x169   : > { %v1680_v55 = vsel %vm1424_vm7, %v1276_v41, %v1552_v49  ;;  %1744 = vst [vmem:[%s2411_s14 + $0x1c8] sm:$0xff] %v1616_v54  ;;  %v1621_v60 = vsel %vm1365_vm8, %v1041_v46, %v1493_v52  ;;  %v1044_v62 = vadd.f32 %v2582_v8, %v2106_v58  ;;  %v1300_v63 = vadd.f32 %v2582_v8, %v2170_v59 }
 0x16a   : > { %1808 = vst [vmem:[%s2411_s14 + $0x3c8] sm:$0xff] %v1680_v55  ;;  %v1685_v61 = vsel %vm1429_vm9, %v1297_v47, %v1557_v53  ;;  %1749 = vst [vmem:[%s2411_s14 + $0x1f0] sm:$0xff] %v1621_v60  ;;  %vm1363_vm10 = vcmp.ge.f32.partialorder %v1033_v56, 0.0  ;;  %v1491_v0 = vmul.f32 0.01, %v1033_v56  ;;  %vm1427_vm11 = vcmp.ge.f32.partialorder %v1289_v57, 0.0  ;;  %v1035_v2 = vpop.f32.mrf.mxu0  ;;  %v1291_v3 = vpop.f32.mrf.mxu1 }
 0x16b   : > { %1813 = vst [vmem:[%s2411_s14 + $0x3f0] sm:$0xff] %v1685_v61  ;;  %v1555_v1 = vmul.f32 0.01, %v1289_v57  ;;  %vm1366_vm12 = vcmp.ge.f32.partialorder %v1044_v62, 0.0  ;;  %v1494_v4 = vmul.f32 0.01, %v1044_v62  ;;  %v1036_v9 = vadd.f32 %v2582_v8, %v1035_v2 }
 0x16c   : > { %vm1430_vm13 = vcmp.ge.f32.partialorder %v1300_v63, 0.0  ;;  %v1558_v5 = vmul.f32 0.01, %v1300_v63  ;;  %v1619_v6 = vsel %vm1363_vm10, %v1033_v56, %v1491_v0  ;;  %v1292_v10 = vadd.f32 %v2582_v8, %v1291_v3 }
 0x16d   : > { %v1683_v7 = vsel %vm1427_vm11, %v1289_v57, %v1555_v1  ;;  %1747 = vst [vmem:[%s2411_s14 + $0x1e0] sm:$0xff] %v1619_v6  ;;  %v1622_v11 = vsel %vm1366_vm12, %v1044_v62, %v1494_v4  ;;  %vm1364_vm14 = vcmp.ge.f32.partialorder %v1036_v9, 0.0  ;;  %v1492_v13 = vmul.f32 0.01, %v1036_v9 }
 0x16e   : > { %1811 = vst [vmem:[%s2411_s14 + $0x3e0] sm:$0xff] %v1683_v7  ;;  %v1686_v12 = vsel %vm1430_vm13, %v1300_v63, %v1558_v5  ;;  %1750 = vst [vmem:[%s2411_s14 + $0x1f8] sm:$0xff] %v1622_v11  ;;  %vm1428_vm15 = vcmp.ge.f32.partialorder %v1292_v10, 0.0  ;;  %v1556_v14 = vmul.f32 0.01, %v1292_v10 }
 0x16f   : > { %1814 = vst [vmem:[%s2411_s14 + $0x3f8] sm:$0xff] %v1686_v12  ;;  %v1620_v15 = vsel %vm1364_vm14, %v1036_v9, %v1492_v13 }
 0x170   : > { %v1684_v16 = vsel %vm1428_vm15, %v1292_v10, %v1556_v14  ;;  %1748 = vst [vmem:[%s2411_s14 + $0x1e8] sm:$0xff] %v1620_v15 }
 0x171   : > { %1812 = vst [vmem:[%s2411_s14 + $0x3e8] sm:$0xff] %v1684_v16 }
 0x172 PF: > { %s13_s12 = sadd.s32 1, %s2274_s12  }
 0x173   : > { %p10_p4 = scmp.ge.s32.totalorder %s13_s12, 4  }
 0x175   :  { %12 = sbr.rel (!%p10_p4) target bundleno = 1 (0x1), region = 62 }

// kernel: vae_forward.12
= control target key start
LH: loop header
LB: loop body
LE: loop exit
PB: predicated region body
PF: predicated region fallthrough
CT: control target
= control target key end

     0   :  { %s1509_s1 = inlined_call_operand.vmem [shape: bf16[128,128], index: 1, kind: input, shape index: {}]   ;;  %s1510_s0 = inlined_call_operand.vmem [shape: bf16[512,128], index: 0, kind: input, shape index: {}]   ;;  %s1511_s2 = inlined_call_operand.vmem [shape: f32[1,128], index: 2, kind: input, shape index: {}]   ;;  %s1512_s3 = inlined_call_operand.vmem [shape: f32[512,128], index: 3, kind: output, shape index: {}]  }
   0x1   :  { %v1068_v0 = vld [vmem:[%s1509_s1 + $0x38] sm:$0xff]   ;;  %v1069_v1 = vld [vmem:[%s1509_s1 + $0x30] sm:$0xff]   ;;  %v1070_v2 = vld [vmem:[%s1509_s1 + $0x28] sm:$0xff]  }
   0x2   :  { %972 = vmatprep.subr.bf16.mxu0 %v1068_v0  ;;  %1052 = vmatprep.subr.bf16.mxu1 %v1068_v0  ;;  %v1071_v3 = vld [vmem:[%s1509_s1 + $0x20] sm:$0xff]   ;;  %v1072_v6 = vld [vmem:[%s1509_s1 + $0x18] sm:$0xff]   ;;  %v1073_v7 = vld [vmem:[%s1509_s1 + $0x10] sm:$0xff]  }
   0x3   :  { %973 = vmatpush3.bf16.msra.mxu0 %v1068_v0  ;;  %1060 = vmatpush3.bf16.msra.mxu1 %v1068_v0  ;;  %v1076_v4 = vld [vmem:[%s1510_s0] sm:$0xff]   ;;  %v1074_v8 = vld [vmem:[%s1509_s1 + $0x8] sm:$0xff]   ;;  %v1080_v12 = vld [vmem:[%s1510_s0 + $0x10] sm:$0xff]  }
   0x4   :  { %974 = vmatprep.subr.bf16.mxu0 %v1069_v1  ;;  %1053 = vmatprep.subr.bf16.mxu1 %v1069_v1  ;;  %v1077_v5 = vld [vmem:[%s1510_s0 + $0x80] sm:$0xff]   ;;  %v1078_v10 = vld [vmem:[%s1510_s0 + $0x8] sm:$0xff]   ;;  %v1081_v13 = vld [vmem:[%s1510_s0 + $0x90] sm:$0xff]  }
   0x5   :  { %988 = vmatprep.mubr.bf16.mxu0 %v1076_v4  ;;  %1020 = vmatprep.mubr.bf16.mxu1 %v1077_v5  ;;  %v1075_v9 = vld [vmem:[%s1509_s1] sm:$0xff]   ;;  %v1079_v11 = vld [vmem:[%s1510_s0 + $0x88] sm:$0xff]   ;;  %v1082_v14 = vld [vmem:[%s1510_s0 + $0x18] sm:$0xff]  }
   0x6   :  { %v1083_v15 = vld [vmem:[%s1510_s0 + $0x98] sm:$0xff]   ;;  %v1084_v16 = vld [vmem:[%s1510_s0 + $0x20] sm:$0xff]   ;;  %v1086_v18 = vld [vmem:[%s1510_s0 + $0x28] sm:$0xff]  }
   0x7   :  { %975 = vmatpush3.bf16.msra.mxu0 %v1069_v1  ;;  %1061 = vmatpush3.bf16.msra.mxu1 %v1069_v1  ;;  %v1085_v17 = vld [vmem:[%s1510_s0 + $0xa0] sm:$0xff]   ;;  %v1087_v19 = vld [vmem:[%s1510_s0 + $0xa8] sm:$0xff]   ;;  %v1088_v20 = vld [vmem:[%s1510_s0 + $0x30] sm:$0xff]  }
   0x8   :  { %976 = vmatprep.subr.bf16.mxu0 %v1070_v2  ;;  %1054 = vmatprep.subr.bf16.mxu1 %v1070_v2  ;;  %v1089_v21 = vld [vmem:[%s1510_s0 + $0xb0] sm:$0xff]   ;;  %v1090_v22 = vld [vmem:[%s1510_s0 + $0x38] sm:$0xff]   ;;  %v1092_v24 = vld [vmem:[%s1510_s0 + $0x40] sm:$0xff]  }
   0x9   :  { %v1091_v23 = vld [vmem:[%s1510_s0 + $0xb8] sm:$0xff]   ;;  %v1093_v25 = vld [vmem:[%s1510_s0 + $0xc0] sm:$0xff]   ;;  %v1094_v26 = vld [vmem:[%s1510_s0 + $0x48] sm:$0xff]  }
   0xa   :  { %v1095_v27 = vld [vmem:[%s1510_s0 + $0xc8] sm:$0xff]   ;;  %v1096_v28 = vld [vmem:[%s1510_s0 + $0x50] sm:$0xff]   ;;  %v1098_v30 = vld [vmem:[%s1510_s0 + $0x58] sm:$0xff]  }
   0xb   :  { %977 = vmatpush3.bf16.msra.mxu0 %v1070_v2  ;;  %1062 = vmatpush3.bf16.msra.mxu1 %v1070_v2  ;;  %v1097_v29 = vld [vmem:[%s1510_s0 + $0xd0] sm:$0xff]   ;;  %v1099_v31 = vld [vmem:[%s1510_s0 + $0xd8] sm:$0xff]   ;;  %v1100_v32 = vld [vmem:[%s1510_s0 + $0x60] sm:$0xff]  }
   0xc   :  { %978 = vmatprep.subr.bf16.mxu0 %v1071_v3  ;;  %1055 = vmatprep.subr.bf16.mxu1 %v1071_v3  ;;  %v1101_v33 = vld [vmem:[%s1510_s0 + $0xe0] sm:$0xff]   ;;  %v1102_v34 = vld [vmem:[%s1510_s0 + $0x68] sm:$0xff]   ;;  %v1104_v36 = vld [vmem:[%s1510_s0 + $0x70] sm:$0xff]  }
   0xd   :  { %v1103_v35 = vld [vmem:[%s1510_s0 + $0xe8] sm:$0xff]   ;;  %v1105_v37 = vld [vmem:[%s1510_s0 + $0xf0] sm:$0xff]   ;;  %v1106_v38 = vld [vmem:[%s1510_s0 + $0x78] sm:$0xff]  }
   0xe   :  { %v1107_v39 = vld [vmem:[%s1510_s0 + $0xf8] sm:$0xff]   ;;  %v1251_v40 = vld [vmem:[%s1511_s2] ss:$0 sm:$0xff] }
   0xf   :  { %979 = vmatpush3.bf16.msra.mxu0 %v1071_v3  ;;  %1063 = vmatpush3.bf16.msra.mxu1 %v1071_v3 }
  0x10   :  { %980 = vmatprep.subr.bf16.mxu0 %v1072_v6  ;;  %1056 = vmatprep.subr.bf16.mxu1 %v1072_v6 }
  0x13   :  { %981 = vmatpush3.bf16.msra.mxu0 %v1072_v6  ;;  %1064 = vmatpush3.bf16.msra.mxu1 %v1072_v6 }
  0x14   :  { %982 = vmatprep.subr.bf16.mxu0 %v1073_v7  ;;  %1057 = vmatprep.subr.bf16.mxu1 %v1073_v7 }
  0x17   :  { %983 = vmatpush3.bf16.msra.mxu0 %v1073_v7  ;;  %1065 = vmatpush3.bf16.msra.mxu1 %v1073_v7 }
  0x18   :  { %984 = vmatprep.subr.bf16.mxu0 %v1074_v8  ;;  %1058 = vmatprep.subr.bf16.mxu1 %v1074_v8 }
  0x1b   :  { %985 = vmatpush3.bf16.msra.mxu0 %v1074_v8  ;;  %1066 = vmatpush3.bf16.msra.mxu1 %v1074_v8 }
  0x1c   :  { %986 = vmatprep.subr.bf16.mxu0 %v1075_v9  ;;  %1059 = vmatprep.subr.bf16.mxu1 %v1075_v9 }
  0x1f   :  { %987 = vmatpush3.bf16.msra.mxu0 %v1075_v9  ;;  %1067 = vmatpush3.bf16.msra.mxu1 %v1075_v9 }
  0x22   :  { %989 = vmatmul.mubr.bf16.vlgmr.msra.gmra.mxu0 %v1078_v10  ;;  %1021 = vmatmul.mubr.bf16.vlgmr.msra.gmra.mxu1 %v1079_v11 }
  0x23   :  { %992 = vmatprep.mubr.bf16.mxu0 %v1080_v12  ;;  %1024 = vmatprep.mubr.bf16.mxu1 %v1081_v13 }
  0x2a   :  { %993 = vmatmul.mubr.bf16.gmra.mxu0 %v1082_v14  ;;  %1025 = vmatmul.mubr.bf16.gmra.mxu1 %v1083_v15 }
  0x2b   :  { %996 = vmatprep.mubr.bf16.mxu0 %v1084_v16  ;;  %1028 = vmatprep.mubr.bf16.mxu1 %v1085_v17 }
  0x32   :  { %997 = vmatmul.mubr.bf16.gmra.mxu0 %v1086_v18  ;;  %1029 = vmatmul.mubr.bf16.gmra.mxu1 %v1087_v19 }
  0x33   :  { %1000 = vmatprep.mubr.bf16.mxu0 %v1088_v20  ;;  %1032 = vmatprep.mubr.bf16.mxu1 %v1089_v21 }
  0x3a   :  { %1001 = vmatmul.mubr.bf16.gmra.mxu0 %v1090_v22  ;;  %1033 = vmatmul.mubr.bf16.gmra.mxu1 %v1091_v23 }
  0x3b   :  { %1004 = vmatprep.mubr.bf16.mxu0 %v1092_v24  ;;  %1036 = vmatprep.mubr.bf16.mxu1 %v1093_v25 }
  0x42   :  { %1005 = vmatmul.mubr.bf16.gmra.mxu0 %v1094_v26  ;;  %1037 = vmatmul.mubr.bf16.gmra.mxu1 %v1095_v27 }
  0x43   :  { %1008 = vmatprep.mubr.bf16.mxu0 %v1096_v28  ;;  %1040 = vmatprep.mubr.bf16.mxu1 %v1097_v29 }
  0x4a   :  { %1009 = vmatmul.mubr.bf16.gmra.mxu0 %v1098_v30  ;;  %1041 = vmatmul.mubr.bf16.gmra.mxu1 %v1099_v31 }
  0x4b   :  { %1012 = vmatprep.mubr.bf16.mxu0 %v1100_v32  ;;  %1044 = vmatprep.mubr.bf16.mxu1 %v1101_v33 }
  0x52   :  { %1013 = vmatmul.mubr.bf16.gmra.mxu0 %v1102_v34  ;;  %1045 = vmatmul.mubr.bf16.gmra.mxu1 %v1103_v35 }
  0x53   :  { %1016 = vmatprep.mubr.bf16.mxu0 %v1104_v36  ;;  %1048 = vmatprep.mubr.bf16.mxu1 %v1105_v37 }
  0x5a   :  { %1017 = vmatmul.mubr.bf16.gmra.mxu0 %v1106_v38  ;;  %1049 = vmatmul.mubr.bf16.gmra.mxu1 %v1107_v39 }
  0xe2   :  { %v990_v41 = vpop.f32.mrf.mxu0  ;;  %v1022_v42 = vpop.f32.mrf.mxu1 }
  0xe3   :  { %v385_v43 = vadd.f32 %v990_v41, %v1251_v40  ;;  %v513_v44 = vadd.f32 %v1022_v42, %v1251_v40 }
  0xe4   :  { %v376_v45 = vpop.f32.mrf.mxu0  ;;  %v504_v46 = vpop.f32.mrf.mxu1 }
  0xe5   :  { %vm633_vm0 = vcmp.ge.f32.partialorder %v385_v43, 0.0  ;;  %v697_v47 = vmul.f32 0.01, %v385_v43  ;;  %vm665_vm1 = vcmp.ge.f32.partialorder %v513_v44, 0.0  ;;  %v729_v48 = vmul.f32 0.01, %v513_v44 }
  0xe6   :  { %v377_v49 = vadd.f32 %v1251_v40, %v376_v45  ;;  %v505_v50 = vadd.f32 %v1251_v40, %v504_v46  ;;  %v991_v51 = vpop.f32.mrf.mxu0  ;;  %v1023_v52 = vpop.f32.mrf.mxu1 }
  0xe7   :  { %v761_v53 = vsel %vm633_vm0, %v385_v43, %v697_v47  ;;  %v793_v54 = vsel %vm665_vm1, %v513_v44, %v729_v48  ;;  %v388_v55 = vadd.f32 %v991_v51, %v1251_v40  ;;  %v516_v56 = vadd.f32 %v1023_v52, %v1251_v40 }
  0xe8   :  { %825 = vst [vmem:[%s1512_s3 + $0x10] sm:$0xff] %v761_v53  ;;  %857 = vst [vmem:[%s1512_s3 + $0x110] sm:$0xff] %v793_v54  ;;  %vm631_vm2 = vcmp.ge.f32.partialorder %v377_v49, 0.0  ;;  %v695_v57 = vmul.f32 0.01, %v377_v49  ;;  %vm663_vm3 = vcmp.ge.f32.partialorder %v505_v50, 0.0  ;;  %v379_v59 = vpop.f32.mrf.mxu0  ;;  %v507_v60 = vpop.f32.mrf.mxu1 }
  0xe9   :  { %v727_v58 = vmul.f32 0.01, %v505_v50  ;;  %vm634_vm4 = vcmp.ge.f32.partialorder %v388_v55, 0.0  ;;  %v698_v61 = vmul.f32 0.01, %v388_v55  ;;  %vm666_vm5 = vcmp.ge.f32.partialorder %v516_v56, 0.0 }
  0xea   :  { %v730_v62 = vmul.f32 0.01, %v516_v56  ;;  %v759_v63 = vsel %vm631_vm2, %v377_v49, %v695_v57  ;;  %v380_v1 = vadd.f32 %v1251_v40, %v379_v59  ;;  %v508_v2 = vadd.f32 %v1251_v40, %v507_v60  ;;  %v994_v3 = vpop.f32.mrf.mxu0  ;;  %v1026_v4 = vpop.f32.mrf.mxu1 }
  0xeb   :  { %v791_v0 = vsel %vm663_vm3, %v505_v50, %v727_v58  ;;  %823 = vst [vmem:[%s1512_s3] sm:$0xff] %v759_v63  ;;  %v762_v5 = vsel %vm634_vm4, %v388_v55, %v698_v61  ;;  %v401_v7 = vadd.f32 %v994_v3, %v1251_v40  ;;  %v529_v8 = vadd.f32 %v1026_v4, %v1251_v40 }
  0xec   :  { %855 = vst [vmem:[%s1512_s3 + $0x100] sm:$0xff] %v791_v0  ;;  %v794_v6 = vsel %vm666_vm5, %v516_v56, %v730_v62  ;;  %826 = vst [vmem:[%s1512_s3 + $0x18] sm:$0xff] %v762_v5  ;;  %vm632_vm6 = vcmp.ge.f32.partialorder %v380_v1, 0.0  ;;  %v696_v9 = vmul.f32 0.01, %v380_v1  ;;  %vm664_vm7 = vcmp.ge.f32.partialorder %v508_v2, 0.0  ;;  %v392_v11 = vpop.f32.mrf.mxu0  ;;  %v520_v12 = vpop.f32.mrf.mxu1 }
  0xed   :  { %858 = vst [vmem:[%s1512_s3 + $0x118] sm:$0xff] %v794_v6  ;;  %v728_v10 = vmul.f32 0.01, %v508_v2  ;;  %vm637_vm8 = vcmp.ge.f32.partialorder %v401_v7, 0.0  ;;  %v701_v13 = vmul.f32 0.01, %v401_v7  ;;  %v393_v17 = vadd.f32 %v1251_v40, %v392_v11 }
  0xee   :  { %vm669_vm9 = vcmp.ge.f32.partialorder %v529_v8, 0.0  ;;  %v733_v14 = vmul.f32 0.01, %v529_v8  ;;  %v760_v15 = vsel %vm632_vm6, %v380_v1, %v696_v9  ;;  %v521_v18 = vadd.f32 %v1251_v40, %v520_v12  ;;  %v995_v19 = vpop.f32.mrf.mxu0  ;;  %v1027_v20 = vpop.f32.mrf.mxu1 }
  0xef   :  { %v792_v16 = vsel %vm664_vm7, %v508_v2, %v728_v10  ;;  %824 = vst [vmem:[%s1512_s3 + $0x8] sm:$0xff] %v760_v15  ;;  %v765_v21 = vsel %vm637_vm8, %v401_v7, %v701_v13  ;;  %v404_v23 = vadd.f32 %v995_v19, %v1251_v40  ;;  %v532_v24 = vadd.f32 %v1027_v20, %v1251_v40 }
  0xf0   :  { %856 = vst [vmem:[%s1512_s3 + $0x108] sm:$0xff] %v792_v16  ;;  %v797_v22 = vsel %vm669_vm9, %v529_v8, %v733_v14  ;;  %829 = vst [vmem:[%s1512_s3 + $0x30] sm:$0xff] %v765_v21  ;;  %vm635_vm10 = vcmp.ge.f32.partialorder %v393_v17, 0.0  ;;  %v699_v25 = vmul.f32 0.01, %v393_v17  ;;  %vm667_vm11 = vcmp.ge.f32.partialorder %v521_v18, 0.0  ;;  %v395_v27 = vpop.f32.mrf.mxu0  ;;  %v523_v28 = vpop.f32.mrf.mxu1 }
  0xf1   :  { %861 = vst [vmem:[%s1512_s3 + $0x130] sm:$0xff] %v797_v22  ;;  %v731_v26 = vmul.f32 0.01, %v521_v18  ;;  %vm638_vm12 = vcmp.ge.f32.partialorder %v404_v23, 0.0  ;;  %v702_v29 = vmul.f32 0.01, %v404_v23  ;;  %v396_v33 = vadd.f32 %v1251_v40, %v395_v27 }
  0xf2   :  { %vm670_vm13 = vcmp.ge.f32.partialorder %v532_v24, 0.0  ;;  %v734_v30 = vmul.f32 0.01, %v532_v24  ;;  %v763_v31 = vsel %vm635_vm10, %v393_v17, %v699_v25  ;;  %v524_v34 = vadd.f32 %v1251_v40, %v523_v28  ;;  %v998_v35 = vpop.f32.mrf.mxu0  ;;  %v1030_v36 = vpop.f32.mrf.mxu1 }
  0xf3   :  { %v795_v32 = vsel %vm667_vm11, %v521_v18, %v731_v26  ;;  %827 = vst [vmem:[%s1512_s3 + $0x20] sm:$0xff] %v763_v31  ;;  %v766_v37 = vsel %vm638_vm12, %v404_v23, %v702_v29  ;;  %v417_v39 = vadd.f32 %v998_v35, %v1251_v40  ;;  %v545_v41 = vadd.f32 %v1030_v36, %v1251_v40 }
  0xf4   :  { %859 = vst [vmem:[%s1512_s3 + $0x120] sm:$0xff] %v795_v32  ;;  %v798_v38 = vsel %vm670_vm13, %v532_v24, %v734_v30  ;;  %830 = vst [vmem:[%s1512_s3 + $0x38] sm:$0xff] %v766_v37  ;;  %vm636_vm14 = vcmp.ge.f32.partialorder %v396_v33, 0.0  ;;  %v700_v42 = vmul.f32 0.01, %v396_v33  ;;  %vm668_vm15 = vcmp.ge.f32.partialorder %v524_v34, 0.0  ;;  %v408_v44 = vpop.f32.mrf.mxu0  ;;  %v536_v45 = vpop.f32.mrf.mxu1 }
  0xf5   :  { %862 = vst [vmem:[%s1512_s3 + $0x138] sm:$0xff] %v798_v38  ;;  %v732_v43 = vmul.f32 0.01, %v524_v34  ;;  %vm641_vm0 = vcmp.ge.f32.partialorder %v417_v39, 0.0  ;;  %v705_v46 = vmul.f32 0.01, %v417_v39  ;;  %v409_v50 = vadd.f32 %v1251_v40, %v408_v44 }
  0xf6   :  { %vm673_vm1 = vcmp.ge.f32.partialorder %v545_v41, 0.0  ;;  %v737_v47 = vmul.f32 0.01, %v545_v41  ;;  %v764_v48 = vsel %vm636_vm14, %v396_v33, %v700_v42  ;;  %v537_v51 = vadd.f32 %v1251_v40, %v536_v45  ;;  %v999_v52 = vpop.f32.mrf.mxu0  ;;  %v1031_v53 = vpop.f32.mrf.mxu1 }
  0xf7   :  { %v796_v49 = vsel %vm668_vm15, %v524_v34, %v732_v43  ;;  %828 = vst [vmem:[%s1512_s3 + $0x28] sm:$0xff] %v764_v48  ;;  %v769_v54 = vsel %vm641_vm0, %v417_v39, %v705_v46  ;;  %v420_v56 = vadd.f32 %v999_v52, %v1251_v40  ;;  %v548_v57 = vadd.f32 %v1031_v53, %v1251_v40 }
  0xf8   :  { %860 = vst [vmem:[%s1512_s3 + $0x128] sm:$0xff] %v796_v49  ;;  %v801_v55 = vsel %vm673_vm1, %v545_v41, %v737_v47  ;;  %833 = vst [vmem:[%s1512_s3 + $0x50] sm:$0xff] %v769_v54  ;;  %vm639_vm2 = vcmp.ge.f32.partialorder %v409_v50, 0.0  ;;  %v703_v58 = vmul.f32 0.01, %v409_v50  ;;  %vm671_vm3 = vcmp.ge.f32.partialorder %v537_v51, 0.0  ;;  %v411_v60 = vpop.f32.mrf.mxu0  ;;  %v539_v61 = vpop.f32.mrf.mxu1 }
  0xf9   :  { %865 = vst [vmem:[%s1512_s3 + $0x150] sm:$0xff] %v801_v55  ;;  %v735_v59 = vmul.f32 0.01, %v537_v51  ;;  %vm642_vm4 = vcmp.ge.f32.partialorder %v420_v56, 0.0  ;;  %v706_v62 = vmul.f32 0.01, %v420_v56  ;;  %v412_v2 = vadd.f32 %v1251_v40, %v411_v60 }
  0xfa   :  { %vm674_vm5 = vcmp.ge.f32.partialorder %v548_v57, 0.0  ;;  %v738_v63 = vmul.f32 0.01, %v548_v57  ;;  %v767_v0 = vsel %vm639_vm2, %v409_v50, %v703_v58  ;;  %v540_v3 = vadd.f32 %v1251_v40, %v539_v61  ;;  %v1002_v4 = vpop.f32.mrf.mxu0  ;;  %v1034_v5 = vpop.f32.mrf.mxu1 }
  0xfb   :  { %v799_v1 = vsel %vm671_vm3, %v537_v51, %v735_v59  ;;  %831 = vst [vmem:[%s1512_s3 + $0x40] sm:$0xff] %v767_v0  ;;  %v770_v6 = vsel %vm642_vm4, %v420_v56, %v706_v62  ;;  %v433_v8 = vadd.f32 %v1002_v4, %v1251_v40  ;;  %v561_v9 = vadd.f32 %v1034_v5, %v1251_v40 }
  0xfc   :  { %863 = vst [vmem:[%s1512_s3 + $0x140] sm:$0xff] %v799_v1  ;;  %v802_v7 = vsel %vm674_vm5, %v548_v57, %v738_v63  ;;  %834 = vst [vmem:[%s1512_s3 + $0x58] sm:$0xff] %v770_v6  ;;  %vm640_vm6 = vcmp.ge.f32.partialorder %v412_v2, 0.0  ;;  %v704_v10 = vmul.f32 0.01, %v412_v2  ;;  %vm672_vm7 = vcmp.ge.f32.partialorder %v540_v3, 0.0  ;;  %v424_v12 = vpop.f32.mrf.mxu0  ;;  %v552_v13 = vpop.f32.mrf.mxu1 }
  0xfd   :  { %866 = vst [vmem:[%s1512_s3 + $0x158] sm:$0xff] %v802_v7  ;;  %v736_v11 = vmul.f32 0.01, %v540_v3  ;;  %vm645_vm8 = vcmp.ge.f32.partialorder %v433_v8, 0.0  ;;  %v709_v14 = vmul.f32 0.01, %v433_v8  ;;  %v425_v18 = vadd.f32 %v1251_v40, %v424_v12 }
  0xfe   :  { %vm677_vm9 = vcmp.ge.f32.partialorder %v561_v9, 0.0  ;;  %v741_v15 = vmul.f32 0.01, %v561_v9  ;;  %v768_v16 = vsel %vm640_vm6, %v412_v2, %v704_v10  ;;  %v553_v19 = vadd.f32 %v1251_v40, %v552_v13  ;;  %v1003_v20 = vpop.f32.mrf.mxu0  ;;  %v1035_v21 = vpop.f32.mrf.mxu1 }
  0xff   :  { %v800_v17 = vsel %vm672_vm7, %v540_v3, %v736_v11  ;;  %832 = vst [vmem:[%s1512_s3 + $0x48] sm:$0xff] %v768_v16  ;;  %v773_v22 = vsel %vm645_vm8, %v433_v8, %v709_v14  ;;  %v436_v24 = vadd.f32 %v1003_v20, %v1251_v40  ;;  %v564_v25 = vadd.f32 %v1035_v21, %v1251_v40 }
 0x100   :  { %864 = vst [vmem:[%s1512_s3 + $0x148] sm:$0xff] %v800_v17  ;;  %v805_v23 = vsel %vm677_vm9, %v561_v9, %v741_v15  ;;  %837 = vst [vmem:[%s1512_s3 + $0x70] sm:$0xff] %v773_v22  ;;  %vm643_vm10 = vcmp.ge.f32.partialorder %v425_v18, 0.0  ;;  %v707_v26 = vmul.f32 0.01, %v425_v18  ;;  %vm675_vm11 = vcmp.ge.f32.partialorder %v553_v19, 0.0  ;;  %v427_v28 = vpop.f32.mrf.mxu0  ;;  %v555_v29 = vpop.f32.mrf.mxu1 }
 0x101   :  { %869 = vst [vmem:[%s1512_s3 + $0x170] sm:$0xff] %v805_v23  ;;  %v739_v27 = vmul.f32 0.01, %v553_v19  ;;  %vm646_vm12 = vcmp.ge.f32.partialorder %v436_v24, 0.0  ;;  %v710_v30 = vmul.f32 0.01, %v436_v24  ;;  %v428_v34 = vadd.f32 %v1251_v40, %v427_v28 }
 0x102   :  { %vm678_vm13 = vcmp.ge.f32.partialorder %v564_v25, 0.0  ;;  %v742_v31 = vmul.f32 0.01, %v564_v25  ;;  %v771_v32 = vsel %vm643_vm10, %v425_v18, %v707_v26  ;;  %v556_v35 = vadd.f32 %v1251_v40, %v555_v29  ;;  %v1006_v36 = vpop.f32.mrf.mxu0  ;;  %v1038_v37 = vpop.f32.mrf.mxu1 }
 0x103   :  { %v803_v33 = vsel %vm675_vm11, %v553_v19, %v739_v27  ;;  %835 = vst [vmem:[%s1512_s3 + $0x60] sm:$0xff] %v771_v32  ;;  %v774_v38 = vsel %vm646_vm12, %v436_v24, %v710_v30  ;;  %v449_v41 = vadd.f32 %v1006_v36, %v1251_v40  ;;  %v577_v42 = vadd.f32 %v1038_v37, %v1251_v40 }
 0x104   :  { %867 = vst [vmem:[%s1512_s3 + $0x160] sm:$0xff] %v803_v33  ;;  %v806_v39 = vsel %vm678_vm13, %v564_v25, %v742_v31  ;;  %838 = vst [vmem:[%s1512_s3 + $0x78] sm:$0xff] %v774_v38  ;;  %vm644_vm14 = vcmp.ge.f32.partialorder %v428_v34, 0.0  ;;  %v708_v43 = vmul.f32 0.01, %v428_v34  ;;  %vm676_vm15 = vcmp.ge.f32.partialorder %v556_v35, 0.0  ;;  %v440_v45 = vpop.f32.mrf.mxu0  ;;  %v568_v46 = vpop.f32.mrf.mxu1 }
 0x105   :  { %870 = vst [vmem:[%s1512_s3 + $0x178] sm:$0xff] %v806_v39  ;;  %v740_v44 = vmul.f32 0.01, %v556_v35  ;;  %vm649_vm0 = vcmp.ge.f32.partialorder %v449_v41, 0.0  ;;  %v713_v47 = vmul.f32 0.01, %v449_v41  ;;  %v441_v51 = vadd.f32 %v1251_v40, %v440_v45 }
 0x106   :  { %vm681_vm1 = vcmp.ge.f32.partialorder %v577_v42, 0.0  ;;  %v745_v48 = vmul.f32 0.01, %v577_v42  ;;  %v772_v49 = vsel %vm644_vm14, %v428_v34, %v708_v43  ;;  %v569_v52 = vadd.f32 %v1251_v40, %v568_v46  ;;  %v1007_v53 = vpop.f32.mrf.mxu0  ;;  %v1039_v54 = vpop.f32.mrf.mxu1 }
 0x107   :  { %v804_v50 = vsel %vm676_vm15, %v556_v35, %v740_v44  ;;  %836 = vst [vmem:[%s1512_s3 + $0x68] sm:$0xff] %v772_v49  ;;  %v777_v55 = vsel %vm649_vm0, %v449_v41, %v713_v47  ;;  %v452_v57 = vadd.f32 %v1007_v53, %v1251_v40  ;;  %v580_v58 = vadd.f32 %v1039_v54, %v1251_v40 }
 0x108   :  { %868 = vst [vmem:[%s1512_s3 + $0x168] sm:$0xff] %v804_v50  ;;  %v809_v56 = vsel %vm681_vm1, %v577_v42, %v745_v48  ;;  %841 = vst [vmem:[%s1512_s3 + $0x90] sm:$0xff] %v777_v55  ;;  %vm647_vm2 = vcmp.ge.f32.partialorder %v441_v51, 0.0  ;;  %v711_v59 = vmul.f32 0.01, %v441_v51  ;;  %vm679_vm3 = vcmp.ge.f32.partialorder %v569_v52, 0.0  ;;  %v443_v61 = vpop.f32.mrf.mxu0  ;;  %v571_v62 = vpop.f32.mrf.mxu1 }
 0x109   :  { %873 = vst [vmem:[%s1512_s3 + $0x190] sm:$0xff] %v809_v56  ;;  %v743_v60 = vmul.f32 0.01, %v569_v52  ;;  %vm650_vm4 = vcmp.ge.f32.partialorder %v452_v57, 0.0  ;;  %v714_v63 = vmul.f32 0.01, %v452_v57  ;;  %v444_v3 = vadd.f32 %v1251_v40, %v443_v61 }
 0x10a   :  { %vm682_vm5 = vcmp.ge.f32.partialorder %v580_v58, 0.0  ;;  %v746_v0 = vmul.f32 0.01, %v580_v58  ;;  %v775_v1 = vsel %vm647_vm2, %v441_v51, %v711_v59  ;;  %v572_v4 = vadd.f32 %v1251_v40, %v571_v62  ;;  %v1010_v5 = vpop.f32.mrf.mxu0  ;;  %v1042_v6 = vpop.f32.mrf.mxu1 }
 0x10b   :  { %v807_v2 = vsel %vm679_vm3, %v569_v52, %v743_v60  ;;  %839 = vst [vmem:[%s1512_s3 + $0x80] sm:$0xff] %v775_v1  ;;  %v778_v7 = vsel %vm650_vm4, %v452_v57, %v714_v63  ;;  %v465_v9 = vadd.f32 %v1010_v5, %v1251_v40  ;;  %v593_v10 = vadd.f32 %v1042_v6, %v1251_v40 }
 0x10c   :  { %871 = vst [vmem:[%s1512_s3 + $0x180] sm:$0xff] %v807_v2  ;;  %v810_v8 = vsel %vm682_vm5, %v580_v58, %v746_v0  ;;  %842 = vst [vmem:[%s1512_s3 + $0x98] sm:$0xff] %v778_v7  ;;  %vm648_vm6 = vcmp.ge.f32.partialorder %v444_v3, 0.0  ;;  %v712_v11 = vmul.f32 0.01, %v444_v3  ;;  %vm680_vm7 = vcmp.ge.f32.partialorder %v572_v4, 0.0  ;;  %v456_v13 = vpop.f32.mrf.mxu0  ;;  %v584_v14 = vpop.f32.mrf.mxu1 }
 0x10d   :  { %874 = vst [vmem:[%s1512_s3 + $0x198] sm:$0xff] %v810_v8  ;;  %v744_v12 = vmul.f32 0.01, %v572_v4  ;;  %vm653_vm8 = vcmp.ge.f32.partialorder %v465_v9, 0.0  ;;  %v717_v15 = vmul.f32 0.01, %v465_v9  ;;  %v457_v19 = vadd.f32 %v1251_v40, %v456_v13 }
 0x10e   :  { %vm685_vm9 = vcmp.ge.f32.partialorder %v593_v10, 0.0  ;;  %v749_v16 = vmul.f32 0.01, %v593_v10  ;;  %v776_v17 = vsel %vm648_vm6, %v444_v3, %v712_v11  ;;  %v585_v20 = vadd.f32 %v1251_v40, %v584_v14  ;;  %v1011_v21 = vpop.f32.mrf.mxu0  ;;  %v1043_v22 = vpop.f32.mrf.mxu1 }
 0x10f   :  { %v808_v18 = vsel %vm680_vm7, %v572_v4, %v744_v12  ;;  %840 = vst [vmem:[%s1512_s3 + $0x88] sm:$0xff] %v776_v17  ;;  %v781_v23 = vsel %vm653_vm8, %v465_v9, %v717_v15  ;;  %v468_v25 = vadd.f32 %v1011_v21, %v1251_v40  ;;  %v596_v26 = vadd.f32 %v1043_v22, %v1251_v40 }
 0x110   :  { %872 = vst [vmem:[%s1512_s3 + $0x188] sm:$0xff] %v808_v18  ;;  %v813_v24 = vsel %vm685_vm9, %v593_v10, %v749_v16  ;;  %845 = vst [vmem:[%s1512_s3 + $0xb0] sm:$0xff] %v781_v23  ;;  %vm651_vm10 = vcmp.ge.f32.partialorder %v457_v19, 0.0  ;;  %v715_v27 = vmul.f32 0.01, %v457_v19  ;;  %vm683_vm11 = vcmp.ge.f32.partialorder %v585_v20, 0.0  ;;  %v459_v29 = vpop.f32.mrf.mxu0  ;;  %v587_v30 = vpop.f32.mrf.mxu1 }
 0x111   :  { %877 = vst [vmem:[%s1512_s3 + $0x1b0] sm:$0xff] %v813_v24  ;;  %v747_v28 = vmul.f32 0.01, %v585_v20  ;;  %vm654_vm12 = vcmp.ge.f32.partialorder %v468_v25, 0.0  ;;  %v718_v31 = vmul.f32 0.01, %v468_v25  ;;  %v460_v35 = vadd.f32 %v1251_v40, %v459_v29 }
 0x112   :  { %vm686_vm13 = vcmp.ge.f32.partialorder %v596_v26, 0.0  ;;  %v750_v32 = vmul.f32 0.01, %v596_v26  ;;  %v779_v33 = vsel %vm651_vm10, %v457_v19, %v715_v27  ;;  %v588_v36 = vadd.f32 %v1251_v40, %v587_v30  ;;  %v1014_v37 = vpop.f32.mrf.mxu0  ;;  %v1046_v38 = vpop.f32.mrf.mxu1 }
 0x113   :  { %v811_v34 = vsel %vm683_vm11, %v585_v20, %v747_v28  ;;  %843 = vst [vmem:[%s1512_s3 + $0xa0] sm:$0xff] %v779_v33  ;;  %v782_v39 = vsel %vm654_vm12, %v468_v25, %v718_v31  ;;  %v481_v42 = vadd.f32 %v1014_v37, %v1251_v40  ;;  %v609_v43 = vadd.f32 %v1046_v38, %v1251_v40 }
 0x114   :  { %875 = vst [vmem:[%s1512_s3 + $0x1a0] sm:$0xff] %v811_v34  ;;  %v814_v41 = vsel %vm686_vm13, %v596_v26, %v750_v32  ;;  %846 = vst [vmem:[%s1512_s3 + $0xb8] sm:$0xff] %v782_v39  ;;  %vm652_vm14 = vcmp.ge.f32.partialorder %v460_v35, 0.0  ;;  %v716_v44 = vmul.f32 0.01, %v460_v35  ;;  %vm684_vm15 = vcmp.ge.f32.partialorder %v588_v36, 0.0  ;;  %v472_v46 = vpop.f32.mrf.mxu0  ;;  %v600_v47 = vpop.f32.mrf.mxu1 }
 0x115   :  { %878 = vst [vmem:[%s1512_s3 + $0x1b8] sm:$0xff] %v814_v41  ;;  %v748_v45 = vmul.f32 0.01, %v588_v36  ;;  %vm657_vm0 = vcmp.ge.f32.partialorder %v481_v42, 0.0  ;;  %v721_v48 = vmul.f32 0.01, %v481_v42  ;;  %v473_v52 = vadd.f32 %v1251_v40, %v472_v46 }
 0x116   :  { %vm689_vm1 = vcmp.ge.f32.partialorder %v609_v43, 0.0  ;;  %v753_v49 = vmul.f32 0.01, %v609_v43  ;;  %v780_v50 = vsel %vm652_vm14, %v460_v35, %v716_v44  ;;  %v601_v53 = vadd.f32 %v1251_v40, %v600_v47  ;;  %v1015_v54 = vpop.f32.mrf.mxu0  ;;  %v1047_v55 = vpop.f32.mrf.mxu1 }
 0x117   :  { %v812_v51 = vsel %vm684_vm15, %v588_v36, %v748_v45  ;;  %844 = vst [vmem:[%s1512_s3 + $0xa8] sm:$0xff] %v780_v50  ;;  %v785_v56 = vsel %vm657_vm0, %v481_v42, %v721_v48  ;;  %v484_v58 = vadd.f32 %v1015_v54, %v1251_v40  ;;  %v612_v59 = vadd.f32 %v1047_v55, %v1251_v40 }
 0x118   :  { %876 = vst [vmem:[%s1512_s3 + $0x1a8] sm:$0xff] %v812_v51  ;;  %v817_v57 = vsel %vm689_vm1, %v609_v43, %v753_v49  ;;  %849 = vst [vmem:[%s1512_s3 + $0xd0] sm:$0xff] %v785_v56  ;;  %vm655_vm2 = vcmp.ge.f32.partialorder %v473_v52, 0.0  ;;  %v719_v60 = vmul.f32 0.01, %v473_v52  ;;  %vm687_vm3 = vcmp.ge.f32.partialorder %v601_v53, 0.0  ;;  %v475_v62 = vpop.f32.mrf.mxu0  ;;  %v603_v63 = vpop.f32.mrf.mxu1 }
 0x119   :  { %881 = vst [vmem:[%s1512_s3 + $0x1d0] sm:$0xff] %v817_v57  ;;  %v751_v61 = vmul.f32 0.01, %v601_v53  ;;  %vm658_vm4 = vcmp.ge.f32.partialorder %v484_v58, 0.0  ;;  %v722_v0 = vmul.f32 0.01, %v484_v58  ;;  %v476_v4 = vadd.f32 %v1251_v40, %v475_v62 }
 0x11a   :  { %vm690_vm5 = vcmp.ge.f32.partialorder %v612_v59, 0.0  ;;  %v754_v1 = vmul.f32 0.01, %v612_v59  ;;  %v783_v2 = vsel %vm655_vm2, %v473_v52, %v719_v60  ;;  %v604_v5 = vadd.f32 %v1251_v40, %v603_v63  ;;  %v1018_v6 = vpop.f32.mrf.mxu0  ;;  %v1050_v7 = vpop.f32.mrf.mxu1 }
 0x11b   :  { %v815_v3 = vsel %vm687_vm3, %v601_v53, %v751_v61  ;;  %847 = vst [vmem:[%s1512_s3 + $0xc0] sm:$0xff] %v783_v2  ;;  %v786_v8 = vsel %vm658_vm4, %v484_v58, %v722_v0  ;;  %v497_v10 = vadd.f32 %v1018_v6, %v1251_v40  ;;  %v625_v11 = vadd.f32 %v1050_v7, %v1251_v40 }
 0x11c   :  { %879 = vst [vmem:[%s1512_s3 + $0x1c0] sm:$0xff] %v815_v3  ;;  %v818_v9 = vsel %vm690_vm5, %v612_v59, %v754_v1  ;;  %850 = vst [vmem:[%s1512_s3 + $0xd8] sm:$0xff] %v786_v8  ;;  %vm656_vm6 = vcmp.ge.f32.partialorder %v476_v4, 0.0  ;;  %v720_v12 = vmul.f32 0.01, %v476_v4  ;;  %vm688_vm7 = vcmp.ge.f32.partialorder %v604_v5, 0.0  ;;  %v488_v14 = vpop.f32.mrf.mxu0  ;;  %v616_v15 = vpop.f32.mrf.mxu1 }
 0x11d   :  { %882 = vst [vmem:[%s1512_s3 + $0x1d8] sm:$0xff] %v818_v9  ;;  %v752_v13 = vmul.f32 0.01, %v604_v5  ;;  %vm661_vm8 = vcmp.ge.f32.partialorder %v497_v10, 0.0  ;;  %v725_v16 = vmul.f32 0.01, %v497_v10  ;;  %v489_v20 = vadd.f32 %v1251_v40, %v488_v14 }
 0x11e   :  { %vm693_vm9 = vcmp.ge.f32.partialorder %v625_v11, 0.0  ;;  %v757_v17 = vmul.f32 0.01, %v625_v11  ;;  %v784_v18 = vsel %vm656_vm6, %v476_v4, %v720_v12  ;;  %v617_v21 = vadd.f32 %v1251_v40, %v616_v15  ;;  %v1019_v22 = vpop.f32.mrf.mxu0  ;;  %v1051_v23 = vpop.f32.mrf.mxu1 }
 0x11f   :  { %v816_v19 = vsel %vm688_vm7, %v604_v5, %v752_v13  ;;  %848 = vst [vmem:[%s1512_s3 + $0xc8] sm:$0xff] %v784_v18  ;;  %v789_v24 = vsel %vm661_vm8, %v497_v10, %v725_v16  ;;  %v500_v26 = vadd.f32 %v1019_v22, %v1251_v40  ;;  %v628_v27 = vadd.f32 %v1051_v23, %v1251_v40 }
 0x120   :  { %880 = vst [vmem:[%s1512_s3 + $0x1c8] sm:$0xff] %v816_v19  ;;  %v821_v25 = vsel %vm693_vm9, %v625_v11, %v757_v17  ;;  %853 = vst [vmem:[%s1512_s3 + $0xf0] sm:$0xff] %v789_v24  ;;  %vm659_vm10 = vcmp.ge.f32.partialorder %v489_v20, 0.0  ;;  %v723_v28 = vmul.f32 0.01, %v489_v20  ;;  %vm691_vm11 = vcmp.ge.f32.partialorder %v617_v21, 0.0  ;;  %v491_v30 = vpop.f32.mrf.mxu0  ;;  %v619_v31 = vpop.f32.mrf.mxu1 }
 0x121   :  { %885 = vst [vmem:[%s1512_s3 + $0x1f0] sm:$0xff] %v821_v25  ;;  %v755_v29 = vmul.f32 0.01, %v617_v21  ;;  %vm662_vm12 = vcmp.ge.f32.partialorder %v500_v26, 0.0  ;;  %v726_v32 = vmul.f32 0.01, %v500_v26  ;;  %v492_v36 = vadd.f32 %v1251_v40, %v491_v30 }
 0x122   :  { %vm694_vm13 = vcmp.ge.f32.partialorder %v628_v27, 0.0  ;;  %v758_v33 = vmul.f32 0.01, %v628_v27  ;;  %v787_v34 = vsel %vm659_vm10, %v489_v20, %v723_v28  ;;  %v620_v37 = vadd.f32 %v1251_v40, %v619_v31 }
 0x123   :  { %v819_v35 = vsel %vm691_vm11, %v617_v21, %v755_v29  ;;  %851 = vst [vmem:[%s1512_s3 + $0xe0] sm:$0xff] %v787_v34  ;;  %v790_v38 = vsel %vm662_vm12, %v500_v26, %v726_v32  ;;  %vm660_vm14 = vcmp.ge.f32.partialorder %v492_v36, 0.0  ;;  %v724_v40 = vmul.f32 0.01, %v492_v36 }
 0x124   :  { %883 = vst [vmem:[%s1512_s3 + $0x1e0] sm:$0xff] %v819_v35  ;;  %v822_v39 = vsel %vm694_vm13, %v628_v27, %v758_v33  ;;  %854 = vst [vmem:[%s1512_s3 + $0xf8] sm:$0xff] %v790_v38  ;;  %vm692_vm15 = vcmp.ge.f32.partialorder %v620_v37, 0.0  ;;  %v756_v41 = vmul.f32 0.01, %v620_v37 }
 0x125   :  { %886 = vst [vmem:[%s1512_s3 + $0x1f8] sm:$0xff] %v822_v39  ;;  %v788_v42 = vsel %vm660_vm14, %v492_v36, %v724_v40 }
 0x126   :  { %v820_v43 = vsel %vm692_vm15, %v620_v37, %v756_v41  ;;  %852 = vst [vmem:[%s1512_s3 + $0xe8] sm:$0xff] %v788_v42 }
 0x127   :  { %884 = vst [vmem:[%s1512_s3 + $0x1e8] sm:$0xff] %v820_v43 }

// kernel: vae_forward.13
= control target key start
LH: loop header
LB: loop body
LE: loop exit
PB: predicated region body
PF: predicated region fallthrough
CT: control target
= control target key end

     0   :  { %s749_s1 = inlined_call_operand.vmem [shape: bf16[256,128], index: 1, kind: input, shape index: {}]   ;;  %s750_s0 = inlined_call_operand.vmem [shape: bf16[128,256], index: 0, kind: input, shape index: {}]   ;;  %s751_s2 = inlined_call_operand.vmem [shape: f32[1,128], index: 2, kind: input, shape index: {}]   ;;  %s752_s3 = inlined_call_operand.vmem [shape: f32[128,128], index: 3, kind: output, shape index: {}]  }
   0x1   :  { %v524_v0 = vld [vmem:[%s749_s1 + $0x78] sm:$0xff]   ;;  %v526_v2 = vld [vmem:[%s749_s1 + $0x70] sm:$0xff]   ;;  %v528_v4 = vld [vmem:[%s749_s1 + $0x68] sm:$0xff]  }
   0x2   :  { %v525_v1 = vld [vmem:[%s749_s1 + $0x38] sm:$0xff]   ;;  %444 = vmatprep.subr.bf16.mxu0 %v524_v0  ;;  %508 = vmatprep.subr.bf16.mxu1 %v524_v0  ;;  %v527_v3 = vld [vmem:[%s749_s1 + $0x30] sm:$0xff]   ;;  %v529_v5 = vld [vmem:[%s749_s1 + $0x28] sm:$0xff]  }
   0x3   :  { %445 = vmatpush3.bf16.msra.mxu0 %v525_v1  ;;  %516 = vmatpush3.bf16.msra.mxu1 %v525_v1  ;;  %v530_v6 = vld [vmem:[%s749_s1 + $0x60] sm:$0xff]   ;;  %v532_v8 = vld [vmem:[%s749_s1 + $0x58] sm:$0xff]   ;;  %v534_v10 = vld [vmem:[%s749_s1 + $0x50] sm:$0xff]  }
   0x4   :  { %446 = vmatprep.subr.bf16.mxu0 %v526_v2  ;;  %509 = vmatprep.subr.bf16.mxu1 %v526_v2  ;;  %v531_v7 = vld [vmem:[%s749_s1 + $0x20] sm:$0xff]   ;;  %v533_v9 = vld [vmem:[%s749_s1 + $0x18] sm:$0xff]   ;;  %v535_v13 = vld [vmem:[%s749_s1 + $0x10] sm:$0xff]  }
   0x5   :  { %v542_v11 = vld [vmem:[%s750_s0 + $0x4] ss:$8 sps:$4 sm:$0xff]   ;;  %v540_v18 = vld [vmem:[%s750_s0] ss:$8 sps:$4 sm:$0xff]   ;;  %v546_v20 = vld [vmem:[%s750_s0 + $0x14] ss:$8 sps:$4 sm:$0xff]  }
   0x6   :  { %v545_v12 = vld [vmem:[%s750_s0 + $0x44] ss:$8 sps:$4 sm:$0xff]   ;;  %278 = vmatprep.mubr.bf16.mxu0 %v542_v11  ;;  %v543_v19 = vld [vmem:[%s750_s0 + $0x40] ss:$8 sps:$4 sm:$0xff]   ;;  %v548_v21 = vld [vmem:[%s750_s0 + $0x54] ss:$8 sps:$4 sm:$0xff]  }
   0x7   :  { %447 = vmatpush3.bf16.msra.mxu0 %v527_v3  ;;  %517 = vmatpush3.bf16.msra.mxu1 %v527_v3  ;;  %v536_v14 = vld [vmem:[%s749_s1 + $0x48] sm:$0xff]   ;;  %v538_v16 = vld [vmem:[%s749_s1 + $0x40] sm:$0xff]   ;;  %v550_v22 = vld [vmem:[%s750_s0 + $0x10] ss:$8 sps:$4 sm:$0xff]  }
   0x8   :  { %448 = vmatprep.subr.bf16.mxu0 %v528_v4  ;;  %510 = vmatprep.subr.bf16.mxu1 %v528_v4  ;;  %v537_v15 = vld [vmem:[%s749_s1 + $0x8] sm:$0xff]   ;;  %v539_v17 = vld [vmem:[%s749_s1] sm:$0xff]   ;;  %v551_v23 = vld [vmem:[%s750_s0 + $0x50] ss:$8 sps:$4 sm:$0xff]  }
   0x9   :  { %310 = vmatprep.mubr.bf16.mxu1 %v545_v12  ;;  %v552_v24 = vld [vmem:[%s750_s0 + $0x24] ss:$8 sps:$4 sm:$0xff]   ;;  %v556_v26 = vld [vmem:[%s750_s0 + $0x20] ss:$8 sps:$4 sm:$0xff]   ;;  %v558_v28 = vld [vmem:[%s750_s0 + $0x34] ss:$8 sps:$4 sm:$0xff]  }
   0xa   :  { %v554_v25 = vld [vmem:[%s750_s0 + $0x64] ss:$8 sps:$4 sm:$0xff]   ;;  %v557_v27 = vld [vmem:[%s750_s0 + $0x60] ss:$8 sps:$4 sm:$0xff]   ;;  %v560_v29 = vld [vmem:[%s750_s0 + $0x74] ss:$8 sps:$4 sm:$0xff]  }
   0xb   :  { %449 = vmatpush3.bf16.msra.mxu0 %v529_v5  ;;  %518 = vmatpush3.bf16.msra.mxu1 %v529_v5  ;;  %v562_v30 = vld [vmem:[%s750_s0 + $0x30] ss:$8 sps:$4 sm:$0xff]   ;;  %v683_v34 = vld [vmem:[%s751_s2] ss:$0 sm:$0xff] }
   0xc   :  { %450 = vmatprep.subr.bf16.mxu0 %v530_v6  ;;  %511 = vmatprep.subr.bf16.mxu1 %v530_v6  ;;  %v563_v31 = vld [vmem:[%s750_s0 + $0x70] ss:$8 sps:$4 sm:$0xff]  }
   0xf   :  { %451 = vmatpush3.bf16.msra.mxu0 %v531_v7  ;;  %519 = vmatpush3.bf16.msra.mxu1 %v531_v7 }
  0x10   :  { %452 = vmatprep.subr.bf16.mxu0 %v532_v8  ;;  %512 = vmatprep.subr.bf16.mxu1 %v532_v8 }
  0x13   :  { %453 = vmatpush3.bf16.msra.mxu0 %v533_v9  ;;  %520 = vmatpush3.bf16.msra.mxu1 %v533_v9 }
  0x14   :  { %454 = vmatprep.subr.bf16.mxu0 %v534_v10  ;;  %513 = vmatprep.subr.bf16.mxu1 %v534_v10 }
  0x17   :  { %455 = vmatpush3.bf16.msra.mxu0 %v535_v13  ;;  %521 = vmatpush3.bf16.msra.mxu1 %v535_v13 }
  0x18   :  { %456 = vmatprep.subr.bf16.mxu0 %v536_v14  ;;  %514 = vmatprep.subr.bf16.mxu1 %v536_v14 }
  0x1b   :  { %457 = vmatpush3.bf16.msra.mxu0 %v537_v15  ;;  %522 = vmatpush3.bf16.msra.mxu1 %v537_v15 }
  0x1c   :  { %458 = vmatprep.subr.bf16.mxu0 %v538_v16  ;;  %515 = vmatprep.subr.bf16.mxu1 %v538_v16 }
  0x1f   :  { %459 = vmatpush3.bf16.msra.mxu0 %v539_v17  ;;  %523 = vmatpush3.bf16.msra.mxu1 %v539_v17 }
  0x22   :  { %279 = vmatmul.mubr.bf16.vlgmr.msra.gmra.mxu0 %v540_v18  ;;  %311 = vmatmul.mubr.bf16.vlgmr.msra.gmra.mxu1 %v543_v19 }
  0x23   :  { %286 = vmatprep.mubr.bf16.mxu0 %v546_v20  ;;  %318 = vmatprep.mubr.bf16.mxu1 %v548_v21 }
  0x2a   :  { %287 = vmatmul.mubr.bf16.gmra.mxu0 %v550_v22  ;;  %319 = vmatmul.mubr.bf16.gmra.mxu1 %v551_v23 }
  0x2b   :  { %294 = vmatprep.mubr.bf16.mxu0 %v552_v24  ;;  %326 = vmatprep.mubr.bf16.mxu1 %v554_v25 }
  0x32   :  { %295 = vmatmul.mubr.bf16.gmra.mxu0 %v556_v26  ;;  %327 = vmatmul.mubr.bf16.gmra.mxu1 %v557_v27 }
  0x33   :  { %302 = vmatprep.mubr.bf16.mxu0 %v558_v28  ;;  %334 = vmatprep.mubr.bf16.mxu1 %v560_v29 }
  0x3a   :  { %303 = vmatmul.mubr.bf16.gmra.mxu0 %v562_v30  ;;  %335 = vmatmul.mubr.bf16.gmra.mxu1 %v563_v31 }
  0xe2   :  { %v460_v32 = vpop.f32.mrf.mxu0  ;;  %v484_v33 = vpop.f32.mrf.mxu1 }
  0xe4   :  { %v461_v35 = vpop.f32.mrf.mxu0  ;;  %v485_v36 = vpop.f32.mrf.mxu1 }
  0xe5   :  { %v462_v37 = vadd.f32 %v461_v35, %v460_v32  ;;  %v486_v38 = vadd.f32 %v485_v36, %v484_v33 }
  0xe6   :  { %v463_v39 = vpop.f32.mrf.mxu0  ;;  %v487_v40 = vpop.f32.mrf.mxu1 }
  0xe7   :  { %v281_v41 = vadd.f32 %v462_v37, %v683_v34  ;;  %v313_v42 = vadd.f32 %v486_v38, %v683_v34 }
  0xe8   :  { %v464_v43 = vpop.f32.mrf.mxu0  ;;  %v488_v44 = vpop.f32.mrf.mxu1 }
  0xe9   :  { %vm343_vm0 = vcmp.ge.f32.partialorder %v281_v41, 0.0  ;;  %v359_v45 = vmul.f32 0.01, %v281_v41  ;;  %vm351_vm1 = vcmp.ge.f32.partialorder %v313_v42, 0.0  ;;  %v367_v46 = vmul.f32 0.01, %v313_v42 }
  0xea   :  { %v465_v47 = vadd.f32 %v464_v43, %v463_v39  ;;  %v489_v48 = vadd.f32 %v488_v44, %v487_v40  ;;  %v466_v49 = vpop.f32.mrf.mxu0  ;;  %v490_v50 = vpop.f32.mrf.mxu1 }
  0xeb   :  { %v375_v51 = vsel %vm343_vm0, %v281_v41, %v359_v45  ;;  %v383_v52 = vsel %vm351_vm1, %v313_v42, %v367_v46 }
  0xec   :  { %391 = vst [vmem:[%s752_s3] sm:$0xff] %v375_v51  ;;  %399 = vst [vmem:[%s752_s3 + $0x40] sm:$0xff] %v383_v52  ;;  %v284_v53 = vadd.f32 %v465_v47, %v683_v34  ;;  %v316_v54 = vadd.f32 %v489_v48, %v683_v34  ;;  %v467_v55 = vpop.f32.mrf.mxu0  ;;  %v491_v56 = vpop.f32.mrf.mxu1 }
  0xed   :  { %v468_v57 = vadd.f32 %v467_v55, %v466_v49  ;;  %v492_v58 = vadd.f32 %v491_v56, %v490_v50 }
  0xee   :  { %vm344_vm2 = vcmp.ge.f32.partialorder %v284_v53, 0.0  ;;  %v360_v59 = vmul.f32 0.01, %v284_v53  ;;  %vm352_vm3 = vcmp.ge.f32.partialorder %v316_v54, 0.0  ;;  %v368_v60 = vmul.f32 0.01, %v316_v54  ;;  %v469_v61 = vpop.f32.mrf.mxu0  ;;  %v493_v62 = vpop.f32.mrf.mxu1 }
  0xef   :  { %v289_v63 = vadd.f32 %v468_v57, %v683_v34  ;;  %v321_v0 = vadd.f32 %v492_v58, %v683_v34 }
  0xf0   :  { %v376_v1 = vsel %vm344_vm2, %v284_v53, %v360_v59  ;;  %v384_v2 = vsel %vm352_vm3, %v316_v54, %v368_v60  ;;  %v470_v3 = vpop.f32.mrf.mxu0  ;;  %v494_v4 = vpop.f32.mrf.mxu1 }
  0xf1   :  { %392 = vst [vmem:[%s752_s3 + $0x8] sm:$0xff] %v376_v1  ;;  %400 = vst [vmem:[%s752_s3 + $0x48] sm:$0xff] %v384_v2  ;;  %vm345_vm4 = vcmp.ge.f32.partialorder %v289_v63, 0.0  ;;  %v361_v5 = vmul.f32 0.01, %v289_v63  ;;  %vm353_vm5 = vcmp.ge.f32.partialorder %v321_v0, 0.0  ;;  %v471_v7 = vadd.f32 %v470_v3, %v469_v61 }
  0xf2   :  { %v369_v6 = vmul.f32 0.01, %v321_v0  ;;  %v495_v8 = vadd.f32 %v494_v4, %v493_v62  ;;  %v472_v9 = vpop.f32.mrf.mxu0  ;;  %v496_v10 = vpop.f32.mrf.mxu1 }
  0xf3   :  { %v377_v11 = vsel %vm345_vm4, %v289_v63, %v361_v5  ;;  %v292_v13 = vadd.f32 %v471_v7, %v683_v34 }
  0xf4   :  { %v385_v12 = vsel %vm353_vm5, %v321_v0, %v369_v6  ;;  %393 = vst [vmem:[%s752_s3 + $0x10] sm:$0xff] %v377_v11  ;;  %v324_v14 = vadd.f32 %v495_v8, %v683_v34  ;;  %v473_v15 = vpop.f32.mrf.mxu0  ;;  %v497_v16 = vpop.f32.mrf.mxu1 }
  0xf5   :  { %401 = vst [vmem:[%s752_s3 + $0x50] sm:$0xff] %v385_v12  ;;  %v474_v17 = vadd.f32 %v473_v15, %v472_v9  ;;  %v498_v18 = vadd.f32 %v497_v16, %v496_v10  ;;  %vm346_vm6 = vcmp.ge.f32.partialorder %v292_v13, 0.0  ;;  %v362_v19 = vmul.f32 0.01, %v292_v13 }
  0xf6   :  { %vm354_vm7 = vcmp.ge.f32.partialorder %v324_v14, 0.0  ;;  %v370_v20 = vmul.f32 0.01, %v324_v14  ;;  %v475_v21 = vpop.f32.mrf.mxu0  ;;  %v499_v22 = vpop.f32.mrf.mxu1 }
  0xf7   :  { %v297_v23 = vadd.f32 %v474_v17, %v683_v34  ;;  %v329_v24 = vadd.f32 %v498_v18, %v683_v34  ;;  %v378_v25 = vsel %vm346_vm6, %v292_v13, %v362_v19 }
  0xf8   :  { %v386_v26 = vsel %vm354_vm7, %v324_v14, %v370_v20  ;;  %v476_v27 = vpop.f32.mrf.mxu0  ;;  %v500_v28 = vpop.f32.mrf.mxu1  ;;  %394 = vst [vmem:[%s752_s3 + $0x18] sm:$0xff] %v378_v25 }
  0xf9   :  { %402 = vst [vmem:[%s752_s3 + $0x58] sm:$0xff] %v386_v26  ;;  %vm347_vm8 = vcmp.ge.f32.partialorder %v297_v23, 0.0  ;;  %v363_v29 = vmul.f32 0.01, %v297_v23  ;;  %vm355_vm9 = vcmp.ge.f32.partialorder %v329_v24, 0.0  ;;  %v477_v31 = vadd.f32 %v476_v27, %v475_v21 }
  0xfa   :  { %v371_v30 = vmul.f32 0.01, %v329_v24  ;;  %v501_v32 = vadd.f32 %v500_v28, %v499_v22  ;;  %v478_v33 = vpop.f32.mrf.mxu0  ;;  %v502_v35 = vpop.f32.mrf.mxu1 }
  0xfb   :  { %v379_v36 = vsel %vm347_vm8, %v297_v23, %v363_v29  ;;  %v300_v38 = vadd.f32 %v477_v31, %v683_v34 }
  0xfc   :  { %v387_v37 = vsel %vm355_vm9, %v329_v24, %v371_v30  ;;  %395 = vst [vmem:[%s752_s3 + $0x20] sm:$0xff] %v379_v36  ;;  %v332_v39 = vadd.f32 %v501_v32, %v683_v34  ;;  %v479_v40 = vpop.f32.mrf.mxu0  ;;  %v503_v41 = vpop.f32.mrf.mxu1 }
  0xfd   :  { %403 = vst [vmem:[%s752_s3 + $0x60] sm:$0xff] %v387_v37  ;;  %v480_v42 = vadd.f32 %v479_v40, %v478_v33  ;;  %v504_v43 = vadd.f32 %v503_v41, %v502_v35  ;;  %vm348_vm10 = vcmp.ge.f32.partialorder %v300_v38, 0.0  ;;  %v364_v44 = vmul.f32 0.01, %v300_v38 }
  0xfe   :  { %vm356_vm11 = vcmp.ge.f32.partialorder %v332_v39, 0.0  ;;  %v372_v45 = vmul.f32 0.01, %v332_v39  ;;  %v481_v46 = vpop.f32.mrf.mxu0  ;;  %v505_v47 = vpop.f32.mrf.mxu1 }
  0xff   :  { %v305_v48 = vadd.f32 %v480_v42, %v683_v34  ;;  %v337_v49 = vadd.f32 %v504_v43, %v683_v34  ;;  %v380_v50 = vsel %vm348_vm10, %v300_v38, %v364_v44 }
 0x100   :  { %v388_v51 = vsel %vm356_vm11, %v332_v39, %v372_v45  ;;  %v482_v52 = vpop.f32.mrf.mxu0  ;;  %v506_v53 = vpop.f32.mrf.mxu1  ;;  %396 = vst [vmem:[%s752_s3 + $0x28] sm:$0xff] %v380_v50 }
 0x101   :  { %404 = vst [vmem:[%s752_s3 + $0x68] sm:$0xff] %v388_v51  ;;  %vm349_vm12 = vcmp.ge.f32.partialorder %v305_v48, 0.0  ;;  %v365_v54 = vmul.f32 0.01, %v305_v48  ;;  %vm357_vm13 = vcmp.ge.f32.partialorder %v337_v49, 0.0  ;;  %v483_v56 = vadd.f32 %v482_v52, %v481_v46 }
 0x102   :  { %v373_v55 = vmul.f32 0.01, %v337_v49  ;;  %v507_v57 = vadd.f32 %v506_v53, %v505_v47 }
 0x103   :  { %v381_v58 = vsel %vm349_vm12, %v305_v48, %v365_v54  ;;  %v308_v60 = vadd.f32 %v483_v56, %v683_v34 }
 0x104   :  { %v389_v59 = vsel %vm357_vm13, %v337_v49, %v373_v55  ;;  %397 = vst [vmem:[%s752_s3 + $0x30] sm:$0xff] %v381_v58  ;;  %v340_v61 = vadd.f32 %v507_v57, %v683_v34 }
 0x105   :  { %405 = vst [vmem:[%s752_s3 + $0x70] sm:$0xff] %v389_v59  ;;  %vm350_vm14 = vcmp.ge.f32.partialorder %v308_v60, 0.0  ;;  %v366_v62 = vmul.f32 0.01, %v308_v60 }
 0x106   :  { %vm358_vm15 = vcmp.ge.f32.partialorder %v340_v61, 0.0  ;;  %v374_v63 = vmul.f32 0.01, %v340_v61 }
 0x107   :  { %v382_v0 = vsel %vm350_vm14, %v308_v60, %v366_v62 }
 0x108   :  { %v390_v1 = vsel %vm358_vm15, %v340_v61, %v374_v63  ;;  %398 = vst [vmem:[%s752_s3 + $0x38] sm:$0xff] %v382_v0 }
 0x109   :  { %406 = vst [vmem:[%s752_s3 + $0x78] sm:$0xff] %v390_v1 }

// kernel: vae_forward.14
= control target key start
LH: loop header
LB: loop body
LE: loop exit
PB: predicated region body
PF: predicated region fallthrough
CT: control target
= control target key end

     0   :  { %s618_s1 = inlined_call_operand.vmem [shape: bf16[384,128], index: 1, kind: input, shape index: {}]   ;;  %s619_s0 = inlined_call_operand.vmem [shape: bf16[32,384], index: 0, kind: input, shape index: {}]   ;;  %s620_s2 = inlined_call_operand.vmem [shape: f32[1,128], index: 2, kind: input, shape index: {}]   ;;  %s621_s3 = inlined_call_operand.vmem [shape: f32[32,128], index: 3, kind: output, shape index: {}]  }
   0x1   :  { %v461_v0 = vld [vmem:[%s618_s1 + $0x78] sm:$0xff]   ;;  %v463_v2 = vld [vmem:[%s618_s1 + $0x70] sm:$0xff]   ;;  %v466_v5 = vld [vmem:[%s618_s1 + $0x68] sm:$0xff]  }
   0x2   :  { %v462_v1 = vld [vmem:[%s618_s1 + $0x38] sm:$0xff]   ;;  %403 = vmatprep.subr.bf16.mxu0 %v461_v0  ;;  %v465_v4 = vld [vmem:[%s618_s1 + $0x30] sm:$0xff]   ;;  %v468_v7 = vld [vmem:[%s618_s1 + $0x28] sm:$0xff]  }
   0x3   :  { %404 = vmatpush3.bf16.msra.mxu0 %v462_v1  ;;  %v464_v3 = vld [vmem:[%s618_s1 + $0xb8] sm:$0xff]   ;;  %v467_v6 = vld [vmem:[%s618_s1 + $0xb0] sm:$0xff]   ;;  %v469_v8 = vld [vmem:[%s618_s1 + $0x60] sm:$0xff]  }
   0x4   :  { %405 = vmatprep.subr.bf16.mxu0 %v463_v2  ;;  %441 = vmatprep.subr.bf16.mxu1 %v464_v3  ;;  %v470_v9 = vld [vmem:[%s618_s1 + $0xa8] sm:$0xff]   ;;  %v471_v10 = vld [vmem:[%s618_s1 + $0x20] sm:$0xff]   ;;  %v472_v11 = vld [vmem:[%s618_s1 + $0x58] sm:$0xff]  }
   0x5   :  { %442 = vmatpush3.bf16.msra.mxu1 %v464_v3  ;;  %v473_v12 = vld [vmem:[%s618_s1 + $0xa0] sm:$0xff]   ;;  %v474_v13 = vld [vmem:[%s618_s1 + $0x18] sm:$0xff]   ;;  %v475_v15 = vld [vmem:[%s618_s1 + $0x50] sm:$0xff]  }
   0x6   :  { %443 = vmatprep.subr.bf16.mxu1 %v467_v6  ;;  %v476_v14 = vld [vmem:[%s618_s1 + $0x98] sm:$0xff]   ;;  %v477_v16 = vld [vmem:[%s618_s1 + $0x10] sm:$0xff]   ;;  %v478_v18 = vld [vmem:[%s618_s1 + $0x48] sm:$0xff]  }
   0x7   :  { %406 = vmatpush3.bf16.msra.mxu0 %v465_v4  ;;  %v479_v17 = vld [vmem:[%s618_s1 + $0x90] sm:$0xff]   ;;  %v480_v19 = vld [vmem:[%s618_s1 + $0x8] sm:$0xff]   ;;  %v481_v20 = vld [vmem:[%s618_s1 + $0x40] sm:$0xff]  }
   0x8   :  { %407 = vmatprep.subr.bf16.mxu0 %v466_v5  ;;  %v482_v21 = vld [vmem:[%s618_s1 + $0x88] sm:$0xff]   ;;  %v486_v22 = vld [vmem:[%s619_s0 + $0x4] ss:$12 sps:$4 sm:$0xff]   ;;  %v372_v32 = vld [vmem:[%s620_s2] ss:$0 sm:$0xff] }
   0x9   :  { %444 = vmatpush3.bf16.msra.mxu1 %v467_v6  ;;  %v483_v23 = vld [vmem:[%s618_s1] sm:$0xff]   ;;  %286 = vmatprep.mubr.bf16.mxu0 %v486_v22  ;;  %v488_v24 = vld [vmem:[%s619_s0 + $0x8] ss:$12 sps:$4 sm:$0xff]  }
   0xa   :  { %445 = vmatprep.subr.bf16.mxu1 %v470_v9  ;;  %v487_v25 = vld [vmem:[%s618_s1 + $0x80] sm:$0xff]   ;;  %457 = vmatprep.mubr.bf16.mxu1 %v488_v24  ;;  %v490_v27 = vld [vmem:[%s619_s0 + $0x1c] ss:$12 sps:$4 sm:$0xff]  }
   0xb   :  { %408 = vmatpush3.bf16.msra.mxu0 %v468_v7  ;;  %v484_v26 = vld [vmem:[%s619_s0] ss:$12 sps:$4 sm:$0xff]   ;;  %v492_v29 = vld [vmem:[%s619_s0 + $0x18] ss:$12 sps:$4 sm:$0xff]  }
   0xc   :  { %409 = vmatprep.subr.bf16.mxu0 %v469_v8  ;;  %v489_v28 = vld [vmem:[%s619_s0 + $0x20] ss:$12 sps:$4 sm:$0xff]  }
   0xd   :  { %446 = vmatpush3.bf16.msra.mxu1 %v470_v9 }
   0xe   :  { %447 = vmatprep.subr.bf16.mxu1 %v473_v12 }
   0xf   :  { %410 = vmatpush3.bf16.msra.mxu0 %v471_v10 }
  0x10   :  { %411 = vmatprep.subr.bf16.mxu0 %v472_v11 }
  0x11   :  { %448 = vmatpush3.bf16.msra.mxu1 %v473_v12 }
  0x12   :  { %449 = vmatprep.subr.bf16.mxu1 %v476_v14 }
  0x13   :  { %412 = vmatpush3.bf16.msra.mxu0 %v474_v13 }
  0x14   :  { %413 = vmatprep.subr.bf16.mxu0 %v475_v15 }
  0x15   :  { %450 = vmatpush3.bf16.msra.mxu1 %v476_v14 }
  0x16   :  { %451 = vmatprep.subr.bf16.mxu1 %v479_v17 }
  0x17   :  { %414 = vmatpush3.bf16.msra.mxu0 %v477_v16 }
  0x18   :  { %415 = vmatprep.subr.bf16.mxu0 %v478_v18 }
  0x19   :  { %452 = vmatpush3.bf16.msra.mxu1 %v479_v17 }
  0x1a   :  { %453 = vmatprep.subr.bf16.mxu1 %v482_v21 }
  0x1b   :  { %416 = vmatpush3.bf16.msra.mxu0 %v480_v19 }
  0x1c   :  { %417 = vmatprep.subr.bf16.mxu0 %v481_v20 }
  0x1d   :  { %454 = vmatpush3.bf16.msra.mxu1 %v482_v21 }
  0x1e   :  { %455 = vmatprep.subr.bf16.mxu1 %v487_v25 }
  0x1f   :  { %418 = vmatpush3.bf16.msra.mxu0 %v483_v23 }
  0x21   :  { %456 = vmatpush3.bf16.msra.mxu1 %v487_v25 }
  0x22   :  { %287 = vmatmul.mubr.bf16.vlgmr.msra.gmra.mxu0 %v484_v26 }
  0x23   :  { %294 = vmatprep.mubr.bf16.mxu0 %v490_v27 }
  0x24   :  { %458 = vmatmul.mubr.bf16.vlgmr.msra.gmra.mxu1 %v489_v28 }
  0x2a   :  { %295 = vmatmul.mubr.bf16.gmra.mxu0 %v492_v29 }
  0xe2   :  { %v419_v30 = vpop.f32.mrf.mxu0 }
  0xe4   :  { %v420_v31 = vpop.f32.mrf.mxu0  ;;  %v459_v34 = vpop.f32.mrf.mxu1 }
  0xe5   :  { %v421_v33 = vadd.f32 %v420_v31, %v419_v30 }
  0xe6   :  { %v422_v35 = vpop.f32.mrf.mxu0  ;;  %v337_v37 = vpop.f32.mrf.mxu1 }
  0xe7   :  { %v289_v36 = vadd.f32 %v421_v33, %v372_v32 }
  0xe8   :  { %v423_v38 = vpop.f32.mrf.mxu0  ;;  %v460_v41 = vpop.f32.mrf.mxu1 }
  0xe9   :  { %v424_v39 = vadd.f32 %v423_v38, %v422_v35  ;;  %v338_v40 = vadd.f32 %v337_v37, %v289_v36 }
  0xea   :  { %v425_v42 = vpop.f32.mrf.mxu0  ;;  %v340_v45 = vpop.f32.mrf.mxu1 }
  0xeb   :  { %vm352_vm0 = vcmp.ge.f32.partialorder %v338_v40, 0.0  ;;  %v356_v43 = vmul.f32 0.01, %v338_v40  ;;  %v292_v44 = vadd.f32 %v424_v39, %v372_v32 }
  0xec   :  { %v426_v46 = vpop.f32.mrf.mxu0 }
  0xed   :  { %v360_v47 = vsel %vm352_vm0, %v338_v40, %v356_v43  ;;  %v427_v48 = vadd.f32 %v426_v46, %v425_v42  ;;  %v341_v49 = vadd.f32 %v340_v45, %v292_v44 }
  0xee   :  { %364 = vst [vmem:[%s621_s3] sm:$0xff] %v360_v47  ;;  %v428_v50 = vpop.f32.mrf.mxu0 }
  0xef   :  { %v297_v51 = vadd.f32 %v427_v48, %v372_v32  ;;  %vm353_vm1 = vcmp.ge.f32.partialorder %v341_v49, 0.0  ;;  %v357_v52 = vmul.f32 0.01, %v341_v49 }
  0xf0   :  { %v429_v53 = vpop.f32.mrf.mxu0 }
  0xf1   :  { %v346_v54 = vadd.f32 %v459_v34, %v297_v51  ;;  %v361_v55 = vsel %vm353_vm1, %v341_v49, %v357_v52  ;;  %v430_v56 = vadd.f32 %v429_v53, %v428_v50 }
  0xf2   :  { %365 = vst [vmem:[%s621_s3 + $0x8] sm:$0xff] %v361_v55 }
  0xf3   :  { %vm354_vm2 = vcmp.ge.f32.partialorder %v346_v54, 0.0  ;;  %v358_v57 = vmul.f32 0.01, %v346_v54  ;;  %v300_v58 = vadd.f32 %v430_v56, %v372_v32 }
  0xf5   :  { %v362_v59 = vsel %vm354_vm2, %v346_v54, %v358_v57  ;;  %v349_v60 = vadd.f32 %v460_v41, %v300_v58 }
  0xf6   :  { %366 = vst [vmem:[%s621_s3 + $0x10] sm:$0xff] %v362_v59 }
  0xf7   :  { %vm355_vm3 = vcmp.ge.f32.partialorder %v349_v60, 0.0  ;;  %v359_v61 = vmul.f32 0.01, %v349_v60 }
  0xf9   :  { %v363_v62 = vsel %vm355_vm3, %v349_v60, %v359_v61 }
  0xfa   :  { %367 = vst [vmem:[%s621_s3 + $0x18] sm:$0xff] %v363_v62 }

// kernel: vae_forward.15
= control target key start
LH: loop header
LB: loop body
LE: loop exit
PB: predicated region body
PF: predicated region fallthrough
CT: control target
= control target key end

     0   :  { %s627_s1 = inlined_call_operand.vmem [shape: bf16[512,128], index: 1, kind: input, shape index: {}]   ;;  %s628_s0 = inlined_call_operand.vmem [shape: bf16[8,512], index: 0, kind: input, shape index: {}]   ;;  %s629_s2 = inlined_call_operand.vmem [shape: f32[1,128], index: 2, kind: input, shape index: {}]   ;;  %s630_s3 = inlined_call_operand.vmem [shape: f32[8,128], index: 3, kind: output, shape index: {}]  }
   0x1   :  { %v463_v0 = vld [vmem:[%s627_s1 + $0x78] sm:$0xff]   ;;  %v467_v4 = vld [vmem:[%s627_s1 + $0x70] sm:$0xff]   ;;  %v471_v8 = vld [vmem:[%s627_s1 + $0x68] sm:$0xff]  }
   0x2   :  { %v464_v1 = vld [vmem:[%s627_s1 + $0xf8] sm:$0xff]   ;;  %419 = vmatprep.subr.bf16.mxu0 %v463_v0  ;;  %v468_v5 = vld [vmem:[%s627_s1 + $0xf0] sm:$0xff]   ;;  %v472_v9 = vld [vmem:[%s627_s1 + $0xe8] sm:$0xff]  }
   0x3   :  { %v465_v2 = vld [vmem:[%s627_s1 + $0x38] sm:$0xff]   ;;  %441 = vmatprep.subr.bf16.mxu1 %v464_v1  ;;  %v469_v6 = vld [vmem:[%s627_s1 + $0x30] sm:$0xff]   ;;  %v473_v10 = vld [vmem:[%s627_s1 + $0x28] sm:$0xff]  }
   0x4   :  { %v466_v3 = vld [vmem:[%s627_s1 + $0xb8] sm:$0xff]   ;;  %420 = vmatpush3.bf16.msra.mxu0 %v465_v2  ;;  %v470_v7 = vld [vmem:[%s627_s1 + $0xb0] sm:$0xff]   ;;  %v474_v11 = vld [vmem:[%s627_s1 + $0xa8] sm:$0xff]  }
   0x5   :  { %442 = vmatpush3.bf16.msra.mxu1 %v466_v3  ;;  %421 = vmatprep.subr.bf16.mxu0 %v467_v4  ;;  %v475_v12 = vld [vmem:[%s627_s1 + $0x60] sm:$0xff]   ;;  %v479_v16 = vld [vmem:[%s627_s1 + $0x58] sm:$0xff]   ;;  %v483_v20 = vld [vmem:[%s627_s1 + $0x50] sm:$0xff]  }
   0x6   :  { %443 = vmatprep.subr.bf16.mxu1 %v468_v5  ;;  %v476_v13 = vld [vmem:[%s627_s1 + $0xe0] sm:$0xff]   ;;  %v480_v17 = vld [vmem:[%s627_s1 + $0xd8] sm:$0xff]   ;;  %v484_v21 = vld [vmem:[%s627_s1 + $0xd0] sm:$0xff]  }
   0x7   :  { %v477_v14 = vld [vmem:[%s627_s1 + $0x20] sm:$0xff]   ;;  %v481_v18 = vld [vmem:[%s627_s1 + $0x18] sm:$0xff]   ;;  %v485_v22 = vld [vmem:[%s627_s1 + $0x10] sm:$0xff]  }
   0x8   :  { %422 = vmatpush3.bf16.msra.mxu0 %v469_v6  ;;  %v478_v15 = vld [vmem:[%s627_s1 + $0xa0] sm:$0xff]   ;;  %v482_v19 = vld [vmem:[%s627_s1 + $0x98] sm:$0xff]   ;;  %v486_v23 = vld [vmem:[%s627_s1 + $0x90] sm:$0xff]  }
   0x9   :  { %444 = vmatpush3.bf16.msra.mxu1 %v470_v7  ;;  %423 = vmatprep.subr.bf16.mxu0 %v471_v8  ;;  %v487_v24 = vld [vmem:[%s627_s1 + $0x48] sm:$0xff]   ;;  %v491_v28 = vld [vmem:[%s627_s1 + $0x40] sm:$0xff]  }
   0xa   :  { %445 = vmatprep.subr.bf16.mxu1 %v472_v9  ;;  %v488_v25 = vld [vmem:[%s627_s1 + $0xc8] sm:$0xff]   ;;  %v492_v29 = vld [vmem:[%s627_s1 + $0xc0] sm:$0xff]  }
   0xb   :  { %v489_v26 = vld [vmem:[%s627_s1 + $0x8] sm:$0xff]   ;;  %v493_v30 = vld [vmem:[%s627_s1] sm:$0xff]  }
   0xc   :  { %424 = vmatpush3.bf16.msra.mxu0 %v473_v10  ;;  %v490_v27 = vld [vmem:[%s627_s1 + $0x88] sm:$0xff]   ;;  %v494_v31 = vld [vmem:[%s627_s1 + $0x80] sm:$0xff]  }
   0xd   :  { %446 = vmatpush3.bf16.msra.mxu1 %v474_v11  ;;  %425 = vmatprep.subr.bf16.mxu0 %v475_v12  ;;  %v15_v32 = vld [vmem:[%s628_s0] sm:$0xff]  ;;  %v16_v33 = vld [vmem:[%s628_s0 + $0x8] sm:$0xff] }
   0xe   :  { %447 = vmatprep.subr.bf16.mxu1 %v476_v13  ;;  %v383_v34 = vcombine.low %v15_v32, %v15_v32  ;;  %v384_v35 = vcombine.high %v15_v32, %v15_v32  ;;  %v385_v36 = vcombine.low %v16_v33, %v16_v33  ;;  %v386_v37 = vcombine.high %v16_v33, %v16_v33  ;;  %v382_v40 = vld [vmem:[%s629_s2] ss:$0 sm:$0xff] }
  0x10   :  { %426 = vmatpush3.bf16.msra.mxu0 %v477_v14  ;;  %326 = vmatprep.mubr.bf16.mxu0 %v384_v35 }
  0x11   :  { %448 = vmatpush3.bf16.msra.mxu1 %v478_v15  ;;  %427 = vmatprep.subr.bf16.mxu0 %v479_v16 }
  0x12   :  { %449 = vmatprep.subr.bf16.mxu1 %v480_v17  ;;  %366 = vmatprep.mubr.bf16.mxu1 %v386_v37 }
  0x14   :  { %428 = vmatpush3.bf16.msra.mxu0 %v481_v18 }
  0x15   :  { %450 = vmatpush3.bf16.msra.mxu1 %v482_v19  ;;  %429 = vmatprep.subr.bf16.mxu0 %v483_v20 }
  0x16   :  { %451 = vmatprep.subr.bf16.mxu1 %v484_v21 }
  0x18   :  { %430 = vmatpush3.bf16.msra.mxu0 %v485_v22 }
  0x19   :  { %452 = vmatpush3.bf16.msra.mxu1 %v486_v23  ;;  %431 = vmatprep.subr.bf16.mxu0 %v487_v24 }
  0x1a   :  { %453 = vmatprep.subr.bf16.mxu1 %v488_v25 }
  0x1c   :  { %432 = vmatpush3.bf16.msra.mxu0 %v489_v26 }
  0x1d   :  { %454 = vmatpush3.bf16.msra.mxu1 %v490_v27  ;;  %433 = vmatprep.subr.bf16.mxu0 %v491_v28 }
  0x1e   :  { %455 = vmatprep.subr.bf16.mxu1 %v492_v29 }
  0x20   :  { %434 = vmatpush3.bf16.msra.mxu0 %v493_v30 }
  0x21   :  { %456 = vmatpush3.bf16.msra.mxu1 %v494_v31 }
  0x23   :  { %327 = vmatmul.mubr.bf16.vlgmr.msra.gmra.mxu0 %v383_v34 }
  0x24   :  { %367 = vmatmul.mubr.bf16.vlgmr.msra.gmra.mxu1 %v385_v36 }
  0xe3   :  { %v435_v38 = vpop.f32.mrf.mxu0 }
  0xe4   :  { %v457_v39 = vpop.f32.mrf.mxu1 }
  0xe5   :  { %v436_v41 = vpop.f32.mrf.mxu0 }
  0xe6   :  { %v458_v42 = vpop.f32.mrf.mxu1  ;;  %v437_v43 = vadd.f32 %v436_v41, %v435_v38 }
  0xe7   :  { %v438_v44 = vpop.f32.mrf.mxu0  ;;  %v459_v47 = vadd.f32 %v458_v42, %v457_v39 }
  0xe8   :  { %v460_v45 = vpop.f32.mrf.mxu1  ;;  %v329_v46 = vadd.f32 %v437_v43, %v382_v40 }
  0xe9   :  { %v439_v48 = vpop.f32.mrf.mxu0 }
  0xea   :  { %v461_v49 = vpop.f32.mrf.mxu1  ;;  %v369_v50 = vadd.f32 %v459_v47, %v329_v46 }
  0xec   :  { %vm374_vm0 = vcmp.ge.f32.partialorder %v369_v50, 0.0  ;;  %v375_v51 = vmul.f32 0.01, %v369_v50 }
  0xee   :  { %v376_v52 = vsel %vm374_vm0, %v369_v50, %v375_v51 }
  0xef   :  { %377 = vst [vmem:[%s630_s3] sm:$0xff] %v376_v52 }

// kernel: vae_forward.16
= control target key start
LH: loop header
LB: loop body
LE: loop exit
PB: predicated region body
PF: predicated region fallthrough
CT: control target
= control target key end

     0   :  { %14 = vsyncpa [#allocation3], 0  ;;  %s767_s0 = inlined_call_operand.vmem [shape: f32[2,256], index: 0, kind: input, shape index: {}]   ;;  %s768_s1 = inlined_call_operand.vmem [shape: f32[256,256], index: 1, kind: input, shape index: {}]   ;;  %s769_s2 = inlined_call_operand.vmem [shape: f32[1,256], index: 2, kind: input, shape index: {}]   ;;  %s770_s3 = inlined_call_operand.vmem [shape: f32[2,128], index: 3, kind: input, shape index: {}]   ;;  %s771_s4 = inlined_call_operand.vmem [shape: f32[128,256], index: 4, kind: input, shape index: {}]   ;;  %s772_s5 = inlined_call_operand.vmem [shape: f32[1,256], index: 5, kind: input, shape index: {}]   ;;  %s773_s6 = inlined_call_operand.hbm [shape: f32[2,128], index: 6, kind: output, shape index: {0}]   ;;  %s774_s7 = inlined_call_operand.hbm [shape: f32[2,128], index: 7, kind: output, shape index: {1}]   ;;  %s775_s8 = inlined_call_operand.vmem [shape: f32[2,256], index: 8, kind: output, shape index: {2}]  }
   0x1   :  { %v60_v0 = vld [vmem:[%s768_s1 + $0xf8] sm:$0xff]  ;;  %v59_v1 = vld [vmem:[%s768_s1 + $0xf0] sm:$0xff]  ;;  %v58_v2 = vld [vmem:[%s768_s1 + $0xe8] sm:$0xff] }
   0x2   :  { %116 = vmatprep.subr.mxu0 %v60_v0  ;;  %v57_v3 = vld [vmem:[%s768_s1 + $0xe0] sm:$0xff]  ;;  %v56_v4 = vld [vmem:[%s768_s1 + $0xd8] sm:$0xff]  ;;  %v55_v5 = vld [vmem:[%s768_s1 + $0xd0] sm:$0xff] }
   0x3   :  { %117 = vmatpush1.msra.mxu0 %v59_v1  ;;  %v54_v6 = vld [vmem:[%s768_s1 + $0xc8] sm:$0xff]  ;;  %v53_v7 = vld [vmem:[%s768_s1 + $0xc0] sm:$0xff]  ;;  %v52_v8 = vld [vmem:[%s768_s1 + $0xb8] sm:$0xff] }
   0x4   :  { %118 = vmatprep.subr.mxu0 %v58_v2  ;;  %v51_v9 = vld [vmem:[%s768_s1 + $0xb0] sm:$0xff]  ;;  %v50_v10 = vld [vmem:[%s768_s1 + $0xa8] sm:$0xff]  ;;  %v49_v11 = vld [vmem:[%s768_s1 + $0xa0] sm:$0xff] }
   0x5   :  { %119 = vmatpush1.msra.mxu0 %v57_v3  ;;  %v48_v12 = vld [vmem:[%s768_s1 + $0x98] sm:$0xff]  ;;  %v47_v13 = vld [vmem:[%s768_s1 + $0x90] sm:$0xff]  ;;  %v46_v14 = vld [vmem:[%s768_s1 + $0x88] sm:$0xff] }
   0x6   :  { %120 = vmatprep.subr.mxu0 %v56_v4  ;;  %v45_v15 = vld [vmem:[%s768_s1 + $0x80] sm:$0xff]  ;;  %v44_v16 = vld [vmem:[%s768_s1 + $0x78] sm:$0xff]  ;;  %v43_v17 = vld [vmem:[%s768_s1 + $0x70] sm:$0xff] }
   0x7   :  { %121 = vmatpush1.msra.mxu0 %v55_v5  ;;  %v42_v18 = vld [vmem:[%s768_s1 + $0x68] sm:$0xff]  ;;  %v41_v19 = vld [vmem:[%s768_s1 + $0x60] sm:$0xff]  ;;  %v40_v20 = vld [vmem:[%s768_s1 + $0x58] sm:$0xff] }
   0x8   :  { %122 = vmatprep.subr.mxu0 %v54_v6  ;;  %v39_v21 = vld [vmem:[%s768_s1 + $0x50] sm:$0xff]  ;;  %v38_v22 = vld [vmem:[%s768_s1 + $0x48] sm:$0xff]  ;;  %v37_v23 = vld [vmem:[%s768_s1 + $0x40] sm:$0xff] }
   0x9   :  { %123 = vmatpush1.msra.mxu0 %v53_v7  ;;  %v528_v24 = vld.sshfl [vmem:[%s767_s0] sm:$0x33 pattern:$0x76325410]  ;;  %v224_v25 = vld [vmem:[%s771_s4 + $0xf8] sm:$0xff]  ;;  %v223_v28 = vld [vmem:[%s771_s4 + $0xf0] sm:$0xff] }
   0xa   :  { %124 = vmatprep.subr.mxu0 %v52_v8  ;;  %v36_v26 = vld [vmem:[%s768_s1 + $0x38] sm:$0xff]  ;;  %v113_v27 = vcombine.high %v528_v24, %v528_v24  ;;  %237 = vmatprep.subr.mxu1 %v224_v25  ;;  %v222_v29 = vld [vmem:[%s771_s4 + $0xe8] sm:$0xff]  ;;  %v35_v30 = vld [vmem:[%s768_s1 + $0x30] sm:$0xff] }
   0xb   :  { %125 = vmatpush1.msra.mxu0 %v51_v9  ;;  %238 = vmatpush1.msra.mxu1 %v223_v28  ;;  %v221_v31 = vld [vmem:[%s771_s4 + $0xe0] sm:$0xff] }
   0xc   :  { %126 = vmatprep.subr.mxu0 %v50_v10 }
   0xd   :  { %127 = vmatpush1.msra.mxu0 %v49_v11 }
   0xe   :  { %128 = vmatprep.subr.mxu0 %v48_v12 }
   0xf   :  { %129 = vmatpush1.msra.mxu0 %v47_v13 }
  0x10   :  { %130 = vmatprep.subr.mxu0 %v46_v14 }
  0x11   :  { %131 = vmatpush1.msra.mxu0 %v45_v15 }
  0x12   :  { %132 = vmatprep.subr.mxu0 %v44_v16 }
  0x13   :  { %133 = vmatpush1.msra.mxu0 %v43_v17 }
  0x14   :  { %134 = vmatprep.subr.mxu0 %v42_v18 }
  0x15   :  { %135 = vmatpush1.msra.mxu0 %v41_v19 }
  0x16   :  { %136 = vmatprep.subr.mxu0 %v40_v20 }
  0x17   :  { %137 = vmatpush1.msra.mxu0 %v39_v21 }
  0x18   :  { %138 = vmatprep.subr.mxu0 %v38_v22 }
  0x19   :  { %15 = vsyncpa [#allocation5], 0  ;;  %139 = vmatpush1.msra.mxu0 %v37_v23  ;;  %v34_v32 = vld [vmem:[%s768_s1 + $0x28] sm:$0xff]  ;;  %180 = vmatprep.mubr.f32.mxu0 %v113_v27  ;;  %v220_v33 = vld [vmem:[%s771_s4 + $0xd8] sm:$0xff]  ;;  %v405_v21 = vmov 0.0   ;;  %s407_s0 = smov [#allocation4]  }
  0x1a   :  { %140 = vmatprep.subr.mxu0 %v36_v26  ;;  %v33_v34 = vld [vmem:[%s768_s1 + $0x20] sm:$0xff]  ;;  %239 = vmatprep.subr.mxu1 %v222_v29  ;;  %v32_v35 = vld [vmem:[%s768_s1 + $0x18] sm:$0xff]  ;;  %v31_v36 = vld [vmem:[%s768_s1 + $0x10] sm:$0xff]  ;;  %s338_s18 = sshll.u32 %s407_s0, 4  ;;  %s339_s18 = int_to_ptr.vmem [resolvable:$true] %s338_s18 }
  0x1b   :  { %141 = vmatpush1.msra.mxu0 %v35_v30  ;;  %240 = vmatpush1.msra.mxu1 %v221_v31  ;;  %v30_v37 = vld [vmem:[%s768_s1 + $0x8] sm:$0xff]  ;;  %v29_v38 = vld [vmem:[%s768_s1] sm:$0xff]  ;;  %v92_v39 = vld [vmem:[%s768_s1 + $0x1f8] sm:$0xff] }
  0x1c   :  { %142 = vmatprep.subr.mxu0 %v34_v32  ;;  %241 = vmatprep.subr.mxu1 %v220_v33  ;;  %v91_v40 = vld [vmem:[%s768_s1 + $0x1f0] sm:$0xff]  ;;  %v90_v41 = vld [vmem:[%s768_s1 + $0x1e8] sm:$0xff]  ;;  %v89_v42 = vld [vmem:[%s768_s1 + $0x1e0] sm:$0xff] }
  0x1d   :  { %143 = vmatpush1.msra.mxu0 %v33_v34  ;;  %v88_v43 = vld [vmem:[%s768_s1 + $0x1d8] sm:$0xff]  ;;  %v87_v44 = vld [vmem:[%s768_s1 + $0x1d0] sm:$0xff]  ;;  %v86_v45 = vld [vmem:[%s768_s1 + $0x1c8] sm:$0xff]  ;;  %301 = vmatprep.mubr.f32.mxu1 %v405_v21 }
  0x1e   :  { %144 = vmatprep.subr.mxu0 %v32_v35  ;;  %v85_v46 = vld [vmem:[%s768_s1 + $0x1c0] sm:$0xff]  ;;  %v84_v47 = vld [vmem:[%s768_s1 + $0x1b8] sm:$0xff]  ;;  %v83_v48 = vld [vmem:[%s768_s1 + $0x1b0] sm:$0xff]  ;;  %v95_v35 = vlaneseq }
  0x1f   :  { %145 = vmatpush1.msra.mxu0 %v31_v36  ;;  %v82_v49 = vld [vmem:[%s768_s1 + $0x1a8] sm:$0xff]  ;;  %v81_v50 = vld [vmem:[%s768_s1 + $0x1a0] sm:$0xff]  ;;  %v80_v51 = vld [vmem:[%s768_s1 + $0x198] sm:$0xff] }
  0x20   :  { %146 = vmatprep.subr.mxu0 %v30_v37  ;;  %v79_v52 = vld [vmem:[%s768_s1 + $0x190] sm:$0xff]  ;;  %v78_v53 = vld [vmem:[%s768_s1 + $0x188] sm:$0xff]  ;;  %v77_v54 = vld [vmem:[%s768_s1 + $0x180] sm:$0xff]  ;;  %v96_v36 = vshrl.u32 %v95_v35, 7 }
  0x21   :  { %147 = vmatpush1.msra.mxu0 %v29_v38  ;;  %v76_v55 = vld [vmem:[%s768_s1 + $0x178] sm:$0xff]  ;;  %v75_v56 = vld [vmem:[%s768_s1 + $0x170] sm:$0xff]  ;;  %v74_v57 = vld [vmem:[%s768_s1 + $0x168] sm:$0xff] }
  0x22   :  { %148 = vmatprep.subr.mxu0 %v92_v39  ;;  %v73_v58 = vld [vmem:[%s768_s1 + $0x160] sm:$0xff]  ;;  %v72_v59 = vld [vmem:[%s768_s1 + $0x158] sm:$0xff]  ;;  %v71_v60 = vld [vmem:[%s768_s1 + $0x150] sm:$0xff]  ;;  %v97_v37 = vsub.s32 0, %v96_v36  ;;  %v101_v39 = vsub.s32 1, %v96_v36 }
  0x23   :  { %149 = vmatpush2.msra.mxu0 %v91_v40  ;;  %v70_v61 = vld [vmem:[%s768_s1 + $0x148] sm:$0xff]  ;;  %v69_v62 = vld [vmem:[%s768_s1 + $0x140] sm:$0xff]  ;;  %v68_v63 = vld [vmem:[%s768_s1 + $0x138] sm:$0xff] }
  0x24   :  { %150 = vmatprep.subr.mxu0 %v90_v41  ;;  %v67_v0 = vld [vmem:[%s768_s1 + $0x130] sm:$0xff]  ;;  %v66_v1 = vld [vmem:[%s768_s1 + $0x128] sm:$0xff]  ;;  %v65_v2 = vld [vmem:[%s768_s1 + $0x120] sm:$0xff] }
  0x25   :  { %151 = vmatpush2.msra.mxu0 %v89_v42  ;;  %v64_v3 = vld [vmem:[%s768_s1 + $0x118] sm:$0xff]  ;;  %v63_v4 = vld [vmem:[%s768_s1 + $0x110] sm:$0xff]  ;;  %v62_v5 = vld [vmem:[%s768_s1 + $0x108] sm:$0xff] }
  0x26   :  { %152 = vmatprep.subr.mxu0 %v88_v43  ;;  %v61_v6 = vld [vmem:[%s768_s1 + $0x100] sm:$0xff]  ;;  %v219_v7 = vld [vmem:[%s771_s4 + $0xd0] sm:$0xff]  ;;  %v218_v8 = vld [vmem:[%s771_s4 + $0xc8] sm:$0xff] }
  0x27   :  { %153 = vmatpush2.msra.mxu0 %v87_v44  ;;  %242 = vmatpush1.msra.mxu1 %v219_v7  ;;  %v217_v9 = vld [vmem:[%s771_s4 + $0xc0] sm:$0xff]  ;;  %v216_v10 = vld [vmem:[%s771_s4 + $0xb8] sm:$0xff]  ;;  %v215_v11 = vld [vmem:[%s771_s4 + $0xb0] sm:$0xff] }
  0x28   :  { %154 = vmatprep.subr.mxu0 %v86_v45  ;;  %243 = vmatprep.subr.mxu1 %v218_v8  ;;  %v214_v12 = vld [vmem:[%s771_s4 + $0xa8] sm:$0xff]  ;;  %v213_v13 = vld [vmem:[%s771_s4 + $0xa0] sm:$0xff]  ;;  %v212_v14 = vld [vmem:[%s771_s4 + $0x98] sm:$0xff] }
  0x29   :  { %155 = vmatpush2.msra.mxu0 %v85_v46  ;;  %244 = vmatpush1.msra.mxu1 %v217_v9  ;;  %v211_v15 = vld [vmem:[%s771_s4 + $0x90] sm:$0xff]  ;;  %v210_v16 = vld [vmem:[%s771_s4 + $0x88] sm:$0xff]  ;;  %v209_v17 = vld [vmem:[%s771_s4 + $0x80] sm:$0xff] }
  0x2a   :  { %156 = vmatprep.subr.mxu0 %v84_v47  ;;  %245 = vmatprep.subr.mxu1 %v216_v10  ;;  %v208_v18 = vld [vmem:[%s771_s4 + $0x78] sm:$0xff]  ;;  %v207_v19 = vld [vmem:[%s771_s4 + $0x70] sm:$0xff]  ;;  %v206_v20 = vld [vmem:[%s771_s4 + $0x68] sm:$0xff] }
  0x2b   :  { %157 = vmatpush2.msra.mxu0 %v83_v48  ;;  %246 = vmatpush1.msra.mxu1 %v215_v11  ;;  %v205_v22 = vld [vmem:[%s771_s4 + $0x60] sm:$0xff]  ;;  %v204_v23 = vld [vmem:[%s771_s4 + $0x58] sm:$0xff]  ;;  %v202_v25 = vld [vmem:[%s771_s4 + $0x48] sm:$0xff] }
  0x2c   :  { %158 = vmatprep.subr.mxu0 %v82_v49  ;;  %247 = vmatprep.subr.mxu1 %v214_v12  ;;  %v201_v26 = vld [vmem:[%s771_s4 + $0x40] sm:$0xff]  ;;  %v200_v27 = vld [vmem:[%s771_s4 + $0x38] sm:$0xff]  ;;  %v199_v28 = vld [vmem:[%s771_s4 + $0x30] sm:$0xff] }
  0x2d   :  { %159 = vmatpush2.msra.mxu0 %v81_v50  ;;  %248 = vmatpush1.msra.mxu1 %v213_v13  ;;  %v198_v29 = vld [vmem:[%s771_s4 + $0x28] sm:$0xff]  ;;  %v197_v30 = vld [vmem:[%s771_s4 + $0x20] sm:$0xff]  ;;  %v196_v31 = vld [vmem:[%s771_s4 + $0x18] sm:$0xff] }
  0x2e   :  { %160 = vmatprep.subr.mxu0 %v80_v51  ;;  %249 = vmatprep.subr.mxu1 %v212_v14  ;;  %v195_v32 = vld [vmem:[%s771_s4 + $0x10] sm:$0xff]  ;;  %v194_v33 = vld [vmem:[%s771_s4 + $0x8] sm:$0xff]  ;;  %v193_v34 = vld [vmem:[%s771_s4] sm:$0xff] }
  0x2f   :  { %161 = vmatpush2.msra.mxu0 %v79_v52  ;;  %250 = vmatpush1.msra.mxu1 %v211_v15  ;;  %v93_v38 = vld [vmem:[%s769_s2] sm:$0x3]  ;;  %s406_s2 = smov [#allocation2]  }
  0x30   :  { %162 = vmatprep.subr.mxu0 %v78_v53  ;;  %251 = vmatprep.subr.mxu1 %v210_v16  ;;  %v98_v40 = vrot.slane %v93_v38, %v97_v37  ;;  %v102_v41 = vrot.slane %v93_v38, %v101_v39  ;;  %v190_v48 = vld [vmem:[%s770_s3] sm:$0x3]  ;;  %s328_s17 = sshll.u32 %s406_s2, 4  ;;  %s329_s17 = int_to_ptr.vmem [resolvable:$true] %s328_s17 }
  0x31   :  { %163 = vmatpush2.msra.mxu0 %v77_v54  ;;  %252 = vmatpush1.msra.mxu1 %v209_v17  ;;  %s361_s19 = scalar_lea.vmem %s329_s17, 32  ;;  %p366_p1 = scmp.lt.s32.totalorder %s329_s17, %s329_s17 }
  0x32   :  { %164 = vmatprep.subr.mxu0 %v76_v55  ;;  %253 = vmatprep.subr.mxu1 %v208_v18  ;;  %p362_p0 = scmp.ne.s32.totalorder %s329_s17, %s361_s19  ;;  %p367_p2 = scmp.lt.s32.totalorder %s361_s19, %s361_s19 }
  0x33   :  { %165 = vmatpush2.msra.mxu0 %v75_v56  ;;  %254 = vmatpush1.msra.mxu1 %v207_v19 }
  0x34   :  { %166 = vmatprep.subr.mxu0 %v74_v57  ;;  %255 = vmatprep.subr.mxu1 %v206_v20  ;;  %p368_p3 = por %p367_p2, %p366_p1 }
  0x35   :  { %167 = vmatpush2.msra.mxu0 %v73_v58  ;;  %256 = vmatpush1.msra.mxu1 %v205_v22 }
  0x36   :  { %168 = vmatprep.subr.mxu0 %v72_v59  ;;  %257 = vmatprep.subr.mxu1 %v204_v23  ;;  %p369_p4 = pnand %p368_p3, %p362_p0 }
  0x37   :  { %169 = vmatpush2.msra.mxu0 %v71_v60 }
  0x38   :  { %170 = vmatprep.subr.mxu0 %v70_v61 }
  0x39   :  { %171 = vmatpush2.msra.mxu0 %v69_v62 }
  0x3a   :  { %172 = vmatprep.subr.mxu0 %v68_v63 }
  0x3b   :  { %173 = vmatpush2.msra.mxu0 %v67_v0 }
  0x3c   :  { %174 = vmatprep.subr.mxu0 %v66_v1 }
  0x3d   :  { %175 = vmatpush2.msra.mxu0 %v65_v2 }
  0x3e   :  { %176 = vmatprep.subr.mxu0 %v64_v3 }
  0x3f   :  { %177 = vmatpush2.msra.mxu0 %v63_v4 }
  0x40   :  { %178 = vmatprep.subr.mxu0 %v62_v5 }
  0x41   :  { %179 = vmatpush2.msra.mxu0 %v61_v6 }
  0x42   :  { %181 = vmatmul.mubr.f32.vlgmr.msra.gmra.mxu0 %v528_v24  ;;  %v203_v24 = vld [vmem:[%s771_s4 + $0x50] sm:$0xff] }
  0x43   :  { %258 = vmatpush1.msra.mxu1 %v203_v24 }
  0x44   :  { %259 = vmatprep.subr.mxu1 %v202_v25 }
  0x45   :  { %260 = vmatpush1.msra.mxu1 %v201_v26 }
  0x46   :  { %261 = vmatprep.subr.mxu1 %v200_v27 }
  0x47   :  { %262 = vmatpush1.msra.mxu1 %v199_v28 }
  0x48   :  { %263 = vmatprep.subr.mxu1 %v198_v29 }
  0x49   :  { %264 = vmatpush1.msra.mxu1 %v197_v30 }
  0x4a   :  { %265 = vmatprep.subr.mxu1 %v196_v31 }
  0x4b   :  { %266 = vmatpush1.msra.mxu1 %v195_v32 }
  0x4c   :  { %267 = vmatprep.subr.mxu1 %v194_v33 }
  0x4d   :  { %268 = vmatpush1.msra.mxu1 %v193_v34 }
 0x102   :  { %v182_v42 = vpop.f32.mrf.mxu0 }
 0x103   :  { %v183_v43 = vadd.f32 %v182_v42, %v98_v40 }
 0x104   :  { %v184_v44 = vpop.f32.mrf.mxu0 }
 0x105   :  { %308 = vst [vmem:[#allocation2] sm:$0x3] %v183_v43  ;;  %v185_v45 = vadd.f32 %v184_v44, %v102_v41 }
 0x107   :  { %v187_v46 = vmul.f32 0.5, %v185_v45  ;;  %309 = vst [vmem:[#allocation4] sm:$0x3] %v185_v45 }
 0x109   :  { %v188_v47 = vmul.f32 1.442695, %v187_v46 }
 0x10b   :  { %359 = vpow2.f32 %v188_v47 }
 0x118   :  { %v360_v49 = vpop.eup %359 }
 0x119   :  { %v191_v50 = vmul.f32 %v360_v49, %v190_v48 }
 0x11b   :  { %v192_v51 = vadd.f32 %v191_v50, %v183_v43 }
 0x11d   :  { %302 = vmatmul.mubr.f32.vlgmr.msra.gmra.mxu1 %v192_v51 }
 0x11e   :  { %372 = shalt.err (!%p369_p4)
}
 0x11f   :  { %331 = dma.vmem_to_hbm [thread:$0]  %s329_s17, 32, %s773_s6, [#allocation3]  }
 0x120   :  { %s381_s3 = scalar_lea.vmem %s339_s18, 32  ;;  %p386_p6 = scmp.lt.s32.totalorder %s339_s18, %s339_s18 }
 0x121   :  { %p382_p5 = scmp.ne.s32.totalorder %s339_s18, %s381_s3  ;;  %p387_p7 = scmp.lt.s32.totalorder %s381_s3, %s381_s3 }
 0x123   :  { %p388_p8 = por %p387_p7, %p386_p6 }
 0x125   :  { %p389_p9 = pnand %p388_p8, %p382_p5 }
 0x127   :  { %392 = shalt.err (!%p389_p9)
}
 0x128   :  { %341 = dma.vmem_to_hbm [thread:$0]  %s339_s18, 32, %s774_s7, [#allocation5]   ;;  %v225_v52 = vld [vmem:[%s772_s5] sm:$0x3] }
 0x129   :  { %v230_v53 = vrot.slane %v225_v52, %v97_v37  ;;  %v234_v54 = vrot.slane %v225_v52, %v101_v39 }
 0x1dd   :  { %v303_v55 = vpop.f32.mrf.mxu1 }
 0x1de   :  { %v304_v57 = vadd.f32 %v303_v55, %v230_v53 }
 0x1df   :  { %v305_v56 = vpop.f32.mrf.mxu1 }
 0x1e0   :  { %v306_v58 = vadd.f32 %v305_v56, %v234_v54 }
 0x1e2   :  { %v312_v59 = vcombine.low %v304_v57, %v306_v58 }
 0x1e4   :  { %355 = vst.sshfl [vmem:[%s775_s8] sm:$0x33 pattern:$0x76325410] %v312_v59 }
 0x1e5   :  { %401 = dma.done.wait [#allocation3], 32  }
 0x1e6   :  { %402 = vsyncadd [#allocation3], 4294967264 }
 0x1e7   :  { %403 = dma.done.wait [#allocation5], 32  }
 0x1e8   :  { %404 = vsyncadd [#allocation5], 4294967264 }
 0x1e9   :  { %352 = vsyncpa [#allocation3], 1 }
 0x1ea   :  { %353 = vsyncpa [#allocation5], 1 }

// kernel: vae_forward.17
= control target key start
LH: loop header
LB: loop body
LE: loop exit
PB: predicated region body
PF: predicated region fallthrough
CT: control target
= control target key end

     0   :  { %s949_s1 = inlined_call_operand.vmem [shape: bf16[640,128], index: 1, kind: input, shape index: {}]   ;;  %s950_s0 = inlined_call_operand.vmem [shape: bf16[32,640], index: 0, kind: input, shape index: {}]   ;;  %s951_s2 = inlined_call_operand.vmem [shape: f32[1,128], index: 2, kind: input, shape index: {}]   ;;  %s952_s3 = inlined_call_operand.vmem [shape: f32[32,128], index: 3, kind: output, shape index: {}]  }
   0x1   :  { %v710_v0 = vld [vmem:[%s949_s1 + $0x78] sm:$0xff]   ;;  %v714_v4 = vld [vmem:[%s949_s1 + $0x70] sm:$0xff]   ;;  %v718_v8 = vld [vmem:[%s949_s1 + $0x68] sm:$0xff]  }
   0x2   :  { %v711_v1 = vld [vmem:[%s949_s1 + $0x38] sm:$0xff]   ;;  %624 = vmatprep.subr.bf16.mxu0 %v710_v0  ;;  %v715_v5 = vld [vmem:[%s949_s1 + $0x30] sm:$0xff]   ;;  %v719_v9 = vld [vmem:[%s949_s1 + $0x28] sm:$0xff]  }
   0x3   :  { %v712_v2 = vld [vmem:[%s949_s1 + $0xf8] sm:$0xff]   ;;  %625 = vmatpush3.bf16.msra.mxu0 %v711_v1  ;;  %v716_v6 = vld [vmem:[%s949_s1 + $0xf0] sm:$0xff]   ;;  %v720_v10 = vld [vmem:[%s949_s1 + $0xe8] sm:$0xff]  }
   0x4   :  { %v713_v3 = vld [vmem:[%s949_s1 + $0xb8] sm:$0xff]   ;;  %652 = vmatprep.subr.bf16.mxu1 %v712_v2  ;;  %626 = vmatprep.subr.bf16.mxu0 %v714_v4  ;;  %v717_v7 = vld [vmem:[%s949_s1 + $0xb0] sm:$0xff]   ;;  %v721_v11 = vld [vmem:[%s949_s1 + $0xa8] sm:$0xff]  }
   0x5   :  { %653 = vmatpush3.bf16.msra.mxu1 %v713_v3  ;;  %v722_v12 = vld [vmem:[%s949_s1 + $0x60] sm:$0xff]   ;;  %v726_v16 = vld [vmem:[%s949_s1 + $0x58] sm:$0xff]   ;;  %v730_v20 = vld [vmem:[%s949_s1 + $0x50] sm:$0xff]  }
   0x6   :  { %654 = vmatprep.subr.bf16.mxu1 %v716_v6  ;;  %v723_v13 = vld [vmem:[%s949_s1 + $0x20] sm:$0xff]   ;;  %v727_v17 = vld [vmem:[%s949_s1 + $0x18] sm:$0xff]   ;;  %v731_v21 = vld [vmem:[%s949_s1 + $0x10] sm:$0xff]  }
   0x7   :  { %627 = vmatpush3.bf16.msra.mxu0 %v715_v5  ;;  %v724_v14 = vld [vmem:[%s949_s1 + $0xe0] sm:$0xff]   ;;  %v728_v18 = vld [vmem:[%s949_s1 + $0xd8] sm:$0xff]   ;;  %v732_v22 = vld [vmem:[%s949_s1 + $0xd0] sm:$0xff]  }
   0x8   :  { %628 = vmatprep.subr.bf16.mxu0 %v718_v8  ;;  %v725_v15 = vld [vmem:[%s949_s1 + $0xa0] sm:$0xff]   ;;  %v729_v19 = vld [vmem:[%s949_s1 + $0x98] sm:$0xff]   ;;  %v733_v23 = vld [vmem:[%s949_s1 + $0x90] sm:$0xff]  }
   0x9   :  { %655 = vmatpush3.bf16.msra.mxu1 %v717_v7  ;;  %v734_v24 = vld [vmem:[%s949_s1 + $0x48] sm:$0xff]   ;;  %v738_v28 = vld [vmem:[%s949_s1 + $0x40] sm:$0xff]   ;;  %v745_v34 = vld [vmem:[%s949_s1 + $0x138] sm:$0xff]  }
   0xa   :  { %656 = vmatprep.subr.bf16.mxu1 %v720_v10  ;;  %v735_v25 = vld [vmem:[%s949_s1 + $0x8] sm:$0xff]   ;;  %v739_v29 = vld [vmem:[%s949_s1] sm:$0xff]   ;;  %v749_v37 = vld [vmem:[%s949_s1 + $0x130] sm:$0xff]  }
   0xb   :  { %629 = vmatpush3.bf16.msra.mxu0 %v719_v9  ;;  %v736_v26 = vld [vmem:[%s949_s1 + $0xc8] sm:$0xff]   ;;  %v740_v30 = vld [vmem:[%s949_s1 + $0xc0] sm:$0xff]   ;;  %v752_v44 = vld [vmem:[%s949_s1 + $0x118] sm:$0xff]  }
   0xc   :  { %630 = vmatprep.subr.bf16.mxu0 %v722_v12  ;;  %v737_v27 = vld [vmem:[%s949_s1 + $0x88] sm:$0xff]   ;;  %v741_v31 = vld [vmem:[%s950_s0] ss:$20 sps:$4 sm:$0xff]   ;;  %v743_v32 = vld [vmem:[%s950_s0 + $0x4] ss:$20 sps:$4 sm:$0xff]  }
   0xd   :  { %657 = vmatpush3.bf16.msra.mxu1 %v721_v11  ;;  %v744_v33 = vld [vmem:[%s949_s1 + $0x80] sm:$0xff]   ;;  %438 = vmatprep.mubr.bf16.mxu0 %v743_v32  ;;  %v746_v35 = vld [vmem:[%s950_s0 + $0x8] ss:$20 sps:$4 sm:$0xff]   ;;  %v759_v46 = vld [vmem:[%s949_s1 + $0x110] sm:$0xff]  }
   0xe   :  { %658 = vmatprep.subr.bf16.mxu1 %v724_v14  ;;  %v748_v36 = vld [vmem:[%s950_s0 + $0xc] ss:$20 sps:$4 sm:$0xff]   ;;  %v755_v41 = vld [vmem:[%s950_s0 + $0x28] ss:$20 sps:$4 sm:$0xff]   ;;  %v758_v43 = vld [vmem:[%s950_s0 + $0x30] ss:$20 sps:$4 sm:$0xff]  }
   0xf   :  { %631 = vmatpush3.bf16.msra.mxu0 %v723_v13  ;;  %487 = vmatprep.mubr.bf16.mxu1 %v748_v36  ;;  %v750_v38 = vld [vmem:[%s949_s1 + $0x128] sm:$0xff]   ;;  %v751_v39 = vld [vmem:[%s949_s1 + $0x120] sm:$0xff]  }
  0x10   :  { %632 = vmatprep.subr.bf16.mxu0 %v726_v16  ;;  %v753_v40 = vld [vmem:[%s950_s0 + $0x2c] ss:$20 sps:$4 sm:$0xff]   ;;  %v756_v42 = vld [vmem:[%s950_s0 + $0x34] ss:$20 sps:$4 sm:$0xff]   ;;  %v762_v45 = vld [vmem:[%s950_s0 + $0x10] ss:$20 sps:$4 sm:$0xff]  }
  0x11   :  { %659 = vmatpush3.bf16.msra.mxu1 %v725_v15  ;;  %v760_v47 = vld [vmem:[%s949_s1 + $0x108] sm:$0xff]   ;;  %v761_v48 = vld [vmem:[%s949_s1 + $0x100] sm:$0xff]  }
  0x12   :  { %660 = vmatprep.subr.bf16.mxu1 %v728_v18  ;;  %v763_v49 = vld [vmem:[%s950_s0 + $0x38] ss:$20 sps:$4 sm:$0xff]   ;;  %v573_v3 = vld [vmem:[%s951_s2] ss:$0 sm:$0xff] }
  0x13   :  { %633 = vmatpush3.bf16.msra.mxu0 %v727_v17 }
  0x14   :  { %634 = vmatprep.subr.bf16.mxu0 %v730_v20 }
  0x15   :  { %661 = vmatpush3.bf16.msra.mxu1 %v729_v19 }
  0x16   :  { %662 = vmatprep.subr.bf16.mxu1 %v732_v22 }
  0x17   :  { %635 = vmatpush3.bf16.msra.mxu0 %v731_v21 }
  0x18   :  { %636 = vmatprep.subr.bf16.mxu0 %v734_v24 }
  0x19   :  { %663 = vmatpush3.bf16.msra.mxu1 %v733_v23 }
  0x1a   :  { %664 = vmatprep.subr.bf16.mxu1 %v736_v26 }
  0x1b   :  { %637 = vmatpush3.bf16.msra.mxu0 %v735_v25 }
  0x1c   :  { %638 = vmatprep.subr.bf16.mxu0 %v738_v28 }
  0x1d   :  { %665 = vmatpush3.bf16.msra.mxu1 %v737_v27 }
  0x1e   :  { %666 = vmatprep.subr.bf16.mxu1 %v740_v30 }
  0x1f   :  { %639 = vmatpush3.bf16.msra.mxu0 %v739_v29 }
  0x20   :  { %690 = vmatprep.subr.bf16.mxu0 %v745_v34 }
  0x21   :  { %667 = vmatpush3.bf16.msra.mxu1 %v744_v33 }
  0x22   :  { %439 = vmatmul.mubr.bf16.vlgmr.msra.gmra.mxu0 %v741_v31 }
  0x23   :  { %691 = vmatpush3.bf16.msra.mxu0 %v745_v34  ;;  %446 = vmatprep.mubr.bf16.mxu0 %v753_v40 }
  0x24   :  { %488 = vmatmul.mubr.bf16.vlgmr.msra.gmra.mxu1 %v746_v35  ;;  %692 = vmatprep.subr.bf16.mxu0 %v749_v37 }
  0x25   :  { %495 = vmatprep.mubr.bf16.mxu1 %v756_v42 }
  0x27   :  { %693 = vmatpush3.bf16.msra.mxu0 %v749_v37 }
  0x28   :  { %694 = vmatprep.subr.bf16.mxu0 %v750_v38 }
  0x2a   :  { %447 = vmatmul.mubr.bf16.gmra.mxu0 %v755_v41 }
  0x2b   :  { %695 = vmatpush3.bf16.msra.mxu0 %v750_v38  ;;  %706 = vmatprep.mubr.bf16.mxu0 %v762_v45 }
  0x2c   :  { %696 = vmatprep.subr.bf16.mxu0 %v751_v39  ;;  %496 = vmatmul.mubr.bf16.gmra.mxu1 %v758_v43 }
  0x2f   :  { %697 = vmatpush3.bf16.msra.mxu0 %v751_v39 }
  0x30   :  { %698 = vmatprep.subr.bf16.mxu0 %v752_v44 }
  0x33   :  { %699 = vmatpush3.bf16.msra.mxu0 %v752_v44 }
  0x34   :  { %700 = vmatprep.subr.bf16.mxu0 %v759_v46 }
  0x37   :  { %701 = vmatpush3.bf16.msra.mxu0 %v759_v46 }
  0x38   :  { %702 = vmatprep.subr.bf16.mxu0 %v760_v47 }
  0x3b   :  { %703 = vmatpush3.bf16.msra.mxu0 %v760_v47 }
  0x3c   :  { %704 = vmatprep.subr.bf16.mxu0 %v761_v48 }
  0x3f   :  { %705 = vmatpush3.bf16.msra.mxu0 %v761_v48 }
  0x42   :  { %707 = vmatmul.mubr.bf16.vlgmr.msra.gmra.mxu0 %v763_v49 }
  0xe2   :  { %v640_v50 = vpop.f32.mrf.mxu0 }
  0xe4   :  { %v641_v51 = vpop.f32.mrf.mxu0  ;;  %v668_v52 = vpop.f32.mrf.mxu1 }
  0xe5   :  { %v642_v2 = vadd.f32 %v641_v51, %v640_v50 }
  0xe6   :  { %v643_v53 = vpop.f32.mrf.mxu0  ;;  %v669_v54 = vpop.f32.mrf.mxu1 }
  0xe7   :  { %v441_v9 = vadd.f32 %v642_v2, %v573_v3  ;;  %v670_v10 = vadd.f32 %v669_v54, %v668_v52 }
  0xe8   :  { %v644_v55 = vpop.f32.mrf.mxu0  ;;  %v671_v56 = vpop.f32.mrf.mxu1 }
  0xe9   :  { %v645_v7 = vadd.f32 %v644_v55, %v643_v53  ;;  %v490_v18 = vadd.f32 %v670_v10, %v441_v9 }
  0xea   :  { %v646_v57 = vpop.f32.mrf.mxu0  ;;  %v672_v58 = vpop.f32.mrf.mxu1 }
  0xeb   :  { %v444_v14 = vadd.f32 %v645_v7, %v573_v3  ;;  %v673_v15 = vadd.f32 %v672_v58, %v671_v56 }
  0xec   :  { %v647_v59 = vpop.f32.mrf.mxu0  ;;  %v674_v60 = vpop.f32.mrf.mxu1 }
  0xed   :  { %v648_v63 = vadd.f32 %v647_v59, %v646_v57  ;;  %v493_v24 = vadd.f32 %v673_v15, %v444_v14 }
  0xee   :  { %v649_v61 = vpop.f32.mrf.mxu0  ;;  %v675_v62 = vpop.f32.mrf.mxu1 }
  0xef   :  { %v449_v4 = vadd.f32 %v648_v63, %v573_v3  ;;  %v676_v5 = vadd.f32 %v675_v62, %v674_v60 }
  0xf0   :  { %v650_v0 = vpop.f32.mrf.mxu0  ;;  %v677_v1 = vpop.f32.mrf.mxu1 }
  0xf1   :  { %v651_v6 = vadd.f32 %v650_v0, %v649_v61  ;;  %v498_v13 = vadd.f32 %v676_v5, %v449_v4 }
  0xf2   :  { %v678_v8 = vpop.f32.mrf.mxu1 }
  0xf3   :  { %v452_v11 = vadd.f32 %v651_v6, %v573_v3  ;;  %v679_v12 = vadd.f32 %v678_v8, %v677_v1 }
  0xf5   :  { %v501_v22 = vadd.f32 %v679_v12, %v452_v11 }
 0x102   :  { %v708_v16 = vpop.f32.mrf.mxu0 }
 0x103   :  { %v547_v17 = vadd.f32 %v708_v16, %v498_v13 }
 0x104   :  { %v538_v19 = vpop.f32.mrf.mxu0 }
 0x105   :  { %vm555_vm0 = vcmp.ge.f32.partialorder %v547_v17, 0.0  ;;  %v559_v20 = vmul.f32 0.01, %v547_v17  ;;  %v539_v21 = vadd.f32 %v538_v19, %v490_v18 }
 0x106   :  { %v709_v23 = vpop.f32.mrf.mxu0 }
 0x107   :  { %v563_v25 = vsel %vm555_vm0, %v547_v17, %v559_v20  ;;  %vm553_vm1 = vcmp.ge.f32.partialorder %v539_v21, 0.0  ;;  %v557_v26 = vmul.f32 0.01, %v539_v21  ;;  %v550_v27 = vadd.f32 %v709_v23, %v501_v22 }
 0x108   :  { %567 = vst [vmem:[%s952_s3 + $0x10] sm:$0xff] %v563_v25  ;;  %v541_v28 = vpop.f32.mrf.mxu0 }
 0x109   :  { %v561_v29 = vsel %vm553_vm1, %v539_v21, %v557_v26  ;;  %vm556_vm2 = vcmp.ge.f32.partialorder %v550_v27, 0.0  ;;  %v560_v30 = vmul.f32 0.01, %v550_v27  ;;  %v542_v31 = vadd.f32 %v541_v28, %v493_v24 }
 0x10a   :  { %565 = vst [vmem:[%s952_s3] sm:$0xff] %v561_v29 }
 0x10b   :  { %v564_v32 = vsel %vm556_vm2, %v550_v27, %v560_v30  ;;  %vm554_vm3 = vcmp.ge.f32.partialorder %v542_v31, 0.0  ;;  %v558_v33 = vmul.f32 0.01, %v542_v31 }
 0x10c   :  { %568 = vst [vmem:[%s952_s3 + $0x18] sm:$0xff] %v564_v32 }
 0x10d   :  { %v562_v34 = vsel %vm554_vm3, %v542_v31, %v558_v33 }
 0x10e   :  { %566 = vst [vmem:[%s952_s3 + $0x8] sm:$0xff] %v562_v34 }

// kernel: vae_forward.18
= control target key start
LH: loop header
LB: loop body
LE: loop exit
PB: predicated region body
PF: predicated region fallthrough
CT: control target
= control target key end

     0   :  { %s1286_s1 = inlined_call_operand.vmem [shape: bf16[512,128], index: 1, kind: input, shape index: {}]   ;;  %s1287_s0 = inlined_call_operand.vmem [shape: bf16[128,512], index: 0, kind: input, shape index: {}]   ;;  %s1288_s2 = inlined_call_operand.vmem [shape: f32[1,128], index: 2, kind: input, shape index: {}]   ;;  %s1289_s3 = inlined_call_operand.vmem [shape: f32[128,128], index: 3, kind: output, shape index: {}]  }
   0x1   :  { %v925_v0 = vld [vmem:[%s1286_s1 + $0x78] sm:$0xff]   ;;  %v929_v4 = vld [vmem:[%s1286_s1 + $0x70] sm:$0xff]   ;;  %v933_v8 = vld [vmem:[%s1286_s1 + $0x68] sm:$0xff]  }
   0x2   :  { %v926_v1 = vld [vmem:[%s1286_s1 + $0xf8] sm:$0xff]   ;;  %797 = vmatprep.subr.bf16.mxu0 %v925_v0  ;;  %v930_v5 = vld [vmem:[%s1286_s1 + $0xf0] sm:$0xff]   ;;  %v934_v9 = vld [vmem:[%s1286_s1 + $0xe8] sm:$0xff]  }
   0x3   :  { %v927_v2 = vld [vmem:[%s1286_s1 + $0x38] sm:$0xff]   ;;  %861 = vmatprep.subr.bf16.mxu1 %v926_v1  ;;  %v931_v6 = vld [vmem:[%s1286_s1 + $0x30] sm:$0xff]   ;;  %v935_v10 = vld [vmem:[%s1286_s1 + $0x28] sm:$0xff]  }
   0x4   :  { %v928_v3 = vld [vmem:[%s1286_s1 + $0xb8] sm:$0xff]   ;;  %798 = vmatpush3.bf16.msra.mxu0 %v927_v2  ;;  %v932_v7 = vld [vmem:[%s1286_s1 + $0xb0] sm:$0xff]   ;;  %v936_v11 = vld [vmem:[%s1286_s1 + $0xa8] sm:$0xff]  }
   0x5   :  { %862 = vmatpush3.bf16.msra.mxu1 %v928_v3  ;;  %799 = vmatprep.subr.bf16.mxu0 %v929_v4  ;;  %v937_v12 = vld [vmem:[%s1286_s1 + $0x60] sm:$0xff]   ;;  %v941_v16 = vld [vmem:[%s1286_s1 + $0x58] sm:$0xff]   ;;  %v945_v20 = vld [vmem:[%s1286_s1 + $0x50] sm:$0xff]  }
   0x6   :  { %863 = vmatprep.subr.bf16.mxu1 %v930_v5  ;;  %v938_v13 = vld [vmem:[%s1286_s1 + $0xe0] sm:$0xff]   ;;  %v942_v17 = vld [vmem:[%s1286_s1 + $0xd8] sm:$0xff]   ;;  %v946_v21 = vld [vmem:[%s1286_s1 + $0xd0] sm:$0xff]  }
   0x7   :  { %v939_v14 = vld [vmem:[%s1286_s1 + $0x20] sm:$0xff]   ;;  %v943_v18 = vld [vmem:[%s1286_s1 + $0x18] sm:$0xff]   ;;  %v947_v22 = vld [vmem:[%s1286_s1 + $0x10] sm:$0xff]  }
   0x8   :  { %800 = vmatpush3.bf16.msra.mxu0 %v931_v6  ;;  %v940_v15 = vld [vmem:[%s1286_s1 + $0xa0] sm:$0xff]   ;;  %v944_v19 = vld [vmem:[%s1286_s1 + $0x98] sm:$0xff]   ;;  %v948_v23 = vld [vmem:[%s1286_s1 + $0x90] sm:$0xff]  }
   0x9   :  { %864 = vmatpush3.bf16.msra.mxu1 %v932_v7  ;;  %801 = vmatprep.subr.bf16.mxu0 %v933_v8  ;;  %v949_v24 = vld [vmem:[%s1286_s1 + $0x48] sm:$0xff]   ;;  %v953_v28 = vld [vmem:[%s1286_s1 + $0x40] sm:$0xff]  }
   0xa   :  { %865 = vmatprep.subr.bf16.mxu1 %v934_v9  ;;  %v950_v25 = vld [vmem:[%s1286_s1 + $0xc8] sm:$0xff]   ;;  %v954_v29 = vld [vmem:[%s1286_s1 + $0xc0] sm:$0xff]  }
   0xb   :  { %v951_v26 = vld [vmem:[%s1286_s1 + $0x8] sm:$0xff]   ;;  %v955_v30 = vld [vmem:[%s1286_s1] sm:$0xff]  }
   0xc   :  { %802 = vmatpush3.bf16.msra.mxu0 %v935_v10  ;;  %v952_v27 = vld [vmem:[%s1286_s1 + $0x88] sm:$0xff]   ;;  %v956_v31 = vld [vmem:[%s1286_s1 + $0x80] sm:$0xff]  }
   0xd   :  { %866 = vmatpush3.bf16.msra.mxu1 %v936_v11  ;;  %803 = vmatprep.subr.bf16.mxu0 %v937_v12  ;;  %v957_v32 = vld [vmem:[%s1287_s0] ss:$16 sps:$4 sm:$0xff]   ;;  %v959_v33 = vld [vmem:[%s1287_s0 + $0x4] ss:$16 sps:$4 sm:$0xff]   ;;  %v960_v34 = vld [vmem:[%s1287_s0 + $0x8] ss:$16 sps:$4 sm:$0xff]  }
   0xe   :  { %867 = vmatprep.subr.bf16.mxu1 %v938_v13  ;;  %v962_v35 = vld [vmem:[%s1287_s0 + $0xc] ss:$16 sps:$4 sm:$0xff]   ;;  %502 = vmatprep.mubr.bf16.mxu0 %v959_v33  ;;  %v963_v36 = vld [vmem:[%s1287_s0 + $0x24] ss:$16 sps:$4 sm:$0xff]   ;;  %v967_v38 = vld [vmem:[%s1287_s0 + $0x20] ss:$16 sps:$4 sm:$0xff]  }
   0xf   :  { %599 = vmatprep.mubr.bf16.mxu1 %v962_v35  ;;  %v965_v37 = vld [vmem:[%s1287_s0 + $0x2c] ss:$16 sps:$4 sm:$0xff]   ;;  %v968_v39 = vld [vmem:[%s1287_s0 + $0x28] ss:$16 sps:$4 sm:$0xff]   ;;  %v969_v40 = vld [vmem:[%s1287_s0 + $0x44] ss:$16 sps:$4 sm:$0xff]  }
  0x10   :  { %804 = vmatpush3.bf16.msra.mxu0 %v939_v14  ;;  %v971_v41 = vld [vmem:[%s1287_s0 + $0x4c] ss:$16 sps:$4 sm:$0xff]   ;;  %v973_v42 = vld [vmem:[%s1287_s0 + $0x40] ss:$16 sps:$4 sm:$0xff]   ;;  %v974_v43 = vld [vmem:[%s1287_s0 + $0x48] ss:$16 sps:$4 sm:$0xff]  }
  0x11   :  { %868 = vmatpush3.bf16.msra.mxu1 %v940_v15  ;;  %805 = vmatprep.subr.bf16.mxu0 %v941_v16  ;;  %v975_v44 = vld [vmem:[%s1287_s0 + $0x64] ss:$16 sps:$4 sm:$0xff]   ;;  %v977_v45 = vld [vmem:[%s1287_s0 + $0x6c] ss:$16 sps:$4 sm:$0xff]   ;;  %v979_v46 = vld [vmem:[%s1287_s0 + $0x60] ss:$16 sps:$4 sm:$0xff]  }
  0x12   :  { %869 = vmatprep.subr.bf16.mxu1 %v942_v17  ;;  %v980_v47 = vld [vmem:[%s1287_s0 + $0x68] ss:$16 sps:$4 sm:$0xff]   ;;  %v981_v48 = vld [vmem:[%s1287_s0 + $0x84] ss:$16 sps:$4 sm:$0xff]   ;;  %v983_v49 = vld [vmem:[%s1287_s0 + $0x8c] ss:$16 sps:$4 sm:$0xff]  }
  0x13   :  { %v985_v50 = vld [vmem:[%s1287_s0 + $0x80] ss:$16 sps:$4 sm:$0xff]   ;;  %v986_v51 = vld [vmem:[%s1287_s0 + $0x88] ss:$16 sps:$4 sm:$0xff]   ;;  %v987_v52 = vld [vmem:[%s1287_s0 + $0xa4] ss:$16 sps:$4 sm:$0xff]  }
  0x14   :  { %806 = vmatpush3.bf16.msra.mxu0 %v943_v18  ;;  %v989_v53 = vld [vmem:[%s1287_s0 + $0xac] ss:$16 sps:$4 sm:$0xff]   ;;  %v991_v54 = vld [vmem:[%s1287_s0 + $0xa0] ss:$16 sps:$4 sm:$0xff]   ;;  %v992_v55 = vld [vmem:[%s1287_s0 + $0xa8] ss:$16 sps:$4 sm:$0xff]  }
  0x15   :  { %870 = vmatpush3.bf16.msra.mxu1 %v944_v19  ;;  %807 = vmatprep.subr.bf16.mxu0 %v945_v20  ;;  %v993_v56 = vld [vmem:[%s1287_s0 + $0xc4] ss:$16 sps:$4 sm:$0xff]   ;;  %v995_v57 = vld [vmem:[%s1287_s0 + $0xcc] ss:$16 sps:$4 sm:$0xff]   ;;  %v997_v58 = vld [vmem:[%s1287_s0 + $0xc0] ss:$16 sps:$4 sm:$0xff]  }
  0x16   :  { %871 = vmatprep.subr.bf16.mxu1 %v946_v21  ;;  %v998_v59 = vld [vmem:[%s1287_s0 + $0xc8] ss:$16 sps:$4 sm:$0xff]   ;;  %v999_v60 = vld [vmem:[%s1287_s0 + $0xe4] ss:$16 sps:$4 sm:$0xff]   ;;  %v1001_v61 = vld [vmem:[%s1287_s0 + $0xec] ss:$16 sps:$4 sm:$0xff]  }
  0x17   :  { %v1003_v62 = vld [vmem:[%s1287_s0 + $0xe0] ss:$16 sps:$4 sm:$0xff]   ;;  %v1004_v63 = vld [vmem:[%s1287_s0 + $0xe8] ss:$16 sps:$4 sm:$0xff]  }
  0x18   :  { %808 = vmatpush3.bf16.msra.mxu0 %v947_v22  ;;  %v1220_v2 = vld [vmem:[%s1288_s2] ss:$0 sm:$0xff] }
  0x19   :  { %872 = vmatpush3.bf16.msra.mxu1 %v948_v23  ;;  %809 = vmatprep.subr.bf16.mxu0 %v949_v24 }
  0x1a   :  { %873 = vmatprep.subr.bf16.mxu1 %v950_v25 }
  0x1c   :  { %810 = vmatpush3.bf16.msra.mxu0 %v951_v26 }
  0x1d   :  { %874 = vmatpush3.bf16.msra.mxu1 %v952_v27  ;;  %811 = vmatprep.subr.bf16.mxu0 %v953_v28 }
  0x1e   :  { %875 = vmatprep.subr.bf16.mxu1 %v954_v29 }
  0x20   :  { %812 = vmatpush3.bf16.msra.mxu0 %v955_v30 }
  0x21   :  { %876 = vmatpush3.bf16.msra.mxu1 %v956_v31 }
  0x23   :  { %503 = vmatmul.mubr.bf16.vlgmr.msra.gmra.mxu0 %v957_v32 }
  0x24   :  { %600 = vmatmul.mubr.bf16.vlgmr.msra.gmra.mxu1 %v960_v34  ;;  %510 = vmatprep.mubr.bf16.mxu0 %v963_v36 }
  0x25   :  { %607 = vmatprep.mubr.bf16.mxu1 %v965_v37 }
  0x2b   :  { %511 = vmatmul.mubr.bf16.gmra.mxu0 %v967_v38 }
  0x2c   :  { %608 = vmatmul.mubr.bf16.gmra.mxu1 %v968_v39  ;;  %518 = vmatprep.mubr.bf16.mxu0 %v969_v40 }
  0x2d   :  { %615 = vmatprep.mubr.bf16.mxu1 %v971_v41 }
  0x33   :  { %519 = vmatmul.mubr.bf16.gmra.mxu0 %v973_v42 }
  0x34   :  { %616 = vmatmul.mubr.bf16.gmra.mxu1 %v974_v43  ;;  %526 = vmatprep.mubr.bf16.mxu0 %v975_v44 }
  0x35   :  { %623 = vmatprep.mubr.bf16.mxu1 %v977_v45 }
  0x3b   :  { %527 = vmatmul.mubr.bf16.gmra.mxu0 %v979_v46 }
  0x3c   :  { %624 = vmatmul.mubr.bf16.gmra.mxu1 %v980_v47  ;;  %534 = vmatprep.mubr.bf16.mxu0 %v981_v48 }
  0x3d   :  { %631 = vmatprep.mubr.bf16.mxu1 %v983_v49 }
  0x43   :  { %535 = vmatmul.mubr.bf16.gmra.mxu0 %v985_v50 }
  0x44   :  { %632 = vmatmul.mubr.bf16.gmra.mxu1 %v986_v51  ;;  %542 = vmatprep.mubr.bf16.mxu0 %v987_v52 }
  0x45   :  { %639 = vmatprep.mubr.bf16.mxu1 %v989_v53 }
  0x4b   :  { %543 = vmatmul.mubr.bf16.gmra.mxu0 %v991_v54 }
  0x4c   :  { %640 = vmatmul.mubr.bf16.gmra.mxu1 %v992_v55  ;;  %550 = vmatprep.mubr.bf16.mxu0 %v993_v56 }
  0x4d   :  { %647 = vmatprep.mubr.bf16.mxu1 %v995_v57 }
  0x53   :  { %551 = vmatmul.mubr.bf16.gmra.mxu0 %v997_v58 }
  0x54   :  { %648 = vmatmul.mubr.bf16.gmra.mxu1 %v998_v59  ;;  %558 = vmatprep.mubr.bf16.mxu0 %v999_v60 }
  0x55   :  { %655 = vmatprep.mubr.bf16.mxu1 %v1001_v61 }
  0x5b   :  { %559 = vmatmul.mubr.bf16.gmra.mxu0 %v1003_v62 }
  0x5c   :  { %656 = vmatmul.mubr.bf16.gmra.mxu1 %v1004_v63 }
  0xe3   :  { %v813_v0 = vpop.f32.mrf.mxu0 }
  0xe4   :  { %v877_v1 = vpop.f32.mrf.mxu1 }
  0xe5   :  { %v814_v3 = vpop.f32.mrf.mxu0 }
  0xe6   :  { %v815_v4 = vadd.f32 %v814_v3, %v813_v0  ;;  %v878_v5 = vpop.f32.mrf.mxu1 }
  0xe7   :  { %v816_v6 = vpop.f32.mrf.mxu0  ;;  %v879_v8 = vadd.f32 %v878_v5, %v877_v1 }
  0xe8   :  { %v505_v7 = vadd.f32 %v815_v4, %v1220_v2  ;;  %v880_v9 = vpop.f32.mrf.mxu1 }
  0xe9   :  { %v817_v10 = vpop.f32.mrf.mxu0 }
  0xea   :  { %v602_v11 = vadd.f32 %v879_v8, %v505_v7  ;;  %v818_v12 = vadd.f32 %v817_v10, %v816_v6  ;;  %v881_v13 = vpop.f32.mrf.mxu1 }
  0xeb   :  { %v819_v14 = vpop.f32.mrf.mxu0  ;;  %v882_v17 = vadd.f32 %v881_v13, %v880_v9 }
  0xec   :  { %vm664_vm0 = vcmp.ge.f32.partialorder %v602_v11, 0.0  ;;  %v680_v15 = vmul.f32 0.01, %v602_v11  ;;  %v508_v16 = vadd.f32 %v818_v12, %v1220_v2  ;;  %v883_v18 = vpop.f32.mrf.mxu1 }
  0xed   :  { %v820_v19 = vpop.f32.mrf.mxu0 }
  0xee   :  { %v696_v20 = vsel %vm664_vm0, %v602_v11, %v680_v15  ;;  %v605_v21 = vadd.f32 %v882_v17, %v508_v16  ;;  %v821_v22 = vadd.f32 %v820_v19, %v819_v14  ;;  %v884_v23 = vpop.f32.mrf.mxu1 }
  0xef   :  { %712 = vst [vmem:[%s1289_s3] sm:$0xff] %v696_v20  ;;  %v822_v24 = vpop.f32.mrf.mxu0  ;;  %v885_v27 = vadd.f32 %v884_v23, %v883_v18 }
  0xf0   :  { %vm665_vm1 = vcmp.ge.f32.partialorder %v605_v21, 0.0  ;;  %v681_v25 = vmul.f32 0.01, %v605_v21  ;;  %v513_v26 = vadd.f32 %v821_v22, %v1220_v2  ;;  %v886_v28 = vpop.f32.mrf.mxu1 }
  0xf1   :  { %v823_v29 = vpop.f32.mrf.mxu0 }
  0xf2   :  { %v697_v30 = vsel %vm665_vm1, %v605_v21, %v681_v25  ;;  %v610_v31 = vadd.f32 %v885_v27, %v513_v26  ;;  %v824_v32 = vadd.f32 %v823_v29, %v822_v24  ;;  %v887_v33 = vpop.f32.mrf.mxu1 }
  0xf3   :  { %713 = vst [vmem:[%s1289_s3 + $0x8] sm:$0xff] %v697_v30  ;;  %v825_v34 = vpop.f32.mrf.mxu0  ;;  %v888_v37 = vadd.f32 %v887_v33, %v886_v28 }
  0xf4   :  { %vm666_vm2 = vcmp.ge.f32.partialorder %v610_v31, 0.0  ;;  %v682_v35 = vmul.f32 0.01, %v610_v31  ;;  %v516_v36 = vadd.f32 %v824_v32, %v1220_v2  ;;  %v889_v38 = vpop.f32.mrf.mxu1 }
  0xf5   :  { %v826_v39 = vpop.f32.mrf.mxu0 }
  0xf6   :  { %v698_v40 = vsel %vm666_vm2, %v610_v31, %v682_v35  ;;  %v613_v41 = vadd.f32 %v888_v37, %v516_v36  ;;  %v827_v42 = vadd.f32 %v826_v39, %v825_v34  ;;  %v890_v43 = vpop.f32.mrf.mxu1 }
  0xf7   :  { %714 = vst [vmem:[%s1289_s3 + $0x10] sm:$0xff] %v698_v40  ;;  %v828_v44 = vpop.f32.mrf.mxu0  ;;  %v891_v47 = vadd.f32 %v890_v43, %v889_v38 }
  0xf8   :  { %vm667_vm3 = vcmp.ge.f32.partialorder %v613_v41, 0.0  ;;  %v683_v45 = vmul.f32 0.01, %v613_v41  ;;  %v521_v46 = vadd.f32 %v827_v42, %v1220_v2  ;;  %v892_v48 = vpop.f32.mrf.mxu1 }
  0xf9   :  { %v829_v49 = vpop.f32.mrf.mxu0 }
  0xfa   :  { %v699_v50 = vsel %vm667_vm3, %v613_v41, %v683_v45  ;;  %v618_v51 = vadd.f32 %v891_v47, %v521_v46  ;;  %v830_v52 = vadd.f32 %v829_v49, %v828_v44  ;;  %v893_v53 = vpop.f32.mrf.mxu1 }
  0xfb   :  { %715 = vst [vmem:[%s1289_s3 + $0x18] sm:$0xff] %v699_v50  ;;  %v831_v54 = vpop.f32.mrf.mxu0  ;;  %v894_v57 = vadd.f32 %v893_v53, %v892_v48 }
  0xfc   :  { %vm668_vm4 = vcmp.ge.f32.partialorder %v618_v51, 0.0  ;;  %v684_v55 = vmul.f32 0.01, %v618_v51  ;;  %v524_v56 = vadd.f32 %v830_v52, %v1220_v2  ;;  %v895_v58 = vpop.f32.mrf.mxu1 }
  0xfd   :  { %v832_v59 = vpop.f32.mrf.mxu0 }
  0xfe   :  { %v700_v60 = vsel %vm668_vm4, %v618_v51, %v684_v55  ;;  %v621_v61 = vadd.f32 %v894_v57, %v524_v56  ;;  %v833_v62 = vadd.f32 %v832_v59, %v831_v54  ;;  %v896_v63 = vpop.f32.mrf.mxu1 }
  0xff   :  { %716 = vst [vmem:[%s1289_s3 + $0x20] sm:$0xff] %v700_v60  ;;  %v834_v0 = vpop.f32.mrf.mxu0  ;;  %v897_v4 = vadd.f32 %v896_v63, %v895_v58 }
 0x100   :  { %vm669_vm5 = vcmp.ge.f32.partialorder %v621_v61, 0.0  ;;  %v685_v1 = vmul.f32 0.01, %v621_v61  ;;  %v529_v3 = vadd.f32 %v833_v62, %v1220_v2  ;;  %v898_v5 = vpop.f32.mrf.mxu1 }
 0x101   :  { %v835_v6 = vpop.f32.mrf.mxu0 }
 0x102   :  { %v701_v7 = vsel %vm669_vm5, %v621_v61, %v685_v1  ;;  %v626_v8 = vadd.f32 %v897_v4, %v529_v3  ;;  %v836_v9 = vadd.f32 %v835_v6, %v834_v0  ;;  %v899_v10 = vpop.f32.mrf.mxu1 }
 0x103   :  { %717 = vst [vmem:[%s1289_s3 + $0x28] sm:$0xff] %v701_v7  ;;  %v837_v11 = vpop.f32.mrf.mxu0  ;;  %v900_v14 = vadd.f32 %v899_v10, %v898_v5 }
 0x104   :  { %vm670_vm6 = vcmp.ge.f32.partialorder %v626_v8, 0.0  ;;  %v686_v12 = vmul.f32 0.01, %v626_v8  ;;  %v532_v13 = vadd.f32 %v836_v9, %v1220_v2  ;;  %v901_v15 = vpop.f32.mrf.mxu1 }
 0x105   :  { %v838_v16 = vpop.f32.mrf.mxu0 }
 0x106   :  { %v702_v17 = vsel %vm670_vm6, %v626_v8, %v686_v12  ;;  %v629_v18 = vadd.f32 %v900_v14, %v532_v13  ;;  %v839_v19 = vadd.f32 %v838_v16, %v837_v11  ;;  %v902_v20 = vpop.f32.mrf.mxu1 }
 0x107   :  { %718 = vst [vmem:[%s1289_s3 + $0x30] sm:$0xff] %v702_v17  ;;  %v840_v21 = vpop.f32.mrf.mxu0  ;;  %v903_v24 = vadd.f32 %v902_v20, %v901_v15 }
 0x108   :  { %vm671_vm7 = vcmp.ge.f32.partialorder %v629_v18, 0.0  ;;  %v687_v22 = vmul.f32 0.01, %v629_v18  ;;  %v537_v23 = vadd.f32 %v839_v19, %v1220_v2  ;;  %v904_v25 = vpop.f32.mrf.mxu1 }
 0x109   :  { %v841_v26 = vpop.f32.mrf.mxu0 }
 0x10a   :  { %v703_v27 = vsel %vm671_vm7, %v629_v18, %v687_v22  ;;  %v634_v28 = vadd.f32 %v903_v24, %v537_v23  ;;  %v842_v29 = vadd.f32 %v841_v26, %v840_v21  ;;  %v905_v30 = vpop.f32.mrf.mxu1 }
 0x10b   :  { %719 = vst [vmem:[%s1289_s3 + $0x38] sm:$0xff] %v703_v27  ;;  %v843_v31 = vpop.f32.mrf.mxu0  ;;  %v906_v34 = vadd.f32 %v905_v30, %v904_v25 }
 0x10c   :  { %vm672_vm8 = vcmp.ge.f32.partialorder %v634_v28, 0.0  ;;  %v688_v32 = vmul.f32 0.01, %v634_v28  ;;  %v540_v33 = vadd.f32 %v842_v29, %v1220_v2  ;;  %v907_v35 = vpop.f32.mrf.mxu1 }
 0x10d   :  { %v844_v36 = vpop.f32.mrf.mxu0 }
 0x10e   :  { %v704_v37 = vsel %vm672_vm8, %v634_v28, %v688_v32  ;;  %v637_v38 = vadd.f32 %v906_v34, %v540_v33  ;;  %v845_v39 = vadd.f32 %v844_v36, %v843_v31  ;;  %v908_v40 = vpop.f32.mrf.mxu1 }
 0x10f   :  { %720 = vst [vmem:[%s1289_s3 + $0x40] sm:$0xff] %v704_v37  ;;  %v846_v41 = vpop.f32.mrf.mxu0  ;;  %v909_v44 = vadd.f32 %v908_v40, %v907_v35 }
 0x110   :  { %vm673_vm9 = vcmp.ge.f32.partialorder %v637_v38, 0.0  ;;  %v689_v42 = vmul.f32 0.01, %v637_v38  ;;  %v545_v43 = vadd.f32 %v845_v39, %v1220_v2  ;;  %v910_v45 = vpop.f32.mrf.mxu1 }
 0x111   :  { %v847_v46 = vpop.f32.mrf.mxu0 }
 0x112   :  { %v705_v47 = vsel %vm673_vm9, %v637_v38, %v689_v42  ;;  %v642_v48 = vadd.f32 %v909_v44, %v545_v43  ;;  %v848_v49 = vadd.f32 %v847_v46, %v846_v41  ;;  %v911_v50 = vpop.f32.mrf.mxu1 }
 0x113   :  { %721 = vst [vmem:[%s1289_s3 + $0x48] sm:$0xff] %v705_v47  ;;  %v849_v51 = vpop.f32.mrf.mxu0  ;;  %v912_v54 = vadd.f32 %v911_v50, %v910_v45 }
 0x114   :  { %vm674_vm10 = vcmp.ge.f32.partialorder %v642_v48, 0.0  ;;  %v690_v52 = vmul.f32 0.01, %v642_v48  ;;  %v548_v53 = vadd.f32 %v848_v49, %v1220_v2  ;;  %v913_v55 = vpop.f32.mrf.mxu1 }
 0x115   :  { %v850_v56 = vpop.f32.mrf.mxu0 }
 0x116   :  { %v706_v57 = vsel %vm674_vm10, %v642_v48, %v690_v52  ;;  %v645_v58 = vadd.f32 %v912_v54, %v548_v53  ;;  %v851_v59 = vadd.f32 %v850_v56, %v849_v51  ;;  %v914_v60 = vpop.f32.mrf.mxu1 }
 0x117   :  { %722 = vst [vmem:[%s1289_s3 + $0x50] sm:$0xff] %v706_v57  ;;  %v852_v61 = vpop.f32.mrf.mxu0  ;;  %v915_v0 = vadd.f32 %v914_v60, %v913_v55 }
 0x118   :  { %vm675_vm11 = vcmp.ge.f32.partialorder %v645_v58, 0.0  ;;  %v691_v62 = vmul.f32 0.01, %v645_v58  ;;  %v553_v63 = vadd.f32 %v851_v59, %v1220_v2  ;;  %v916_v1 = vpop.f32.mrf.mxu1 }
 0x119   :  { %v853_v3 = vpop.f32.mrf.mxu0 }
 0x11a   :  { %v707_v4 = vsel %vm675_vm11, %v645_v58, %v691_v62  ;;  %v650_v5 = vadd.f32 %v915_v0, %v553_v63  ;;  %v854_v6 = vadd.f32 %v853_v3, %v852_v61  ;;  %v917_v7 = vpop.f32.mrf.mxu1 }
 0x11b   :  { %723 = vst [vmem:[%s1289_s3 + $0x58] sm:$0xff] %v707_v4  ;;  %v855_v8 = vpop.f32.mrf.mxu0  ;;  %v918_v11 = vadd.f32 %v917_v7, %v916_v1 }
 0x11c   :  { %vm676_vm12 = vcmp.ge.f32.partialorder %v650_v5, 0.0  ;;  %v692_v9 = vmul.f32 0.01, %v650_v5  ;;  %v556_v10 = vadd.f32 %v854_v6, %v1220_v2  ;;  %v919_v12 = vpop.f32.mrf.mxu1 }
 0x11d   :  { %v856_v13 = vpop.f32.mrf.mxu0 }
 0x11e   :  { %v708_v14 = vsel %vm676_vm12, %v650_v5, %v692_v9  ;;  %v653_v15 = vadd.f32 %v918_v11, %v556_v10  ;;  %v857_v16 = vadd.f32 %v856_v13, %v855_v8  ;;  %v920_v17 = vpop.f32.mrf.mxu1 }
 0x11f   :  { %724 = vst [vmem:[%s1289_s3 + $0x60] sm:$0xff] %v708_v14  ;;  %v858_v18 = vpop.f32.mrf.mxu0  ;;  %v921_v21 = vadd.f32 %v920_v17, %v919_v12 }
 0x120   :  { %vm677_vm13 = vcmp.ge.f32.partialorder %v653_v15, 0.0  ;;  %v693_v19 = vmul.f32 0.01, %v653_v15  ;;  %v561_v20 = vadd.f32 %v857_v16, %v1220_v2  ;;  %v922_v22 = vpop.f32.mrf.mxu1 }
 0x121   :  { %v859_v23 = vpop.f32.mrf.mxu0 }
 0x122   :  { %v709_v24 = vsel %vm677_vm13, %v653_v15, %v693_v19  ;;  %v658_v25 = vadd.f32 %v921_v21, %v561_v20  ;;  %v860_v26 = vadd.f32 %v859_v23, %v858_v18  ;;  %v923_v27 = vpop.f32.mrf.mxu1 }
 0x123   :  { %725 = vst [vmem:[%s1289_s3 + $0x68] sm:$0xff] %v709_v24  ;;  %v924_v30 = vadd.f32 %v923_v27, %v922_v22 }
 0x124   :  { %vm678_vm14 = vcmp.ge.f32.partialorder %v658_v25, 0.0  ;;  %v694_v28 = vmul.f32 0.01, %v658_v25  ;;  %v564_v29 = vadd.f32 %v860_v26, %v1220_v2 }
 0x126   :  { %v710_v31 = vsel %vm678_vm14, %v658_v25, %v694_v28  ;;  %v661_v32 = vadd.f32 %v924_v30, %v564_v29 }
 0x127   :  { %726 = vst [vmem:[%s1289_s3 + $0x70] sm:$0xff] %v710_v31 }
 0x128   :  { %vm679_vm15 = vcmp.ge.f32.partialorder %v661_v32, 0.0  ;;  %v695_v33 = vmul.f32 0.01, %v661_v32 }
 0x12a   :  { %v711_v34 = vsel %vm679_vm15, %v661_v32, %v695_v33 }
 0x12b   :  { %727 = vst [vmem:[%s1289_s3 + $0x78] sm:$0xff] %v711_v34 }

// kernel: vae_forward.19
= control target key start
LH: loop header
LB: loop body
LE: loop exit
PB: predicated region body
PF: predicated region fallthrough
CT: control target
= control target key end

     0   :  { %v2118_v0 = vmov 0   ;;  %s2927_s1 = inlined_call_operand.vmem [shape: bf16[384,128], index: 1, kind: input, shape index: {}]   ;;  %s2928_s0 = inlined_call_operand.vmem [shape: bf16[512,384], index: 0, kind: input, shape index: {}]   ;;  %s2929_s2 = inlined_call_operand.vmem [shape: f32[1,128], index: 2, kind: input, shape index: {}]   ;;  %s2930_s3 = inlined_call_operand.vmem [shape: f32[512,128], index: 3, kind: output, shape index: {}]  }
   0x1   :  { %854 = vmatprep.subr.bf16.mxu0 %v2118_v0  ;;  %1933 = vmatprep.subr.bf16.mxu1 %v2118_v0  ;;  %v1966_v1 = vld [vmem:[%s2927_s1 + $0x38] sm:$0xff]   ;;  %v1967_v2 = vld [vmem:[%s2927_s1 + $0x30] sm:$0xff]   ;;  %v1968_v3 = vld [vmem:[%s2927_s1 + $0x28] sm:$0xff]  }
   0x2   :  { %855 = vmatpush1.bf16.msra.mxu0 %v1966_v1  ;;  %1949 = vmatpush1.bf16.msra.mxu1 %v1966_v1  ;;  %v1969_v4 = vld [vmem:[%s2927_s1 + $0x20] sm:$0xff]   ;;  %v1970_v5 = vld [vmem:[%s2927_s1 + $0x18] sm:$0xff]   ;;  %v1971_v7 = vld [vmem:[%s2927_s1 + $0x10] sm:$0xff]  }
   0x3   :  { %856 = vmatprep.subr.bf16.mxu0 %v2118_v0  ;;  %1934 = vmatprep.subr.bf16.mxu1 %v2118_v0  ;;  %v1984_v6 = vld [vmem:[%s2928_s0 + $0x4] ss:$12 sps:$4 sm:$0xff]   ;;  %v1972_v9 = vld [vmem:[%s2927_s1 + $0x8] sm:$0xff]   ;;  %v1974_v11 = vld [vmem:[%s2927_s1 + $0x78] sm:$0xff]  }
   0x4   :  { %v1987_v8 = vld [vmem:[%s2928_s0 + $0x244] ss:$12 sps:$4 sm:$0xff]   ;;  %886 = vmatprep.mubr.bf16.mxu0 %v1984_v6  ;;  %v1976_v13 = vld [vmem:[%s2927_s1 + $0x68] sm:$0xff]   ;;  %v1978_v15 = vld [vmem:[%s2927_s1 + $0x58] sm:$0xff]  }
   0x5   :  { %1078 = vmatprep.mubr.bf16.mxu1 %v1987_v8  ;;  %v1973_v10 = vld [vmem:[%s2927_s1] sm:$0xff]   ;;  %v1975_v12 = vld [vmem:[%s2927_s1 + $0x70] sm:$0xff]   ;;  %v1980_v17 = vld [vmem:[%s2927_s1 + $0x48] sm:$0xff]  }
   0x6   :  { %857 = vmatpush1.bf16.msra.mxu0 %v1967_v2  ;;  %1950 = vmatpush1.bf16.msra.mxu1 %v1967_v2  ;;  %v1977_v14 = vld [vmem:[%s2927_s1 + $0x60] sm:$0xff]   ;;  %v1979_v16 = vld [vmem:[%s2927_s1 + $0x50] sm:$0xff]   ;;  %v1988_v19 = vld [vmem:[%s2927_s1 + $0xb8] sm:$0xff]  }
   0x7   :  { %858 = vmatprep.subr.bf16.mxu0 %v2118_v0  ;;  %1935 = vmatprep.subr.bf16.mxu1 %v2118_v0  ;;  %v1981_v18 = vld [vmem:[%s2927_s1 + $0x40] sm:$0xff]   ;;  %v1989_v22 = vld [vmem:[%s2928_s0 + $0x1c] ss:$12 sps:$4 sm:$0xff]   ;;  %v1995_v24 = vld [vmem:[%s2927_s1 + $0xb0] sm:$0xff]  }
   0x8   :  { %v1982_v20 = vld [vmem:[%s2928_s0] ss:$12 sps:$4 sm:$0xff]   ;;  %v1991_v23 = vld [vmem:[%s2928_s0 + $0x25c] ss:$12 sps:$4 sm:$0xff]   ;;  %v1993_v26 = vld [vmem:[%s2928_s0 + $0x18] ss:$12 sps:$4 sm:$0xff]  }
   0x9   :  { %v1985_v21 = vld [vmem:[%s2928_s0 + $0x240] ss:$12 sps:$4 sm:$0xff]   ;;  %v1994_v27 = vld [vmem:[%s2928_s0 + $0x258] ss:$12 sps:$4 sm:$0xff]   ;;  %v2000_v31 = vld [vmem:[%s2928_s0 + $0x30] ss:$12 sps:$4 sm:$0xff]  }
   0xa   :  { %859 = vmatpush1.bf16.msra.mxu0 %v1968_v3  ;;  %1951 = vmatpush1.bf16.msra.mxu1 %v1968_v3  ;;  %v2002_v25 = vld [vmem:[%s2927_s1 + $0xa8] sm:$0xff]   ;;  %v1996_v28 = vld [vmem:[%s2928_s0 + $0x34] ss:$12 sps:$4 sm:$0xff]   ;;  %v2016_v32 = vld [vmem:[%s2927_s1 + $0x98] sm:$0xff]  }
   0xb   :  { %860 = vmatprep.subr.bf16.mxu0 %v2118_v0  ;;  %1936 = vmatprep.subr.bf16.mxu1 %v2118_v0  ;;  %v1998_v29 = vld [vmem:[%s2928_s0 + $0x274] ss:$12 sps:$4 sm:$0xff]   ;;  %v2001_v33 = vld [vmem:[%s2928_s0 + $0x270] ss:$12 sps:$4 sm:$0xff]   ;;  %v2003_v34 = vld [vmem:[%s2928_s0 + $0x4c] ss:$12 sps:$4 sm:$0xff]  }
   0xc   :  { %v2009_v30 = vld [vmem:[%s2927_s1 + $0xa0] sm:$0xff]   ;;  %v2005_v35 = vld [vmem:[%s2928_s0 + $0x28c] ss:$12 sps:$4 sm:$0xff]   ;;  %v2023_v36 = vld [vmem:[%s2927_s1 + $0x90] sm:$0xff]  }
   0xd   :  { %v2007_v37 = vld [vmem:[%s2928_s0 + $0x48] ss:$12 sps:$4 sm:$0xff]   ;;  %v2010_v39 = vld [vmem:[%s2928_s0 + $0x64] ss:$12 sps:$4 sm:$0xff]   ;;  %v2014_v43 = vld [vmem:[%s2928_s0 + $0x60] ss:$12 sps:$4 sm:$0xff]  }
   0xe   :  { %861 = vmatpush1.bf16.msra.mxu0 %v1969_v4  ;;  %1952 = vmatpush1.bf16.msra.mxu1 %v1969_v4  ;;  %v2008_v38 = vld [vmem:[%s2928_s0 + $0x288] ss:$12 sps:$4 sm:$0xff]   ;;  %v2012_v40 = vld [vmem:[%s2928_s0 + $0x2a4] ss:$12 sps:$4 sm:$0xff]   ;;  %v2015_v44 = vld [vmem:[%s2928_s0 + $0x2a0] ss:$12 sps:$4 sm:$0xff]  }
   0xf   :  { %862 = vmatprep.subr.bf16.mxu0 %v2118_v0  ;;  %1937 = vmatprep.subr.bf16.mxu1 %v2118_v0  ;;  %v2030_v41 = vld [vmem:[%s2927_s1 + $0x88] sm:$0xff]   ;;  %v2037_v42 = vld [vmem:[%s2927_s1 + $0x80] sm:$0xff]   ;;  %v2028_v51 = vld [vmem:[%s2928_s0 + $0x90] ss:$12 sps:$4 sm:$0xff]  }
  0x10   :  { %v2017_v45 = vld [vmem:[%s2928_s0 + $0x7c] ss:$12 sps:$4 sm:$0xff]   ;;  %v2021_v47 = vld [vmem:[%s2928_s0 + $0x78] ss:$12 sps:$4 sm:$0xff]   ;;  %v2024_v49 = vld [vmem:[%s2928_s0 + $0x94] ss:$12 sps:$4 sm:$0xff]  }
  0x11   :  { %v2019_v46 = vld [vmem:[%s2928_s0 + $0x2bc] ss:$12 sps:$4 sm:$0xff]   ;;  %v2022_v48 = vld [vmem:[%s2928_s0 + $0x2b8] ss:$12 sps:$4 sm:$0xff]   ;;  %v2026_v50 = vld [vmem:[%s2928_s0 + $0x2d4] ss:$12 sps:$4 sm:$0xff]  }
  0x12   :  { %863 = vmatpush1.bf16.msra.mxu0 %v1970_v5  ;;  %1953 = vmatpush1.bf16.msra.mxu1 %v1970_v5  ;;  %v2029_v52 = vld [vmem:[%s2928_s0 + $0x2d0] ss:$12 sps:$4 sm:$0xff]   ;;  %v2031_v53 = vld [vmem:[%s2928_s0 + $0xac] ss:$12 sps:$4 sm:$0xff]   ;;  %v2035_v55 = vld [vmem:[%s2928_s0 + $0xa8] ss:$12 sps:$4 sm:$0xff]  }
  0x13   :  { %864 = vmatprep.subr.bf16.mxu0 %v2118_v0  ;;  %1938 = vmatprep.subr.bf16.mxu1 %v2118_v0  ;;  %v2033_v54 = vld [vmem:[%s2928_s0 + $0x2ec] ss:$12 sps:$4 sm:$0xff]   ;;  %v2036_v56 = vld [vmem:[%s2928_s0 + $0x2e8] ss:$12 sps:$4 sm:$0xff]   ;;  %v2038_v57 = vld [vmem:[%s2928_s0 + $0xc4] ss:$12 sps:$4 sm:$0xff]  }
  0x14   :  { %v2040_v58 = vld [vmem:[%s2928_s0 + $0x8] ss:$12 sps:$4 sm:$0xff]   ;;  %v2041_v59 = vld [vmem:[%s2928_s0 + $0xc0] ss:$12 sps:$4 sm:$0xff]   ;;  %v2045_v62 = vld [vmem:[%s2928_s0 + $0x38] ss:$12 sps:$4 sm:$0xff]  }
  0x15   :  { %v2042_v60 = vld [vmem:[%s2928_s0 + $0x20] ss:$12 sps:$4 sm:$0xff]   ;;  %v2043_v61 = vld [vmem:[%s2928_s0 + $0xdc] ss:$12 sps:$4 sm:$0xff]   ;;  %v2046_v63 = vld [vmem:[%s2928_s0 + $0xd8] ss:$12 sps:$4 sm:$0xff]  }
  0x16   :  { %865 = vmatpush1.bf16.msra.mxu0 %v1971_v7  ;;  %1954 = vmatpush1.bf16.msra.mxu1 %v1971_v7  ;;  %v2048_v1 = vld [vmem:[%s2928_s0 + $0xf4] ss:$12 sps:$4 sm:$0xff]   ;;  %v2051_v3 = vld [vmem:[%s2928_s0 + $0xf0] ss:$12 sps:$4 sm:$0xff]   ;;  %v2053_v5 = vld [vmem:[%s2928_s0 + $0x10c] ss:$12 sps:$4 sm:$0xff]  }
  0x17   :  { %866 = vmatprep.subr.bf16.mxu0 %v2118_v0  ;;  %1939 = vmatprep.subr.bf16.mxu1 %v2118_v0  ;;  %v2050_v2 = vld [vmem:[%s2928_s0 + $0x68] ss:$12 sps:$4 sm:$0xff]   ;;  %v2052_v4 = vld [vmem:[%s2928_s0 + $0x80] ss:$12 sps:$4 sm:$0xff]   ;;  %v2055_v6 = vld [vmem:[%s2928_s0 + $0x98] ss:$12 sps:$4 sm:$0xff]  }
  0x18   :  { %v2056_v7 = vld [vmem:[%s2928_s0 + $0x108] ss:$12 sps:$4 sm:$0xff]   ;;  %v2057_v8 = vld [vmem:[%s2928_s0 + $0xb0] ss:$12 sps:$4 sm:$0xff]  }
  0x1a   :  { %867 = vmatpush1.bf16.msra.mxu0 %v1972_v9  ;;  %1955 = vmatpush1.bf16.msra.mxu1 %v1972_v9  ;;  %v2058_v9 = vld [vmem:[%s2928_s0 + $0x124] ss:$12 sps:$4 sm:$0xff]  }
  0x1b   :  { %868 = vmatprep.subr.bf16.mxu0 %v2118_v0  ;;  %1940 = vmatprep.subr.bf16.mxu1 %v2118_v0 }
  0x1e   :  { %869 = vmatpush1.bf16.msra.mxu0 %v1973_v10  ;;  %1956 = vmatpush1.bf16.msra.mxu1 %v1973_v10  ;;  %v2060_v10 = vld [vmem:[%s2928_s0 + $0xc8] ss:$12 sps:$4 sm:$0xff]  }
  0x1f   :  { %870 = vmatprep.subr.bf16.mxu0 %v2118_v0  ;;  %1941 = vmatprep.subr.bf16.mxu1 %v2118_v0 }
  0x22   :  { %871 = vmatpush2.bf16.msra.mxu0 %v1974_v11  ;;  %1957 = vmatpush2.bf16.msra.mxu1 %v1974_v11  ;;  %v2061_v11 = vld [vmem:[%s2928_s0 + $0x120] ss:$12 sps:$4 sm:$0xff]  }
  0x23   :  { %872 = vmatprep.subr.bf16.mxu0 %v2118_v0  ;;  %1942 = vmatprep.subr.bf16.mxu1 %v2118_v0 }
  0x26   :  { %873 = vmatpush2.bf16.msra.mxu0 %v1975_v12  ;;  %1958 = vmatpush2.bf16.msra.mxu1 %v1975_v12  ;;  %v2062_v12 = vld [vmem:[%s2928_s0 + $0xe0] ss:$12 sps:$4 sm:$0xff]  }
  0x27   :  { %874 = vmatprep.subr.bf16.mxu0 %v2118_v0  ;;  %1943 = vmatprep.subr.bf16.mxu1 %v2118_v0 }
  0x2a   :  { %875 = vmatpush2.bf16.msra.mxu0 %v1976_v13  ;;  %1959 = vmatpush2.bf16.msra.mxu1 %v1976_v13  ;;  %v2063_v13 = vld [vmem:[%s2928_s0 + $0x13c] ss:$12 sps:$4 sm:$0xff]  }
  0x2b   :  { %876 = vmatprep.subr.bf16.mxu0 %v2118_v0  ;;  %1944 = vmatprep.subr.bf16.mxu1 %v2118_v0 }
  0x2e   :  { %877 = vmatpush2.bf16.msra.mxu0 %v1977_v14  ;;  %1960 = vmatpush2.bf16.msra.mxu1 %v1977_v14  ;;  %v2065_v14 = vld [vmem:[%s2928_s0 + $0xf8] ss:$12 sps:$4 sm:$0xff]  }
  0x2f   :  { %878 = vmatprep.subr.bf16.mxu0 %v2118_v0  ;;  %1945 = vmatprep.subr.bf16.mxu1 %v2118_v0 }
  0x32   :  { %879 = vmatpush2.bf16.msra.mxu0 %v1978_v15  ;;  %1961 = vmatpush2.bf16.msra.mxu1 %v1978_v15  ;;  %v2066_v15 = vld [vmem:[%s2928_s0 + $0x138] ss:$12 sps:$4 sm:$0xff]  }
  0x33   :  { %880 = vmatprep.subr.bf16.mxu0 %v2118_v0  ;;  %1946 = vmatprep.subr.bf16.mxu1 %v2118_v0 }
  0x36   :  { %881 = vmatpush2.bf16.msra.mxu0 %v1979_v16  ;;  %1962 = vmatpush2.bf16.msra.mxu1 %v1979_v16  ;;  %v2067_v16 = vld [vmem:[%s2928_s0 + $0x110] ss:$12 sps:$4 sm:$0xff]  }
  0x37   :  { %882 = vmatprep.subr.bf16.mxu0 %v2118_v0  ;;  %1947 = vmatprep.subr.bf16.mxu1 %v2118_v0 }
  0x3a   :  { %883 = vmatpush2.bf16.msra.mxu0 %v1980_v17  ;;  %1963 = vmatpush2.bf16.msra.mxu1 %v1980_v17  ;;  %v2068_v17 = vld [vmem:[%s2928_s0 + $0x154] ss:$12 sps:$4 sm:$0xff]  }
  0x3b   :  { %884 = vmatprep.subr.bf16.mxu0 %v2118_v0  ;;  %1948 = vmatprep.subr.bf16.mxu1 %v2118_v0  ;;  %v2047_v0 = vld [vmem:[%s2928_s0 + $0x50] ss:$12 sps:$4 sm:$0xff]  }
  0x3e   :  { %885 = vmatpush2.bf16.msra.mxu0 %v1981_v18  ;;  %1964 = vmatpush2.bf16.msra.mxu1 %v1981_v18  ;;  %v2070_v18 = vld [vmem:[%s2928_s0 + $0x128] ss:$12 sps:$4 sm:$0xff]  }
  0x3f   :  { %1853 = vmatprep.subr.bf16.mxu1 %v1988_v19 }
  0x41   :  { %887 = vmatmul.mubr.bf16.vlgmr.msra.gmra.mxu0 %v1982_v20  ;;  %1079 = vmatmul.mubr.bf16.vlgmr.msra.gmra.mxu1 %v1985_v21  ;;  %v2072_v20 = vld [vmem:[%s2928_s0 + $0x140] ss:$12 sps:$4 sm:$0xff]  }
  0x42   :  { %1854 = vmatpush3.bf16.msra.mxu1 %v1988_v19  ;;  %894 = vmatprep.mubr.bf16.mxu0 %v1989_v22  ;;  %v2071_v19 = vld [vmem:[%s2928_s0 + $0x150] ss:$12 sps:$4 sm:$0xff]   ;;  %v2073_v21 = vld [vmem:[%s2928_s0 + $0x16c] ss:$12 sps:$4 sm:$0xff]  }
  0x43   :  { %1086 = vmatprep.mubr.bf16.mxu1 %v1991_v23  ;;  %1855 = vmatprep.subr.bf16.mxu1 %v1995_v24  ;;  %v2075_v22 = vld [vmem:[%s2928_s0 + $0x158] ss:$12 sps:$4 sm:$0xff]   ;;  %v2076_v23 = vld [vmem:[%s2928_s0 + $0x168] ss:$12 sps:$4 sm:$0xff]  }
  0x46   :  { %1856 = vmatpush3.bf16.msra.mxu1 %v1995_v24  ;;  %v2077_v24 = vld [vmem:[%s2928_s0 + $0x170] ss:$12 sps:$4 sm:$0xff]  }
  0x47   :  { %1857 = vmatprep.subr.bf16.mxu1 %v2002_v25 }
  0x49   :  { %895 = vmatmul.mubr.bf16.gmra.mxu0 %v1993_v26  ;;  %1087 = vmatmul.mubr.bf16.gmra.mxu1 %v1994_v27  ;;  %v2080_v26 = vld [vmem:[%s2928_s0 + $0x188] ss:$12 sps:$4 sm:$0xff]   ;;  %v2081_v27 = vld [vmem:[%s2928_s0 + $0x180] ss:$12 sps:$4 sm:$0xff]  }
  0x4a   :  { %902 = vmatprep.mubr.bf16.mxu0 %v1996_v28  ;;  %1094 = vmatprep.mubr.bf16.mxu1 %v1998_v29  ;;  %v2082_v28 = vld [vmem:[%s2928_s0 + $0x1a0] ss:$12 sps:$4 sm:$0xff]   ;;  %v2083_v29 = vld [vmem:[%s2928_s0 + $0x19c] ss:$12 sps:$4 sm:$0xff]  }
  0x4b   :  { %1858 = vmatpush3.bf16.msra.mxu1 %v2002_v25  ;;  %v2078_v25 = vld [vmem:[%s2928_s0 + $0x184] ss:$12 sps:$4 sm:$0xff]  }
  0x4c   :  { %1859 = vmatprep.subr.bf16.mxu1 %v2009_v30 }
  0x4f   :  { %1860 = vmatpush3.bf16.msra.mxu1 %v2009_v30  ;;  %v2085_v30 = vld [vmem:[%s2928_s0 + $0x1b8] ss:$12 sps:$4 sm:$0xff]  }
  0x50   :  { %1861 = vmatprep.subr.bf16.mxu1 %v2016_v32 }
  0x51   :  { %903 = vmatmul.mubr.bf16.gmra.mxu0 %v2000_v31  ;;  %1095 = vmatmul.mubr.bf16.gmra.mxu1 %v2001_v33  ;;  %v2086_v31 = vld [vmem:[%s2928_s0 + $0x198] ss:$12 sps:$4 sm:$0xff]   ;;  %v2088_v33 = vld [vmem:[%s2928_s0 + $0x1b4] ss:$12 sps:$4 sm:$0xff]  }
  0x52   :  { %910 = vmatprep.mubr.bf16.mxu0 %v2003_v34  ;;  %1102 = vmatprep.mubr.bf16.mxu1 %v2005_v35  ;;  %v2090_v34 = vld [vmem:[%s2928_s0 + $0x1e8] ss:$12 sps:$4 sm:$0xff]   ;;  %v2091_v35 = vld [vmem:[%s2928_s0 + $0x1b0] ss:$12 sps:$4 sm:$0xff]  }
  0x53   :  { %1862 = vmatpush3.bf16.msra.mxu1 %v2016_v32  ;;  %v2087_v32 = vld [vmem:[%s2928_s0 + $0x1d0] ss:$12 sps:$4 sm:$0xff]  }
  0x54   :  { %1863 = vmatprep.subr.bf16.mxu1 %v2023_v36 }
  0x57   :  { %1864 = vmatpush3.bf16.msra.mxu1 %v2023_v36  ;;  %v2092_v36 = vld [vmem:[%s2928_s0 + $0x200] ss:$12 sps:$4 sm:$0xff]  }
  0x58   :  { %1865 = vmatprep.subr.bf16.mxu1 %v2030_v41 }
  0x59   :  { %911 = vmatmul.mubr.bf16.gmra.mxu0 %v2007_v37  ;;  %1103 = vmatmul.mubr.bf16.gmra.mxu1 %v2008_v38  ;;  %v2093_v37 = vld [vmem:[%s2928_s0 + $0x1cc] ss:$12 sps:$4 sm:$0xff]  }
  0x5a   :  { %918 = vmatprep.mubr.bf16.mxu0 %v2010_v39  ;;  %1110 = vmatprep.mubr.bf16.mxu1 %v2012_v40  ;;  %v2095_v38 = vld [vmem:[%s2928_s0 + $0x218] ss:$12 sps:$4 sm:$0xff]   ;;  %v2096_v39 = vld [vmem:[%s2928_s0 + $0x1c8] ss:$12 sps:$4 sm:$0xff]   ;;  %v2097_v40 = vld [vmem:[%s2928_s0 + $0x230] ss:$12 sps:$4 sm:$0xff]  }
  0x5b   :  { %1866 = vmatpush3.bf16.msra.mxu1 %v2030_v41  ;;  %v2098_v41 = vld [vmem:[%s2928_s0 + $0x1e4] ss:$12 sps:$4 sm:$0xff]  }
  0x5c   :  { %1867 = vmatprep.subr.bf16.mxu1 %v2037_v42 }
  0x5f   :  { %1868 = vmatpush3.bf16.msra.mxu1 %v2037_v42  ;;  %v2100_v42 = vld [vmem:[%s2928_s0 + $0x248] ss:$12 sps:$4 sm:$0xff]  }
  0x61   :  { %919 = vmatmul.mubr.bf16.gmra.mxu0 %v2014_v43  ;;  %1111 = vmatmul.mubr.bf16.gmra.mxu1 %v2015_v44  ;;  %v2101_v43 = vld [vmem:[%s2928_s0 + $0x1e0] ss:$12 sps:$4 sm:$0xff]  }
  0x62   :  { %926 = vmatprep.mubr.bf16.mxu0 %v2017_v45  ;;  %1118 = vmatprep.mubr.bf16.mxu1 %v2019_v46  ;;  %v2102_v44 = vld [vmem:[%s2928_s0 + $0x260] ss:$12 sps:$4 sm:$0xff]   ;;  %v2103_v45 = vld [vmem:[%s2928_s0 + $0x1fc] ss:$12 sps:$4 sm:$0xff]   ;;  %v2105_v46 = vld [vmem:[%s2928_s0 + $0x278] ss:$12 sps:$4 sm:$0xff]  }
  0x69   :  { %927 = vmatmul.mubr.bf16.gmra.mxu0 %v2021_v47  ;;  %1119 = vmatmul.mubr.bf16.gmra.mxu1 %v2022_v48  ;;  %v2106_v47 = vld [vmem:[%s2928_s0 + $0x1f8] ss:$12 sps:$4 sm:$0xff]   ;;  %v2107_v48 = vld [vmem:[%s2928_s0 + $0x290] ss:$12 sps:$4 sm:$0xff]  }
  0x6a   :  { %934 = vmatprep.mubr.bf16.mxu0 %v2024_v49  ;;  %1126 = vmatprep.mubr.bf16.mxu1 %v2026_v50  ;;  %v2108_v49 = vld [vmem:[%s2928_s0 + $0x214] ss:$12 sps:$4 sm:$0xff]  }
  0x6b   :  { %v2110_v50 = vld [vmem:[%s2928_s0 + $0x2a8] ss:$12 sps:$4 sm:$0xff]  }
  0x71   :  { %935 = vmatmul.mubr.bf16.gmra.mxu0 %v2028_v51  ;;  %1127 = vmatmul.mubr.bf16.gmra.mxu1 %v2029_v52  ;;  %v2111_v51 = vld [vmem:[%s2928_s0 + $0x210] ss:$12 sps:$4 sm:$0xff]   ;;  %v2112_v52 = vld [vmem:[%s2928_s0 + $0x2c0] ss:$12 sps:$4 sm:$0xff]  }
  0x72   :  { %942 = vmatprep.mubr.bf16.mxu0 %v2031_v53  ;;  %1134 = vmatprep.mubr.bf16.mxu1 %v2033_v54  ;;  %v2113_v53 = vld [vmem:[%s2928_s0 + $0x22c] ss:$12 sps:$4 sm:$0xff]  }
  0x73   :  { %v2115_v54 = vld [vmem:[%s2928_s0 + $0x2d8] ss:$12 sps:$4 sm:$0xff]  }
  0x79   :  { %943 = vmatmul.mubr.bf16.gmra.mxu0 %v2035_v55  ;;  %1135 = vmatmul.mubr.bf16.gmra.mxu1 %v2036_v56  ;;  %v2116_v55 = vld [vmem:[%s2928_s0 + $0x228] ss:$12 sps:$4 sm:$0xff]   ;;  %v2117_v56 = vld [vmem:[%s2928_s0 + $0x2f0] ss:$12 sps:$4 sm:$0xff]  }
  0x7a   :  { %950 = vmatprep.mubr.bf16.mxu0 %v2038_v57  ;;  %1869 = vmatprep.mubr.bf16.mxu1 %v2040_v58 }
  0x81   :  { %951 = vmatmul.mubr.bf16.gmra.mxu0 %v2041_v59  ;;  %1870 = vmatmul.mubr.bf16.vlgmr.msra.gmra.mxu1 %v2042_v60 }
  0x82   :  { %958 = vmatprep.mubr.bf16.mxu0 %v2043_v61  ;;  %1873 = vmatprep.mubr.bf16.mxu1 %v2045_v62 }
  0x89   :  { %959 = vmatmul.mubr.bf16.gmra.mxu0 %v2046_v63  ;;  %1874 = vmatmul.mubr.bf16.gmra.mxu1 %v2047_v0 }
  0x8a   :  { %966 = vmatprep.mubr.bf16.mxu0 %v2048_v1  ;;  %1877 = vmatprep.mubr.bf16.mxu1 %v2050_v2 }
  0x91   :  { %967 = vmatmul.mubr.bf16.gmra.mxu0 %v2051_v3  ;;  %1878 = vmatmul.mubr.bf16.gmra.mxu1 %v2052_v4 }
  0x92   :  { %974 = vmatprep.mubr.bf16.mxu0 %v2053_v5  ;;  %1881 = vmatprep.mubr.bf16.mxu1 %v2055_v6 }
  0x99   :  { %975 = vmatmul.mubr.bf16.gmra.mxu0 %v2056_v7  ;;  %1882 = vmatmul.mubr.bf16.gmra.mxu1 %v2057_v8 }
  0x9a   :  { %982 = vmatprep.mubr.bf16.mxu0 %v2058_v9  ;;  %1885 = vmatprep.mubr.bf16.mxu1 %v2060_v10 }
  0xa1   :  { %983 = vmatmul.mubr.bf16.gmra.mxu0 %v2061_v11  ;;  %1886 = vmatmul.mubr.bf16.gmra.mxu1 %v2062_v12 }
  0xa2   :  { %990 = vmatprep.mubr.bf16.mxu0 %v2063_v13  ;;  %1889 = vmatprep.mubr.bf16.mxu1 %v2065_v14 }
  0xa9   :  { %991 = vmatmul.mubr.bf16.gmra.mxu0 %v2066_v15  ;;  %1890 = vmatmul.mubr.bf16.gmra.mxu1 %v2067_v16 }
  0xaa   :  { %998 = vmatprep.mubr.bf16.mxu0 %v2068_v17  ;;  %1893 = vmatprep.mubr.bf16.mxu1 %v2070_v18 }
  0xb1   :  { %999 = vmatmul.mubr.bf16.gmra.mxu0 %v2071_v19  ;;  %1894 = vmatmul.mubr.bf16.gmra.mxu1 %v2072_v20 }
  0xb2   :  { %1006 = vmatprep.mubr.bf16.mxu0 %v2073_v21  ;;  %1897 = vmatprep.mubr.bf16.mxu1 %v2075_v22 }
  0xb9   :  { %1007 = vmatmul.mubr.bf16.gmra.mxu0 %v2076_v23  ;;  %1898 = vmatmul.mubr.bf16.gmra.mxu1 %v2077_v24 }
  0xba   :  { %1014 = vmatprep.mubr.bf16.mxu0 %v2078_v25  ;;  %1901 = vmatprep.mubr.bf16.mxu1 %v2080_v26 }
  0xc1   :  { %1015 = vmatmul.mubr.bf16.gmra.mxu0 %v2081_v27  ;;  %1902 = vmatmul.mubr.bf16.gmra.mxu1 %v2082_v28 }
  0xc2   :  { %1022 = vmatprep.mubr.bf16.mxu0 %v2083_v29  ;;  %1905 = vmatprep.mubr.bf16.mxu1 %v2085_v30 }
  0xc9   :  { %1023 = vmatmul.mubr.bf16.gmra.mxu0 %v2086_v31  ;;  %1906 = vmatmul.mubr.bf16.gmra.mxu1 %v2087_v32 }
  0xca   :  { %1030 = vmatprep.mubr.bf16.mxu0 %v2088_v33  ;;  %1909 = vmatprep.mubr.bf16.mxu1 %v2090_v34 }
  0xd1   :  { %1031 = vmatmul.mubr.bf16.gmra.mxu0 %v2091_v35  ;;  %1910 = vmatmul.mubr.bf16.gmra.mxu1 %v2092_v36 }
  0xd2   :  { %1038 = vmatprep.mubr.bf16.mxu0 %v2093_v37  ;;  %1913 = vmatprep.mubr.bf16.mxu1 %v2095_v38 }
  0xd9   :  { %1039 = vmatmul.mubr.bf16.gmra.mxu0 %v2096_v39  ;;  %1914 = vmatmul.mubr.bf16.gmra.mxu1 %v2097_v40 }
  0xda   :  { %1046 = vmatprep.mubr.bf16.mxu0 %v2098_v41  ;;  %1917 = vmatprep.mubr.bf16.mxu1 %v2100_v42 }
  0xe1   :  { %1047 = vmatmul.mubr.bf16.gmra.mxu0 %v2101_v43  ;;  %1918 = vmatmul.mubr.bf16.gmra.mxu1 %v2102_v44 }
  0xe2   :  { %1054 = vmatprep.mubr.bf16.mxu0 %v2103_v45  ;;  %1921 = vmatprep.mubr.bf16.mxu1 %v2105_v46 }
  0xe9   :  { %1055 = vmatmul.mubr.bf16.gmra.mxu0 %v2106_v47  ;;  %1922 = vmatmul.mubr.bf16.gmra.mxu1 %v2107_v48 }
  0xea   :  { %1062 = vmatprep.mubr.bf16.mxu0 %v2108_v49  ;;  %1925 = vmatprep.mubr.bf16.mxu1 %v2110_v50 }
  0xf1   :  { %1063 = vmatmul.mubr.bf16.gmra.mxu0 %v2111_v51  ;;  %1926 = vmatmul.mubr.bf16.gmra.mxu1 %v2112_v52 }
  0xf2   :  { %1070 = vmatprep.mubr.bf16.mxu0 %v2113_v53  ;;  %1929 = vmatprep.mubr.bf16.mxu1 %v2115_v54 }
  0xf9   :  { %1071 = vmatmul.mubr.bf16.gmra.mxu0 %v2116_v55  ;;  %1930 = vmatmul.mubr.bf16.gmra.mxu1 %v2117_v56  ;;  %v2596_v55 = vld [vmem:[%s2929_s2] ss:$0 sm:$0xff] }
 0x101   :  { %v2531_v57 = vpop.f32.mrf.mxu0  ;;  %v2533_v58 = vpop.f32.mrf.mxu1 }
 0x103   :  { %v890_v59 = vpop.f32.mrf.mxu0  ;;  %v1082_v60 = vpop.f32.mrf.mxu1 }
 0x105   :  { %v2535_v61 = vpop.f32.mrf.mxu0  ;;  %v2537_v62 = vpop.f32.mrf.mxu1 }
 0x107   :  { %v893_v63 = vpop.f32.mrf.mxu0  ;;  %v1085_v0 = vpop.f32.mrf.mxu1 }
 0x109   :  { %v896_v1 = vpop.f32.mrf.mxu0  ;;  %v2539_v2 = vpop.f32.mrf.mxu1 }
 0x10a   :  { %v897_v60 = vadd.f32 %v2596_v55, %v896_v1  ;;  %v892_v1 = vadd.f32 %v2596_v55, %v2535_v61 }
 0x10b   :  { %v898_v3 = vpop.f32.mrf.mxu0  ;;  %v1090_v4 = vpop.f32.mrf.mxu1 }
 0x10c   :  { %v889_v3 = vadd.f32 %v2596_v55, %v2531_v57 }
 0x10d   :  { %v2541_v5 = vpop.f32.mrf.mxu0  ;;  %v2543_v6 = vpop.f32.mrf.mxu1 }
 0x10f   :  { %v901_v7 = vpop.f32.mrf.mxu0  ;;  %v1093_v8 = vpop.f32.mrf.mxu1 }
 0x111   :  { %v2545_v9 = vpop.f32.mrf.mxu0  ;;  %v2547_v10 = vpop.f32.mrf.mxu1 }
 0x113   :  { %v906_v11 = vpop.f32.mrf.mxu0  ;;  %v1098_v12 = vpop.f32.mrf.mxu1 }
 0x115   :  { %v2549_v13 = vpop.f32.mrf.mxu0  ;;  %v2551_v14 = vpop.f32.mrf.mxu1 }
 0x117   :  { %v909_v15 = vpop.f32.mrf.mxu0  ;;  %v1101_v16 = vpop.f32.mrf.mxu1 }
 0x118   :  { %v900_v15 = vadd.f32 %v2596_v55, %v2541_v5 }
 0x119   :  { %v2553_v17 = vpop.f32.mrf.mxu0  ;;  %v2555_v18 = vpop.f32.mrf.mxu1 }
 0x11b   :  { %v914_v19 = vpop.f32.mrf.mxu0  ;;  %v1106_v20 = vpop.f32.mrf.mxu1 }
 0x11d   :  { %v2557_v21 = vpop.f32.mrf.mxu0  ;;  %v2559_v22 = vpop.f32.mrf.mxu1 }
 0x11f   :  { %v917_v23 = vpop.f32.mrf.mxu0  ;;  %v1109_v24 = vpop.f32.mrf.mxu1 }
 0x121   :  { %v2561_v25 = vpop.f32.mrf.mxu0  ;;  %v2563_v26 = vpop.f32.mrf.mxu1 }
 0x123   :  { %v922_v27 = vpop.f32.mrf.mxu0  ;;  %v1114_v28 = vpop.f32.mrf.mxu1 }
 0x124   :  { %v913_v28 = vadd.f32 %v2596_v55, %v2553_v17 }
 0x125   :  { %v2565_v29 = vpop.f32.mrf.mxu0  ;;  %v2567_v30 = vpop.f32.mrf.mxu1 }
 0x127   :  { %v925_v31 = vpop.f32.mrf.mxu0  ;;  %v1117_v32 = vpop.f32.mrf.mxu1 }
 0x129   :  { %v2569_v33 = vpop.f32.mrf.mxu0  ;;  %v2571_v34 = vpop.f32.mrf.mxu1 }
 0x12b   :  { %v930_v35 = vpop.f32.mrf.mxu0  ;;  %v1122_v36 = vpop.f32.mrf.mxu1 }
 0x12c   :  { %v905_v36 = vadd.f32 %v2596_v55, %v2545_v9 }
 0x12d   :  { %v2573_v37 = vpop.f32.mrf.mxu0  ;;  %v2575_v38 = vpop.f32.mrf.mxu1 }
 0x12f   :  { %v933_v39 = vpop.f32.mrf.mxu0  ;;  %v1125_v40 = vpop.f32.mrf.mxu1 }
 0x131   :  { %v2577_v41 = vpop.f32.mrf.mxu0  ;;  %v2579_v42 = vpop.f32.mrf.mxu1 }
 0x133   :  { %v938_v43 = vpop.f32.mrf.mxu0  ;;  %v1130_v44 = vpop.f32.mrf.mxu1 }
 0x135   :  { %v2581_v45 = vpop.f32.mrf.mxu0  ;;  %v2583_v46 = vpop.f32.mrf.mxu1 }
 0x137   :  { %v941_v47 = vpop.f32.mrf.mxu0  ;;  %v1133_v48 = vpop.f32.mrf.mxu1 }
 0x139   :  { %v2585_v49 = vpop.f32.mrf.mxu0  ;;  %v2587_v50 = vpop.f32.mrf.mxu1 }
 0x13b   :  { %v946_v51 = vpop.f32.mrf.mxu0  ;;  %v1138_v52 = vpop.f32.mrf.mxu1 }
 0x13c   :  { %v916_v52 = vadd.f32 %v2596_v55, %v2557_v21 }
 0x13d   :  { %v2589_v53 = vpop.f32.mrf.mxu0  ;;  %v2591_v54 = vpop.f32.mrf.mxu1 }
 0x13f   :  { %v949_v56 = vpop.f32.mrf.mxu0  ;;  %v1141_v59 = vpop.f32.mrf.mxu1 }
 0x140   :  { %v908_v59 = vadd.f32 %v2596_v55, %v2549_v13 }
 0x141   :  { %v2599_v63 = vpop.f32.mrf.mxu0  ;;  %v1871_v0 = vpop.f32.mrf.mxu1 }
 0x142   :  { %v1186_v4 = vadd.f32 %v1871_v0, %v897_v60 }
 0x143   :  { %v954_v7 = vpop.f32.mrf.mxu0  ;;  %v1177_v8 = vpop.f32.mrf.mxu1 }
 0x144   :  { %vm1434_vm0 = vcmp.ge.f32.partialorder %v1186_v4, 0.0  ;;  %v1498_v11 = vmul.f32 0.01, %v1186_v4  ;;  %v1178_v12 = vadd.f32 %v1177_v8, %v889_v3  ;;  %v929_v7 = vadd.f32 %v2596_v55, %v2569_v33 }
 0x145   :  { %v2605_v16 = vpop.f32.mrf.mxu0  ;;  %v1872_v19 = vpop.f32.mrf.mxu1 }
 0x146   :  { %v1562_v20 = vsel %vm1434_vm0, %v1186_v4, %v1498_v11  ;;  %vm1432_vm1 = vcmp.ge.f32.partialorder %v1178_v12, 0.0  ;;  %v1496_v23 = vmul.f32 0.01, %v1178_v12  ;;  %v1189_v57 = vadd.f32 %v1872_v19, %v900_v15 }
 0x147   :  { %1626 = vst [vmem:[%s2930_s3 + $0x10] sm:$0xff] %v1562_v20  ;;  %v957_v24 = vpop.f32.mrf.mxu0  ;;  %v1180_v27 = vpop.f32.mrf.mxu1  ;;  %v921_v19 = vadd.f32 %v2596_v55, %v2561_v25 }
 0x148   :  { %v1560_v5 = vsel %vm1432_vm1, %v1178_v12, %v1496_v23  ;;  %v1181_v31 = vadd.f32 %v1180_v27, %v892_v1  ;;  %vm1435_vm2 = vcmp.ge.f32.partialorder %v1189_v57, 0.0  ;;  %v1499_v61 = vmul.f32 0.01, %v1189_v57 }
 0x149   :  { %1624 = vst [vmem:[%s2930_s3] sm:$0xff] %v1560_v5  ;;  %v2617_v32 = vpop.f32.mrf.mxu0  ;;  %v1875_v35 = vpop.f32.mrf.mxu1  ;;  %v932_v5 = vadd.f32 %v2596_v55, %v2573_v37 }
 0x14a   :  { %vm1433_vm3 = vcmp.ge.f32.partialorder %v1181_v31, 0.0  ;;  %v1497_v39 = vmul.f32 0.01, %v1181_v31  ;;  %v1202_v40 = vadd.f32 %v1875_v35, %v913_v28  ;;  %v1563_v43 = vsel %vm1435_vm2, %v1189_v57, %v1499_v61 }
 0x14b   :  { %v962_v44 = vpop.f32.mrf.mxu0  ;;  %v1193_v17 = vpop.f32.mrf.mxu1  ;;  %1627 = vst [vmem:[%s2930_s3 + $0x18] sm:$0xff] %v1563_v43  ;;  %v924_v61 = vadd.f32 %v2596_v55, %v2565_v29  ;;  %v945_v43 = vadd.f32 %v2596_v55, %v2585_v49 }
 0x14c   :  { %v1561_v47 = vsel %vm1433_vm3, %v1181_v31, %v1497_v39  ;;  %vm1438_vm4 = vcmp.ge.f32.partialorder %v1202_v40, 0.0  ;;  %v1502_v48 = vmul.f32 0.01, %v1202_v40  ;;  %v1194_v51 = vadd.f32 %v1193_v17, %v905_v36 }
 0x14d   :  { %1625 = vst [vmem:[%s2930_s3 + $0x8] sm:$0xff] %v1561_v47  ;;  %v2629_v9 = vpop.f32.mrf.mxu0  ;;  %v1876_v56 = vpop.f32.mrf.mxu1 }
 0x14e   :  { %v1566_v60 = vsel %vm1438_vm4, %v1202_v40, %v1502_v48  ;;  %vm1436_vm5 = vcmp.ge.f32.partialorder %v1194_v51, 0.0  ;;  %v1500_v0 = vmul.f32 0.01, %v1194_v51  ;;  %v1205_v3 = vadd.f32 %v1876_v56, %v916_v52 }
 0x14f   :  { %1630 = vst [vmem:[%s2930_s3 + $0x30] sm:$0xff] %v1566_v60  ;;  %v965_v4 = vpop.f32.mrf.mxu0  ;;  %v1196_v21 = vpop.f32.mrf.mxu1 }
 0x150   :  { %v1564_v8 = vsel %vm1436_vm5, %v1194_v51, %v1500_v0  ;;  %v1197_v11 = vadd.f32 %v1196_v21, %v908_v59  ;;  %vm1439_vm6 = vcmp.ge.f32.partialorder %v1205_v3, 0.0  ;;  %v1503_v13 = vmul.f32 0.01, %v1205_v3 }
 0x151   :  { %1628 = vst [vmem:[%s2930_s3 + $0x20] sm:$0xff] %v1564_v8  ;;  %v2641_v12 = vpop.f32.mrf.mxu0  ;;  %v1879_v15 = vpop.f32.mrf.mxu1  ;;  %v937_v51 = vadd.f32 %v2596_v55, %v2577_v41  ;;  %v948_v21 = vadd.f32 %v2596_v55, %v2589_v53  ;;  %v940_v8 = vadd.f32 %v2596_v55, %v2581_v45  ;;  %v961_v53 = vadd.f32 %v2596_v55, %v2617_v32 }
 0x152   :  { %vm1437_vm7 = vcmp.ge.f32.partialorder %v1197_v11, 0.0  ;;  %v1501_v1 = vmul.f32 0.01, %v1197_v11  ;;  %v1218_v20 = vadd.f32 %v1879_v15, %v929_v7  ;;  %v1567_v23 = vsel %vm1439_vm6, %v1205_v3, %v1503_v13 }
 0x153   :  { %v970_v57 = vpop.f32.mrf.mxu0  ;;  %v1209_v33 = vpop.f32.mrf.mxu1  ;;  %1631 = vst [vmem:[%s2930_s3 + $0x38] sm:$0xff] %v1567_v23 }
 0x154   :  { %v1565_v24 = vsel %vm1437_vm7, %v1197_v11, %v1501_v1  ;;  %vm1442_vm8 = vcmp.ge.f32.partialorder %v1218_v20, 0.0  ;;  %v1506_v27 = vmul.f32 0.01, %v1218_v20  ;;  %v1210_v28 = vadd.f32 %v1209_v33, %v921_v19 }
 0x155   :  { %1629 = vst [vmem:[%s2930_s3 + $0x28] sm:$0xff] %v1565_v24  ;;  %v2653_v25 = vpop.f32.mrf.mxu0  ;;  %v1880_v31 = vpop.f32.mrf.mxu1  ;;  %v953_v24 = vadd.f32 %v2596_v55, %v2599_v63 }
 0x156   :  { %v1570_v35 = vsel %vm1442_vm8, %v1218_v20, %v1506_v27  ;;  %vm1440_vm9 = vcmp.ge.f32.partialorder %v1210_v28, 0.0  ;;  %v1504_v36 = vmul.f32 0.01, %v1210_v28  ;;  %v1221_v39 = vadd.f32 %v1880_v31, %v932_v5 }
 0x157   :  { %1634 = vst [vmem:[%s2930_s3 + $0x50] sm:$0xff] %v1570_v35  ;;  %v973_v40 = vpop.f32.mrf.mxu0  ;;  %v1212_v37 = vpop.f32.mrf.mxu1 }
 0x158   :  { %v1568_v44 = vsel %vm1440_vm9, %v1210_v28, %v1504_v36  ;;  %v1213_v17 = vadd.f32 %v1212_v37, %v924_v61  ;;  %vm1443_vm10 = vcmp.ge.f32.partialorder %v1221_v39, 0.0  ;;  %v1507_v29 = vmul.f32 0.01, %v1221_v39 }
 0x159   :  { %1632 = vst [vmem:[%s2930_s3 + $0x40] sm:$0xff] %v1568_v44  ;;  %v976_v47 = vpop.f32.mrf.mxu0  ;;  %v1883_v48 = vpop.f32.mrf.mxu1  ;;  %v956_v37 = vadd.f32 %v2596_v55, %v2605_v16 }
 0x15a   :  { %vm1441_vm11 = vcmp.ge.f32.partialorder %v1213_v17, 0.0  ;;  %v1505_v52 = vmul.f32 0.01, %v1213_v17  ;;  %v1234_v56 = vadd.f32 %v1883_v48, %v945_v43  ;;  %v1571_v59 = vsel %vm1443_vm10, %v1221_v39, %v1507_v29 }
 0x15b   :  { %v978_v60 = vpop.f32.mrf.mxu0  ;;  %v1225_v0 = vpop.f32.mrf.mxu1  ;;  %1635 = vst [vmem:[%s2930_s3 + $0x58] sm:$0xff] %v1571_v59  ;;  %v964_v39 = vadd.f32 %v2596_v55, %v2629_v9  ;;  %v977_v48 = vadd.f32 %v2596_v55, %v976_v47 }
 0x15c   :  { %v1569_v49 = vsel %vm1441_vm11, %v1213_v17, %v1505_v52  ;;  %vm1446_vm12 = vcmp.ge.f32.partialorder %v1234_v56, 0.0  ;;  %v1510_v3 = vmul.f32 0.01, %v1234_v56  ;;  %v1226_v4 = vadd.f32 %v1225_v0, %v937_v51 }
 0x15d   :  { %1633 = vst [vmem:[%s2930_s3 + $0x48] sm:$0xff] %v1569_v49  ;;  %v979_v41 = vpop.f32.mrf.mxu0  ;;  %v1884_v7 = vpop.f32.mrf.mxu1  ;;  %v969_v60 = vadd.f32 %v2596_v55, %v2641_v12 }
 0x15e   :  { %v1574_v11 = vsel %vm1446_vm12, %v1234_v56, %v1510_v3  ;;  %vm1444_vm13 = vcmp.ge.f32.partialorder %v1226_v4, 0.0  ;;  %v1508_v13 = vmul.f32 0.01, %v1226_v4  ;;  %v1237_v15 = vadd.f32 %v1884_v7, %v948_v21 }
 0x15f   :  { %1638 = vst [vmem:[%s2930_s3 + $0x70] sm:$0xff] %v1574_v11  ;;  %v981_v19 = vpop.f32.mrf.mxu0  ;;  %v1228_v1 = vpop.f32.mrf.mxu1  ;;  %v980_v11 = vadd.f32 %v2596_v55, %v979_v41 }
 0x160   :  { %v1572_v20 = vsel %vm1444_vm13, %v1226_v4, %v1508_v13  ;;  %v1229_v23 = vadd.f32 %v1228_v1, %v940_v8  ;;  %vm1447_vm14 = vcmp.ge.f32.partialorder %v1237_v15, 0.0  ;;  %v1511_v45 = vmul.f32 0.01, %v1237_v15 }
 0x161   :  { %1636 = vst [vmem:[%s2930_s3 + $0x60] sm:$0xff] %v1572_v20  ;;  %v2685_v57 = vpop.f32.mrf.mxu0  ;;  %v1887_v33 = vpop.f32.mrf.mxu1 }
 0x162   :  { %vm1445_vm15 = vcmp.ge.f32.partialorder %v1229_v23, 0.0  ;;  %v1509_v27 = vmul.f32 0.01, %v1229_v23  ;;  %v1250_v28 = vadd.f32 %v1887_v33, %v961_v53  ;;  %v1575_v5 = vsel %vm1447_vm14, %v1237_v15, %v1511_v45 }
 0x163   :  { %v986_v31 = vpop.f32.mrf.mxu0  ;;  %v1241_v32 = vpop.f32.mrf.mxu1  ;;  %1639 = vst [vmem:[%s2930_s3 + $0x78] sm:$0xff] %v1575_v5  ;;  %v972_v15 = vadd.f32 %v2596_v55, %v2653_v25 }
 0x164   :  { %v1573_v61 = vsel %vm1445_vm15, %v1229_v23, %v1509_v27  ;;  %vm1450_vm0 = vcmp.ge.f32.partialorder %v1250_v28, 0.0  ;;  %v1514_v35 = vmul.f32 0.01, %v1250_v28  ;;  %v1242_v36 = vadd.f32 %v1241_v32, %v953_v24 }
 0x165   :  { %1637 = vst [vmem:[%s2930_s3 + $0x68] sm:$0xff] %v1573_v61  ;;  %v2697_v63 = vpop.f32.mrf.mxu0  ;;  %v1888_v40 = vpop.f32.mrf.mxu1 }
 0x166   :  { %v1578_v43 = vsel %vm1450_vm0, %v1250_v28, %v1514_v35  ;;  %vm1448_vm1 = vcmp.ge.f32.partialorder %v1242_v36, 0.0  ;;  %v1512_v44 = vmul.f32 0.01, %v1242_v36  ;;  %v1253_v17 = vadd.f32 %v1888_v40, %v964_v39 }
 0x167   :  { %1642 = vst [vmem:[%s2930_s3 + $0x90] sm:$0xff] %v1578_v43  ;;  %v989_v29 = vpop.f32.mrf.mxu0  ;;  %v1244_v9 = vpop.f32.mrf.mxu1  ;;  %v985_v28 = vadd.f32 %v2596_v55, %v2685_v57 }
 0x168   :  { %v1576_v51 = vsel %vm1448_vm1, %v1242_v36, %v1512_v44  ;;  %v1245_v52 = vadd.f32 %v1244_v9, %v956_v37  ;;  %vm1451_vm2 = vcmp.ge.f32.partialorder %v1253_v17, 0.0  ;;  %v1515_v16 = vmul.f32 0.01, %v1253_v17 }
 0x169   :  { %1640 = vst [vmem:[%s2930_s3 + $0x80] sm:$0xff] %v1576_v51  ;;  %v992_v56 = vpop.f32.mrf.mxu0  ;;  %v1891_v59 = vpop.f32.mrf.mxu1  ;;  %v988_v44 = vadd.f32 %v2596_v55, %v2697_v63 }
 0x16a   :  { %vm1449_vm3 = vcmp.ge.f32.partialorder %v1245_v52, 0.0  ;;  %v1513_v0 = vmul.f32 0.01, %v1245_v52  ;;  %v1266_v49 = vadd.f32 %v1891_v59, %v977_v48  ;;  %v1579_v3 = vsel %vm1451_vm2, %v1253_v17, %v1515_v16 }
 0x16b   :  { %v994_v4 = vpop.f32.mrf.mxu0  ;;  %v1257_v21 = vpop.f32.mrf.mxu1  ;;  %1643 = vst [vmem:[%s2930_s3 + $0x98] sm:$0xff] %v1579_v3  ;;  %v993_v41 = vadd.f32 %v2596_v55, %v992_v56 }
 0x16c   :  { %v1577_v47 = vsel %vm1449_vm3, %v1245_v52, %v1513_v0  ;;  %vm1454_vm4 = vcmp.ge.f32.partialorder %v1266_v49, 0.0  ;;  %v1518_v7 = vmul.f32 0.01, %v1266_v49  ;;  %v1258_v8 = vadd.f32 %v1257_v21, %v969_v60 }
 0x16d   :  { %1641 = vst [vmem:[%s2930_s3 + $0x88] sm:$0xff] %v1577_v47  ;;  %v995_v12 = vpop.f32.mrf.mxu0  ;;  %v1892_v13 = vpop.f32.mrf.mxu1 }
 0x16e   :  { %v1582_v19 = vsel %vm1454_vm4, %v1266_v49, %v1518_v7  ;;  %vm1452_vm5 = vcmp.ge.f32.partialorder %v1258_v8, 0.0  ;;  %v1516_v1 = vmul.f32 0.01, %v1258_v8  ;;  %v1269_v53 = vadd.f32 %v1892_v13, %v980_v11 }
 0x16f   :  { %1646 = vst [vmem:[%s2930_s3 + $0xb0] sm:$0xff] %v1582_v19  ;;  %v997_v20 = vpop.f32.mrf.mxu0  ;;  %v1260_v23 = vpop.f32.mrf.mxu1  ;;  %v996_v37 = vadd.f32 %v2596_v55, %v995_v12 }
 0x170   :  { %v1580_v45 = vsel %vm1452_vm5, %v1258_v8, %v1516_v1  ;;  %v1261_v33 = vadd.f32 %v1260_v23, %v972_v15  ;;  %vm1455_vm6 = vcmp.ge.f32.partialorder %v1269_v53, 0.0  ;;  %v1519_v25 = vmul.f32 0.01, %v1269_v53 }
 0x171   :  { %1644 = vst [vmem:[%s2930_s3 + $0xa0] sm:$0xff] %v1580_v45  ;;  %v1000_v24 = vpop.f32.mrf.mxu0  ;;  %v1895_v27 = vpop.f32.mrf.mxu1 }
 0x172   :  { %vm1453_vm7 = vcmp.ge.f32.partialorder %v1261_v33, 0.0  ;;  %v1517_v5 = vmul.f32 0.01, %v1261_v33  ;;  %v1282_v31 = vadd.f32 %v1895_v27, %v993_v41  ;;  %v1583_v32 = vsel %vm1455_vm6, %v1269_v53, %v1519_v25 }
 0x173   :  { %v1002_v61 = vpop.f32.mrf.mxu0  ;;  %v1273_v35 = vpop.f32.mrf.mxu1  ;;  %1647 = vst [vmem:[%s2930_s3 + $0xb8] sm:$0xff] %v1583_v32  ;;  %v1001_v60 = vadd.f32 %v2596_v55, %v1000_v24 }
 0x174   :  { %v1581_v36 = vsel %vm1453_vm7, %v1261_v33, %v1517_v5  ;;  %vm1458_vm8 = vcmp.ge.f32.partialorder %v1282_v31, 0.0  ;;  %v1522_v39 = vmul.f32 0.01, %v1282_v31  ;;  %v1274_v40 = vadd.f32 %v1273_v35, %v985_v28 }
 0x175   :  { %1645 = vst [vmem:[%s2930_s3 + $0xa8] sm:$0xff] %v1581_v36  ;;  %v1003_v57 = vpop.f32.mrf.mxu0  ;;  %v1896_v43 = vpop.f32.mrf.mxu1 }
 0x176   :  { %v1586_v17 = vsel %vm1458_vm8, %v1282_v31, %v1522_v39  ;;  %vm1456_vm9 = vcmp.ge.f32.partialorder %v1274_v40, 0.0  ;;  %v1520_v29 = vmul.f32 0.01, %v1274_v40  ;;  %v1285_v9 = vadd.f32 %v1896_v43, %v996_v37 }
 0x177   :  { %1650 = vst [vmem:[%s2930_s3 + $0xd0] sm:$0xff] %v1586_v17  ;;  %v1005_v48 = vpop.f32.mrf.mxu0  ;;  %v1276_v51 = vpop.f32.mrf.mxu1  ;;  %v1004_v11 = vadd.f32 %v2596_v55, %v1003_v57 }
 0x178   :  { %v1584_v52 = vsel %vm1456_vm9, %v1274_v40, %v1520_v29  ;;  %v1277_v16 = vadd.f32 %v1276_v51, %v988_v44  ;;  %vm1459_vm10 = vcmp.ge.f32.partialorder %v1285_v9, 0.0  ;;  %v1523_v56 = vmul.f32 0.01, %v1285_v9 }
 0x179   :  { %1648 = vst [vmem:[%s2930_s3 + $0xc0] sm:$0xff] %v1584_v52  ;;  %v1008_v59 = vpop.f32.mrf.mxu0  ;;  %v1899_v63 = vpop.f32.mrf.mxu1 }
 0x17a   :  { %vm1457_vm11 = vcmp.ge.f32.partialorder %v1277_v16, 0.0  ;;  %v1521_v0 = vmul.f32 0.01, %v1277_v16  ;;  %v1009_v49 = vadd.f32 %v2596_v55, %v1008_v59  ;;  %v1587_v3 = vsel %vm1459_vm10, %v1285_v9, %v1523_v56 }
 0x17b   :  { %v1010_v4 = vpop.f32.mrf.mxu0  ;;  %v1289_v21 = vpop.f32.mrf.mxu1  ;;  %1651 = vst [vmem:[%s2930_s3 + $0xd8] sm:$0xff] %v1587_v3 }
 0x17c   :  { %v1585_v47 = vsel %vm1457_vm11, %v1277_v16, %v1521_v0  ;;  %v1298_v7 = vadd.f32 %v1899_v63, %v1009_v49  ;;  %v1290_v8 = vadd.f32 %v1289_v21, %v1001_v60 }
 0x17d   :  { %1649 = vst [vmem:[%s2930_s3 + $0xc8] sm:$0xff] %v1585_v47  ;;  %v1011_v12 = vpop.f32.mrf.mxu0  ;;  %v1900_v13 = vpop.f32.mrf.mxu1 }
 0x17e   :  { %vm1462_vm12 = vcmp.ge.f32.partialorder %v1298_v7, 0.0  ;;  %v1526_v15 = vmul.f32 0.01, %v1298_v7  ;;  %vm1460_vm13 = vcmp.ge.f32.partialorder %v1290_v8, 0.0  ;;  %v1524_v19 = vmul.f32 0.01, %v1290_v8 }
 0x17f   :  { %v1012_v1 = vadd.f32 %v2596_v55, %v1011_v12  ;;  %v1013_v53 = vpop.f32.mrf.mxu0  ;;  %v1292_v20 = vpop.f32.mrf.mxu1 }
 0x180   :  { %v1590_v23 = vsel %vm1462_vm12, %v1298_v7, %v1526_v15  ;;  %v1588_v41 = vsel %vm1460_vm13, %v1290_v8, %v1524_v19  ;;  %v1293_v45 = vadd.f32 %v1292_v20, %v1004_v11 }
 0x181   :  { %1654 = vst [vmem:[%s2930_s3 + $0xf0] sm:$0xff] %v1590_v23  ;;  %1652 = vst [vmem:[%s2930_s3 + $0xe0] sm:$0xff] %v1588_v41  ;;  %v1301_v33 = vadd.f32 %v1900_v13, %v1012_v1  ;;  %v1016_v25 = vpop.f32.mrf.mxu0  ;;  %v1903_v24 = vpop.f32.mrf.mxu1 }
 0x182   :  { %vm1461_vm14 = vcmp.ge.f32.partialorder %v1293_v45, 0.0  ;;  %v1525_v27 = vmul.f32 0.01, %v1293_v45  ;;  %v1017_v28 = vadd.f32 %v2596_v55, %v1016_v25 }
 0x183   :  { %vm1463_vm15 = vcmp.ge.f32.partialorder %v1301_v33, 0.0  ;;  %v1527_v5 = vmul.f32 0.01, %v1301_v33  ;;  %v1018_v31 = vpop.f32.mrf.mxu0  ;;  %v1305_v32 = vpop.f32.mrf.mxu1 }
 0x184   :  { %v1589_v61 = vsel %vm1461_vm14, %v1293_v45, %v1525_v27  ;;  %v1306_v35 = vadd.f32 %v1305_v32, %v1017_v28 }
 0x185   :  { %v1591_v36 = vsel %vm1463_vm15, %v1301_v33, %v1527_v5  ;;  %1653 = vst [vmem:[%s2930_s3 + $0xe8] sm:$0xff] %v1589_v61  ;;  %v1019_v39 = vpop.f32.mrf.mxu0  ;;  %v1904_v40 = vpop.f32.mrf.mxu1 }
 0x186   :  { %1655 = vst [vmem:[%s2930_s3 + $0xf8] sm:$0xff] %v1591_v36  ;;  %vm1464_vm0 = vcmp.ge.f32.partialorder %v1306_v35, 0.0  ;;  %v1528_v37 = vmul.f32 0.01, %v1306_v35  ;;  %v1020_v57 = vadd.f32 %v2596_v55, %v1019_v39 }
 0x187   :  { %v1021_v43 = vpop.f32.mrf.mxu0  ;;  %v1308_v44 = vpop.f32.mrf.mxu1 }
 0x188   :  { %v1592_v17 = vsel %vm1464_vm0, %v1306_v35, %v1528_v37  ;;  %v1309_v29 = vadd.f32 %v1308_v44, %v1020_v57 }
 0x189   :  { %1656 = vst [vmem:[%s2930_s3 + $0x100] sm:$0xff] %v1592_v17  ;;  %v1024_v9 = vpop.f32.mrf.mxu0  ;;  %v1907_v48 = vpop.f32.mrf.mxu1 }
 0x18a   :  { %vm1465_vm1 = vcmp.ge.f32.partialorder %v1309_v29, 0.0  ;;  %v1529_v51 = vmul.f32 0.01, %v1309_v29  ;;  %v1025_v52 = vadd.f32 %v2596_v55, %v1024_v9 }
 0x18b   :  { %v1026_v16 = vpop.f32.mrf.mxu0  ;;  %v1321_v56 = vpop.f32.mrf.mxu1 }
 0x18c   :  { %v1593_v59 = vsel %vm1465_vm1, %v1309_v29, %v1529_v51  ;;  %v1314_v63 = vadd.f32 %v1903_v24, %v1025_v52  ;;  %v1089_v29 = vadd.f32 %v2596_v55, %v2539_v2 }
 0x18d   :  { %1657 = vst [vmem:[%s2930_s3 + $0x108] sm:$0xff] %v1593_v59  ;;  %v1027_v60 = vpop.f32.mrf.mxu0  ;;  %v1908_v0 = vpop.f32.mrf.mxu1 }
 0x18e   :  { %vm1466_vm2 = vcmp.ge.f32.partialorder %v1314_v63, 0.0  ;;  %v1530_v49 = vmul.f32 0.01, %v1314_v63  ;;  %v1028_v3 = vadd.f32 %v2596_v55, %v1027_v60 }
 0x18f   :  { %v1029_v4 = vpop.f32.mrf.mxu0  ;;  %v1324_v21 = vpop.f32.mrf.mxu1 }
 0x190   :  { %v1594_v47 = vsel %vm1466_vm2, %v1314_v63, %v1530_v49  ;;  %v1317_v7 = vadd.f32 %v1904_v40, %v1028_v3  ;;  %v1081_v63 = vadd.f32 %v2596_v55, %v2533_v58  ;;  %v1084_v4 = vadd.f32 %v2596_v55, %v2537_v62 }
 0x191   :  { %1658 = vst [vmem:[%s2930_s3 + $0x110] sm:$0xff] %v1594_v47  ;;  %v1032_v8 = vpop.f32.mrf.mxu0  ;;  %v2778_v11 = vpop.f32.mrf.mxu1 }
 0x192   :  { %vm1467_vm3 = vcmp.ge.f32.partialorder %v1317_v7, 0.0  ;;  %v1531_v12 = vmul.f32 0.01, %v1317_v7  ;;  %v1033_v13 = vadd.f32 %v2596_v55, %v1032_v8 }
 0x193   :  { %v1034_v15 = vpop.f32.mrf.mxu0  ;;  %v1337_v19 = vpop.f32.mrf.mxu1 }
 0x194   :  { %v1595_v1 = vsel %vm1467_vm3, %v1317_v7, %v1531_v12  ;;  %v1322_v53 = vadd.f32 %v1321_v56, %v1033_v13 }
 0x195   :  { %1659 = vst [vmem:[%s2930_s3 + $0x118] sm:$0xff] %v1595_v1  ;;  %v1035_v20 = vpop.f32.mrf.mxu0  ;;  %v2784_v23 = vpop.f32.mrf.mxu1  ;;  %v1097_v1 = vadd.f32 %v2596_v55, %v2547_v10 }
 0x196   :  { %vm1468_vm4 = vcmp.ge.f32.partialorder %v1322_v53, 0.0  ;;  %v1532_v41 = vmul.f32 0.01, %v1322_v53  ;;  %v1036_v45 = vadd.f32 %v2596_v55, %v1035_v20 }
 0x197   :  { %v1037_v33 = vpop.f32.mrf.mxu0  ;;  %v1340_v25 = vpop.f32.mrf.mxu1 }
 0x198   :  { %v1596_v24 = vsel %vm1468_vm4, %v1322_v53, %v1532_v41  ;;  %v1325_v27 = vadd.f32 %v1324_v21, %v1036_v45  ;;  %v1092_v21 = vadd.f32 %v2596_v55, %v2543_v6  ;;  %v1105_v45 = vadd.f32 %v2596_v55, %v2555_v18 }
 0x199   :  { %1660 = vst [vmem:[%s2930_s3 + $0x120] sm:$0xff] %v1596_v24  ;;  %v1040_v28 = vpop.f32.mrf.mxu0  ;;  %v2790_v5 = vpop.f32.mrf.mxu1 }
 0x19a   :  { %vm1469_vm5 = vcmp.ge.f32.partialorder %v1325_v27, 0.0  ;;  %v1533_v31 = vmul.f32 0.01, %v1325_v27  ;;  %v1041_v32 = vadd.f32 %v2596_v55, %v1040_v28 }
 0x19b   :  { %v1042_v61 = vpop.f32.mrf.mxu0  ;;  %v2793_v35 = vpop.f32.mrf.mxu1 }
 0x19c   :  { %v1597_v36 = vsel %vm1469_vm5, %v1325_v27, %v1533_v31  ;;  %v1330_v39 = vadd.f32 %v1907_v48, %v1041_v32 }
 0x19d   :  { %1661 = vst [vmem:[%s2930_s3 + $0x128] sm:$0xff] %v1597_v36  ;;  %v1043_v40 = vpop.f32.mrf.mxu0  ;;  %v2798_v37 = vpop.f32.mrf.mxu1 }
 0x19e   :  { %vm1470_vm6 = vcmp.ge.f32.partialorder %v1330_v39, 0.0  ;;  %v1534_v57 = vmul.f32 0.01, %v1330_v39  ;;  %v1044_v43 = vadd.f32 %v2596_v55, %v1043_v40 }
 0x19f   :  { %v1045_v44 = vpop.f32.mrf.mxu0  ;;  %v2801_v17 = vpop.f32.mrf.mxu1 }
 0x1a0   :  { %v1598_v9 = vsel %vm1470_vm6, %v1330_v39, %v1534_v57  ;;  %v1333_v51 = vadd.f32 %v1908_v0, %v1044_v43  ;;  %v1108_v39 = vadd.f32 %v2596_v55, %v2559_v22 }
 0x1a1   :  { %1662 = vst [vmem:[%s2930_s3 + $0x130] sm:$0xff] %v1598_v9  ;;  %v1048_v48 = vpop.f32.mrf.mxu0  ;;  %v1919_v52 = vpop.f32.mrf.mxu1 }
 0x1a2   :  { %vm1471_vm7 = vcmp.ge.f32.partialorder %v1333_v51, 0.0  ;;  %v1535_v16 = vmul.f32 0.01, %v1333_v51  ;;  %v1049_v56 = vadd.f32 %v2596_v55, %v1048_v48  ;;  %v1378_v59 = vadd.f32 %v1919_v52, %v1089_v29 }
 0x1a3   :  { %v1050_v60 = vpop.f32.mrf.mxu0  ;;  %v1369_v49 = vpop.f32.mrf.mxu1 }
 0x1a4   :  { %v1599_v3 = vsel %vm1471_vm7, %v1333_v51, %v1535_v16  ;;  %v1338_v2 = vadd.f32 %v1337_v19, %v1049_v56  ;;  %vm1482_vm8 = vcmp.ge.f32.partialorder %v1378_v59, 0.0  ;;  %v1546_v0 = vmul.f32 0.01, %v1378_v59 }
 0x1a5   :  { %1663 = vst [vmem:[%s2930_s3 + $0x138] sm:$0xff] %v1599_v3  ;;  %v1370_v47 = vadd.f32 %v1369_v49, %v1081_v63  ;;  %v1051_v7 = vpop.f32.mrf.mxu0  ;;  %v1920_v8 = vpop.f32.mrf.mxu1  ;;  %v1100_v16 = vadd.f32 %v2596_v55, %v2551_v14  ;;  %v1121_v14 = vadd.f32 %v2596_v55, %v2571_v34 }
 0x1a6   :  { %vm1472_vm9 = vcmp.ge.f32.partialorder %v1338_v2, 0.0  ;;  %v1536_v58 = vmul.f32 0.01, %v1338_v2  ;;  %v1610_v12 = vsel %vm1482_vm8, %v1378_v59, %v1546_v0  ;;  %v1052_v13 = vadd.f32 %v2596_v55, %v1051_v7 }
 0x1a7   :  { %1674 = vst [vmem:[%s2930_s3 + $0x190] sm:$0xff] %v1610_v12  ;;  %vm1480_vm10 = vcmp.ge.f32.partialorder %v1370_v47, 0.0  ;;  %v1544_v62 = vmul.f32 0.01, %v1370_v47  ;;  %v1381_v15 = vadd.f32 %v1920_v8, %v1092_v21  ;;  %v1053_v6 = vpop.f32.mrf.mxu0  ;;  %v1372_v19 = vpop.f32.mrf.mxu1 }
 0x1a8   :  { %v1600_v53 = vsel %vm1472_vm9, %v1338_v2, %v1536_v58  ;;  %v1341_v20 = vadd.f32 %v1340_v25, %v1052_v13  ;;  %v1373_v41 = vadd.f32 %v1372_v19, %v1084_v4  ;;  %v1113_v2 = vadd.f32 %v2596_v55, %v2563_v26 }
 0x1a9   :  { %1664 = vst [vmem:[%s2930_s3 + $0x140] sm:$0xff] %v1600_v53  ;;  %v1608_v33 = vsel %vm1480_vm10, %v1370_v47, %v1544_v62  ;;  %vm1483_vm11 = vcmp.ge.f32.partialorder %v1381_v15, 0.0  ;;  %v1547_v24 = vmul.f32 0.01, %v1381_v15  ;;  %v1056_v27 = vpop.f32.mrf.mxu0  ;;  %v1923_v28 = vpop.f32.mrf.mxu1  ;;  %v1116_v13 = vadd.f32 %v2596_v55, %v2567_v30 }
 0x1aa   :  { %1672 = vst [vmem:[%s2930_s3 + $0x180] sm:$0xff] %v1608_v33  ;;  %vm1473_vm12 = vcmp.ge.f32.partialorder %v1341_v20, 0.0  ;;  %v1537_v10 = vmul.f32 0.01, %v1341_v20  ;;  %vm1481_vm13 = vcmp.ge.f32.partialorder %v1373_v41, 0.0  ;;  %v1057_v18 = vadd.f32 %v2596_v55, %v1056_v27 }
 0x1ab   :  { %v1545_v25 = vmul.f32 0.01, %v1373_v41  ;;  %v1611_v31 = vsel %vm1483_vm11, %v1381_v15, %v1547_v24  ;;  %v1394_v32 = vadd.f32 %v1923_v28, %v1105_v45  ;;  %v1058_v61 = vpop.f32.mrf.mxu0  ;;  %v1385_v36 = vpop.f32.mrf.mxu1  ;;  %v1124_v19 = vadd.f32 %v2596_v55, %v2575_v38 }
 0x1ac   :  { %v1601_v40 = vsel %vm1473_vm12, %v1341_v20, %v1537_v10  ;;  %1675 = vst [vmem:[%s2930_s3 + $0x198] sm:$0xff] %v1611_v31  ;;  %v1386_v43 = vadd.f32 %v1385_v36, %v1097_v1  ;;  %v1346_v44 = vadd.f32 %v2778_v11, %v1057_v18  ;;  %v1137_v28 = vadd.f32 %v2596_v55, %v2587_v50 }
 0x1ad   :  { %v1609_v57 = vsel %vm1481_vm13, %v1373_v41, %v1545_v25  ;;  %1665 = vst [vmem:[%s2930_s3 + $0x148] sm:$0xff] %v1601_v40  ;;  %vm1486_vm14 = vcmp.ge.f32.partialorder %v1394_v32, 0.0  ;;  %v1550_v29 = vmul.f32 0.01, %v1394_v32  ;;  %v1059_v22 = vpop.f32.mrf.mxu0  ;;  %v1924_v9 = vpop.f32.mrf.mxu1 }
 0x1ae   :  { %1673 = vst [vmem:[%s2930_s3 + $0x188] sm:$0xff] %v1609_v57  ;;  %vm1484_vm15 = vcmp.ge.f32.partialorder %v1386_v43, 0.0  ;;  %v1548_v51 = vmul.f32 0.01, %v1386_v43  ;;  %v1060_v48 = vadd.f32 %v2596_v55, %v1059_v22  ;;  %v1397_v52 = vadd.f32 %v1924_v9, %v1108_v39 }
 0x1af   :  { %vm1474_vm0 = vcmp.ge.f32.partialorder %v1346_v44, 0.0  ;;  %v1538_v56 = vmul.f32 0.01, %v1346_v44  ;;  %v1614_v59 = vsel %vm1486_vm14, %v1394_v32, %v1550_v29  ;;  %v1061_v63 = vpop.f32.mrf.mxu0  ;;  %v1388_v60 = vpop.f32.mrf.mxu1  ;;  %v1129_v57 = vadd.f32 %v2596_v55, %v2579_v42 }
 0x1b0   :  { %1678 = vst [vmem:[%s2930_s3 + $0x1b0] sm:$0xff] %v1614_v59  ;;  %v1612_v11 = vsel %vm1484_vm15, %v1386_v43, %v1548_v51  ;;  %v1349_v49 = vadd.f32 %v2784_v23, %v1060_v48  ;;  %vm1487_vm1 = vcmp.ge.f32.partialorder %v1397_v52, 0.0  ;;  %v1551_v3 = vmul.f32 0.01, %v1397_v52 }
 0x1b1   :  { %v1602_v0 = vsel %vm1474_vm0, %v1346_v44, %v1538_v56  ;;  %1676 = vst [vmem:[%s2930_s3 + $0x1a0] sm:$0xff] %v1612_v11  ;;  %v1389_v4 = vadd.f32 %v1388_v60, %v1100_v16  ;;  %v1064_v21 = vpop.f32.mrf.mxu0  ;;  %v1927_v47 = vpop.f32.mrf.mxu1  ;;  %v1132_v48 = vadd.f32 %v2596_v55, %v2583_v46  ;;  %v1140_v42 = vadd.f32 %v2596_v55, %v2591_v54 }
 0x1b2   :  { %1666 = vst [vmem:[%s2930_s3 + $0x150] sm:$0xff] %v1602_v0  ;;  %vm1475_vm2 = vcmp.ge.f32.partialorder %v1349_v49, 0.0  ;;  %v1539_v23 = vmul.f32 0.01, %v1349_v49  ;;  %v1615_v7 = vsel %vm1487_vm1, %v1397_v52, %v1551_v3  ;;  %v1065_v26 = vadd.f32 %v2596_v55, %v1064_v21 }
 0x1b3   :  { %1679 = vst [vmem:[%s2930_s3 + $0x1b8] sm:$0xff] %v1615_v7  ;;  %vm1485_vm3 = vcmp.ge.f32.partialorder %v1389_v4, 0.0  ;;  %v1549_v34 = vmul.f32 0.01, %v1389_v4  ;;  %v1410_v8 = vadd.f32 %v1927_v47, %v1121_v14  ;;  %v1066_v58 = vpop.f32.mrf.mxu0  ;;  %v1401_v12 = vpop.f32.mrf.mxu1 }
 0x1b4   :  { %v1603_v62 = vsel %vm1475_vm2, %v1349_v49, %v1539_v23  ;;  %v1354_v15 = vadd.f32 %v2793_v35, %v1065_v26  ;;  %v1402_v6 = vadd.f32 %v1401_v12, %v1113_v2 }
 0x1b5   :  { %1667 = vst [vmem:[%s2930_s3 + $0x158] sm:$0xff] %v1603_v62  ;;  %v1613_v1 = vsel %vm1485_vm3, %v1389_v4, %v1549_v34  ;;  %vm1490_vm4 = vcmp.ge.f32.partialorder %v1410_v8, 0.0  ;;  %v1554_v53 = vmul.f32 0.01, %v1410_v8  ;;  %v1067_v20 = vpop.f32.mrf.mxu0  ;;  %v1928_v41 = vpop.f32.mrf.mxu1 }
 0x1b6   :  { %1677 = vst [vmem:[%s2930_s3 + $0x1a8] sm:$0xff] %v1613_v1  ;;  %vm1476_vm5 = vcmp.ge.f32.partialorder %v1354_v15, 0.0  ;;  %v1540_v30 = vmul.f32 0.01, %v1354_v15  ;;  %vm1488_vm6 = vcmp.ge.f32.partialorder %v1402_v6, 0.0  ;;  %v1068_v38 = vadd.f32 %v2596_v55, %v1067_v20 }
 0x1b7   :  { %v1552_v35 = vmul.f32 0.01, %v1402_v6  ;;  %v1618_v45 = vsel %vm1490_vm4, %v1410_v8, %v1554_v53  ;;  %v1413_v33 = vadd.f32 %v1928_v41, %v1124_v19  ;;  %v1069_v24 = vpop.f32.mrf.mxu0  ;;  %v1404_v27 = vpop.f32.mrf.mxu1 }
 0x1b8   :  { %v1604_v10 = vsel %vm1476_vm5, %v1354_v15, %v1540_v30  ;;  %1682 = vst [vmem:[%s2930_s3 + $0x1d0] sm:$0xff] %v1618_v45  ;;  %v1405_v31 = vadd.f32 %v1404_v27, %v1116_v13  ;;  %v1357_v18 = vadd.f32 %v2801_v17, %v1068_v38 }
 0x1b9   :  { %v1616_v25 = vsel %vm1488_vm6, %v1402_v6, %v1552_v35  ;;  %1668 = vst [vmem:[%s2930_s3 + $0x160] sm:$0xff] %v1604_v10  ;;  %vm1491_vm7 = vcmp.ge.f32.partialorder %v1413_v33, 0.0  ;;  %v1555_v32 = vmul.f32 0.01, %v1413_v33  ;;  %v1072_v50 = vpop.f32.mrf.mxu0  ;;  %v1931_v61 = vpop.f32.mrf.mxu1 }
 0x1ba   :  { %1680 = vst [vmem:[%s2930_s3 + $0x1c0] sm:$0xff] %v1616_v25  ;;  %vm1489_vm8 = vcmp.ge.f32.partialorder %v1405_v31, 0.0  ;;  %v1553_v36 = vmul.f32 0.01, %v1405_v31  ;;  %v1073_v39 = vadd.f32 %v2596_v55, %v1072_v50  ;;  %v1426_v40 = vadd.f32 %v1931_v61, %v1137_v28 }
 0x1bb   :  { %vm1477_vm9 = vcmp.ge.f32.partialorder %v1357_v18, 0.0  ;;  %v1541_v43 = vmul.f32 0.01, %v1357_v18  ;;  %v1619_v44 = vsel %vm1491_vm7, %v1413_v33, %v1555_v32  ;;  %v1074_v29 = vpop.f32.mrf.mxu0  ;;  %v1417_v22 = vpop.f32.mrf.mxu1 }
 0x1bc   :  { %1683 = vst [vmem:[%s2930_s3 + $0x1d8] sm:$0xff] %v1619_v44  ;;  %v1617_v17 = vsel %vm1489_vm8, %v1405_v31, %v1553_v36  ;;  %v1362_v9 = vadd.f32 %v2790_v5, %v1073_v39  ;;  %vm1494_vm10 = vcmp.ge.f32.partialorder %v1426_v40, 0.0  ;;  %v1558_v51 = vmul.f32 0.01, %v1426_v40 }
 0x1bd   :  { %v1605_v52 = vsel %vm1477_vm9, %v1357_v18, %v1541_v43  ;;  %1681 = vst [vmem:[%s2930_s3 + $0x1c8] sm:$0xff] %v1617_v17  ;;  %v1418_v16 = vadd.f32 %v1417_v22, %v1129_v57  ;;  %v1075_v56 = vpop.f32.mrf.mxu0  ;;  %v1932_v59 = vpop.f32.mrf.mxu1 }
 0x1be   :  { %1669 = vst [vmem:[%s2930_s3 + $0x168] sm:$0xff] %v1605_v52  ;;  %vm1478_vm11 = vcmp.ge.f32.partialorder %v1362_v9, 0.0  ;;  %v1542_v5 = vmul.f32 0.01, %v1362_v9  ;;  %v1622_v63 = vsel %vm1494_vm10, %v1426_v40, %v1558_v51  ;;  %v1076_v46 = vadd.f32 %v2596_v55, %v1075_v56 }
 0x1bf   :  { %1686 = vst [vmem:[%s2930_s3 + $0x1f0] sm:$0xff] %v1622_v63  ;;  %vm1492_vm12 = vcmp.ge.f32.partialorder %v1418_v16, 0.0  ;;  %v1556_v54 = vmul.f32 0.01, %v1418_v16  ;;  %v1429_v60 = vadd.f32 %v1932_v59, %v1140_v42  ;;  %v1077_v11 = vpop.f32.mrf.mxu0  ;;  %v1420_v49 = vpop.f32.mrf.mxu1 }
 0x1c0   :  { %v1606_v3 = vsel %vm1478_vm11, %v1362_v9, %v1542_v5  ;;  %v1365_v2 = vadd.f32 %v2798_v37, %v1076_v46  ;;  %v1421_v14 = vadd.f32 %v1420_v49, %v1132_v48 }
 0x1c1   :  { %1670 = vst [vmem:[%s2930_s3 + $0x170] sm:$0xff] %v1606_v3  ;;  %v1620_v0 = vsel %vm1492_vm12, %v1418_v16, %v1556_v54  ;;  %vm1495_vm13 = vcmp.ge.f32.partialorder %v1429_v60, 0.0  ;;  %v1559_v55 = vmul.f32 0.01, %v1429_v60 }
 0x1c2   :  { %1684 = vst [vmem:[%s2930_s3 + $0x1e0] sm:$0xff] %v1620_v0  ;;  %vm1479_vm14 = vcmp.ge.f32.partialorder %v1365_v2, 0.0  ;;  %v1543_v4 = vmul.f32 0.01, %v1365_v2  ;;  %vm1493_vm15 = vcmp.ge.f32.partialorder %v1421_v14, 0.0 }
 0x1c3   :  { %v1557_v21 = vmul.f32 0.01, %v1421_v14  ;;  %v1623_v47 = vsel %vm1495_vm13, %v1429_v60, %v1559_v55 }
 0x1c4   :  { %v1607_v23 = vsel %vm1479_vm14, %v1365_v2, %v1543_v4  ;;  %1687 = vst [vmem:[%s2930_s3 + $0x1f8] sm:$0xff] %v1623_v47 }
 0x1c5   :  { %v1621_v37 = vsel %vm1493_vm15, %v1421_v14, %v1557_v21  ;;  %1671 = vst [vmem:[%s2930_s3 + $0x178] sm:$0xff] %v1607_v23 }
 0x1c6   :  { %1685 = vst [vmem:[%s2930_s3 + $0x1e8] sm:$0xff] %v1621_v37 }

// kernel: vae_forward.20
= control target key start
LH: loop header
LB: loop body
LE: loop exit
PB: predicated region body
PF: predicated region fallthrough
CT: control target
= control target key end

     0   :  { %s2631_s12 = smov 0   ;;  %s3133_s0 = inlined_call_operand.vmem [shape: bf16[2048,256], index: 0, kind: input, shape index: {}]   ;;  %s3134_s1 = inlined_call_operand.vmem [shape: bf16[256,128], index: 1, kind: input, shape index: {}]   ;;  %s3135_s2 = inlined_call_operand.vmem [shape: f32[1,128], index: 2, kind: input, shape index: {}]   ;;  %s3136_s3 = inlined_call_operand.vmem [shape: f32[2048,128], index: 3, kind: output, shape index: {}]  }
   0x1 LB: > { %s2194_s13 = sadd.s32 4294967295, %s2608_s12   ;;  %p2198_p0 = scmp.ge.s32.totalorder %s2608_s12, 1  ;;  %s2608_s12 = sphi %s2631_s12, %s13_s12  }
   0x2   : > { %p139_p1 = scmp.lt.s32.totalorder %s2608_s12, 3 }
   0x4   : > { %p140_p2 = pnand %p2198_p0, %p139_p1 }
   0x5   : > { %s2199_s16 = sshll.u32 (!%p140_p2), %s2194_s13, 7 }
   0x6   : > { %143 = sbr.rel (%p140_p2) target bundleno = 527 (0x20f), region = 32  ;;  %p165_p3 = scmp.lt.s32.totalorder (!%p140_p2), %s2199_s16, 255 }
   0xb   : > { %v2393_v0 = vld [vmem:[%s3134_s1 + $0x38] sm:$0xff]   ;;  %v2610_v1 = vmov 0   ;;  %v2394_v2 = vld [vmem:[%s3134_s1 + $0x30] sm:$0xff]   ;;  %v2395_v3 = vld [vmem:[%s3134_s1 + $0x28] sm:$0xff]   ;;  %s3138_s16 = smov (!%p165_p3, %s2199_s16), 255 }
   0xc   : > { %1081 = vmatprep.subr.bf16.mxu0 %v2610_v1  ;;  %2352 = vmatprep.subr.bf16.mxu1 %v2610_v1  ;;  %v2396_v4 = vld [vmem:[%s3134_s1 + $0x20] sm:$0xff]   ;;  %s2351_s23 = sshll.u32 %s3138_s16, 3  ;;  %v2397_v5 = vld [vmem:[%s3134_s1 + $0x18] sm:$0xff]   ;;  %v2398_v7 = vld [vmem:[%s3134_s1 + $0x10] sm:$0xff]  }
   0xd   : > { %1082 = vmatpush1.bf16.msra.mxu0 %v2393_v0  ;;  %2368 = vmatpush1.bf16.msra.mxu1 %v2393_v0  ;;  %s2670_s28 = scalar_lea.vmem %s3133_s0, %s2351_s23  ;;  %v2399_v9 = vld [vmem:[%s3134_s1 + $0x8] sm:$0xff]   ;;  %v2400_v10 = vld [vmem:[%s3134_s1] sm:$0xff]   ;;  %v2401_v11 = vld [vmem:[%s3134_s1 + $0x78] sm:$0xff]   ;;  %s2843_s5 = scalar_lea.vmem %s3136_s3, %s2351_s23 }
   0xe   : > { %1083 = vmatprep.subr.bf16.mxu0 %v2610_v1  ;;  %2353 = vmatprep.subr.bf16.mxu1 %v2610_v1  ;;  %v2411_v6 = vld [vmem:[%s2670_s28 + $0x4] ss:$8 sps:$4 sm:$0xff]   ;;  %v2402_v12 = vld [vmem:[%s3134_s1 + $0x70] sm:$0xff]   ;;  %v2405_v15 = vld [vmem:[%s3134_s1 + $0x58] sm:$0xff]  }
   0xf   : > { %v2414_v8 = vld [vmem:[%s2670_s28 + $0x204] ss:$8 sps:$4 sm:$0xff]   ;;  %1113 = vmatprep.mubr.bf16.mxu0 %v2411_v6  ;;  %v2406_v16 = vld [vmem:[%s3134_s1 + $0x50] sm:$0xff]   ;;  %v2409_v19 = vld [vmem:[%s2670_s28] ss:$8 sps:$4 sm:$0xff]  }
  0x10   : > { %1369 = vmatprep.mubr.bf16.mxu1 %v2414_v8  ;;  %v2403_v13 = vld [vmem:[%s3134_s1 + $0x68] sm:$0xff]   ;;  %v2404_v14 = vld [vmem:[%s3134_s1 + $0x60] sm:$0xff]   ;;  %v2415_v21 = vld [vmem:[%s2670_s28 + $0x14] ss:$8 sps:$4 sm:$0xff]  }
  0x11   : > { %1084 = vmatpush1.bf16.msra.mxu0 %v2394_v2  ;;  %2369 = vmatpush1.bf16.msra.mxu1 %v2394_v2  ;;  %v2407_v17 = vld [vmem:[%s3134_s1 + $0x48] sm:$0xff]   ;;  %v2408_v18 = vld [vmem:[%s3134_s1 + $0x40] sm:$0xff]   ;;  %v2417_v22 = vld [vmem:[%s2670_s28 + $0x214] ss:$8 sps:$4 sm:$0xff]  }
  0x12   : > { %1085 = vmatprep.subr.bf16.mxu0 %v2610_v1  ;;  %2354 = vmatprep.subr.bf16.mxu1 %v2610_v1  ;;  %v2412_v20 = vld [vmem:[%s2670_s28 + $0x200] ss:$8 sps:$4 sm:$0xff]   ;;  %v2419_v23 = vld [vmem:[%s2670_s28 + $0x10] ss:$8 sps:$4 sm:$0xff]   ;;  %v2421_v25 = vld [vmem:[%s2670_s28 + $0x24] ss:$8 sps:$4 sm:$0xff]  }
  0x13   : > { %v2420_v24 = vld [vmem:[%s2670_s28 + $0x210] ss:$8 sps:$4 sm:$0xff]   ;;  %v2423_v26 = vld [vmem:[%s2670_s28 + $0x224] ss:$8 sps:$4 sm:$0xff]   ;;  %v2425_v27 = vld [vmem:[%s2670_s28 + $0x20] ss:$8 sps:$4 sm:$0xff]  }
  0x14   : > { %v2426_v28 = vld [vmem:[%s2670_s28 + $0x220] ss:$8 sps:$4 sm:$0xff]   ;;  %v2427_v29 = vld [vmem:[%s2670_s28 + $0x34] ss:$8 sps:$4 sm:$0xff]   ;;  %v2431_v31 = vld [vmem:[%s2670_s28 + $0x30] ss:$8 sps:$4 sm:$0xff]  }
  0x15   : > { %1086 = vmatpush1.bf16.msra.mxu0 %v2395_v3  ;;  %2370 = vmatpush1.bf16.msra.mxu1 %v2395_v3  ;;  %v2429_v30 = vld [vmem:[%s2670_s28 + $0x234] ss:$8 sps:$4 sm:$0xff]   ;;  %v2432_v32 = vld [vmem:[%s2670_s28 + $0x230] ss:$8 sps:$4 sm:$0xff]   ;;  %v2433_v33 = vld [vmem:[%s2670_s28 + $0x44] ss:$8 sps:$4 sm:$0xff]  }
  0x16   : > { %1087 = vmatprep.subr.bf16.mxu0 %v2610_v1  ;;  %2355 = vmatprep.subr.bf16.mxu1 %v2610_v1  ;;  %v2435_v34 = vld [vmem:[%s2670_s28 + $0x244] ss:$8 sps:$4 sm:$0xff]   ;;  %v2437_v35 = vld [vmem:[%s2670_s28 + $0x40] ss:$8 sps:$4 sm:$0xff]   ;;  %v2439_v37 = vld [vmem:[%s2670_s28 + $0x54] ss:$8 sps:$4 sm:$0xff]  }
  0x17   : > { %v2438_v36 = vld [vmem:[%s2670_s28 + $0x240] ss:$8 sps:$4 sm:$0xff]   ;;  %v2441_v38 = vld [vmem:[%s2670_s28 + $0x254] ss:$8 sps:$4 sm:$0xff]   ;;  %v2443_v39 = vld [vmem:[%s2670_s28 + $0x50] ss:$8 sps:$4 sm:$0xff]  }
  0x18   : > { %v2444_v40 = vld [vmem:[%s2670_s28 + $0x250] ss:$8 sps:$4 sm:$0xff]   ;;  %v2445_v41 = vld [vmem:[%s2670_s28 + $0x64] ss:$8 sps:$4 sm:$0xff]   ;;  %v2449_v43 = vld [vmem:[%s2670_s28 + $0x60] ss:$8 sps:$4 sm:$0xff]  }
  0x19   : > { %1088 = vmatpush1.bf16.msra.mxu0 %v2396_v4  ;;  %2371 = vmatpush1.bf16.msra.mxu1 %v2396_v4  ;;  %v2447_v42 = vld [vmem:[%s2670_s28 + $0x264] ss:$8 sps:$4 sm:$0xff]   ;;  %v2450_v44 = vld [vmem:[%s2670_s28 + $0x260] ss:$8 sps:$4 sm:$0xff]   ;;  %v2451_v45 = vld [vmem:[%s2670_s28 + $0x74] ss:$8 sps:$4 sm:$0xff]  }
  0x1a   : > { %1089 = vmatprep.subr.bf16.mxu0 %v2610_v1  ;;  %2356 = vmatprep.subr.bf16.mxu1 %v2610_v1  ;;  %v2453_v46 = vld [vmem:[%s2670_s28 + $0x274] ss:$8 sps:$4 sm:$0xff]   ;;  %v2455_v47 = vld [vmem:[%s2670_s28 + $0x70] ss:$8 sps:$4 sm:$0xff]   ;;  %v2457_v49 = vld [vmem:[%s2670_s28 + $0x84] ss:$8 sps:$4 sm:$0xff]  }
  0x1b   : > { %v2456_v48 = vld [vmem:[%s2670_s28 + $0x270] ss:$8 sps:$4 sm:$0xff]   ;;  %v2459_v50 = vld [vmem:[%s2670_s28 + $0x284] ss:$8 sps:$4 sm:$0xff]   ;;  %v2461_v51 = vld [vmem:[%s2670_s28 + $0x80] ss:$8 sps:$4 sm:$0xff]  }
  0x1c   : > { %v2462_v52 = vld [vmem:[%s2670_s28 + $0x280] ss:$8 sps:$4 sm:$0xff]   ;;  %v2463_v53 = vld [vmem:[%s2670_s28 + $0x94] ss:$8 sps:$4 sm:$0xff]   ;;  %v2467_v55 = vld [vmem:[%s2670_s28 + $0x90] ss:$8 sps:$4 sm:$0xff]  }
  0x1d   : > { %1090 = vmatpush1.bf16.msra.mxu0 %v2397_v5  ;;  %2372 = vmatpush1.bf16.msra.mxu1 %v2397_v5  ;;  %v2465_v54 = vld [vmem:[%s2670_s28 + $0x294] ss:$8 sps:$4 sm:$0xff]   ;;  %v2468_v56 = vld [vmem:[%s2670_s28 + $0x290] ss:$8 sps:$4 sm:$0xff]   ;;  %v2469_v57 = vld [vmem:[%s2670_s28 + $0xa4] ss:$8 sps:$4 sm:$0xff]  }
  0x1e   : > { %1091 = vmatprep.subr.bf16.mxu0 %v2610_v1  ;;  %2357 = vmatprep.subr.bf16.mxu1 %v2610_v1  ;;  %v2471_v58 = vld [vmem:[%s2670_s28 + $0x2a4] ss:$8 sps:$4 sm:$0xff]   ;;  %v2473_v59 = vld [vmem:[%s2670_s28 + $0xa0] ss:$8 sps:$4 sm:$0xff]   ;;  %v2475_v61 = vld [vmem:[%s2670_s28 + $0xb4] ss:$8 sps:$4 sm:$0xff]  }
  0x1f   : > { %v2474_v60 = vld [vmem:[%s2670_s28 + $0x2a0] ss:$8 sps:$4 sm:$0xff]   ;;  %v2477_v62 = vld [vmem:[%s2670_s28 + $0x2b4] ss:$8 sps:$4 sm:$0xff]   ;;  %v2479_v63 = vld [vmem:[%s2670_s28 + $0xb0] ss:$8 sps:$4 sm:$0xff]  }
  0x20   : > { %v2480_v0 = vld [vmem:[%s2670_s28 + $0x2b0] ss:$8 sps:$4 sm:$0xff]   ;;  %v2483_v2 = vld [vmem:[%s2670_s28 + $0x2c4] ss:$8 sps:$4 sm:$0xff]   ;;  %v2485_v3 = vld [vmem:[%s2670_s28 + $0xc0] ss:$8 sps:$4 sm:$0xff]  }
  0x21   : > { %1092 = vmatpush1.bf16.msra.mxu0 %v2398_v7  ;;  %2373 = vmatpush1.bf16.msra.mxu1 %v2398_v7  ;;  %v2486_v4 = vld [vmem:[%s2670_s28 + $0x2c0] ss:$8 sps:$4 sm:$0xff]   ;;  %v2487_v5 = vld [vmem:[%s2670_s28 + $0xd4] ss:$8 sps:$4 sm:$0xff]   ;;  %v2491_v7 = vld [vmem:[%s2670_s28 + $0xd0] ss:$8 sps:$4 sm:$0xff]  }
  0x22   : > { %1093 = vmatprep.subr.bf16.mxu0 %v2610_v1  ;;  %2358 = vmatprep.subr.bf16.mxu1 %v2610_v1  ;;  %v2489_v6 = vld [vmem:[%s2670_s28 + $0x2d4] ss:$8 sps:$4 sm:$0xff]   ;;  %v2492_v8 = vld [vmem:[%s2670_s28 + $0x2d0] ss:$8 sps:$4 sm:$0xff]  }
  0x25   : > { %1094 = vmatpush1.bf16.msra.mxu0 %v2399_v9  ;;  %2374 = vmatpush1.bf16.msra.mxu1 %v2399_v9  ;;  %v2493_v9 = vld [vmem:[%s2670_s28 + $0xe4] ss:$8 sps:$4 sm:$0xff]  }
  0x26   : > { %1095 = vmatprep.subr.bf16.mxu0 %v2610_v1  ;;  %2359 = vmatprep.subr.bf16.mxu1 %v2610_v1 }
  0x29   : > { %1096 = vmatpush1.bf16.msra.mxu0 %v2400_v10  ;;  %2375 = vmatpush1.bf16.msra.mxu1 %v2400_v10  ;;  %v2495_v10 = vld [vmem:[%s2670_s28 + $0x2e4] ss:$8 sps:$4 sm:$0xff]  }
  0x2a   : > { %1097 = vmatprep.subr.bf16.mxu0 %v2610_v1  ;;  %2360 = vmatprep.subr.bf16.mxu1 %v2610_v1 }
  0x2d   : > { %1098 = vmatpush2.bf16.msra.mxu0 %v2401_v11  ;;  %2376 = vmatpush2.bf16.msra.mxu1 %v2401_v11  ;;  %v2497_v11 = vld [vmem:[%s2670_s28 + $0xe0] ss:$8 sps:$4 sm:$0xff]  }
  0x2e   : > { %1099 = vmatprep.subr.bf16.mxu0 %v2610_v1  ;;  %2361 = vmatprep.subr.bf16.mxu1 %v2610_v1 }
  0x31   : > { %1100 = vmatpush2.bf16.msra.mxu0 %v2402_v12  ;;  %2377 = vmatpush2.bf16.msra.mxu1 %v2402_v12  ;;  %v2498_v12 = vld [vmem:[%s2670_s28 + $0x2e0] ss:$8 sps:$4 sm:$0xff]  }
  0x32   : > { %1101 = vmatprep.subr.bf16.mxu0 %v2610_v1  ;;  %2362 = vmatprep.subr.bf16.mxu1 %v2610_v1 }
  0x35   : > { %1102 = vmatpush2.bf16.msra.mxu0 %v2403_v13  ;;  %2378 = vmatpush2.bf16.msra.mxu1 %v2403_v13  ;;  %v2499_v13 = vld [vmem:[%s2670_s28 + $0xf4] ss:$8 sps:$4 sm:$0xff]  }
  0x36   : > { %1103 = vmatprep.subr.bf16.mxu0 %v2610_v1  ;;  %2363 = vmatprep.subr.bf16.mxu1 %v2610_v1 }
  0x39   : > { %1104 = vmatpush2.bf16.msra.mxu0 %v2404_v14  ;;  %2379 = vmatpush2.bf16.msra.mxu1 %v2404_v14  ;;  %v2501_v14 = vld [vmem:[%s2670_s28 + $0x2f4] ss:$8 sps:$4 sm:$0xff]  }
  0x3a   : > { %1105 = vmatprep.subr.bf16.mxu0 %v2610_v1  ;;  %2364 = vmatprep.subr.bf16.mxu1 %v2610_v1 }
  0x3d   : > { %1106 = vmatpush2.bf16.msra.mxu0 %v2405_v15  ;;  %2380 = vmatpush2.bf16.msra.mxu1 %v2405_v15  ;;  %v2503_v15 = vld [vmem:[%s2670_s28 + $0xf0] ss:$8 sps:$4 sm:$0xff]  }
  0x3e   : > { %1107 = vmatprep.subr.bf16.mxu0 %v2610_v1  ;;  %2365 = vmatprep.subr.bf16.mxu1 %v2610_v1 }
  0x41   : > { %1108 = vmatpush2.bf16.msra.mxu0 %v2406_v16  ;;  %2381 = vmatpush2.bf16.msra.mxu1 %v2406_v16  ;;  %v2504_v16 = vld [vmem:[%s2670_s28 + $0x2f0] ss:$8 sps:$4 sm:$0xff]  }
  0x42   : > { %1109 = vmatprep.subr.bf16.mxu0 %v2610_v1  ;;  %2366 = vmatprep.subr.bf16.mxu1 %v2610_v1 }
  0x45   : > { %1110 = vmatpush2.bf16.msra.mxu0 %v2407_v17  ;;  %2382 = vmatpush2.bf16.msra.mxu1 %v2407_v17  ;;  %v2505_v17 = vld [vmem:[%s2670_s28 + $0x104] ss:$8 sps:$4 sm:$0xff]  }
  0x46   : > { %1111 = vmatprep.subr.bf16.mxu0 %v2610_v1  ;;  %2367 = vmatprep.subr.bf16.mxu1 %v2610_v1  ;;  %v2481_v1 = vld [vmem:[%s2670_s28 + $0xc4] ss:$8 sps:$4 sm:$0xff]  }
  0x49   : > { %1112 = vmatpush2.bf16.msra.mxu0 %v2408_v18  ;;  %2383 = vmatpush2.bf16.msra.mxu1 %v2408_v18  ;;  %v2507_v18 = vld [vmem:[%s2670_s28 + $0x304] ss:$8 sps:$4 sm:$0xff]  }
  0x4c   : > { %1114 = vmatmul.mubr.bf16.vlgmr.msra.gmra.mxu0 %v2409_v19  ;;  %1370 = vmatmul.mubr.bf16.vlgmr.msra.gmra.mxu1 %v2412_v20  ;;  %v2509_v19 = vld [vmem:[%s2670_s28 + $0x100] ss:$8 sps:$4 sm:$0xff]  }
  0x4d   : > { %1121 = vmatprep.mubr.bf16.mxu0 %v2415_v21  ;;  %1377 = vmatprep.mubr.bf16.mxu1 %v2417_v22  ;;  %v2510_v20 = vld [vmem:[%s2670_s28 + $0x300] ss:$8 sps:$4 sm:$0xff]   ;;  %v2511_v21 = vld [vmem:[%s2670_s28 + $0x114] ss:$8 sps:$4 sm:$0xff]  }
  0x4e   : > { %v2513_v22 = vld [vmem:[%s2670_s28 + $0x314] ss:$8 sps:$4 sm:$0xff]  }
  0x54   : > { %1122 = vmatmul.mubr.bf16.gmra.mxu0 %v2419_v23  ;;  %1378 = vmatmul.mubr.bf16.gmra.mxu1 %v2420_v24  ;;  %v2515_v23 = vld [vmem:[%s2670_s28 + $0x110] ss:$8 sps:$4 sm:$0xff]  }
  0x55   : > { %1129 = vmatprep.mubr.bf16.mxu0 %v2421_v25  ;;  %1385 = vmatprep.mubr.bf16.mxu1 %v2423_v26  ;;  %v2516_v24 = vld [vmem:[%s2670_s28 + $0x310] ss:$8 sps:$4 sm:$0xff]   ;;  %v2517_v25 = vld [vmem:[%s2670_s28 + $0x124] ss:$8 sps:$4 sm:$0xff]  }
  0x56   : > { %v2519_v26 = vld [vmem:[%s2670_s28 + $0x324] ss:$8 sps:$4 sm:$0xff]  }
  0x5c   : > { %1130 = vmatmul.mubr.bf16.gmra.mxu0 %v2425_v27  ;;  %1386 = vmatmul.mubr.bf16.gmra.mxu1 %v2426_v28  ;;  %v2521_v27 = vld [vmem:[%s2670_s28 + $0x120] ss:$8 sps:$4 sm:$0xff]  }
  0x5d   : > { %1137 = vmatprep.mubr.bf16.mxu0 %v2427_v29  ;;  %1393 = vmatprep.mubr.bf16.mxu1 %v2429_v30  ;;  %v2522_v28 = vld [vmem:[%s2670_s28 + $0x320] ss:$8 sps:$4 sm:$0xff]   ;;  %v2523_v29 = vld [vmem:[%s2670_s28 + $0x134] ss:$8 sps:$4 sm:$0xff]  }
  0x5e   : > { %v2525_v30 = vld [vmem:[%s2670_s28 + $0x334] ss:$8 sps:$4 sm:$0xff]  }
  0x64   : > { %1138 = vmatmul.mubr.bf16.gmra.mxu0 %v2431_v31  ;;  %1394 = vmatmul.mubr.bf16.gmra.mxu1 %v2432_v32  ;;  %v2527_v31 = vld [vmem:[%s2670_s28 + $0x130] ss:$8 sps:$4 sm:$0xff]  }
  0x65   : > { %1145 = vmatprep.mubr.bf16.mxu0 %v2433_v33  ;;  %1401 = vmatprep.mubr.bf16.mxu1 %v2435_v34  ;;  %v2528_v32 = vld [vmem:[%s2670_s28 + $0x330] ss:$8 sps:$4 sm:$0xff]   ;;  %v2529_v33 = vld [vmem:[%s2670_s28 + $0x144] ss:$8 sps:$4 sm:$0xff]  }
  0x66   : > { %v2531_v34 = vld [vmem:[%s2670_s28 + $0x344] ss:$8 sps:$4 sm:$0xff]  }
  0x6c   : > { %1146 = vmatmul.mubr.bf16.gmra.mxu0 %v2437_v35  ;;  %1402 = vmatmul.mubr.bf16.gmra.mxu1 %v2438_v36  ;;  %v2533_v35 = vld [vmem:[%s2670_s28 + $0x140] ss:$8 sps:$4 sm:$0xff]  }
  0x6d   : > { %1153 = vmatprep.mubr.bf16.mxu0 %v2439_v37  ;;  %1409 = vmatprep.mubr.bf16.mxu1 %v2441_v38  ;;  %v2534_v36 = vld [vmem:[%s2670_s28 + $0x340] ss:$8 sps:$4 sm:$0xff]   ;;  %v2535_v37 = vld [vmem:[%s2670_s28 + $0x154] ss:$8 sps:$4 sm:$0xff]  }
  0x6e   : > { %v2537_v38 = vld [vmem:[%s2670_s28 + $0x354] ss:$8 sps:$4 sm:$0xff]  }
  0x74   : > { %1154 = vmatmul.mubr.bf16.gmra.mxu0 %v2443_v39  ;;  %1410 = vmatmul.mubr.bf16.gmra.mxu1 %v2444_v40  ;;  %v2539_v39 = vld [vmem:[%s2670_s28 + $0x150] ss:$8 sps:$4 sm:$0xff]  }
  0x75   : > { %1161 = vmatprep.mubr.bf16.mxu0 %v2445_v41  ;;  %1417 = vmatprep.mubr.bf16.mxu1 %v2447_v42  ;;  %v2540_v40 = vld [vmem:[%s2670_s28 + $0x350] ss:$8 sps:$4 sm:$0xff]   ;;  %v2541_v41 = vld [vmem:[%s2670_s28 + $0x164] ss:$8 sps:$4 sm:$0xff]  }
  0x76   : > { %v2543_v42 = vld [vmem:[%s2670_s28 + $0x364] ss:$8 sps:$4 sm:$0xff]  }
  0x7c   : > { %1162 = vmatmul.mubr.bf16.gmra.mxu0 %v2449_v43  ;;  %1418 = vmatmul.mubr.bf16.gmra.mxu1 %v2450_v44  ;;  %v2545_v43 = vld [vmem:[%s2670_s28 + $0x160] ss:$8 sps:$4 sm:$0xff]  }
  0x7d   : > { %1169 = vmatprep.mubr.bf16.mxu0 %v2451_v45  ;;  %1425 = vmatprep.mubr.bf16.mxu1 %v2453_v46  ;;  %v2546_v44 = vld [vmem:[%s2670_s28 + $0x360] ss:$8 sps:$4 sm:$0xff]   ;;  %v2547_v45 = vld [vmem:[%s2670_s28 + $0x174] ss:$8 sps:$4 sm:$0xff]  }
  0x7e   : > { %v2549_v46 = vld [vmem:[%s2670_s28 + $0x374] ss:$8 sps:$4 sm:$0xff]  }
  0x84   : > { %1170 = vmatmul.mubr.bf16.gmra.mxu0 %v2455_v47  ;;  %1426 = vmatmul.mubr.bf16.gmra.mxu1 %v2456_v48  ;;  %v2551_v47 = vld [vmem:[%s2670_s28 + $0x170] ss:$8 sps:$4 sm:$0xff]  }
  0x85   : > { %1177 = vmatprep.mubr.bf16.mxu0 %v2457_v49  ;;  %1433 = vmatprep.mubr.bf16.mxu1 %v2459_v50  ;;  %v2552_v48 = vld [vmem:[%s2670_s28 + $0x370] ss:$8 sps:$4 sm:$0xff]   ;;  %v2553_v49 = vld [vmem:[%s2670_s28 + $0x184] ss:$8 sps:$4 sm:$0xff]  }
  0x86   : > { %v2555_v50 = vld [vmem:[%s2670_s28 + $0x384] ss:$8 sps:$4 sm:$0xff]  }
  0x8c   : > { %1178 = vmatmul.mubr.bf16.gmra.mxu0 %v2461_v51  ;;  %1434 = vmatmul.mubr.bf16.gmra.mxu1 %v2462_v52  ;;  %v2557_v51 = vld [vmem:[%s2670_s28 + $0x180] ss:$8 sps:$4 sm:$0xff]  }
  0x8d   : > { %1185 = vmatprep.mubr.bf16.mxu0 %v2463_v53  ;;  %1441 = vmatprep.mubr.bf16.mxu1 %v2465_v54  ;;  %v2558_v52 = vld [vmem:[%s2670_s28 + $0x380] ss:$8 sps:$4 sm:$0xff]   ;;  %v2559_v53 = vld [vmem:[%s2670_s28 + $0x194] ss:$8 sps:$4 sm:$0xff]  }
  0x8e   : > { %v2561_v54 = vld [vmem:[%s2670_s28 + $0x394] ss:$8 sps:$4 sm:$0xff]  }
  0x94   : > { %1186 = vmatmul.mubr.bf16.gmra.mxu0 %v2467_v55  ;;  %1442 = vmatmul.mubr.bf16.gmra.mxu1 %v2468_v56  ;;  %v2834_v55 = vld [vmem:[%s3135_s2] ss:$0 sm:$0xff] }
  0x95   : > { %1193 = vmatprep.mubr.bf16.mxu0 %v2469_v57  ;;  %1449 = vmatprep.mubr.bf16.mxu1 %v2471_v58 }
  0x9c   : > { %1194 = vmatmul.mubr.bf16.gmra.mxu0 %v2473_v59  ;;  %1450 = vmatmul.mubr.bf16.gmra.mxu1 %v2474_v60 }
  0x9d   : > { %1201 = vmatprep.mubr.bf16.mxu0 %v2475_v61  ;;  %1457 = vmatprep.mubr.bf16.mxu1 %v2477_v62 }
  0xa4   : > { %1202 = vmatmul.mubr.bf16.gmra.mxu0 %v2479_v63  ;;  %1458 = vmatmul.mubr.bf16.gmra.mxu1 %v2480_v0 }
  0xa5   : > { %1209 = vmatprep.mubr.bf16.mxu0 %v2481_v1  ;;  %1465 = vmatprep.mubr.bf16.mxu1 %v2483_v2  ;;  %v2563_v2 = vld [vmem:[%s2670_s28 + $0x190] ss:$8 sps:$4 sm:$0xff]  }
  0xac   : > { %1210 = vmatmul.mubr.bf16.gmra.mxu0 %v2485_v3  ;;  %1466 = vmatmul.mubr.bf16.gmra.mxu1 %v2486_v4  ;;  %v2564_v3 = vld [vmem:[%s2670_s28 + $0x390] ss:$8 sps:$4 sm:$0xff]  }
  0xad   : > { %1217 = vmatprep.mubr.bf16.mxu0 %v2487_v5  ;;  %1473 = vmatprep.mubr.bf16.mxu1 %v2489_v6 }
  0xb4   : > { %1218 = vmatmul.mubr.bf16.gmra.mxu0 %v2491_v7  ;;  %1474 = vmatmul.mubr.bf16.gmra.mxu1 %v2492_v8  ;;  %v2565_v8 = vld [vmem:[%s2670_s28 + $0x1a4] ss:$8 sps:$4 sm:$0xff]  }
  0xb5   : > { %1225 = vmatprep.mubr.bf16.mxu0 %v2493_v9  ;;  %1481 = vmatprep.mubr.bf16.mxu1 %v2495_v10 }
  0xbc   : > { %1226 = vmatmul.mubr.bf16.gmra.mxu0 %v2497_v11  ;;  %1482 = vmatmul.mubr.bf16.gmra.mxu1 %v2498_v12  ;;  %v2567_v11 = vld [vmem:[%s2670_s28 + $0x3a4] ss:$8 sps:$4 sm:$0xff]  }
  0xbd   : > { %1233 = vmatprep.mubr.bf16.mxu0 %v2499_v13  ;;  %1489 = vmatprep.mubr.bf16.mxu1 %v2501_v14 }
  0xc4   : > { %1234 = vmatmul.mubr.bf16.gmra.mxu0 %v2503_v15  ;;  %1490 = vmatmul.mubr.bf16.gmra.mxu1 %v2504_v16 }
  0xc5   : > { %1241 = vmatprep.mubr.bf16.mxu0 %v2505_v17  ;;  %1497 = vmatprep.mubr.bf16.mxu1 %v2507_v18 }
  0xcc   : > { %1242 = vmatmul.mubr.bf16.gmra.mxu0 %v2509_v19  ;;  %1498 = vmatmul.mubr.bf16.gmra.mxu1 %v2510_v20 }
  0xcd   : > { %1249 = vmatprep.mubr.bf16.mxu0 %v2511_v21  ;;  %1505 = vmatprep.mubr.bf16.mxu1 %v2513_v22 }
  0xd4   : > { %1250 = vmatmul.mubr.bf16.gmra.mxu0 %v2515_v23  ;;  %1506 = vmatmul.mubr.bf16.gmra.mxu1 %v2516_v24 }
  0xd5   : > { %1257 = vmatprep.mubr.bf16.mxu0 %v2517_v25  ;;  %1513 = vmatprep.mubr.bf16.mxu1 %v2519_v26  ;;  %v2569_v26 = vld [vmem:[%s2670_s28 + $0x1a0] ss:$8 sps:$4 sm:$0xff]  }
  0xdc   : > { %1258 = vmatmul.mubr.bf16.gmra.mxu0 %v2521_v27  ;;  %1514 = vmatmul.mubr.bf16.gmra.mxu1 %v2522_v28  ;;  %v2570_v27 = vld [vmem:[%s2670_s28 + $0x3a0] ss:$8 sps:$4 sm:$0xff]  }
  0xdd   : > { %1265 = vmatprep.mubr.bf16.mxu0 %v2523_v29  ;;  %1521 = vmatprep.mubr.bf16.mxu1 %v2525_v30 }
  0xe4   : > { %1266 = vmatmul.mubr.bf16.gmra.mxu0 %v2527_v31  ;;  %1522 = vmatmul.mubr.bf16.gmra.mxu1 %v2528_v32  ;;  %v2571_v32 = vld [vmem:[%s2670_s28 + $0x1b4] ss:$8 sps:$4 sm:$0xff]  }
  0xe5   : > { %1273 = vmatprep.mubr.bf16.mxu0 %v2529_v33  ;;  %1529 = vmatprep.mubr.bf16.mxu1 %v2531_v34 }
  0xec   : > { %1274 = vmatmul.mubr.bf16.gmra.mxu0 %v2533_v35  ;;  %1530 = vmatmul.mubr.bf16.gmra.mxu1 %v2534_v36  ;;  %v2573_v35 = vld [vmem:[%s2670_s28 + $0x3b4] ss:$8 sps:$4 sm:$0xff]  }
  0xed   : > { %1281 = vmatprep.mubr.bf16.mxu0 %v2535_v37  ;;  %1537 = vmatprep.mubr.bf16.mxu1 %v2537_v38 }
  0xf4   : > { %1282 = vmatmul.mubr.bf16.gmra.mxu0 %v2539_v39  ;;  %1538 = vmatmul.mubr.bf16.gmra.mxu1 %v2540_v40 }
  0xf5   : > { %1289 = vmatprep.mubr.bf16.mxu0 %v2541_v41  ;;  %1545 = vmatprep.mubr.bf16.mxu1 %v2543_v42 }
  0xfc   : > { %1290 = vmatmul.mubr.bf16.gmra.mxu0 %v2545_v43  ;;  %1546 = vmatmul.mubr.bf16.gmra.mxu1 %v2546_v44 }
  0xfd   : > { %1297 = vmatprep.mubr.bf16.mxu0 %v2547_v45  ;;  %1553 = vmatprep.mubr.bf16.mxu1 %v2549_v46 }
 0x104   : > { %1298 = vmatmul.mubr.bf16.gmra.mxu0 %v2551_v47  ;;  %1554 = vmatmul.mubr.bf16.gmra.mxu1 %v2552_v48 }
 0x105   : > { %1305 = vmatprep.mubr.bf16.mxu0 %v2553_v49  ;;  %1561 = vmatprep.mubr.bf16.mxu1 %v2555_v50  ;;  %v2575_v50 = vld [vmem:[%s2670_s28 + $0x1b0] ss:$8 sps:$4 sm:$0xff]  }
 0x10c   : > { %v1115_v56 = vpop.f32.mrf.mxu0  ;;  %1306 = vmatmul.mubr.bf16.gmra.mxu0 %v2557_v51  ;;  %v1371_v57 = vpop.f32.mrf.mxu1  ;;  %1562 = vmatmul.mubr.bf16.gmra.mxu1 %v2558_v52  ;;  %v2576_v51 = vld [vmem:[%s2670_s28 + $0x3b0] ss:$8 sps:$4 sm:$0xff]  }
 0x10d   : > { %v1116_v58 = vadd.f32 %v2834_v55, %v1115_v56  ;;  %v1372_v59 = vadd.f32 %v2834_v55, %v1371_v57  ;;  %1313 = vmatprep.mubr.bf16.mxu0 %v2559_v53  ;;  %1569 = vmatprep.mubr.bf16.mxu1 %v2561_v54  ;;  %v2579_v57 = vld [vmem:[%s2670_s28 + $0x1c4] ss:$8 sps:$4 sm:$0xff]  }
 0x10e   : > { %v1117_v60 = vpop.f32.mrf.mxu0  ;;  %v1373_v61 = vpop.f32.mrf.mxu1 }
 0x10f   : > { %vm1626_vm0 = vcmp.ge.f32.partialorder %v1116_v58, 0.0  ;;  %v1754_v62 = vmul.f32 0.01, %v1116_v58  ;;  %vm1690_vm1 = vcmp.ge.f32.partialorder %v1372_v59, 0.0  ;;  %v1818_v63 = vmul.f32 0.01, %v1372_v59 }
 0x110   : > { %v1118_v0 = vpop.f32.mrf.mxu0  ;;  %v1374_v1 = vpop.f32.mrf.mxu1  ;;  %v2582_v60 = vld [vmem:[%s2670_s28 + $0x3c4] ss:$8 sps:$4 sm:$0xff]  }
 0x111   : > { %v1882_v4 = vsel %vm1626_vm0, %v1116_v58, %v1754_v62  ;;  %v1946_v5 = vsel %vm1690_vm1, %v1372_v59, %v1818_v63  ;;  %v1119_v6 = vadd.f32 %v2834_v55, %v1118_v0  ;;  %v1375_v7 = vadd.f32 %v2834_v55, %v1374_v1 }
 0x112   : > { %2010 = vst [vmem:[%s2843_s5] sm:$0xff] %v1882_v4  ;;  %2074 = vst [vmem:[%s2843_s5 + $0x200] sm:$0xff] %v1946_v5  ;;  %v1120_v9 = vpop.f32.mrf.mxu0  ;;  %v1376_v10 = vpop.f32.mrf.mxu1 }
 0x113   : > { %vm1627_vm2 = vcmp.ge.f32.partialorder %v1119_v6, 0.0  ;;  %v1755_v12 = vmul.f32 0.01, %v1119_v6  ;;  %vm1691_vm3 = vcmp.ge.f32.partialorder %v1375_v7, 0.0  ;;  %v1819_v13 = vmul.f32 0.01, %v1375_v7 }
 0x114   : > { %v1123_v14 = vpop.f32.mrf.mxu0  ;;  %1314 = vmatmul.mubr.bf16.gmra.mxu0 %v2563_v2  ;;  %v1379_v15 = vpop.f32.mrf.mxu1  ;;  %1570 = vmatmul.mubr.bf16.gmra.mxu1 %v2564_v3 }
 0x115   : > { %v1883_v16 = vsel %vm1627_vm2, %v1119_v6, %v1755_v12  ;;  %v1947_v17 = vsel %vm1691_vm3, %v1375_v7, %v1819_v13  ;;  %v1124_v18 = vadd.f32 %v2834_v55, %v1123_v14  ;;  %v1380_v19 = vadd.f32 %v2834_v55, %v1379_v15  ;;  %1321 = vmatprep.mubr.bf16.mxu0 %v2565_v8  ;;  %v2580_v12 = vld [vmem:[%s2670_s28 + $0x3c0] ss:$8 sps:$4 sm:$0xff]  }
 0x116   : > { %2011 = vst [vmem:[%s2843_s5 + $0x8] sm:$0xff] %v1883_v16  ;;  %2075 = vst [vmem:[%s2843_s5 + $0x208] sm:$0xff] %v1947_v17  ;;  %v1125_v20 = vpop.f32.mrf.mxu0  ;;  %v1381_v21 = vpop.f32.mrf.mxu1  ;;  %1577 = vmatprep.mubr.bf16.mxu1 %v2567_v11  ;;  %v2577_v11 = vld [vmem:[%s2670_s28 + $0x1c0] ss:$8 sps:$4 sm:$0xff]   ;;  %v2585_v17 = vld [vmem:[%s2670_s28 + $0x1d4] ss:$8 sps:$4 sm:$0xff]  }
 0x117   : > { %vm1628_vm4 = vcmp.ge.f32.partialorder %v1124_v18, 0.0  ;;  %v1756_v22 = vmul.f32 0.01, %v1124_v18  ;;  %vm1692_vm5 = vcmp.ge.f32.partialorder %v1380_v19, 0.0  ;;  %v1820_v23 = vmul.f32 0.01, %v1380_v19 }
 0x118   : > { %v1126_v24 = vpop.f32.mrf.mxu0  ;;  %v1382_v25 = vpop.f32.mrf.mxu1  ;;  %v2588_v20 = vld [vmem:[%s2670_s28 + $0x3d4] ss:$8 sps:$4 sm:$0xff]  }
 0x119   : > { %v1884_v28 = vsel %vm1628_vm4, %v1124_v18, %v1756_v22  ;;  %v1948_v29 = vsel %vm1692_vm5, %v1380_v19, %v1820_v23  ;;  %v1127_v30 = vadd.f32 %v2834_v55, %v1126_v24  ;;  %v1383_v31 = vadd.f32 %v2834_v55, %v1382_v25 }
 0x11a   : > { %2012 = vst [vmem:[%s2843_s5 + $0x10] sm:$0xff] %v1884_v28  ;;  %2076 = vst [vmem:[%s2843_s5 + $0x210] sm:$0xff] %v1948_v29  ;;  %v1128_v33 = vpop.f32.mrf.mxu0  ;;  %v1384_v34 = vpop.f32.mrf.mxu1 }
 0x11b   : > { %vm1629_vm6 = vcmp.ge.f32.partialorder %v1127_v30, 0.0  ;;  %v1757_v36 = vmul.f32 0.01, %v1127_v30  ;;  %vm1693_vm7 = vcmp.ge.f32.partialorder %v1383_v31, 0.0  ;;  %v1821_v37 = vmul.f32 0.01, %v1383_v31 }
 0x11c   : > { %v1131_v38 = vpop.f32.mrf.mxu0  ;;  %1322 = vmatmul.mubr.bf16.gmra.mxu0 %v2569_v26  ;;  %v1387_v39 = vpop.f32.mrf.mxu1  ;;  %1578 = vmatmul.mubr.bf16.gmra.mxu1 %v2570_v27 }
 0x11d   : > { %v1885_v40 = vsel %vm1629_vm6, %v1127_v30, %v1757_v36  ;;  %v1949_v41 = vsel %vm1693_vm7, %v1383_v31, %v1821_v37  ;;  %v1132_v42 = vadd.f32 %v2834_v55, %v1131_v38  ;;  %v1388_v43 = vadd.f32 %v2834_v55, %v1387_v39  ;;  %1329 = vmatprep.mubr.bf16.mxu0 %v2571_v32  ;;  %v2586_v36 = vld [vmem:[%s2670_s28 + $0x3d0] ss:$8 sps:$4 sm:$0xff]  }
 0x11e   : > { %2013 = vst [vmem:[%s2843_s5 + $0x18] sm:$0xff] %v1885_v40  ;;  %2077 = vst [vmem:[%s2843_s5 + $0x218] sm:$0xff] %v1949_v41  ;;  %v1133_v44 = vpop.f32.mrf.mxu0  ;;  %v1389_v45 = vpop.f32.mrf.mxu1  ;;  %1585 = vmatprep.mubr.bf16.mxu1 %v2573_v35  ;;  %v2583_v35 = vld [vmem:[%s2670_s28 + $0x1d0] ss:$8 sps:$4 sm:$0xff]   ;;  %v2591_v41 = vld [vmem:[%s2670_s28 + $0x1e4] ss:$8 sps:$4 sm:$0xff]  }
 0x11f   : > { %vm1630_vm8 = vcmp.ge.f32.partialorder %v1132_v42, 0.0  ;;  %v1758_v46 = vmul.f32 0.01, %v1132_v42  ;;  %vm1694_vm9 = vcmp.ge.f32.partialorder %v1388_v43, 0.0  ;;  %v1822_v47 = vmul.f32 0.01, %v1388_v43 }
 0x120   : > { %v1134_v48 = vpop.f32.mrf.mxu0  ;;  %v1390_v49 = vpop.f32.mrf.mxu1  ;;  %v2594_v44 = vld [vmem:[%s2670_s28 + $0x3e4] ss:$8 sps:$4 sm:$0xff]  }
 0x121   : > { %v1886_v52 = vsel %vm1630_vm8, %v1132_v42, %v1758_v46  ;;  %v1950_v53 = vsel %vm1694_vm9, %v1388_v43, %v1822_v47  ;;  %v1135_v54 = vadd.f32 %v2834_v55, %v1134_v48  ;;  %v1391_v56 = vadd.f32 %v2834_v55, %v1390_v49 }
 0x122   : > { %2014 = vst [vmem:[%s2843_s5 + $0x20] sm:$0xff] %v1886_v52  ;;  %2078 = vst [vmem:[%s2843_s5 + $0x220] sm:$0xff] %v1950_v53  ;;  %v1136_v58 = vpop.f32.mrf.mxu0  ;;  %v1392_v59 = vpop.f32.mrf.mxu1 }
 0x123   : > { %vm1631_vm10 = vcmp.ge.f32.partialorder %v1135_v54, 0.0  ;;  %v1759_v61 = vmul.f32 0.01, %v1135_v54  ;;  %vm1695_vm11 = vcmp.ge.f32.partialorder %v1391_v56, 0.0  ;;  %v1823_v62 = vmul.f32 0.01, %v1391_v56 }
 0x124   : > { %v1139_v63 = vpop.f32.mrf.mxu0  ;;  %1330 = vmatmul.mubr.bf16.gmra.mxu0 %v2575_v50  ;;  %v1395_v0 = vpop.f32.mrf.mxu1  ;;  %1586 = vmatmul.mubr.bf16.gmra.mxu1 %v2576_v51 }
 0x125   : > { %v1887_v1 = vsel %vm1631_vm10, %v1135_v54, %v1759_v61  ;;  %v1951_v2 = vsel %vm1695_vm11, %v1391_v56, %v1823_v62  ;;  %v1140_v3 = vadd.f32 %v2834_v55, %v1139_v63  ;;  %v1396_v4 = vadd.f32 %v2834_v55, %v1395_v0  ;;  %1337 = vmatprep.mubr.bf16.mxu0 %v2579_v57  ;;  %v2592_v61 = vld [vmem:[%s2670_s28 + $0x3e0] ss:$8 sps:$4 sm:$0xff]  }
 0x126   : > { %2015 = vst [vmem:[%s2843_s5 + $0x28] sm:$0xff] %v1887_v1  ;;  %2079 = vst [vmem:[%s2843_s5 + $0x228] sm:$0xff] %v1951_v2  ;;  %v1141_v5 = vpop.f32.mrf.mxu0  ;;  %v1397_v6 = vpop.f32.mrf.mxu1  ;;  %1593 = vmatprep.mubr.bf16.mxu1 %v2582_v60  ;;  %v2589_v60 = vld [vmem:[%s2670_s28 + $0x1e0] ss:$8 sps:$4 sm:$0xff]   ;;  %v2597_v2 = vld [vmem:[%s2670_s28 + $0x1f4] ss:$8 sps:$4 sm:$0xff]  }
 0x127   : > { %vm1632_vm12 = vcmp.ge.f32.partialorder %v1140_v3, 0.0  ;;  %v1760_v7 = vmul.f32 0.01, %v1140_v3  ;;  %vm1696_vm13 = vcmp.ge.f32.partialorder %v1396_v4, 0.0  ;;  %v1824_v8 = vmul.f32 0.01, %v1396_v4 }
 0x128   : > { %v1142_v9 = vpop.f32.mrf.mxu0  ;;  %v1398_v10 = vpop.f32.mrf.mxu1  ;;  %v2600_v5 = vld [vmem:[%s2670_s28 + $0x3f4] ss:$8 sps:$4 sm:$0xff]  }
 0x129   : > { %v1888_v13 = vsel %vm1632_vm12, %v1140_v3, %v1760_v7  ;;  %v1952_v14 = vsel %vm1696_vm13, %v1396_v4, %v1824_v8  ;;  %v1143_v15 = vadd.f32 %v2834_v55, %v1142_v9  ;;  %v1399_v16 = vadd.f32 %v2834_v55, %v1398_v10 }
 0x12a   : > { %2016 = vst [vmem:[%s2843_s5 + $0x30] sm:$0xff] %v1888_v13  ;;  %2080 = vst [vmem:[%s2843_s5 + $0x230] sm:$0xff] %v1952_v14  ;;  %v1144_v18 = vpop.f32.mrf.mxu0  ;;  %v1400_v19 = vpop.f32.mrf.mxu1 }
 0x12b   : > { %vm1633_vm14 = vcmp.ge.f32.partialorder %v1143_v15, 0.0  ;;  %v1761_v21 = vmul.f32 0.01, %v1143_v15  ;;  %vm1697_vm15 = vcmp.ge.f32.partialorder %v1399_v16, 0.0  ;;  %v1825_v22 = vmul.f32 0.01, %v1399_v16 }
 0x12c   : > { %v1147_v23 = vpop.f32.mrf.mxu0  ;;  %1338 = vmatmul.mubr.bf16.gmra.mxu0 %v2577_v11  ;;  %v1403_v24 = vpop.f32.mrf.mxu1  ;;  %1594 = vmatmul.mubr.bf16.gmra.mxu1 %v2580_v12 }
 0x12d   : > { %v1889_v25 = vsel %vm1633_vm14, %v1143_v15, %v1761_v21  ;;  %v1953_v26 = vsel %vm1697_vm15, %v1399_v16, %v1825_v22  ;;  %v1148_v27 = vadd.f32 %v2834_v55, %v1147_v23  ;;  %v1404_v28 = vadd.f32 %v2834_v55, %v1403_v24  ;;  %1345 = vmatprep.mubr.bf16.mxu0 %v2585_v17  ;;  %v2598_v21 = vld [vmem:[%s2670_s28 + $0x3f0] ss:$8 sps:$4 sm:$0xff]  }
 0x12e   : > { %2017 = vst [vmem:[%s2843_s5 + $0x38] sm:$0xff] %v1889_v25  ;;  %2081 = vst [vmem:[%s2843_s5 + $0x238] sm:$0xff] %v1953_v26  ;;  %v1149_v29 = vpop.f32.mrf.mxu0  ;;  %v1405_v30 = vpop.f32.mrf.mxu1  ;;  %1601 = vmatprep.mubr.bf16.mxu1 %v2588_v20  ;;  %v2595_v20 = vld [vmem:[%s2670_s28 + $0x1f0] ss:$8 sps:$4 sm:$0xff]  }
 0x12f   : > { %vm1634_vm0 = vcmp.ge.f32.partialorder %v1148_v27, 0.0  ;;  %v1762_v31 = vmul.f32 0.01, %v1148_v27  ;;  %vm1698_vm1 = vcmp.ge.f32.partialorder %v1404_v28, 0.0  ;;  %v1826_v32 = vmul.f32 0.01, %v1404_v28 }
 0x130   : > { %v1150_v33 = vpop.f32.mrf.mxu0  ;;  %v1406_v34 = vpop.f32.mrf.mxu1 }
 0x131   : > { %v1890_v37 = vsel %vm1634_vm0, %v1148_v27, %v1762_v31  ;;  %v1954_v38 = vsel %vm1698_vm1, %v1404_v28, %v1826_v32  ;;  %v1151_v39 = vadd.f32 %v2834_v55, %v1150_v33  ;;  %v1407_v40 = vadd.f32 %v2834_v55, %v1406_v34 }
 0x132   : > { %2018 = vst [vmem:[%s2843_s5 + $0x40] sm:$0xff] %v1890_v37  ;;  %2082 = vst [vmem:[%s2843_s5 + $0x240] sm:$0xff] %v1954_v38  ;;  %v1152_v42 = vpop.f32.mrf.mxu0  ;;  %v1408_v43 = vpop.f32.mrf.mxu1 }
 0x133   : > { %vm1635_vm2 = vcmp.ge.f32.partialorder %v1151_v39, 0.0  ;;  %v1763_v45 = vmul.f32 0.01, %v1151_v39  ;;  %vm1699_vm3 = vcmp.ge.f32.partialorder %v1407_v40, 0.0  ;;  %v1827_v46 = vmul.f32 0.01, %v1407_v40 }
 0x134   : > { %v1155_v47 = vpop.f32.mrf.mxu0  ;;  %1346 = vmatmul.mubr.bf16.gmra.mxu0 %v2583_v35  ;;  %v1411_v48 = vpop.f32.mrf.mxu1  ;;  %1602 = vmatmul.mubr.bf16.gmra.mxu1 %v2586_v36 }
 0x135   : > { %v1891_v49 = vsel %vm1635_vm2, %v1151_v39, %v1763_v45  ;;  %v1955_v50 = vsel %vm1699_vm3, %v1407_v40, %v1827_v46  ;;  %v1156_v51 = vadd.f32 %v2834_v55, %v1155_v47  ;;  %v1412_v52 = vadd.f32 %v2834_v55, %v1411_v48  ;;  %1353 = vmatprep.mubr.bf16.mxu0 %v2591_v41 }
 0x136   : > { %2019 = vst [vmem:[%s2843_s5 + $0x48] sm:$0xff] %v1891_v49  ;;  %2083 = vst [vmem:[%s2843_s5 + $0x248] sm:$0xff] %v1955_v50  ;;  %v1157_v53 = vpop.f32.mrf.mxu0  ;;  %v1413_v54 = vpop.f32.mrf.mxu1  ;;  %1609 = vmatprep.mubr.bf16.mxu1 %v2594_v44 }
 0x137   : > { %vm1636_vm4 = vcmp.ge.f32.partialorder %v1156_v51, 0.0  ;;  %v1764_v56 = vmul.f32 0.01, %v1156_v51  ;;  %vm1700_vm5 = vcmp.ge.f32.partialorder %v1412_v52, 0.0  ;;  %v1828_v57 = vmul.f32 0.01, %v1412_v52 }
 0x138   : > { %v1158_v58 = vpop.f32.mrf.mxu0  ;;  %v1414_v59 = vpop.f32.mrf.mxu1 }
 0x139   : > { %v1892_v62 = vsel %vm1636_vm4, %v1156_v51, %v1764_v56  ;;  %v1956_v63 = vsel %vm1700_vm5, %v1412_v52, %v1828_v57  ;;  %v1159_v0 = vadd.f32 %v2834_v55, %v1158_v58  ;;  %v1415_v1 = vadd.f32 %v2834_v55, %v1414_v59 }
 0x13a   : > { %2020 = vst [vmem:[%s2843_s5 + $0x50] sm:$0xff] %v1892_v62  ;;  %2084 = vst [vmem:[%s2843_s5 + $0x250] sm:$0xff] %v1956_v63  ;;  %v1160_v3 = vpop.f32.mrf.mxu0  ;;  %v1416_v4 = vpop.f32.mrf.mxu1 }
 0x13b   : > { %vm1637_vm6 = vcmp.ge.f32.partialorder %v1159_v0, 0.0  ;;  %v1765_v6 = vmul.f32 0.01, %v1159_v0  ;;  %vm1701_vm7 = vcmp.ge.f32.partialorder %v1415_v1, 0.0  ;;  %v1829_v7 = vmul.f32 0.01, %v1415_v1 }
 0x13c   : > { %v1163_v8 = vpop.f32.mrf.mxu0  ;;  %1354 = vmatmul.mubr.bf16.gmra.mxu0 %v2589_v60  ;;  %v1419_v9 = vpop.f32.mrf.mxu1  ;;  %1610 = vmatmul.mubr.bf16.gmra.mxu1 %v2592_v61 }
 0x13d   : > { %v1893_v10 = vsel %vm1637_vm6, %v1159_v0, %v1765_v6  ;;  %v1957_v11 = vsel %vm1701_vm7, %v1415_v1, %v1829_v7  ;;  %v1164_v12 = vadd.f32 %v2834_v55, %v1163_v8  ;;  %v1420_v13 = vadd.f32 %v2834_v55, %v1419_v9  ;;  %1361 = vmatprep.mubr.bf16.mxu0 %v2597_v2 }
 0x13e   : > { %2021 = vst [vmem:[%s2843_s5 + $0x58] sm:$0xff] %v1893_v10  ;;  %2085 = vst [vmem:[%s2843_s5 + $0x258] sm:$0xff] %v1957_v11  ;;  %v1165_v14 = vpop.f32.mrf.mxu0  ;;  %v1421_v15 = vpop.f32.mrf.mxu1  ;;  %1617 = vmatprep.mubr.bf16.mxu1 %v2600_v5 }
 0x13f   : > { %vm1638_vm8 = vcmp.ge.f32.partialorder %v1164_v12, 0.0  ;;  %v1766_v16 = vmul.f32 0.01, %v1164_v12  ;;  %vm1702_vm9 = vcmp.ge.f32.partialorder %v1420_v13, 0.0  ;;  %v1830_v17 = vmul.f32 0.01, %v1420_v13 }
 0x140   : > { %v1166_v18 = vpop.f32.mrf.mxu0  ;;  %v1422_v19 = vpop.f32.mrf.mxu1 }
 0x141   : > { %v1894_v22 = vsel %vm1638_vm8, %v1164_v12, %v1766_v16  ;;  %v1958_v23 = vsel %vm1702_vm9, %v1420_v13, %v1830_v17  ;;  %v1167_v24 = vadd.f32 %v2834_v55, %v1166_v18  ;;  %v1423_v25 = vadd.f32 %v2834_v55, %v1422_v19 }
 0x142   : > { %2022 = vst [vmem:[%s2843_s5 + $0x60] sm:$0xff] %v1894_v22  ;;  %2086 = vst [vmem:[%s2843_s5 + $0x260] sm:$0xff] %v1958_v23  ;;  %v1168_v26 = vpop.f32.mrf.mxu0  ;;  %v1424_v27 = vpop.f32.mrf.mxu1 }
 0x143   : > { %vm1639_vm10 = vcmp.ge.f32.partialorder %v1167_v24, 0.0  ;;  %v1767_v28 = vmul.f32 0.01, %v1167_v24  ;;  %vm1703_vm11 = vcmp.ge.f32.partialorder %v1423_v25, 0.0  ;;  %v1831_v29 = vmul.f32 0.01, %v1423_v25 }
 0x144   : > { %v1171_v30 = vpop.f32.mrf.mxu0  ;;  %1362 = vmatmul.mubr.bf16.gmra.mxu0 %v2595_v20  ;;  %v1427_v31 = vpop.f32.mrf.mxu1  ;;  %1618 = vmatmul.mubr.bf16.gmra.mxu1 %v2598_v21 }
 0x145   : > { %v1895_v32 = vsel %vm1639_vm10, %v1167_v24, %v1767_v28  ;;  %v1959_v33 = vsel %vm1703_vm11, %v1423_v25, %v1831_v29  ;;  %v1172_v34 = vadd.f32 %v2834_v55, %v1171_v30  ;;  %v1428_v35 = vadd.f32 %v2834_v55, %v1427_v31 }
 0x146   : > { %2023 = vst [vmem:[%s2843_s5 + $0x68] sm:$0xff] %v1895_v32  ;;  %2087 = vst [vmem:[%s2843_s5 + $0x268] sm:$0xff] %v1959_v33  ;;  %v1173_v36 = vpop.f32.mrf.mxu0  ;;  %v1429_v37 = vpop.f32.mrf.mxu1 }
 0x147   : > { %vm1640_vm12 = vcmp.ge.f32.partialorder %v1172_v34, 0.0  ;;  %v1768_v38 = vmul.f32 0.01, %v1172_v34  ;;  %vm1704_vm13 = vcmp.ge.f32.partialorder %v1428_v35, 0.0  ;;  %v1832_v39 = vmul.f32 0.01, %v1428_v35 }
 0x148   : > { %v1174_v40 = vpop.f32.mrf.mxu0  ;;  %v1430_v41 = vpop.f32.mrf.mxu1 }
 0x149   : > { %v1896_v42 = vsel %vm1640_vm12, %v1172_v34, %v1768_v38  ;;  %v1960_v43 = vsel %vm1704_vm13, %v1428_v35, %v1832_v39  ;;  %v1175_v44 = vadd.f32 %v2834_v55, %v1174_v40  ;;  %v1431_v45 = vadd.f32 %v2834_v55, %v1430_v41 }
 0x14a   : > { %2024 = vst [vmem:[%s2843_s5 + $0x70] sm:$0xff] %v1896_v42  ;;  %2088 = vst [vmem:[%s2843_s5 + $0x270] sm:$0xff] %v1960_v43  ;;  %v1176_v46 = vpop.f32.mrf.mxu0  ;;  %v1432_v47 = vpop.f32.mrf.mxu1 }
 0x14b   : > { %vm1641_vm14 = vcmp.ge.f32.partialorder %v1175_v44, 0.0  ;;  %v1769_v48 = vmul.f32 0.01, %v1175_v44  ;;  %vm1705_vm15 = vcmp.ge.f32.partialorder %v1431_v45, 0.0  ;;  %v1833_v49 = vmul.f32 0.01, %v1431_v45 }
 0x14c   : > { %v1179_v50 = vpop.f32.mrf.mxu0  ;;  %v1435_v51 = vpop.f32.mrf.mxu1 }
 0x14d   : > { %v1897_v52 = vsel %vm1641_vm14, %v1175_v44, %v1769_v48  ;;  %v1961_v53 = vsel %vm1705_vm15, %v1431_v45, %v1833_v49  ;;  %v1180_v54 = vadd.f32 %v2834_v55, %v1179_v50  ;;  %v1436_v56 = vadd.f32 %v2834_v55, %v1435_v51 }
 0x14e   : > { %2025 = vst [vmem:[%s2843_s5 + $0x78] sm:$0xff] %v1897_v52  ;;  %2089 = vst [vmem:[%s2843_s5 + $0x278] sm:$0xff] %v1961_v53  ;;  %v1181_v57 = vpop.f32.mrf.mxu0  ;;  %v1437_v58 = vpop.f32.mrf.mxu1 }
 0x14f   : > { %vm1642_vm0 = vcmp.ge.f32.partialorder %v1180_v54, 0.0  ;;  %v1770_v59 = vmul.f32 0.01, %v1180_v54  ;;  %vm1706_vm1 = vcmp.ge.f32.partialorder %v1436_v56, 0.0  ;;  %v1834_v60 = vmul.f32 0.01, %v1436_v56 }
 0x150   : > { %v1182_v61 = vpop.f32.mrf.mxu0  ;;  %v1438_v62 = vpop.f32.mrf.mxu1 }
 0x151   : > { %v1898_v63 = vsel %vm1642_vm0, %v1180_v54, %v1770_v59  ;;  %v1962_v0 = vsel %vm1706_vm1, %v1436_v56, %v1834_v60  ;;  %v1183_v1 = vadd.f32 %v2834_v55, %v1182_v61  ;;  %v1439_v2 = vadd.f32 %v2834_v55, %v1438_v62 }
 0x152   : > { %2026 = vst [vmem:[%s2843_s5 + $0x80] sm:$0xff] %v1898_v63  ;;  %2090 = vst [vmem:[%s2843_s5 + $0x280] sm:$0xff] %v1962_v0  ;;  %v1184_v3 = vpop.f32.mrf.mxu0  ;;  %v1440_v4 = vpop.f32.mrf.mxu1 }
 0x153   : > { %vm1643_vm2 = vcmp.ge.f32.partialorder %v1183_v1, 0.0  ;;  %v1771_v5 = vmul.f32 0.01, %v1183_v1  ;;  %vm1707_vm3 = vcmp.ge.f32.partialorder %v1439_v2, 0.0  ;;  %v1835_v6 = vmul.f32 0.01, %v1439_v2 }
 0x154   : > { %v1187_v7 = vpop.f32.mrf.mxu0  ;;  %v1443_v8 = vpop.f32.mrf.mxu1 }
 0x155   : > { %v1899_v9 = vsel %vm1643_vm2, %v1183_v1, %v1771_v5  ;;  %v1963_v10 = vsel %vm1707_vm3, %v1439_v2, %v1835_v6  ;;  %v1188_v11 = vadd.f32 %v2834_v55, %v1187_v7  ;;  %v1444_v12 = vadd.f32 %v2834_v55, %v1443_v8 }
 0x156   : > { %2027 = vst [vmem:[%s2843_s5 + $0x88] sm:$0xff] %v1899_v9  ;;  %2091 = vst [vmem:[%s2843_s5 + $0x288] sm:$0xff] %v1963_v10  ;;  %v1189_v13 = vpop.f32.mrf.mxu0  ;;  %v1445_v14 = vpop.f32.mrf.mxu1 }
 0x157   : > { %vm1644_vm4 = vcmp.ge.f32.partialorder %v1188_v11, 0.0  ;;  %v1772_v15 = vmul.f32 0.01, %v1188_v11  ;;  %vm1708_vm5 = vcmp.ge.f32.partialorder %v1444_v12, 0.0  ;;  %v1836_v16 = vmul.f32 0.01, %v1444_v12 }
 0x158   : > { %v1190_v17 = vpop.f32.mrf.mxu0  ;;  %v1446_v18 = vpop.f32.mrf.mxu1 }
 0x159   : > { %v1900_v19 = vsel %vm1644_vm4, %v1188_v11, %v1772_v15  ;;  %v1964_v20 = vsel %vm1708_vm5, %v1444_v12, %v1836_v16  ;;  %v1191_v21 = vadd.f32 %v2834_v55, %v1190_v17  ;;  %v1447_v22 = vadd.f32 %v2834_v55, %v1446_v18 }
 0x15a   : > { %2028 = vst [vmem:[%s2843_s5 + $0x90] sm:$0xff] %v1900_v19  ;;  %2092 = vst [vmem:[%s2843_s5 + $0x290] sm:$0xff] %v1964_v20  ;;  %v1192_v23 = vpop.f32.mrf.mxu0  ;;  %v1448_v24 = vpop.f32.mrf.mxu1 }
 0x15b   : > { %vm1645_vm6 = vcmp.ge.f32.partialorder %v1191_v21, 0.0  ;;  %v1773_v25 = vmul.f32 0.01, %v1191_v21  ;;  %vm1709_vm7 = vcmp.ge.f32.partialorder %v1447_v22, 0.0  ;;  %v1837_v26 = vmul.f32 0.01, %v1447_v22 }
 0x15c   : > { %v1195_v27 = vpop.f32.mrf.mxu0  ;;  %v1451_v28 = vpop.f32.mrf.mxu1 }
 0x15d   : > { %v1901_v29 = vsel %vm1645_vm6, %v1191_v21, %v1773_v25  ;;  %v1965_v30 = vsel %vm1709_vm7, %v1447_v22, %v1837_v26  ;;  %v1196_v31 = vadd.f32 %v2834_v55, %v1195_v27  ;;  %v1452_v32 = vadd.f32 %v2834_v55, %v1451_v28 }
 0x15e   : > { %2029 = vst [vmem:[%s2843_s5 + $0x98] sm:$0xff] %v1901_v29  ;;  %2093 = vst [vmem:[%s2843_s5 + $0x298] sm:$0xff] %v1965_v30  ;;  %v1197_v33 = vpop.f32.mrf.mxu0  ;;  %v1453_v34 = vpop.f32.mrf.mxu1 }
 0x15f   : > { %vm1646_vm8 = vcmp.ge.f32.partialorder %v1196_v31, 0.0  ;;  %v1774_v35 = vmul.f32 0.01, %v1196_v31  ;;  %vm1710_vm9 = vcmp.ge.f32.partialorder %v1452_v32, 0.0  ;;  %v1838_v36 = vmul.f32 0.01, %v1452_v32 }
 0x160   : > { %v1198_v37 = vpop.f32.mrf.mxu0  ;;  %v1454_v38 = vpop.f32.mrf.mxu1 }
 0x161   : > { %v1902_v39 = vsel %vm1646_vm8, %v1196_v31, %v1774_v35  ;;  %v1966_v40 = vsel %vm1710_vm9, %v1452_v32, %v1838_v36  ;;  %v1199_v41 = vadd.f32 %v2834_v55, %v1198_v37  ;;  %v1455_v42 = vadd.f32 %v2834_v55, %v1454_v38 }
 0x162   : > { %2030 = vst [vmem:[%s2843_s5 + $0xa0] sm:$0xff] %v1902_v39  ;;  %2094 = vst [vmem:[%s2843_s5 + $0x2a0] sm:$0xff] %v1966_v40  ;;  %v1200_v43 = vpop.f32.mrf.mxu0  ;;  %v1456_v44 = vpop.f32.mrf.mxu1 }
 0x163   : > { %vm1647_vm10 = vcmp.ge.f32.partialorder %v1199_v41, 0.0  ;;  %v1775_v45 = vmul.f32 0.01, %v1199_v41  ;;  %vm1711_vm11 = vcmp.ge.f32.partialorder %v1455_v42, 0.0  ;;  %v1839_v46 = vmul.f32 0.01, %v1455_v42 }
 0x164   : > { %v1203_v47 = vpop.f32.mrf.mxu0  ;;  %v1459_v48 = vpop.f32.mrf.mxu1 }
 0x165   : > { %v1903_v49 = vsel %vm1647_vm10, %v1199_v41, %v1775_v45  ;;  %v1967_v50 = vsel %vm1711_vm11, %v1455_v42, %v1839_v46  ;;  %v1204_v51 = vadd.f32 %v2834_v55, %v1203_v47  ;;  %v1460_v52 = vadd.f32 %v2834_v55, %v1459_v48 }
 0x166   : > { %2031 = vst [vmem:[%s2843_s5 + $0xa8] sm:$0xff] %v1903_v49  ;;  %2095 = vst [vmem:[%s2843_s5 + $0x2a8] sm:$0xff] %v1967_v50  ;;  %v1205_v53 = vpop.f32.mrf.mxu0  ;;  %v1461_v54 = vpop.f32.mrf.mxu1 }
 0x167   : > { %vm1648_vm12 = vcmp.ge.f32.partialorder %v1204_v51, 0.0  ;;  %v1776_v56 = vmul.f32 0.01, %v1204_v51  ;;  %vm1712_vm13 = vcmp.ge.f32.partialorder %v1460_v52, 0.0  ;;  %v1840_v57 = vmul.f32 0.01, %v1460_v52 }
 0x168   : > { %v1206_v58 = vpop.f32.mrf.mxu0  ;;  %v1462_v59 = vpop.f32.mrf.mxu1 }
 0x169   : > { %v1904_v60 = vsel %vm1648_vm12, %v1204_v51, %v1776_v56  ;;  %v1968_v61 = vsel %vm1712_vm13, %v1460_v52, %v1840_v57  ;;  %v1207_v62 = vadd.f32 %v2834_v55, %v1206_v58  ;;  %v1463_v63 = vadd.f32 %v2834_v55, %v1462_v59 }
 0x16a   : > { %2032 = vst [vmem:[%s2843_s5 + $0xb0] sm:$0xff] %v1904_v60  ;;  %2096 = vst [vmem:[%s2843_s5 + $0x2b0] sm:$0xff] %v1968_v61  ;;  %v1208_v0 = vpop.f32.mrf.mxu0  ;;  %v1464_v1 = vpop.f32.mrf.mxu1 }
 0x16b   : > { %vm1649_vm14 = vcmp.ge.f32.partialorder %v1207_v62, 0.0  ;;  %v1777_v2 = vmul.f32 0.01, %v1207_v62  ;;  %vm1713_vm15 = vcmp.ge.f32.partialorder %v1463_v63, 0.0  ;;  %v1841_v3 = vmul.f32 0.01, %v1463_v63 }
 0x16c   : > { %v1211_v4 = vpop.f32.mrf.mxu0  ;;  %v1467_v5 = vpop.f32.mrf.mxu1 }
 0x16d   : > { %v1905_v6 = vsel %vm1649_vm14, %v1207_v62, %v1777_v2  ;;  %v1969_v7 = vsel %vm1713_vm15, %v1463_v63, %v1841_v3  ;;  %v1212_v8 = vadd.f32 %v2834_v55, %v1211_v4  ;;  %v1468_v9 = vadd.f32 %v2834_v55, %v1467_v5 }
 0x16e   : > { %2033 = vst [vmem:[%s2843_s5 + $0xb8] sm:$0xff] %v1905_v6  ;;  %2097 = vst [vmem:[%s2843_s5 + $0x2b8] sm:$0xff] %v1969_v7  ;;  %v1213_v10 = vpop.f32.mrf.mxu0  ;;  %v1469_v11 = vpop.f32.mrf.mxu1 }
 0x16f   : > { %vm1650_vm0 = vcmp.ge.f32.partialorder %v1212_v8, 0.0  ;;  %v1778_v12 = vmul.f32 0.01, %v1212_v8  ;;  %vm1714_vm1 = vcmp.ge.f32.partialorder %v1468_v9, 0.0  ;;  %v1842_v13 = vmul.f32 0.01, %v1468_v9 }
 0x170   : > { %v1214_v14 = vpop.f32.mrf.mxu0  ;;  %v1470_v15 = vpop.f32.mrf.mxu1 }
 0x171   : > { %v1906_v16 = vsel %vm1650_vm0, %v1212_v8, %v1778_v12  ;;  %v1970_v17 = vsel %vm1714_vm1, %v1468_v9, %v1842_v13  ;;  %v1215_v18 = vadd.f32 %v2834_v55, %v1214_v14  ;;  %v1471_v19 = vadd.f32 %v2834_v55, %v1470_v15 }
 0x172   : > { %2034 = vst [vmem:[%s2843_s5 + $0xc0] sm:$0xff] %v1906_v16  ;;  %2098 = vst [vmem:[%s2843_s5 + $0x2c0] sm:$0xff] %v1970_v17  ;;  %v1216_v20 = vpop.f32.mrf.mxu0  ;;  %v1472_v21 = vpop.f32.mrf.mxu1 }
 0x173   : > { %vm1651_vm2 = vcmp.ge.f32.partialorder %v1215_v18, 0.0  ;;  %v1779_v22 = vmul.f32 0.01, %v1215_v18  ;;  %vm1715_vm3 = vcmp.ge.f32.partialorder %v1471_v19, 0.0  ;;  %v1843_v23 = vmul.f32 0.01, %v1471_v19 }
 0x174   : > { %v1219_v24 = vpop.f32.mrf.mxu0  ;;  %v1475_v25 = vpop.f32.mrf.mxu1 }
 0x175   : > { %v1907_v26 = vsel %vm1651_vm2, %v1215_v18, %v1779_v22  ;;  %v1971_v27 = vsel %vm1715_vm3, %v1471_v19, %v1843_v23  ;;  %v1220_v28 = vadd.f32 %v2834_v55, %v1219_v24  ;;  %v1476_v29 = vadd.f32 %v2834_v55, %v1475_v25 }
 0x176   : > { %2035 = vst [vmem:[%s2843_s5 + $0xc8] sm:$0xff] %v1907_v26  ;;  %2099 = vst [vmem:[%s2843_s5 + $0x2c8] sm:$0xff] %v1971_v27  ;;  %v1221_v30 = vpop.f32.mrf.mxu0  ;;  %v1477_v31 = vpop.f32.mrf.mxu1 }
 0x177   : > { %vm1652_vm4 = vcmp.ge.f32.partialorder %v1220_v28, 0.0  ;;  %v1780_v32 = vmul.f32 0.01, %v1220_v28  ;;  %vm1716_vm5 = vcmp.ge.f32.partialorder %v1476_v29, 0.0  ;;  %v1844_v33 = vmul.f32 0.01, %v1476_v29 }
 0x178   : > { %v1222_v34 = vpop.f32.mrf.mxu0  ;;  %v1478_v35 = vpop.f32.mrf.mxu1 }
 0x179   : > { %v1908_v36 = vsel %vm1652_vm4, %v1220_v28, %v1780_v32  ;;  %v1972_v37 = vsel %vm1716_vm5, %v1476_v29, %v1844_v33  ;;  %v1223_v38 = vadd.f32 %v2834_v55, %v1222_v34  ;;  %v1479_v39 = vadd.f32 %v2834_v55, %v1478_v35  ;;  %v3002_v35 = vld [vmem:[%s3135_s2] ss:$0 sm:$0xff] }
 0x17a   : > { %2036 = vst [vmem:[%s2843_s5 + $0xd0] sm:$0xff] %v1908_v36  ;;  %2100 = vst [vmem:[%s2843_s5 + $0x2d0] sm:$0xff] %v1972_v37  ;;  %v1224_v40 = vpop.f32.mrf.mxu0  ;;  %v1480_v41 = vpop.f32.mrf.mxu1 }
 0x17b   : > { %vm1653_vm6 = vcmp.ge.f32.partialorder %v1223_v38, 0.0  ;;  %v1781_v42 = vmul.f32 0.01, %v1223_v38  ;;  %vm1717_vm7 = vcmp.ge.f32.partialorder %v1479_v39, 0.0  ;;  %v1845_v43 = vmul.f32 0.01, %v1479_v39 }
 0x17c   : > { %v1227_v44 = vpop.f32.mrf.mxu0  ;;  %v1483_v45 = vpop.f32.mrf.mxu1 }
 0x17d   : > { %v1909_v46 = vsel %vm1653_vm6, %v1223_v38, %v1781_v42  ;;  %v1973_v47 = vsel %vm1717_vm7, %v1479_v39, %v1845_v43  ;;  %v1228_v48 = vadd.f32 %v2834_v55, %v1227_v44  ;;  %v1484_v49 = vadd.f32 %v2834_v55, %v1483_v45 }
 0x17e   : > { %2037 = vst [vmem:[%s2843_s5 + $0xd8] sm:$0xff] %v1909_v46  ;;  %2101 = vst [vmem:[%s2843_s5 + $0x2d8] sm:$0xff] %v1973_v47  ;;  %v1229_v50 = vpop.f32.mrf.mxu0  ;;  %v1485_v51 = vpop.f32.mrf.mxu1 }
 0x17f   : > { %vm1654_vm8 = vcmp.ge.f32.partialorder %v1228_v48, 0.0  ;;  %v1782_v52 = vmul.f32 0.01, %v1228_v48  ;;  %vm1718_vm9 = vcmp.ge.f32.partialorder %v1484_v49, 0.0  ;;  %v1846_v53 = vmul.f32 0.01, %v1484_v49 }
 0x180   : > { %v1230_v54 = vpop.f32.mrf.mxu0  ;;  %v1486_v56 = vpop.f32.mrf.mxu1 }
 0x181   : > { %v1910_v57 = vsel %vm1654_vm8, %v1228_v48, %v1782_v52  ;;  %v1974_v58 = vsel %vm1718_vm9, %v1484_v49, %v1846_v53  ;;  %v1231_v59 = vadd.f32 %v2834_v55, %v1230_v54  ;;  %v1487_v60 = vadd.f32 %v2834_v55, %v1486_v56 }
 0x182   : > { %2038 = vst [vmem:[%s2843_s5 + $0xe0] sm:$0xff] %v1910_v57  ;;  %2102 = vst [vmem:[%s2843_s5 + $0x2e0] sm:$0xff] %v1974_v58  ;;  %v1232_v61 = vpop.f32.mrf.mxu0  ;;  %v1488_v62 = vpop.f32.mrf.mxu1 }
 0x183   : > { %vm1655_vm10 = vcmp.ge.f32.partialorder %v1231_v59, 0.0  ;;  %v1783_v63 = vmul.f32 0.01, %v1231_v59  ;;  %vm1719_vm11 = vcmp.ge.f32.partialorder %v1487_v60, 0.0  ;;  %v1847_v0 = vmul.f32 0.01, %v1487_v60 }
 0x184   : > { %v1235_v1 = vpop.f32.mrf.mxu0  ;;  %v1491_v2 = vpop.f32.mrf.mxu1 }
 0x185   : > { %v1911_v3 = vsel %vm1655_vm10, %v1231_v59, %v1783_v63  ;;  %v1975_v4 = vsel %vm1719_vm11, %v1487_v60, %v1847_v0  ;;  %v1236_v5 = vadd.f32 %v2834_v55, %v1235_v1  ;;  %v1492_v6 = vadd.f32 %v2834_v55, %v1491_v2 }
 0x186   : > { %2039 = vst [vmem:[%s2843_s5 + $0xe8] sm:$0xff] %v1911_v3  ;;  %2103 = vst [vmem:[%s2843_s5 + $0x2e8] sm:$0xff] %v1975_v4  ;;  %v1237_v7 = vpop.f32.mrf.mxu0  ;;  %v1493_v8 = vpop.f32.mrf.mxu1 }
 0x187   : > { %vm1656_vm12 = vcmp.ge.f32.partialorder %v1236_v5, 0.0  ;;  %v1784_v9 = vmul.f32 0.01, %v1236_v5  ;;  %vm1720_vm13 = vcmp.ge.f32.partialorder %v1492_v6, 0.0  ;;  %v1848_v10 = vmul.f32 0.01, %v1492_v6 }
 0x188   : > { %v1238_v11 = vpop.f32.mrf.mxu0  ;;  %v1494_v12 = vpop.f32.mrf.mxu1 }
 0x189   : > { %v1912_v13 = vsel %vm1656_vm12, %v1236_v5, %v1784_v9  ;;  %v1976_v14 = vsel %vm1720_vm13, %v1492_v6, %v1848_v10  ;;  %v1239_v15 = vadd.f32 %v2834_v55, %v1238_v11  ;;  %v1495_v16 = vadd.f32 %v2834_v55, %v1494_v12 }
 0x18a   : > { %2040 = vst [vmem:[%s2843_s5 + $0xf0] sm:$0xff] %v1912_v13  ;;  %2104 = vst [vmem:[%s2843_s5 + $0x2f0] sm:$0xff] %v1976_v14  ;;  %v1240_v17 = vpop.f32.mrf.mxu0  ;;  %v1496_v18 = vpop.f32.mrf.mxu1 }
 0x18b   : > { %vm1657_vm14 = vcmp.ge.f32.partialorder %v1239_v15, 0.0  ;;  %v1785_v19 = vmul.f32 0.01, %v1239_v15  ;;  %vm1721_vm15 = vcmp.ge.f32.partialorder %v1495_v16, 0.0  ;;  %v1849_v20 = vmul.f32 0.01, %v1495_v16 }
 0x18c   : > { %v1243_v21 = vpop.f32.mrf.mxu0  ;;  %v1499_v22 = vpop.f32.mrf.mxu1 }
 0x18d   : > { %v1913_v23 = vsel %vm1657_vm14, %v1239_v15, %v1785_v19  ;;  %v1977_v24 = vsel %vm1721_vm15, %v1495_v16, %v1849_v20  ;;  %v1244_v25 = vadd.f32 %v2834_v55, %v1243_v21  ;;  %v1500_v26 = vadd.f32 %v2834_v55, %v1499_v22 }
 0x18e   : > { %2041 = vst [vmem:[%s2843_s5 + $0xf8] sm:$0xff] %v1913_v23  ;;  %2105 = vst [vmem:[%s2843_s5 + $0x2f8] sm:$0xff] %v1977_v24  ;;  %v1245_v27 = vpop.f32.mrf.mxu0  ;;  %v1501_v28 = vpop.f32.mrf.mxu1 }
 0x18f   : > { %vm1658_vm0 = vcmp.ge.f32.partialorder %v1244_v25, 0.0  ;;  %v1786_v29 = vmul.f32 0.01, %v1244_v25  ;;  %vm1722_vm1 = vcmp.ge.f32.partialorder %v1500_v26, 0.0  ;;  %v1850_v30 = vmul.f32 0.01, %v1500_v26 }
 0x190   : > { %v1246_v31 = vpop.f32.mrf.mxu0  ;;  %v1502_v32 = vpop.f32.mrf.mxu1 }
 0x191   : > { %v1914_v33 = vsel %vm1658_vm0, %v1244_v25, %v1786_v29  ;;  %v1978_v34 = vsel %vm1722_vm1, %v1500_v26, %v1850_v30  ;;  %v1247_v55 = vadd.f32 %v3002_v35, %v1246_v31  ;;  %v1503_v36 = vadd.f32 %v3002_v35, %v1502_v32 }
 0x192   : > { %2042 = vst [vmem:[%s2843_s5 + $0x100] sm:$0xff] %v1914_v33  ;;  %2106 = vst [vmem:[%s2843_s5 + $0x300] sm:$0xff] %v1978_v34  ;;  %v1248_v37 = vpop.f32.mrf.mxu0  ;;  %v1504_v38 = vpop.f32.mrf.mxu1 }
 0x193   : > { %vm1659_vm2 = vcmp.ge.f32.partialorder %v1247_v55, 0.0  ;;  %v1787_v39 = vmul.f32 0.01, %v1247_v55  ;;  %vm1723_vm3 = vcmp.ge.f32.partialorder %v1503_v36, 0.0  ;;  %v1851_v40 = vmul.f32 0.01, %v1503_v36 }
 0x194   : > { %v1251_v41 = vpop.f32.mrf.mxu0  ;;  %v1507_v42 = vpop.f32.mrf.mxu1 }
 0x195   : > { %v1915_v43 = vsel %vm1659_vm2, %v1247_v55, %v1787_v39  ;;  %v1979_v44 = vsel %vm1723_vm3, %v1503_v36, %v1851_v40  ;;  %v1252_v45 = vadd.f32 %v3002_v35, %v1251_v41  ;;  %v1508_v46 = vadd.f32 %v3002_v35, %v1507_v42 }
 0x196   : > { %2043 = vst [vmem:[%s2843_s5 + $0x108] sm:$0xff] %v1915_v43  ;;  %2107 = vst [vmem:[%s2843_s5 + $0x308] sm:$0xff] %v1979_v44  ;;  %v1253_v47 = vpop.f32.mrf.mxu0  ;;  %v1509_v48 = vpop.f32.mrf.mxu1 }
 0x197   : > { %vm1660_vm4 = vcmp.ge.f32.partialorder %v1252_v45, 0.0  ;;  %v1788_v49 = vmul.f32 0.01, %v1252_v45  ;;  %vm1724_vm5 = vcmp.ge.f32.partialorder %v1508_v46, 0.0  ;;  %v1852_v50 = vmul.f32 0.01, %v1508_v46 }
 0x198   : > { %v1254_v51 = vpop.f32.mrf.mxu0  ;;  %v1510_v52 = vpop.f32.mrf.mxu1 }
 0x199   : > { %v1916_v53 = vsel %vm1660_vm4, %v1252_v45, %v1788_v49  ;;  %v1980_v54 = vsel %vm1724_vm5, %v1508_v46, %v1852_v50  ;;  %v1255_v56 = vadd.f32 %v3002_v35, %v1254_v51  ;;  %v1511_v57 = vadd.f32 %v3002_v35, %v1510_v52 }
 0x19a   : > { %2044 = vst [vmem:[%s2843_s5 + $0x110] sm:$0xff] %v1916_v53  ;;  %2108 = vst [vmem:[%s2843_s5 + $0x310] sm:$0xff] %v1980_v54  ;;  %v1256_v58 = vpop.f32.mrf.mxu0  ;;  %v1512_v59 = vpop.f32.mrf.mxu1 }
 0x19b   : > { %vm1661_vm6 = vcmp.ge.f32.partialorder %v1255_v56, 0.0  ;;  %v1789_v60 = vmul.f32 0.01, %v1255_v56  ;;  %vm1725_vm7 = vcmp.ge.f32.partialorder %v1511_v57, 0.0  ;;  %v1853_v61 = vmul.f32 0.01, %v1511_v57 }
 0x19c   : > { %v1259_v62 = vpop.f32.mrf.mxu0  ;;  %v1515_v63 = vpop.f32.mrf.mxu1 }
 0x19d   : > { %v1917_v0 = vsel %vm1661_vm6, %v1255_v56, %v1789_v60  ;;  %v1981_v1 = vsel %vm1725_vm7, %v1511_v57, %v1853_v61  ;;  %v1260_v2 = vadd.f32 %v3002_v35, %v1259_v62  ;;  %v1516_v3 = vadd.f32 %v3002_v35, %v1515_v63 }
 0x19e   : > { %2045 = vst [vmem:[%s2843_s5 + $0x118] sm:$0xff] %v1917_v0  ;;  %2109 = vst [vmem:[%s2843_s5 + $0x318] sm:$0xff] %v1981_v1  ;;  %v1261_v4 = vpop.f32.mrf.mxu0  ;;  %v1517_v5 = vpop.f32.mrf.mxu1 }
 0x19f   : > { %vm1662_vm8 = vcmp.ge.f32.partialorder %v1260_v2, 0.0  ;;  %v1790_v6 = vmul.f32 0.01, %v1260_v2  ;;  %vm1726_vm9 = vcmp.ge.f32.partialorder %v1516_v3, 0.0  ;;  %v1854_v7 = vmul.f32 0.01, %v1516_v3 }
 0x1a0   : > { %v1262_v8 = vpop.f32.mrf.mxu0  ;;  %v1518_v9 = vpop.f32.mrf.mxu1 }
 0x1a1   : > { %v1918_v10 = vsel %vm1662_vm8, %v1260_v2, %v1790_v6  ;;  %v1982_v11 = vsel %vm1726_vm9, %v1516_v3, %v1854_v7  ;;  %v1263_v12 = vadd.f32 %v3002_v35, %v1262_v8  ;;  %v1519_v13 = vadd.f32 %v3002_v35, %v1518_v9 }
 0x1a2   : > { %2046 = vst [vmem:[%s2843_s5 + $0x120] sm:$0xff] %v1918_v10  ;;  %2110 = vst [vmem:[%s2843_s5 + $0x320] sm:$0xff] %v1982_v11  ;;  %v1264_v14 = vpop.f32.mrf.mxu0  ;;  %v1520_v15 = vpop.f32.mrf.mxu1 }
 0x1a3   : > { %vm1663_vm10 = vcmp.ge.f32.partialorder %v1263_v12, 0.0  ;;  %v1791_v16 = vmul.f32 0.01, %v1263_v12  ;;  %vm1727_vm11 = vcmp.ge.f32.partialorder %v1519_v13, 0.0  ;;  %v1855_v17 = vmul.f32 0.01, %v1519_v13 }
 0x1a4   : > { %v1267_v18 = vpop.f32.mrf.mxu0  ;;  %v1523_v19 = vpop.f32.mrf.mxu1 }
 0x1a5   : > { %v1919_v20 = vsel %vm1663_vm10, %v1263_v12, %v1791_v16  ;;  %v1983_v21 = vsel %vm1727_vm11, %v1519_v13, %v1855_v17  ;;  %v1268_v22 = vadd.f32 %v3002_v35, %v1267_v18  ;;  %v1524_v23 = vadd.f32 %v3002_v35, %v1523_v19 }
 0x1a6   : > { %2047 = vst [vmem:[%s2843_s5 + $0x128] sm:$0xff] %v1919_v20  ;;  %2111 = vst [vmem:[%s2843_s5 + $0x328] sm:$0xff] %v1983_v21  ;;  %v1269_v24 = vpop.f32.mrf.mxu0  ;;  %v1525_v25 = vpop.f32.mrf.mxu1 }
 0x1a7   : > { %vm1664_vm12 = vcmp.ge.f32.partialorder %v1268_v22, 0.0  ;;  %v1792_v26 = vmul.f32 0.01, %v1268_v22  ;;  %vm1728_vm13 = vcmp.ge.f32.partialorder %v1524_v23, 0.0  ;;  %v1856_v27 = vmul.f32 0.01, %v1524_v23 }
 0x1a8   : > { %v1270_v28 = vpop.f32.mrf.mxu0  ;;  %v1526_v29 = vpop.f32.mrf.mxu1 }
 0x1a9   : > { %v1920_v30 = vsel %vm1664_vm12, %v1268_v22, %v1792_v26  ;;  %v1984_v31 = vsel %vm1728_vm13, %v1524_v23, %v1856_v27  ;;  %v1271_v32 = vadd.f32 %v3002_v35, %v1270_v28  ;;  %v1527_v33 = vadd.f32 %v3002_v35, %v1526_v29 }
 0x1aa   : > { %2048 = vst [vmem:[%s2843_s5 + $0x130] sm:$0xff] %v1920_v30  ;;  %2112 = vst [vmem:[%s2843_s5 + $0x330] sm:$0xff] %v1984_v31  ;;  %v1272_v34 = vpop.f32.mrf.mxu0  ;;  %v1528_v55 = vpop.f32.mrf.mxu1 }
 0x1ab   : > { %vm1665_vm14 = vcmp.ge.f32.partialorder %v1271_v32, 0.0  ;;  %v1793_v36 = vmul.f32 0.01, %v1271_v32  ;;  %vm1729_vm15 = vcmp.ge.f32.partialorder %v1527_v33, 0.0  ;;  %v1857_v37 = vmul.f32 0.01, %v1527_v33 }
 0x1ac   : > { %v1275_v38 = vpop.f32.mrf.mxu0  ;;  %v1531_v39 = vpop.f32.mrf.mxu1 }
 0x1ad   : > { %v1921_v40 = vsel %vm1665_vm14, %v1271_v32, %v1793_v36  ;;  %v1985_v41 = vsel %vm1729_vm15, %v1527_v33, %v1857_v37  ;;  %v1276_v42 = vadd.f32 %v3002_v35, %v1275_v38  ;;  %v1532_v43 = vadd.f32 %v3002_v35, %v1531_v39 }
 0x1ae   : > { %2049 = vst [vmem:[%s2843_s5 + $0x138] sm:$0xff] %v1921_v40  ;;  %2113 = vst [vmem:[%s2843_s5 + $0x338] sm:$0xff] %v1985_v41  ;;  %v1277_v44 = vpop.f32.mrf.mxu0  ;;  %v1533_v45 = vpop.f32.mrf.mxu1 }
 0x1af   : > { %vm1666_vm0 = vcmp.ge.f32.partialorder %v1276_v42, 0.0  ;;  %v1794_v46 = vmul.f32 0.01, %v1276_v42  ;;  %vm1730_vm1 = vcmp.ge.f32.partialorder %v1532_v43, 0.0  ;;  %v1858_v47 = vmul.f32 0.01, %v1532_v43 }
 0x1b0   : > { %v1278_v48 = vpop.f32.mrf.mxu0  ;;  %v1534_v49 = vpop.f32.mrf.mxu1 }
 0x1b1   : > { %v1922_v50 = vsel %vm1666_vm0, %v1276_v42, %v1794_v46  ;;  %v1986_v51 = vsel %vm1730_vm1, %v1532_v43, %v1858_v47  ;;  %v1279_v52 = vadd.f32 %v3002_v35, %v1278_v48  ;;  %v1535_v53 = vadd.f32 %v3002_v35, %v1534_v49 }
 0x1b2   : > { %2050 = vst [vmem:[%s2843_s5 + $0x140] sm:$0xff] %v1922_v50  ;;  %2114 = vst [vmem:[%s2843_s5 + $0x340] sm:$0xff] %v1986_v51  ;;  %v1280_v54 = vpop.f32.mrf.mxu0  ;;  %v1536_v56 = vpop.f32.mrf.mxu1 }
 0x1b3   : > { %vm1667_vm2 = vcmp.ge.f32.partialorder %v1279_v52, 0.0  ;;  %v1795_v57 = vmul.f32 0.01, %v1279_v52  ;;  %vm1731_vm3 = vcmp.ge.f32.partialorder %v1535_v53, 0.0  ;;  %v1859_v58 = vmul.f32 0.01, %v1535_v53 }
 0x1b4   : > { %v1283_v59 = vpop.f32.mrf.mxu0  ;;  %v1539_v60 = vpop.f32.mrf.mxu1 }
 0x1b5   : > { %v1923_v61 = vsel %vm1667_vm2, %v1279_v52, %v1795_v57  ;;  %v1987_v62 = vsel %vm1731_vm3, %v1535_v53, %v1859_v58  ;;  %v1284_v63 = vadd.f32 %v3002_v35, %v1283_v59  ;;  %v1540_v0 = vadd.f32 %v3002_v35, %v1539_v60 }
 0x1b6   : > { %2051 = vst [vmem:[%s2843_s5 + $0x148] sm:$0xff] %v1923_v61  ;;  %2115 = vst [vmem:[%s2843_s5 + $0x348] sm:$0xff] %v1987_v62  ;;  %v1285_v1 = vpop.f32.mrf.mxu0  ;;  %v1541_v2 = vpop.f32.mrf.mxu1 }
 0x1b7   : > { %vm1668_vm4 = vcmp.ge.f32.partialorder %v1284_v63, 0.0  ;;  %v1796_v3 = vmul.f32 0.01, %v1284_v63  ;;  %vm1732_vm5 = vcmp.ge.f32.partialorder %v1540_v0, 0.0  ;;  %v1860_v4 = vmul.f32 0.01, %v1540_v0 }
 0x1b8   : > { %v1286_v5 = vpop.f32.mrf.mxu0  ;;  %v1542_v6 = vpop.f32.mrf.mxu1 }
 0x1b9   : > { %v1924_v7 = vsel %vm1668_vm4, %v1284_v63, %v1796_v3  ;;  %v1988_v8 = vsel %vm1732_vm5, %v1540_v0, %v1860_v4  ;;  %v1287_v9 = vadd.f32 %v3002_v35, %v1286_v5  ;;  %v1543_v10 = vadd.f32 %v3002_v35, %v1542_v6 }
 0x1ba   : > { %2052 = vst [vmem:[%s2843_s5 + $0x150] sm:$0xff] %v1924_v7  ;;  %2116 = vst [vmem:[%s2843_s5 + $0x350] sm:$0xff] %v1988_v8  ;;  %v1288_v11 = vpop.f32.mrf.mxu0  ;;  %v1544_v12 = vpop.f32.mrf.mxu1 }
 0x1bb   : > { %vm1669_vm6 = vcmp.ge.f32.partialorder %v1287_v9, 0.0  ;;  %v1797_v13 = vmul.f32 0.01, %v1287_v9  ;;  %vm1733_vm7 = vcmp.ge.f32.partialorder %v1543_v10, 0.0  ;;  %v1861_v14 = vmul.f32 0.01, %v1543_v10 }
 0x1bc   : > { %v1291_v15 = vpop.f32.mrf.mxu0  ;;  %v1547_v16 = vpop.f32.mrf.mxu1 }
 0x1bd   : > { %v1925_v17 = vsel %vm1669_vm6, %v1287_v9, %v1797_v13  ;;  %v1989_v18 = vsel %vm1733_vm7, %v1543_v10, %v1861_v14  ;;  %v1292_v19 = vadd.f32 %v3002_v35, %v1291_v15  ;;  %v1548_v20 = vadd.f32 %v3002_v35, %v1547_v16 }
 0x1be   : > { %2053 = vst [vmem:[%s2843_s5 + $0x158] sm:$0xff] %v1925_v17  ;;  %2117 = vst [vmem:[%s2843_s5 + $0x358] sm:$0xff] %v1989_v18  ;;  %v1293_v21 = vpop.f32.mrf.mxu0  ;;  %v1549_v22 = vpop.f32.mrf.mxu1 }
 0x1bf   : > { %vm1670_vm8 = vcmp.ge.f32.partialorder %v1292_v19, 0.0  ;;  %v1798_v23 = vmul.f32 0.01, %v1292_v19  ;;  %vm1734_vm9 = vcmp.ge.f32.partialorder %v1548_v20, 0.0  ;;  %v1862_v24 = vmul.f32 0.01, %v1548_v20 }
 0x1c0   : > { %v1294_v25 = vpop.f32.mrf.mxu0  ;;  %v1550_v26 = vpop.f32.mrf.mxu1 }
 0x1c1   : > { %v1926_v27 = vsel %vm1670_vm8, %v1292_v19, %v1798_v23  ;;  %v1990_v28 = vsel %vm1734_vm9, %v1548_v20, %v1862_v24  ;;  %v1295_v29 = vadd.f32 %v3002_v35, %v1294_v25  ;;  %v1551_v30 = vadd.f32 %v3002_v35, %v1550_v26 }
 0x1c2   : > { %2054 = vst [vmem:[%s2843_s5 + $0x160] sm:$0xff] %v1926_v27  ;;  %2118 = vst [vmem:[%s2843_s5 + $0x360] sm:$0xff] %v1990_v28  ;;  %v1296_v31 = vpop.f32.mrf.mxu0  ;;  %v1552_v32 = vpop.f32.mrf.mxu1 }
 0x1c3   : > { %vm1671_vm10 = vcmp.ge.f32.partialorder %v1295_v29, 0.0  ;;  %v1799_v33 = vmul.f32 0.01, %v1295_v29  ;;  %vm1735_vm11 = vcmp.ge.f32.partialorder %v1551_v30, 0.0  ;;  %v1863_v34 = vmul.f32 0.01, %v1551_v30 }
 0x1c4   : > { %v1299_v55 = vpop.f32.mrf.mxu0  ;;  %v1555_v36 = vpop.f32.mrf.mxu1 }
 0x1c5   : > { %v1927_v37 = vsel %vm1671_vm10, %v1295_v29, %v1799_v33  ;;  %v1991_v38 = vsel %vm1735_vm11, %v1551_v30, %v1863_v34  ;;  %v1300_v39 = vadd.f32 %v3002_v35, %v1299_v55  ;;  %v1556_v40 = vadd.f32 %v3002_v35, %v1555_v36 }
 0x1c6   : > { %2055 = vst [vmem:[%s2843_s5 + $0x168] sm:$0xff] %v1927_v37  ;;  %2119 = vst [vmem:[%s2843_s5 + $0x368] sm:$0xff] %v1991_v38  ;;  %v1301_v41 = vpop.f32.mrf.mxu0  ;;  %v1557_v42 = vpop.f32.mrf.mxu1 }
 0x1c7   : > { %vm1672_vm12 = vcmp.ge.f32.partialorder %v1300_v39, 0.0  ;;  %v1800_v43 = vmul.f32 0.01, %v1300_v39  ;;  %vm1736_vm13 = vcmp.ge.f32.partialorder %v1556_v40, 0.0  ;;  %v1864_v44 = vmul.f32 0.01, %v1556_v40 }
 0x1c8   : > { %v1302_v45 = vpop.f32.mrf.mxu0  ;;  %v1558_v46 = vpop.f32.mrf.mxu1 }
 0x1c9   : > { %v1928_v47 = vsel %vm1672_vm12, %v1300_v39, %v1800_v43  ;;  %v1992_v48 = vsel %vm1736_vm13, %v1556_v40, %v1864_v44  ;;  %v1303_v49 = vadd.f32 %v3002_v35, %v1302_v45  ;;  %v1559_v50 = vadd.f32 %v3002_v35, %v1558_v46 }
 0x1ca   : > { %2056 = vst [vmem:[%s2843_s5 + $0x170] sm:$0xff] %v1928_v47  ;;  %2120 = vst [vmem:[%s2843_s5 + $0x370] sm:$0xff] %v1992_v48  ;;  %v1304_v51 = vpop.f32.mrf.mxu0  ;;  %v1560_v52 = vpop.f32.mrf.mxu1 }
 0x1cb   : > { %vm1673_vm14 = vcmp.ge.f32.partialorder %v1303_v49, 0.0  ;;  %v1801_v53 = vmul.f32 0.01, %v1303_v49  ;;  %vm1737_vm15 = vcmp.ge.f32.partialorder %v1559_v50, 0.0  ;;  %v1865_v54 = vmul.f32 0.01, %v1559_v50 }
 0x1cc   : > { %v1307_v56 = vpop.f32.mrf.mxu0  ;;  %v1563_v57 = vpop.f32.mrf.mxu1 }
 0x1cd   : > { %v1929_v58 = vsel %vm1673_vm14, %v1303_v49, %v1801_v53  ;;  %v1993_v59 = vsel %vm1737_vm15, %v1559_v50, %v1865_v54  ;;  %v1308_v60 = vadd.f32 %v3002_v35, %v1307_v56  ;;  %v1564_v61 = vadd.f32 %v3002_v35, %v1563_v57 }
 0x1ce   : > { %2057 = vst [vmem:[%s2843_s5 + $0x178] sm:$0xff] %v1929_v58  ;;  %2121 = vst [vmem:[%s2843_s5 + $0x378] sm:$0xff] %v1993_v59  ;;  %v1309_v62 = vpop.f32.mrf.mxu0  ;;  %v1565_v63 = vpop.f32.mrf.mxu1 }
 0x1cf   : > { %vm1674_vm0 = vcmp.ge.f32.partialorder %v1308_v60, 0.0  ;;  %v1802_v0 = vmul.f32 0.01, %v1308_v60  ;;  %vm1738_vm1 = vcmp.ge.f32.partialorder %v1564_v61, 0.0  ;;  %v1866_v1 = vmul.f32 0.01, %v1564_v61 }
 0x1d0   : > { %v1310_v2 = vpop.f32.mrf.mxu0  ;;  %v1566_v3 = vpop.f32.mrf.mxu1 }
 0x1d1   : > { %v1930_v4 = vsel %vm1674_vm0, %v1308_v60, %v1802_v0  ;;  %v1994_v5 = vsel %vm1738_vm1, %v1564_v61, %v1866_v1  ;;  %v1311_v6 = vadd.f32 %v3002_v35, %v1310_v2  ;;  %v1567_v7 = vadd.f32 %v3002_v35, %v1566_v3 }
 0x1d2   : > { %2058 = vst [vmem:[%s2843_s5 + $0x180] sm:$0xff] %v1930_v4  ;;  %2122 = vst [vmem:[%s2843_s5 + $0x380] sm:$0xff] %v1994_v5  ;;  %v1312_v8 = vpop.f32.mrf.mxu0  ;;  %v1568_v9 = vpop.f32.mrf.mxu1 }
 0x1d3   : > { %vm1675_vm2 = vcmp.ge.f32.partialorder %v1311_v6, 0.0  ;;  %v1803_v10 = vmul.f32 0.01, %v1311_v6  ;;  %vm1739_vm3 = vcmp.ge.f32.partialorder %v1567_v7, 0.0  ;;  %v1867_v11 = vmul.f32 0.01, %v1567_v7 }
 0x1d4   : > { %v1315_v12 = vpop.f32.mrf.mxu0  ;;  %v1571_v13 = vpop.f32.mrf.mxu1 }
 0x1d5   : > { %v1931_v14 = vsel %vm1675_vm2, %v1311_v6, %v1803_v10  ;;  %v1995_v15 = vsel %vm1739_vm3, %v1567_v7, %v1867_v11  ;;  %v1316_v16 = vadd.f32 %v3002_v35, %v1315_v12  ;;  %v1572_v17 = vadd.f32 %v3002_v35, %v1571_v13 }
 0x1d6   : > { %2059 = vst [vmem:[%s2843_s5 + $0x188] sm:$0xff] %v1931_v14  ;;  %2123 = vst [vmem:[%s2843_s5 + $0x388] sm:$0xff] %v1995_v15  ;;  %v1317_v18 = vpop.f32.mrf.mxu0  ;;  %v1573_v19 = vpop.f32.mrf.mxu1 }
 0x1d7   : > { %vm1676_vm4 = vcmp.ge.f32.partialorder %v1316_v16, 0.0  ;;  %v1804_v20 = vmul.f32 0.01, %v1316_v16  ;;  %vm1740_vm5 = vcmp.ge.f32.partialorder %v1572_v17, 0.0  ;;  %v1868_v21 = vmul.f32 0.01, %v1572_v17 }
 0x1d8   : > { %v1318_v22 = vpop.f32.mrf.mxu0  ;;  %v1574_v23 = vpop.f32.mrf.mxu1 }
 0x1d9   : > { %v1932_v24 = vsel %vm1676_vm4, %v1316_v16, %v1804_v20  ;;  %v1996_v25 = vsel %vm1740_vm5, %v1572_v17, %v1868_v21  ;;  %v1319_v26 = vadd.f32 %v3002_v35, %v1318_v22  ;;  %v1575_v27 = vadd.f32 %v3002_v35, %v1574_v23 }
 0x1da   : > { %2060 = vst [vmem:[%s2843_s5 + $0x190] sm:$0xff] %v1932_v24  ;;  %2124 = vst [vmem:[%s2843_s5 + $0x390] sm:$0xff] %v1996_v25  ;;  %v1320_v28 = vpop.f32.mrf.mxu0  ;;  %v1576_v29 = vpop.f32.mrf.mxu1 }
 0x1db   : > { %vm1677_vm6 = vcmp.ge.f32.partialorder %v1319_v26, 0.0  ;;  %v1805_v30 = vmul.f32 0.01, %v1319_v26  ;;  %vm1741_vm7 = vcmp.ge.f32.partialorder %v1575_v27, 0.0  ;;  %v1869_v31 = vmul.f32 0.01, %v1575_v27 }
 0x1dc   : > { %v1323_v32 = vpop.f32.mrf.mxu0  ;;  %v1579_v33 = vpop.f32.mrf.mxu1 }
 0x1dd   : > { %v1933_v34 = vsel %vm1677_vm6, %v1319_v26, %v1805_v30  ;;  %v1997_v55 = vsel %vm1741_vm7, %v1575_v27, %v1869_v31  ;;  %v1324_v36 = vadd.f32 %v3002_v35, %v1323_v32  ;;  %v1580_v37 = vadd.f32 %v3002_v35, %v1579_v33 }
 0x1de   : > { %2061 = vst [vmem:[%s2843_s5 + $0x198] sm:$0xff] %v1933_v34  ;;  %2125 = vst [vmem:[%s2843_s5 + $0x398] sm:$0xff] %v1997_v55  ;;  %v1325_v38 = vpop.f32.mrf.mxu0  ;;  %v1581_v39 = vpop.f32.mrf.mxu1 }
 0x1df   : > { %vm1678_vm8 = vcmp.ge.f32.partialorder %v1324_v36, 0.0  ;;  %v1806_v40 = vmul.f32 0.01, %v1324_v36  ;;  %vm1742_vm9 = vcmp.ge.f32.partialorder %v1580_v37, 0.0  ;;  %v1870_v41 = vmul.f32 0.01, %v1580_v37 }
 0x1e0   : > { %v1326_v42 = vpop.f32.mrf.mxu0  ;;  %v1582_v43 = vpop.f32.mrf.mxu1 }
 0x1e1   : > { %v1934_v44 = vsel %vm1678_vm8, %v1324_v36, %v1806_v40  ;;  %v1998_v45 = vsel %vm1742_vm9, %v1580_v37, %v1870_v41  ;;  %v1327_v46 = vadd.f32 %v3002_v35, %v1326_v42  ;;  %v1583_v47 = vadd.f32 %v3002_v35, %v1582_v43 }
 0x1e2   : > { %2062 = vst [vmem:[%s2843_s5 + $0x1a0] sm:$0xff] %v1934_v44  ;;  %2126 = vst [vmem:[%s2843_s5 + $0x3a0] sm:$0xff] %v1998_v45  ;;  %v1328_v48 = vpop.f32.mrf.mxu0  ;;  %v1584_v49 = vpop.f32.mrf.mxu1 }
 0x1e3   : > { %vm1679_vm10 = vcmp.ge.f32.partialorder %v1327_v46, 0.0  ;;  %v1807_v50 = vmul.f32 0.01, %v1327_v46  ;;  %vm1743_vm11 = vcmp.ge.f32.partialorder %v1583_v47, 0.0  ;;  %v1871_v51 = vmul.f32 0.01, %v1583_v47 }
 0x1e4   : > { %v1331_v52 = vpop.f32.mrf.mxu0  ;;  %v1587_v53 = vpop.f32.mrf.mxu1 }
 0x1e5   : > { %v1935_v54 = vsel %vm1679_vm10, %v1327_v46, %v1807_v50  ;;  %v1999_v56 = vsel %vm1743_vm11, %v1583_v47, %v1871_v51  ;;  %v1332_v57 = vadd.f32 %v3002_v35, %v1331_v52  ;;  %v1588_v58 = vadd.f32 %v3002_v35, %v1587_v53 }
 0x1e6   : > { %2063 = vst [vmem:[%s2843_s5 + $0x1a8] sm:$0xff] %v1935_v54  ;;  %2127 = vst [vmem:[%s2843_s5 + $0x3a8] sm:$0xff] %v1999_v56  ;;  %v1333_v59 = vpop.f32.mrf.mxu0  ;;  %v1589_v60 = vpop.f32.mrf.mxu1 }
 0x1e7   : > { %vm1680_vm12 = vcmp.ge.f32.partialorder %v1332_v57, 0.0  ;;  %v1808_v61 = vmul.f32 0.01, %v1332_v57  ;;  %vm1744_vm13 = vcmp.ge.f32.partialorder %v1588_v58, 0.0  ;;  %v1872_v62 = vmul.f32 0.01, %v1588_v58 }
 0x1e8   : > { %v1334_v63 = vpop.f32.mrf.mxu0  ;;  %v1590_v0 = vpop.f32.mrf.mxu1 }
 0x1e9   : > { %v1936_v1 = vsel %vm1680_vm12, %v1332_v57, %v1808_v61  ;;  %v2000_v2 = vsel %vm1744_vm13, %v1588_v58, %v1872_v62  ;;  %v1335_v3 = vadd.f32 %v3002_v35, %v1334_v63  ;;  %v1591_v4 = vadd.f32 %v3002_v35, %v1590_v0 }
 0x1ea   : > { %2064 = vst [vmem:[%s2843_s5 + $0x1b0] sm:$0xff] %v1936_v1  ;;  %2128 = vst [vmem:[%s2843_s5 + $0x3b0] sm:$0xff] %v2000_v2  ;;  %v1336_v5 = vpop.f32.mrf.mxu0  ;;  %v1592_v6 = vpop.f32.mrf.mxu1 }
 0x1eb   : > { %vm1681_vm14 = vcmp.ge.f32.partialorder %v1335_v3, 0.0  ;;  %v1809_v7 = vmul.f32 0.01, %v1335_v3  ;;  %vm1745_vm15 = vcmp.ge.f32.partialorder %v1591_v4, 0.0  ;;  %v1873_v8 = vmul.f32 0.01, %v1591_v4 }
 0x1ec   : > { %v1339_v9 = vpop.f32.mrf.mxu0  ;;  %v1595_v10 = vpop.f32.mrf.mxu1 }
 0x1ed   : > { %v1937_v11 = vsel %vm1681_vm14, %v1335_v3, %v1809_v7  ;;  %v2001_v12 = vsel %vm1745_vm15, %v1591_v4, %v1873_v8  ;;  %v1340_v13 = vadd.f32 %v3002_v35, %v1339_v9  ;;  %v1596_v14 = vadd.f32 %v3002_v35, %v1595_v10 }
 0x1ee   : > { %2065 = vst [vmem:[%s2843_s5 + $0x1b8] sm:$0xff] %v1937_v11  ;;  %2129 = vst [vmem:[%s2843_s5 + $0x3b8] sm:$0xff] %v2001_v12  ;;  %v1341_v15 = vpop.f32.mrf.mxu0  ;;  %v1597_v16 = vpop.f32.mrf.mxu1 }
 0x1ef   : > { %vm1682_vm0 = vcmp.ge.f32.partialorder %v1340_v13, 0.0  ;;  %v1810_v17 = vmul.f32 0.01, %v1340_v13  ;;  %vm1746_vm1 = vcmp.ge.f32.partialorder %v1596_v14, 0.0  ;;  %v1874_v18 = vmul.f32 0.01, %v1596_v14 }
 0x1f0   : > { %v1342_v19 = vpop.f32.mrf.mxu0  ;;  %v1598_v20 = vpop.f32.mrf.mxu1 }
 0x1f1   : > { %v1938_v21 = vsel %vm1682_vm0, %v1340_v13, %v1810_v17  ;;  %v2002_v22 = vsel %vm1746_vm1, %v1596_v14, %v1874_v18  ;;  %v1343_v23 = vadd.f32 %v3002_v35, %v1342_v19  ;;  %v1599_v24 = vadd.f32 %v3002_v35, %v1598_v20 }
 0x1f2   : > { %2066 = vst [vmem:[%s2843_s5 + $0x1c0] sm:$0xff] %v1938_v21  ;;  %2130 = vst [vmem:[%s2843_s5 + $0x3c0] sm:$0xff] %v2002_v22  ;;  %v1344_v25 = vpop.f32.mrf.mxu0  ;;  %v1600_v26 = vpop.f32.mrf.mxu1 }
 0x1f3   : > { %vm1683_vm2 = vcmp.ge.f32.partialorder %v1343_v23, 0.0  ;;  %v1811_v27 = vmul.f32 0.01, %v1343_v23  ;;  %vm1747_vm3 = vcmp.ge.f32.partialorder %v1599_v24, 0.0  ;;  %v1875_v28 = vmul.f32 0.01, %v1599_v24 }
 0x1f4   : > { %v1347_v29 = vpop.f32.mrf.mxu0  ;;  %v1603_v30 = vpop.f32.mrf.mxu1 }
 0x1f5   : > { %v1939_v31 = vsel %vm1683_vm2, %v1343_v23, %v1811_v27  ;;  %v2003_v32 = vsel %vm1747_vm3, %v1599_v24, %v1875_v28  ;;  %v1348_v33 = vadd.f32 %v3002_v35, %v1347_v29  ;;  %v1604_v34 = vadd.f32 %v3002_v35, %v1603_v30 }
 0x1f6   : > { %2067 = vst [vmem:[%s2843_s5 + $0x1c8] sm:$0xff] %v1939_v31  ;;  %2131 = vst [vmem:[%s2843_s5 + $0x3c8] sm:$0xff] %v2003_v32  ;;  %v1349_v55 = vpop.f32.mrf.mxu0  ;;  %v1605_v36 = vpop.f32.mrf.mxu1 }
 0x1f7   : > { %vm1684_vm4 = vcmp.ge.f32.partialorder %v1348_v33, 0.0  ;;  %v1812_v37 = vmul.f32 0.01, %v1348_v33  ;;  %vm1748_vm5 = vcmp.ge.f32.partialorder %v1604_v34, 0.0  ;;  %v1876_v38 = vmul.f32 0.01, %v1604_v34 }
 0x1f8   : > { %v1350_v39 = vpop.f32.mrf.mxu0  ;;  %v1606_v40 = vpop.f32.mrf.mxu1 }
 0x1f9   : > { %v1940_v41 = vsel %vm1684_vm4, %v1348_v33, %v1812_v37  ;;  %v2004_v42 = vsel %vm1748_vm5, %v1604_v34, %v1876_v38  ;;  %v1351_v43 = vadd.f32 %v3002_v35, %v1350_v39  ;;  %v1607_v44 = vadd.f32 %v3002_v35, %v1606_v40 }
 0x1fa   : > { %2068 = vst [vmem:[%s2843_s5 + $0x1d0] sm:$0xff] %v1940_v41  ;;  %2132 = vst [vmem:[%s2843_s5 + $0x3d0] sm:$0xff] %v2004_v42  ;;  %v1352_v45 = vpop.f32.mrf.mxu0  ;;  %v1608_v46 = vpop.f32.mrf.mxu1 }
 0x1fb   : > { %vm1685_vm6 = vcmp.ge.f32.partialorder %v1351_v43, 0.0  ;;  %v1813_v47 = vmul.f32 0.01, %v1351_v43  ;;  %vm1749_vm7 = vcmp.ge.f32.partialorder %v1607_v44, 0.0  ;;  %v1877_v48 = vmul.f32 0.01, %v1607_v44 }
 0x1fc   : > { %v1355_v49 = vpop.f32.mrf.mxu0  ;;  %v1611_v50 = vpop.f32.mrf.mxu1 }
 0x1fd   : > { %v1941_v51 = vsel %vm1685_vm6, %v1351_v43, %v1813_v47  ;;  %v2005_v52 = vsel %vm1749_vm7, %v1607_v44, %v1877_v48  ;;  %v1356_v53 = vadd.f32 %v3002_v35, %v1355_v49  ;;  %v1612_v54 = vadd.f32 %v3002_v35, %v1611_v50 }
 0x1fe   : > { %2069 = vst [vmem:[%s2843_s5 + $0x1d8] sm:$0xff] %v1941_v51  ;;  %2133 = vst [vmem:[%s2843_s5 + $0x3d8] sm:$0xff] %v2005_v52  ;;  %v1357_v56 = vpop.f32.mrf.mxu0  ;;  %v1613_v57 = vpop.f32.mrf.mxu1 }
 0x1ff   : > { %vm1686_vm8 = vcmp.ge.f32.partialorder %v1356_v53, 0.0  ;;  %v1814_v58 = vmul.f32 0.01, %v1356_v53  ;;  %vm1750_vm9 = vcmp.ge.f32.partialorder %v1612_v54, 0.0  ;;  %v1878_v59 = vmul.f32 0.01, %v1612_v54 }
 0x200   : > { %v1358_v60 = vpop.f32.mrf.mxu0  ;;  %v1614_v61 = vpop.f32.mrf.mxu1 }
 0x201   : > { %v1942_v62 = vsel %vm1686_vm8, %v1356_v53, %v1814_v58  ;;  %v2006_v63 = vsel %vm1750_vm9, %v1612_v54, %v1878_v59  ;;  %v1359_v0 = vadd.f32 %v3002_v35, %v1358_v60  ;;  %v1615_v1 = vadd.f32 %v3002_v35, %v1614_v61 }
 0x202   : > { %2070 = vst [vmem:[%s2843_s5 + $0x1e0] sm:$0xff] %v1942_v62  ;;  %2134 = vst [vmem:[%s2843_s5 + $0x3e0] sm:$0xff] %v2006_v63  ;;  %v1360_v2 = vpop.f32.mrf.mxu0  ;;  %v1616_v3 = vpop.f32.mrf.mxu1 }
 0x203   : > { %vm1687_vm10 = vcmp.ge.f32.partialorder %v1359_v0, 0.0  ;;  %v1815_v4 = vmul.f32 0.01, %v1359_v0  ;;  %vm1751_vm11 = vcmp.ge.f32.partialorder %v1615_v1, 0.0  ;;  %v1879_v5 = vmul.f32 0.01, %v1615_v1 }
 0x204   : > { %v1363_v6 = vpop.f32.mrf.mxu0  ;;  %v1619_v7 = vpop.f32.mrf.mxu1 }
 0x205   : > { %v1943_v8 = vsel %vm1687_vm10, %v1359_v0, %v1815_v4  ;;  %v2007_v9 = vsel %vm1751_vm11, %v1615_v1, %v1879_v5  ;;  %v1364_v10 = vadd.f32 %v3002_v35, %v1363_v6  ;;  %v1620_v11 = vadd.f32 %v3002_v35, %v1619_v7 }
 0x206   : > { %2071 = vst [vmem:[%s2843_s5 + $0x1e8] sm:$0xff] %v1943_v8  ;;  %2135 = vst [vmem:[%s2843_s5 + $0x3e8] sm:$0xff] %v2007_v9  ;;  %v1365_v12 = vpop.f32.mrf.mxu0  ;;  %v1621_v13 = vpop.f32.mrf.mxu1 }
 0x207   : > { %vm1688_vm12 = vcmp.ge.f32.partialorder %v1364_v10, 0.0  ;;  %v1816_v14 = vmul.f32 0.01, %v1364_v10  ;;  %vm1752_vm13 = vcmp.ge.f32.partialorder %v1620_v11, 0.0  ;;  %v1880_v15 = vmul.f32 0.01, %v1620_v11 }
 0x208   : > { %v1366_v16 = vpop.f32.mrf.mxu0  ;;  %v1622_v17 = vpop.f32.mrf.mxu1 }
 0x209   : > { %v1944_v18 = vsel %vm1688_vm12, %v1364_v10, %v1816_v14  ;;  %v2008_v19 = vsel %vm1752_vm13, %v1620_v11, %v1880_v15  ;;  %v1367_v20 = vadd.f32 %v3002_v35, %v1366_v16  ;;  %v1623_v21 = vadd.f32 %v3002_v35, %v1622_v17 }
 0x20a   : > { %2072 = vst [vmem:[%s2843_s5 + $0x1f0] sm:$0xff] %v1944_v18  ;;  %2136 = vst [vmem:[%s2843_s5 + $0x3f0] sm:$0xff] %v2008_v19  ;;  %v1368_v22 = vpop.f32.mrf.mxu0  ;;  %v1624_v23 = vpop.f32.mrf.mxu1 }
 0x20b   : > { %vm1689_vm14 = vcmp.ge.f32.partialorder %v1367_v20, 0.0  ;;  %v1817_v24 = vmul.f32 0.01, %v1367_v20  ;;  %vm1753_vm15 = vcmp.ge.f32.partialorder %v1623_v21, 0.0  ;;  %v1881_v25 = vmul.f32 0.01, %v1623_v21 }
 0x20d   : > { %v1945_v26 = vsel %vm1689_vm14, %v1367_v20, %v1817_v24  ;;  %v2009_v27 = vsel %vm1753_vm15, %v1623_v21, %v1881_v25 }
 0x20e   : > { %2073 = vst [vmem:[%s2843_s5 + $0x1f8] sm:$0xff] %v1945_v26  ;;  %2137 = vst [vmem:[%s2843_s5 + $0x3f8] sm:$0xff] %v2009_v27 }
 0x20f PF: > { %s13_s12 = sadd.s32 1, %s2608_s12  }
 0x210   : > { %p10_p4 = scmp.ge.s32.totalorder %s13_s12, 4  }
 0x212   :  { %12 = sbr.rel (!%p10_p4) target bundleno = 1 (0x1), region = 62 }

// kernel: vae_forward.21
= control target key start
LH: loop header
LB: loop body
LE: loop exit
PB: predicated region body
PF: predicated region fallthrough
CT: control target
= control target key end

     0   :  { %s2296_s12 = smov 0   ;;  %s2675_s0 = inlined_call_operand.vmem [shape: bf16[8192,128], index: 0, kind: input, shape index: {}]   ;;  %s2676_s1 = inlined_call_operand.vmem [shape: bf16[128,128], index: 1, kind: input, shape index: {}]   ;;  %s2677_s2 = inlined_call_operand.vmem [shape: f32[1,128], index: 2, kind: input, shape index: {}]   ;;  %s2678_s3 = inlined_call_operand.vmem [shape: f32[8192,128], index: 3, kind: output, shape index: {}]  }
   0x1 LB: > { %s1871_s13 = sadd.s32 4294967295, %s2274_s12   ;;  %p1875_p0 = scmp.ge.s32.totalorder %s2274_s12, 1  ;;  %s2274_s12 = sphi %s2296_s12, %s13_s12  }
   0x2   : > { %p138_p1 = scmp.lt.s32.totalorder %s2274_s12, 9 }
   0x4   : > { %p139_p2 = pnand %p1875_p0, %p138_p1 }
   0x5   : > { %s1876_s16 = sshll.u32 (!%p139_p2), %s1871_s13, 7 }
   0x6   : > { %142 = sbr.rel (%p139_p2) target bundleno = 370 (0x172), region = 32  ;;  %p163_p3 = scmp.lt.s32.totalorder (!%p139_p2), %s1876_s16, 1023 }
   0xb   : > { %v2195_v0 = vld [vmem:[%s2676_s1 + $0x38] sm:$0xff]   ;;  %v2196_v1 = vld [vmem:[%s2676_s1 + $0x30] sm:$0xff]   ;;  %s2680_s16 = smov (!%p163_p3, %s1876_s16), 1023  ;;  %v2197_v2 = vld [vmem:[%s2676_s1 + $0x28] sm:$0xff]  }
   0xc   : > { %2027 = vmatprep.subr.bf16.mxu0 %v2195_v0  ;;  %2171 = vmatprep.subr.bf16.mxu1 %v2195_v0  ;;  %s1877_s21 = sshll.u32 %s2680_s16, 2  ;;  %v2198_v3 = vld [vmem:[%s2676_s1 + $0x20] sm:$0xff]   ;;  %v2199_v6 = vld [vmem:[%s2676_s1 + $0x18] sm:$0xff]   ;;  %v2200_v7 = vld [vmem:[%s2676_s1 + $0x10] sm:$0xff]   ;;  %s1879_s10 = sshll.u32 %s2680_s16, 3 }
   0xd   : > { %2028 = vmatpush3.bf16.msra.mxu0 %v2195_v0  ;;  %2179 = vmatpush3.bf16.msra.mxu1 %v2195_v0  ;;  %s2319_s24 = scalar_lea.vmem %s2675_s0, %s1877_s21  ;;  %v2201_v8 = vld [vmem:[%s2676_s1 + $0x8] sm:$0xff]   ;;  %v2202_v9 = vld [vmem:[%s2676_s1] sm:$0xff]   ;;  %s2411_s14 = scalar_lea.vmem %s2678_s3, %s1879_s10 }
   0xe   : > { %2029 = vmatprep.subr.bf16.mxu0 %v2196_v1  ;;  %2172 = vmatprep.subr.bf16.mxu1 %v2196_v1  ;;  %v2203_v4 = vld [vmem:[%s2319_s24] sm:$0xff]   ;;  %v2205_v10 = vld [vmem:[%s2319_s24 + $0x8] sm:$0xff]   ;;  %v2207_v12 = vld [vmem:[%s2319_s24 + $0x10] sm:$0xff]  }
   0xf   : > { %v2204_v5 = vld [vmem:[%s2319_s24 + $0x100] sm:$0xff]   ;;  %2043 = vmatprep.mubr.bf16.mxu0 %v2203_v4  ;;  %v2206_v11 = vld [vmem:[%s2319_s24 + $0x108] sm:$0xff]   ;;  %v2208_v13 = vld [vmem:[%s2319_s24 + $0x110] sm:$0xff]  }
  0x10   : > { %2107 = vmatprep.mubr.bf16.mxu1 %v2204_v5  ;;  %v2209_v14 = vld [vmem:[%s2319_s24 + $0x18] sm:$0xff]   ;;  %v2211_v16 = vld [vmem:[%s2319_s24 + $0x20] sm:$0xff]   ;;  %v2213_v18 = vld [vmem:[%s2319_s24 + $0x28] sm:$0xff]  }
  0x11   : > { %2030 = vmatpush3.bf16.msra.mxu0 %v2196_v1  ;;  %2180 = vmatpush3.bf16.msra.mxu1 %v2196_v1  ;;  %v2210_v15 = vld [vmem:[%s2319_s24 + $0x118] sm:$0xff]   ;;  %v2212_v17 = vld [vmem:[%s2319_s24 + $0x120] sm:$0xff]   ;;  %v2214_v19 = vld [vmem:[%s2319_s24 + $0x128] sm:$0xff]  }
  0x12   : > { %2031 = vmatprep.subr.bf16.mxu0 %v2197_v2  ;;  %2173 = vmatprep.subr.bf16.mxu1 %v2197_v2  ;;  %v2215_v20 = vld [vmem:[%s2319_s24 + $0x30] sm:$0xff]   ;;  %v2217_v22 = vld [vmem:[%s2319_s24 + $0x38] sm:$0xff]   ;;  %v2219_v24 = vld [vmem:[%s2319_s24 + $0x40] sm:$0xff]  }
  0x13   : > { %v2216_v21 = vld [vmem:[%s2319_s24 + $0x130] sm:$0xff]   ;;  %v2218_v23 = vld [vmem:[%s2319_s24 + $0x138] sm:$0xff]   ;;  %v2220_v25 = vld [vmem:[%s2319_s24 + $0x140] sm:$0xff]  }
  0x14   : > { %v2221_v26 = vld [vmem:[%s2319_s24 + $0x48] sm:$0xff]   ;;  %v2223_v28 = vld [vmem:[%s2319_s24 + $0x50] sm:$0xff]   ;;  %v2225_v30 = vld [vmem:[%s2319_s24 + $0x58] sm:$0xff]  }
  0x15   : > { %2032 = vmatpush3.bf16.msra.mxu0 %v2197_v2  ;;  %2181 = vmatpush3.bf16.msra.mxu1 %v2197_v2  ;;  %v2222_v27 = vld [vmem:[%s2319_s24 + $0x148] sm:$0xff]   ;;  %v2224_v29 = vld [vmem:[%s2319_s24 + $0x150] sm:$0xff]   ;;  %v2226_v31 = vld [vmem:[%s2319_s24 + $0x158] sm:$0xff]  }
  0x16   : > { %2033 = vmatprep.subr.bf16.mxu0 %v2198_v3  ;;  %2174 = vmatprep.subr.bf16.mxu1 %v2198_v3  ;;  %v2227_v32 = vld [vmem:[%s2319_s24 + $0x60] sm:$0xff]   ;;  %v2229_v34 = vld [vmem:[%s2319_s24 + $0x68] sm:$0xff]   ;;  %v2231_v36 = vld [vmem:[%s2319_s24 + $0x70] sm:$0xff]  }
  0x17   : > { %v2228_v33 = vld [vmem:[%s2319_s24 + $0x160] sm:$0xff]   ;;  %v2230_v35 = vld [vmem:[%s2319_s24 + $0x168] sm:$0xff]   ;;  %v2232_v37 = vld [vmem:[%s2319_s24 + $0x170] sm:$0xff]  }
  0x18   : > { %v2233_v38 = vld [vmem:[%s2319_s24 + $0x78] sm:$0xff]   ;;  %v2235_v40 = vld [vmem:[%s2319_s24 + $0x80] sm:$0xff]   ;;  %v2237_v42 = vld [vmem:[%s2319_s24 + $0x88] sm:$0xff]  }
  0x19   : > { %2034 = vmatpush3.bf16.msra.mxu0 %v2198_v3  ;;  %2182 = vmatpush3.bf16.msra.mxu1 %v2198_v3  ;;  %v2234_v39 = vld [vmem:[%s2319_s24 + $0x178] sm:$0xff]   ;;  %v2236_v41 = vld [vmem:[%s2319_s24 + $0x180] sm:$0xff]   ;;  %v2238_v43 = vld [vmem:[%s2319_s24 + $0x188] sm:$0xff]  }
  0x1a   : > { %2035 = vmatprep.subr.bf16.mxu0 %v2199_v6  ;;  %2175 = vmatprep.subr.bf16.mxu1 %v2199_v6  ;;  %v2239_v44 = vld [vmem:[%s2319_s24 + $0x90] sm:$0xff]   ;;  %v2241_v46 = vld [vmem:[%s2319_s24 + $0x98] sm:$0xff]   ;;  %v2243_v48 = vld [vmem:[%s2319_s24 + $0xa0] sm:$0xff]  }
  0x1b   : > { %v2240_v45 = vld [vmem:[%s2319_s24 + $0x190] sm:$0xff]   ;;  %v2242_v47 = vld [vmem:[%s2319_s24 + $0x198] sm:$0xff]   ;;  %v2244_v49 = vld [vmem:[%s2319_s24 + $0x1a0] sm:$0xff]  }
  0x1c   : > { %v2245_v50 = vld [vmem:[%s2319_s24 + $0xa8] sm:$0xff]   ;;  %v2247_v52 = vld [vmem:[%s2319_s24 + $0xb0] sm:$0xff]   ;;  %v2249_v54 = vld [vmem:[%s2319_s24 + $0xb8] sm:$0xff]  }
  0x1d   : > { %2036 = vmatpush3.bf16.msra.mxu0 %v2199_v6  ;;  %2183 = vmatpush3.bf16.msra.mxu1 %v2199_v6  ;;  %v2246_v51 = vld [vmem:[%s2319_s24 + $0x1a8] sm:$0xff]   ;;  %v2248_v53 = vld [vmem:[%s2319_s24 + $0x1b0] sm:$0xff]   ;;  %v2250_v55 = vld [vmem:[%s2319_s24 + $0x1b8] sm:$0xff]  }
  0x1e   : > { %2037 = vmatprep.subr.bf16.mxu0 %v2200_v7  ;;  %2176 = vmatprep.subr.bf16.mxu1 %v2200_v7  ;;  %v2251_v56 = vld [vmem:[%s2319_s24 + $0xc0] sm:$0xff]   ;;  %v2253_v58 = vld [vmem:[%s2319_s24 + $0xc8] sm:$0xff]   ;;  %v2255_v60 = vld [vmem:[%s2319_s24 + $0xd0] sm:$0xff]  }
  0x1f   : > { %v2252_v57 = vld [vmem:[%s2319_s24 + $0x1c0] sm:$0xff]   ;;  %v2254_v59 = vld [vmem:[%s2319_s24 + $0x1c8] sm:$0xff]   ;;  %v2256_v61 = vld [vmem:[%s2319_s24 + $0x1d0] sm:$0xff]  }
  0x20   : > { %v2257_v62 = vld [vmem:[%s2319_s24 + $0xd8] sm:$0xff]   ;;  %v2259_v0 = vld [vmem:[%s2319_s24 + $0xe0] sm:$0xff]   ;;  %v2261_v2 = vld [vmem:[%s2319_s24 + $0xe8] sm:$0xff]  }
  0x21   : > { %2038 = vmatpush3.bf16.msra.mxu0 %v2200_v7  ;;  %2184 = vmatpush3.bf16.msra.mxu1 %v2200_v7  ;;  %v2258_v63 = vld [vmem:[%s2319_s24 + $0x1d8] sm:$0xff]   ;;  %v2260_v1 = vld [vmem:[%s2319_s24 + $0x1e0] sm:$0xff]   ;;  %v2262_v3 = vld [vmem:[%s2319_s24 + $0x1e8] sm:$0xff]  }
  0x22   : > { %2039 = vmatprep.subr.bf16.mxu0 %v2201_v8  ;;  %2177 = vmatprep.subr.bf16.mxu1 %v2201_v8  ;;  %v2263_v4 = vld [vmem:[%s2319_s24 + $0xf0] sm:$0xff]   ;;  %v2265_v6 = vld [vmem:[%s2319_s24 + $0xf8] sm:$0xff]  }
  0x23   : > { %v2264_v5 = vld [vmem:[%s2319_s24 + $0x1f0] sm:$0xff]   ;;  %v2266_v7 = vld [vmem:[%s2319_s24 + $0x1f8] sm:$0xff]  }
  0x25   : > { %2040 = vmatpush3.bf16.msra.mxu0 %v2201_v8  ;;  %2185 = vmatpush3.bf16.msra.mxu1 %v2201_v8  ;;  %v2403_v8 = vld [vmem:[%s2677_s2] ss:$0 sm:$0xff] }
  0x26   : > { %2041 = vmatprep.subr.bf16.mxu0 %v2202_v9  ;;  %2178 = vmatprep.subr.bf16.mxu1 %v2202_v9 }
  0x29   : > { %2042 = vmatpush3.bf16.msra.mxu0 %v2202_v9  ;;  %2186 = vmatpush3.bf16.msra.mxu1 %v2202_v9 }
  0x2c   : > { %2044 = vmatmul.mubr.bf16.vlgmr.msra.gmra.mxu0 %v2205_v10  ;;  %2108 = vmatmul.mubr.bf16.vlgmr.msra.gmra.mxu1 %v2206_v11 }
  0x2d   : > { %2047 = vmatprep.mubr.bf16.mxu0 %v2207_v12  ;;  %2111 = vmatprep.mubr.bf16.mxu1 %v2208_v13 }
  0x34   : > { %2048 = vmatmul.mubr.bf16.gmra.mxu0 %v2209_v14  ;;  %2112 = vmatmul.mubr.bf16.gmra.mxu1 %v2210_v15 }
  0x35   : > { %2051 = vmatprep.mubr.bf16.mxu0 %v2211_v16  ;;  %2115 = vmatprep.mubr.bf16.mxu1 %v2212_v17 }
  0x3c   : > { %2052 = vmatmul.mubr.bf16.gmra.mxu0 %v2213_v18  ;;  %2116 = vmatmul.mubr.bf16.gmra.mxu1 %v2214_v19 }
  0x3d   : > { %2055 = vmatprep.mubr.bf16.mxu0 %v2215_v20  ;;  %2119 = vmatprep.mubr.bf16.mxu1 %v2216_v21 }
  0x44   : > { %2056 = vmatmul.mubr.bf16.gmra.mxu0 %v2217_v22  ;;  %2120 = vmatmul.mubr.bf16.gmra.mxu1 %v2218_v23 }
  0x45   : > { %2059 = vmatprep.mubr.bf16.mxu0 %v2219_v24  ;;  %2123 = vmatprep.mubr.bf16.mxu1 %v2220_v25 }
  0x4c   : > { %2060 = vmatmul.mubr.bf16.gmra.mxu0 %v2221_v26  ;;  %2124 = vmatmul.mubr.bf16.gmra.mxu1 %v2222_v27 }
  0x4d   : > { %2063 = vmatprep.mubr.bf16.mxu0 %v2223_v28  ;;  %2127 = vmatprep.mubr.bf16.mxu1 %v2224_v29 }
  0x54   : > { %2064 = vmatmul.mubr.bf16.gmra.mxu0 %v2225_v30  ;;  %2128 = vmatmul.mubr.bf16.gmra.mxu1 %v2226_v31 }
  0x55   : > { %2067 = vmatprep.mubr.bf16.mxu0 %v2227_v32  ;;  %2131 = vmatprep.mubr.bf16.mxu1 %v2228_v33 }
  0x5c   : > { %2068 = vmatmul.mubr.bf16.gmra.mxu0 %v2229_v34  ;;  %2132 = vmatmul.mubr.bf16.gmra.mxu1 %v2230_v35 }
  0x5d   : > { %2071 = vmatprep.mubr.bf16.mxu0 %v2231_v36  ;;  %2135 = vmatprep.mubr.bf16.mxu1 %v2232_v37 }
  0x64   : > { %2072 = vmatmul.mubr.bf16.gmra.mxu0 %v2233_v38  ;;  %2136 = vmatmul.mubr.bf16.gmra.mxu1 %v2234_v39 }
  0x65   : > { %2075 = vmatprep.mubr.bf16.mxu0 %v2235_v40  ;;  %2139 = vmatprep.mubr.bf16.mxu1 %v2236_v41 }
  0x6c   : > { %2076 = vmatmul.mubr.bf16.gmra.mxu0 %v2237_v42  ;;  %2140 = vmatmul.mubr.bf16.gmra.mxu1 %v2238_v43 }
  0x6d   : > { %2079 = vmatprep.mubr.bf16.mxu0 %v2239_v44  ;;  %2143 = vmatprep.mubr.bf16.mxu1 %v2240_v45 }
  0x74   : > { %2080 = vmatmul.mubr.bf16.gmra.mxu0 %v2241_v46  ;;  %2144 = vmatmul.mubr.bf16.gmra.mxu1 %v2242_v47 }
  0x75   : > { %2083 = vmatprep.mubr.bf16.mxu0 %v2243_v48  ;;  %2147 = vmatprep.mubr.bf16.mxu1 %v2244_v49 }
  0x7c   : > { %2084 = vmatmul.mubr.bf16.gmra.mxu0 %v2245_v50  ;;  %2148 = vmatmul.mubr.bf16.gmra.mxu1 %v2246_v51 }
  0x7d   : > { %2087 = vmatprep.mubr.bf16.mxu0 %v2247_v52  ;;  %2151 = vmatprep.mubr.bf16.mxu1 %v2248_v53 }
  0x84   : > { %2088 = vmatmul.mubr.bf16.gmra.mxu0 %v2249_v54  ;;  %2152 = vmatmul.mubr.bf16.gmra.mxu1 %v2250_v55 }
  0x85   : > { %2091 = vmatprep.mubr.bf16.mxu0 %v2251_v56  ;;  %2155 = vmatprep.mubr.bf16.mxu1 %v2252_v57 }
  0x8c   : > { %2092 = vmatmul.mubr.bf16.gmra.mxu0 %v2253_v58  ;;  %2156 = vmatmul.mubr.bf16.gmra.mxu1 %v2254_v59 }
  0x8d   : > { %2095 = vmatprep.mubr.bf16.mxu0 %v2255_v60  ;;  %2159 = vmatprep.mubr.bf16.mxu1 %v2256_v61 }
  0x94   : > { %2096 = vmatmul.mubr.bf16.gmra.mxu0 %v2257_v62  ;;  %2160 = vmatmul.mubr.bf16.gmra.mxu1 %v2258_v63 }
  0x95   : > { %2099 = vmatprep.mubr.bf16.mxu0 %v2259_v0  ;;  %2163 = vmatprep.mubr.bf16.mxu1 %v2260_v1 }
  0x9c   : > { %2100 = vmatmul.mubr.bf16.gmra.mxu0 %v2261_v2  ;;  %2164 = vmatmul.mubr.bf16.gmra.mxu1 %v2262_v3 }
  0x9d   : > { %2103 = vmatprep.mubr.bf16.mxu0 %v2263_v4  ;;  %2167 = vmatprep.mubr.bf16.mxu1 %v2264_v5 }
  0xa4   : > { %2104 = vmatmul.mubr.bf16.gmra.mxu0 %v2265_v6  ;;  %2168 = vmatmul.mubr.bf16.gmra.mxu1 %v2266_v7 }
  0xec   : > { %v2045_v9 = vpop.f32.mrf.mxu0  ;;  %v2109_v10 = vpop.f32.mrf.mxu1 }
  0xed   : > { %v801_v11 = vadd.f32 %v2045_v9, %v2403_v8  ;;  %v1057_v12 = vadd.f32 %v2109_v10, %v2403_v8 }
  0xee   : > { %v792_v13 = vpop.f32.mrf.mxu0  ;;  %v1048_v14 = vpop.f32.mrf.mxu1 }
  0xef   : > { %vm1305_vm0 = vcmp.ge.f32.partialorder %v801_v11, 0.0  ;;  %v1433_v15 = vmul.f32 0.01, %v801_v11  ;;  %vm1369_vm1 = vcmp.ge.f32.partialorder %v1057_v12, 0.0  ;;  %v1497_v16 = vmul.f32 0.01, %v1057_v12 }
  0xf0   : > { %v793_v17 = vadd.f32 %v2403_v8, %v792_v13  ;;  %v1049_v18 = vadd.f32 %v2403_v8, %v1048_v14  ;;  %v2046_v19 = vpop.f32.mrf.mxu0  ;;  %v2110_v20 = vpop.f32.mrf.mxu1 }
  0xf1   : > { %v1561_v21 = vsel %vm1305_vm0, %v801_v11, %v1433_v15  ;;  %v1625_v22 = vsel %vm1369_vm1, %v1057_v12, %v1497_v16  ;;  %v804_v23 = vadd.f32 %v2046_v19, %v2403_v8  ;;  %v1060_v24 = vadd.f32 %v2110_v20, %v2403_v8 }
  0xf2   : > { %1689 = vst [vmem:[%s2411_s14 + $0x10] sm:$0xff] %v1561_v21  ;;  %1753 = vst [vmem:[%s2411_s14 + $0x210] sm:$0xff] %v1625_v22  ;;  %vm1303_vm2 = vcmp.ge.f32.partialorder %v793_v17, 0.0  ;;  %v1431_v25 = vmul.f32 0.01, %v793_v17  ;;  %vm1367_vm3 = vcmp.ge.f32.partialorder %v1049_v18, 0.0  ;;  %v795_v27 = vpop.f32.mrf.mxu0  ;;  %v1051_v28 = vpop.f32.mrf.mxu1 }
  0xf3   : > { %v1495_v26 = vmul.f32 0.01, %v1049_v18  ;;  %vm1306_vm4 = vcmp.ge.f32.partialorder %v804_v23, 0.0  ;;  %v1434_v29 = vmul.f32 0.01, %v804_v23  ;;  %vm1370_vm5 = vcmp.ge.f32.partialorder %v1060_v24, 0.0 }
  0xf4   : > { %v1498_v30 = vmul.f32 0.01, %v1060_v24  ;;  %v1559_v31 = vsel %vm1303_vm2, %v793_v17, %v1431_v25  ;;  %v796_v33 = vadd.f32 %v2403_v8, %v795_v27  ;;  %v1052_v34 = vadd.f32 %v2403_v8, %v1051_v28  ;;  %v2049_v35 = vpop.f32.mrf.mxu0  ;;  %v2113_v36 = vpop.f32.mrf.mxu1 }
  0xf5   : > { %v1623_v32 = vsel %vm1367_vm3, %v1049_v18, %v1495_v26  ;;  %1687 = vst [vmem:[%s2411_s14] sm:$0xff] %v1559_v31  ;;  %v1562_v37 = vsel %vm1306_vm4, %v804_v23, %v1434_v29  ;;  %v817_v39 = vadd.f32 %v2049_v35, %v2403_v8  ;;  %v1073_v40 = vadd.f32 %v2113_v36, %v2403_v8 }
  0xf6   : > { %1751 = vst [vmem:[%s2411_s14 + $0x200] sm:$0xff] %v1623_v32  ;;  %v1626_v38 = vsel %vm1370_vm5, %v1060_v24, %v1498_v30  ;;  %1690 = vst [vmem:[%s2411_s14 + $0x18] sm:$0xff] %v1562_v37  ;;  %vm1304_vm6 = vcmp.ge.f32.partialorder %v796_v33, 0.0  ;;  %v1432_v41 = vmul.f32 0.01, %v796_v33  ;;  %vm1368_vm7 = vcmp.ge.f32.partialorder %v1052_v34, 0.0  ;;  %v808_v43 = vpop.f32.mrf.mxu0  ;;  %v1064_v44 = vpop.f32.mrf.mxu1 }
  0xf7   : > { %1754 = vst [vmem:[%s2411_s14 + $0x218] sm:$0xff] %v1626_v38  ;;  %v1496_v42 = vmul.f32 0.01, %v1052_v34  ;;  %vm1309_vm8 = vcmp.ge.f32.partialorder %v817_v39, 0.0  ;;  %v1437_v45 = vmul.f32 0.01, %v817_v39  ;;  %v809_v49 = vadd.f32 %v2403_v8, %v808_v43 }
  0xf8   : > { %vm1373_vm9 = vcmp.ge.f32.partialorder %v1073_v40, 0.0  ;;  %v1501_v46 = vmul.f32 0.01, %v1073_v40  ;;  %v1560_v47 = vsel %vm1304_vm6, %v796_v33, %v1432_v41  ;;  %v1065_v50 = vadd.f32 %v2403_v8, %v1064_v44  ;;  %v2050_v51 = vpop.f32.mrf.mxu0  ;;  %v2114_v52 = vpop.f32.mrf.mxu1 }
  0xf9   : > { %v1624_v48 = vsel %vm1368_vm7, %v1052_v34, %v1496_v42  ;;  %1688 = vst [vmem:[%s2411_s14 + $0x8] sm:$0xff] %v1560_v47  ;;  %v1565_v53 = vsel %vm1309_vm8, %v817_v39, %v1437_v45  ;;  %v820_v55 = vadd.f32 %v2050_v51, %v2403_v8  ;;  %v1076_v56 = vadd.f32 %v2114_v52, %v2403_v8 }
  0xfa   : > { %1752 = vst [vmem:[%s2411_s14 + $0x208] sm:$0xff] %v1624_v48  ;;  %v1629_v54 = vsel %vm1373_vm9, %v1073_v40, %v1501_v46  ;;  %1693 = vst [vmem:[%s2411_s14 + $0x30] sm:$0xff] %v1565_v53  ;;  %vm1307_vm10 = vcmp.ge.f32.partialorder %v809_v49, 0.0  ;;  %v1435_v57 = vmul.f32 0.01, %v809_v49  ;;  %vm1371_vm11 = vcmp.ge.f32.partialorder %v1065_v50, 0.0  ;;  %v811_v59 = vpop.f32.mrf.mxu0  ;;  %v1067_v60 = vpop.f32.mrf.mxu1 }
  0xfb   : > { %1757 = vst [vmem:[%s2411_s14 + $0x230] sm:$0xff] %v1629_v54  ;;  %v1499_v58 = vmul.f32 0.01, %v1065_v50  ;;  %vm1310_vm12 = vcmp.ge.f32.partialorder %v820_v55, 0.0  ;;  %v1438_v61 = vmul.f32 0.01, %v820_v55  ;;  %v812_v1 = vadd.f32 %v2403_v8, %v811_v59 }
  0xfc   : > { %vm1374_vm13 = vcmp.ge.f32.partialorder %v1076_v56, 0.0  ;;  %v1502_v62 = vmul.f32 0.01, %v1076_v56  ;;  %v1563_v63 = vsel %vm1307_vm10, %v809_v49, %v1435_v57  ;;  %v1068_v2 = vadd.f32 %v2403_v8, %v1067_v60  ;;  %v2053_v3 = vpop.f32.mrf.mxu0  ;;  %v2117_v4 = vpop.f32.mrf.mxu1 }
  0xfd   : > { %v1627_v0 = vsel %vm1371_vm11, %v1065_v50, %v1499_v58  ;;  %1691 = vst [vmem:[%s2411_s14 + $0x20] sm:$0xff] %v1563_v63  ;;  %v1566_v5 = vsel %vm1310_vm12, %v820_v55, %v1438_v61  ;;  %v833_v7 = vadd.f32 %v2053_v3, %v2403_v8  ;;  %v1089_v9 = vadd.f32 %v2117_v4, %v2403_v8 }
  0xfe   : > { %1755 = vst [vmem:[%s2411_s14 + $0x220] sm:$0xff] %v1627_v0  ;;  %v1630_v6 = vsel %vm1374_vm13, %v1076_v56, %v1502_v62  ;;  %1694 = vst [vmem:[%s2411_s14 + $0x38] sm:$0xff] %v1566_v5  ;;  %vm1308_vm14 = vcmp.ge.f32.partialorder %v812_v1, 0.0  ;;  %v1436_v10 = vmul.f32 0.01, %v812_v1  ;;  %vm1372_vm15 = vcmp.ge.f32.partialorder %v1068_v2, 0.0  ;;  %v824_v12 = vpop.f32.mrf.mxu0  ;;  %v1080_v13 = vpop.f32.mrf.mxu1 }
  0xff   : > { %1758 = vst [vmem:[%s2411_s14 + $0x238] sm:$0xff] %v1630_v6  ;;  %v1500_v11 = vmul.f32 0.01, %v1068_v2  ;;  %vm1313_vm0 = vcmp.ge.f32.partialorder %v833_v7, 0.0  ;;  %v1441_v14 = vmul.f32 0.01, %v833_v7  ;;  %v825_v18 = vadd.f32 %v2403_v8, %v824_v12 }
 0x100   : > { %vm1377_vm1 = vcmp.ge.f32.partialorder %v1089_v9, 0.0  ;;  %v1505_v15 = vmul.f32 0.01, %v1089_v9  ;;  %v1564_v16 = vsel %vm1308_vm14, %v812_v1, %v1436_v10  ;;  %v1081_v19 = vadd.f32 %v2403_v8, %v1080_v13  ;;  %v2054_v20 = vpop.f32.mrf.mxu0  ;;  %v2118_v21 = vpop.f32.mrf.mxu1 }
 0x101   : > { %v1628_v17 = vsel %vm1372_vm15, %v1068_v2, %v1500_v11  ;;  %1692 = vst [vmem:[%s2411_s14 + $0x28] sm:$0xff] %v1564_v16  ;;  %v1569_v22 = vsel %vm1313_vm0, %v833_v7, %v1441_v14  ;;  %v836_v24 = vadd.f32 %v2054_v20, %v2403_v8  ;;  %v1092_v25 = vadd.f32 %v2118_v21, %v2403_v8 }
 0x102   : > { %1756 = vst [vmem:[%s2411_s14 + $0x228] sm:$0xff] %v1628_v17  ;;  %v1633_v23 = vsel %vm1377_vm1, %v1089_v9, %v1505_v15  ;;  %1697 = vst [vmem:[%s2411_s14 + $0x50] sm:$0xff] %v1569_v22  ;;  %vm1311_vm2 = vcmp.ge.f32.partialorder %v825_v18, 0.0  ;;  %v1439_v26 = vmul.f32 0.01, %v825_v18  ;;  %vm1375_vm3 = vcmp.ge.f32.partialorder %v1081_v19, 0.0  ;;  %v827_v28 = vpop.f32.mrf.mxu0  ;;  %v1083_v29 = vpop.f32.mrf.mxu1 }
 0x103   : > { %1761 = vst [vmem:[%s2411_s14 + $0x250] sm:$0xff] %v1633_v23  ;;  %v1503_v27 = vmul.f32 0.01, %v1081_v19  ;;  %vm1314_vm4 = vcmp.ge.f32.partialorder %v836_v24, 0.0  ;;  %v1442_v30 = vmul.f32 0.01, %v836_v24  ;;  %v828_v34 = vadd.f32 %v2403_v8, %v827_v28 }
 0x104   : > { %vm1378_vm5 = vcmp.ge.f32.partialorder %v1092_v25, 0.0  ;;  %v1506_v31 = vmul.f32 0.01, %v1092_v25  ;;  %v1567_v32 = vsel %vm1311_vm2, %v825_v18, %v1439_v26  ;;  %v1084_v35 = vadd.f32 %v2403_v8, %v1083_v29  ;;  %v2057_v36 = vpop.f32.mrf.mxu0  ;;  %v2121_v37 = vpop.f32.mrf.mxu1 }
 0x105   : > { %v1631_v33 = vsel %vm1375_vm3, %v1081_v19, %v1503_v27  ;;  %1695 = vst [vmem:[%s2411_s14 + $0x40] sm:$0xff] %v1567_v32  ;;  %v1570_v38 = vsel %vm1314_vm4, %v836_v24, %v1442_v30  ;;  %v849_v40 = vadd.f32 %v2057_v36, %v2403_v8  ;;  %v1105_v41 = vadd.f32 %v2121_v37, %v2403_v8 }
 0x106   : > { %1759 = vst [vmem:[%s2411_s14 + $0x240] sm:$0xff] %v1631_v33  ;;  %v1634_v39 = vsel %vm1378_vm5, %v1092_v25, %v1506_v31  ;;  %1698 = vst [vmem:[%s2411_s14 + $0x58] sm:$0xff] %v1570_v38  ;;  %vm1312_vm6 = vcmp.ge.f32.partialorder %v828_v34, 0.0  ;;  %v1440_v42 = vmul.f32 0.01, %v828_v34  ;;  %vm1376_vm7 = vcmp.ge.f32.partialorder %v1084_v35, 0.0  ;;  %v840_v44 = vpop.f32.mrf.mxu0  ;;  %v1096_v45 = vpop.f32.mrf.mxu1 }
 0x107   : > { %1762 = vst [vmem:[%s2411_s14 + $0x258] sm:$0xff] %v1634_v39  ;;  %v1504_v43 = vmul.f32 0.01, %v1084_v35  ;;  %vm1317_vm8 = vcmp.ge.f32.partialorder %v849_v40, 0.0  ;;  %v1445_v46 = vmul.f32 0.01, %v849_v40  ;;  %v841_v50 = vadd.f32 %v2403_v8, %v840_v44 }
 0x108   : > { %vm1381_vm9 = vcmp.ge.f32.partialorder %v1105_v41, 0.0  ;;  %v1509_v47 = vmul.f32 0.01, %v1105_v41  ;;  %v1568_v48 = vsel %vm1312_vm6, %v828_v34, %v1440_v42  ;;  %v1097_v51 = vadd.f32 %v2403_v8, %v1096_v45  ;;  %v2058_v52 = vpop.f32.mrf.mxu0  ;;  %v2122_v53 = vpop.f32.mrf.mxu1 }
 0x109   : > { %v1632_v49 = vsel %vm1376_vm7, %v1084_v35, %v1504_v43  ;;  %1696 = vst [vmem:[%s2411_s14 + $0x48] sm:$0xff] %v1568_v48  ;;  %v1573_v54 = vsel %vm1317_vm8, %v849_v40, %v1445_v46  ;;  %v852_v56 = vadd.f32 %v2058_v52, %v2403_v8  ;;  %v1108_v57 = vadd.f32 %v2122_v53, %v2403_v8 }
 0x10a   : > { %1760 = vst [vmem:[%s2411_s14 + $0x248] sm:$0xff] %v1632_v49  ;;  %v1637_v55 = vsel %vm1381_vm9, %v1105_v41, %v1509_v47  ;;  %1701 = vst [vmem:[%s2411_s14 + $0x70] sm:$0xff] %v1573_v54  ;;  %vm1315_vm10 = vcmp.ge.f32.partialorder %v841_v50, 0.0  ;;  %v1443_v58 = vmul.f32 0.01, %v841_v50  ;;  %vm1379_vm11 = vcmp.ge.f32.partialorder %v1097_v51, 0.0  ;;  %v843_v60 = vpop.f32.mrf.mxu0  ;;  %v1099_v61 = vpop.f32.mrf.mxu1 }
 0x10b   : > { %1765 = vst [vmem:[%s2411_s14 + $0x270] sm:$0xff] %v1637_v55  ;;  %v1507_v59 = vmul.f32 0.01, %v1097_v51  ;;  %vm1318_vm12 = vcmp.ge.f32.partialorder %v852_v56, 0.0  ;;  %v1446_v62 = vmul.f32 0.01, %v852_v56  ;;  %v844_v2 = vadd.f32 %v2403_v8, %v843_v60 }
 0x10c   : > { %vm1382_vm13 = vcmp.ge.f32.partialorder %v1108_v57, 0.0  ;;  %v1510_v63 = vmul.f32 0.01, %v1108_v57  ;;  %v1571_v0 = vsel %vm1315_vm10, %v841_v50, %v1443_v58  ;;  %v1100_v3 = vadd.f32 %v2403_v8, %v1099_v61  ;;  %v2061_v4 = vpop.f32.mrf.mxu0  ;;  %v2125_v5 = vpop.f32.mrf.mxu1 }
 0x10d   : > { %v1635_v1 = vsel %vm1379_vm11, %v1097_v51, %v1507_v59  ;;  %1699 = vst [vmem:[%s2411_s14 + $0x60] sm:$0xff] %v1571_v0  ;;  %v1574_v6 = vsel %vm1318_vm12, %v852_v56, %v1446_v62  ;;  %v865_v9 = vadd.f32 %v2061_v4, %v2403_v8  ;;  %v1121_v10 = vadd.f32 %v2125_v5, %v2403_v8 }
 0x10e   : > { %1763 = vst [vmem:[%s2411_s14 + $0x260] sm:$0xff] %v1635_v1  ;;  %v1638_v7 = vsel %vm1382_vm13, %v1108_v57, %v1510_v63  ;;  %1702 = vst [vmem:[%s2411_s14 + $0x78] sm:$0xff] %v1574_v6  ;;  %vm1316_vm14 = vcmp.ge.f32.partialorder %v844_v2, 0.0  ;;  %v1444_v11 = vmul.f32 0.01, %v844_v2  ;;  %vm1380_vm15 = vcmp.ge.f32.partialorder %v1100_v3, 0.0  ;;  %v856_v13 = vpop.f32.mrf.mxu0  ;;  %v1112_v14 = vpop.f32.mrf.mxu1 }
 0x10f   : > { %1766 = vst [vmem:[%s2411_s14 + $0x278] sm:$0xff] %v1638_v7  ;;  %v1508_v12 = vmul.f32 0.01, %v1100_v3  ;;  %vm1321_vm0 = vcmp.ge.f32.partialorder %v865_v9, 0.0  ;;  %v1449_v15 = vmul.f32 0.01, %v865_v9  ;;  %v857_v19 = vadd.f32 %v2403_v8, %v856_v13 }
 0x110   : > { %vm1385_vm1 = vcmp.ge.f32.partialorder %v1121_v10, 0.0  ;;  %v1513_v16 = vmul.f32 0.01, %v1121_v10  ;;  %v1572_v17 = vsel %vm1316_vm14, %v844_v2, %v1444_v11  ;;  %v1113_v20 = vadd.f32 %v2403_v8, %v1112_v14  ;;  %v2062_v21 = vpop.f32.mrf.mxu0  ;;  %v2126_v22 = vpop.f32.mrf.mxu1 }
 0x111   : > { %v1636_v18 = vsel %vm1380_vm15, %v1100_v3, %v1508_v12  ;;  %1700 = vst [vmem:[%s2411_s14 + $0x68] sm:$0xff] %v1572_v17  ;;  %v1577_v23 = vsel %vm1321_vm0, %v865_v9, %v1449_v15  ;;  %v868_v25 = vadd.f32 %v2062_v21, %v2403_v8  ;;  %v1124_v26 = vadd.f32 %v2126_v22, %v2403_v8 }
 0x112   : > { %1764 = vst [vmem:[%s2411_s14 + $0x268] sm:$0xff] %v1636_v18  ;;  %v1641_v24 = vsel %vm1385_vm1, %v1121_v10, %v1513_v16  ;;  %1705 = vst [vmem:[%s2411_s14 + $0x90] sm:$0xff] %v1577_v23  ;;  %vm1319_vm2 = vcmp.ge.f32.partialorder %v857_v19, 0.0  ;;  %v1447_v27 = vmul.f32 0.01, %v857_v19  ;;  %vm1383_vm3 = vcmp.ge.f32.partialorder %v1113_v20, 0.0  ;;  %v859_v29 = vpop.f32.mrf.mxu0  ;;  %v1115_v30 = vpop.f32.mrf.mxu1 }
 0x113   : > { %1769 = vst [vmem:[%s2411_s14 + $0x290] sm:$0xff] %v1641_v24  ;;  %v1511_v28 = vmul.f32 0.01, %v1113_v20  ;;  %vm1322_vm4 = vcmp.ge.f32.partialorder %v868_v25, 0.0  ;;  %v1450_v31 = vmul.f32 0.01, %v868_v25  ;;  %v860_v35 = vadd.f32 %v2403_v8, %v859_v29 }
 0x114   : > { %vm1386_vm5 = vcmp.ge.f32.partialorder %v1124_v26, 0.0  ;;  %v1514_v32 = vmul.f32 0.01, %v1124_v26  ;;  %v1575_v33 = vsel %vm1319_vm2, %v857_v19, %v1447_v27  ;;  %v1116_v36 = vadd.f32 %v2403_v8, %v1115_v30  ;;  %v2065_v37 = vpop.f32.mrf.mxu0  ;;  %v2129_v38 = vpop.f32.mrf.mxu1 }
 0x115   : > { %v1639_v34 = vsel %vm1383_vm3, %v1113_v20, %v1511_v28  ;;  %1703 = vst [vmem:[%s2411_s14 + $0x80] sm:$0xff] %v1575_v33  ;;  %v1578_v39 = vsel %vm1322_vm4, %v868_v25, %v1450_v31  ;;  %v881_v41 = vadd.f32 %v2065_v37, %v2403_v8  ;;  %v1137_v42 = vadd.f32 %v2129_v38, %v2403_v8 }
 0x116   : > { %1767 = vst [vmem:[%s2411_s14 + $0x280] sm:$0xff] %v1639_v34  ;;  %v1642_v40 = vsel %vm1386_vm5, %v1124_v26, %v1514_v32  ;;  %1706 = vst [vmem:[%s2411_s14 + $0x98] sm:$0xff] %v1578_v39  ;;  %vm1320_vm6 = vcmp.ge.f32.partialorder %v860_v35, 0.0  ;;  %v1448_v43 = vmul.f32 0.01, %v860_v35  ;;  %vm1384_vm7 = vcmp.ge.f32.partialorder %v1116_v36, 0.0  ;;  %v872_v45 = vpop.f32.mrf.mxu0  ;;  %v1128_v46 = vpop.f32.mrf.mxu1 }
 0x117   : > { %1770 = vst [vmem:[%s2411_s14 + $0x298] sm:$0xff] %v1642_v40  ;;  %v1512_v44 = vmul.f32 0.01, %v1116_v36  ;;  %vm1325_vm8 = vcmp.ge.f32.partialorder %v881_v41, 0.0  ;;  %v1453_v47 = vmul.f32 0.01, %v881_v41  ;;  %v873_v51 = vadd.f32 %v2403_v8, %v872_v45 }
 0x118   : > { %vm1389_vm9 = vcmp.ge.f32.partialorder %v1137_v42, 0.0  ;;  %v1517_v48 = vmul.f32 0.01, %v1137_v42  ;;  %v1576_v49 = vsel %vm1320_vm6, %v860_v35, %v1448_v43  ;;  %v1129_v52 = vadd.f32 %v2403_v8, %v1128_v46  ;;  %v2066_v53 = vpop.f32.mrf.mxu0  ;;  %v2130_v54 = vpop.f32.mrf.mxu1 }
 0x119   : > { %v1640_v50 = vsel %vm1384_vm7, %v1116_v36, %v1512_v44  ;;  %1704 = vst [vmem:[%s2411_s14 + $0x88] sm:$0xff] %v1576_v49  ;;  %v1581_v55 = vsel %vm1325_vm8, %v881_v41, %v1453_v47  ;;  %v884_v57 = vadd.f32 %v2066_v53, %v2403_v8  ;;  %v1140_v58 = vadd.f32 %v2130_v54, %v2403_v8 }
 0x11a   : > { %1768 = vst [vmem:[%s2411_s14 + $0x288] sm:$0xff] %v1640_v50  ;;  %v1645_v56 = vsel %vm1389_vm9, %v1137_v42, %v1517_v48  ;;  %1709 = vst [vmem:[%s2411_s14 + $0xb0] sm:$0xff] %v1581_v55  ;;  %vm1323_vm10 = vcmp.ge.f32.partialorder %v873_v51, 0.0  ;;  %v1451_v59 = vmul.f32 0.01, %v873_v51  ;;  %vm1387_vm11 = vcmp.ge.f32.partialorder %v1129_v52, 0.0  ;;  %v875_v61 = vpop.f32.mrf.mxu0  ;;  %v1131_v62 = vpop.f32.mrf.mxu1 }
 0x11b   : > { %1773 = vst [vmem:[%s2411_s14 + $0x2b0] sm:$0xff] %v1645_v56  ;;  %v1515_v60 = vmul.f32 0.01, %v1129_v52  ;;  %vm1326_vm12 = vcmp.ge.f32.partialorder %v884_v57, 0.0  ;;  %v1454_v63 = vmul.f32 0.01, %v884_v57  ;;  %v876_v3 = vadd.f32 %v2403_v8, %v875_v61 }
 0x11c   : > { %vm1390_vm13 = vcmp.ge.f32.partialorder %v1140_v58, 0.0  ;;  %v1518_v0 = vmul.f32 0.01, %v1140_v58  ;;  %v1579_v1 = vsel %vm1323_vm10, %v873_v51, %v1451_v59  ;;  %v1132_v4 = vadd.f32 %v2403_v8, %v1131_v62  ;;  %v2069_v5 = vpop.f32.mrf.mxu0  ;;  %v2133_v6 = vpop.f32.mrf.mxu1 }
 0x11d   : > { %v1643_v2 = vsel %vm1387_vm11, %v1129_v52, %v1515_v60  ;;  %1707 = vst [vmem:[%s2411_s14 + $0xa0] sm:$0xff] %v1579_v1  ;;  %v1582_v7 = vsel %vm1326_vm12, %v884_v57, %v1454_v63  ;;  %v897_v10 = vadd.f32 %v2069_v5, %v2403_v8  ;;  %v1153_v11 = vadd.f32 %v2133_v6, %v2403_v8 }
 0x11e   : > { %1771 = vst [vmem:[%s2411_s14 + $0x2a0] sm:$0xff] %v1643_v2  ;;  %v1646_v9 = vsel %vm1390_vm13, %v1140_v58, %v1518_v0  ;;  %1710 = vst [vmem:[%s2411_s14 + $0xb8] sm:$0xff] %v1582_v7  ;;  %vm1324_vm14 = vcmp.ge.f32.partialorder %v876_v3, 0.0  ;;  %v1452_v12 = vmul.f32 0.01, %v876_v3  ;;  %vm1388_vm15 = vcmp.ge.f32.partialorder %v1132_v4, 0.0  ;;  %v888_v14 = vpop.f32.mrf.mxu0  ;;  %v1144_v15 = vpop.f32.mrf.mxu1 }
 0x11f   : > { %1774 = vst [vmem:[%s2411_s14 + $0x2b8] sm:$0xff] %v1646_v9  ;;  %v1516_v13 = vmul.f32 0.01, %v1132_v4  ;;  %vm1329_vm0 = vcmp.ge.f32.partialorder %v897_v10, 0.0  ;;  %v1457_v16 = vmul.f32 0.01, %v897_v10  ;;  %v889_v20 = vadd.f32 %v2403_v8, %v888_v14 }
 0x120   : > { %vm1393_vm1 = vcmp.ge.f32.partialorder %v1153_v11, 0.0  ;;  %v1521_v17 = vmul.f32 0.01, %v1153_v11  ;;  %v1580_v18 = vsel %vm1324_vm14, %v876_v3, %v1452_v12  ;;  %v1145_v21 = vadd.f32 %v2403_v8, %v1144_v15  ;;  %v2070_v22 = vpop.f32.mrf.mxu0  ;;  %v2134_v23 = vpop.f32.mrf.mxu1 }
 0x121   : > { %v1644_v19 = vsel %vm1388_vm15, %v1132_v4, %v1516_v13  ;;  %1708 = vst [vmem:[%s2411_s14 + $0xa8] sm:$0xff] %v1580_v18  ;;  %v1585_v24 = vsel %vm1329_vm0, %v897_v10, %v1457_v16  ;;  %v900_v26 = vadd.f32 %v2070_v22, %v2403_v8  ;;  %v1156_v27 = vadd.f32 %v2134_v23, %v2403_v8 }
 0x122   : > { %1772 = vst [vmem:[%s2411_s14 + $0x2a8] sm:$0xff] %v1644_v19  ;;  %v1649_v25 = vsel %vm1393_vm1, %v1153_v11, %v1521_v17  ;;  %1713 = vst [vmem:[%s2411_s14 + $0xd0] sm:$0xff] %v1585_v24  ;;  %vm1327_vm2 = vcmp.ge.f32.partialorder %v889_v20, 0.0  ;;  %v1455_v28 = vmul.f32 0.01, %v889_v20  ;;  %vm1391_vm3 = vcmp.ge.f32.partialorder %v1145_v21, 0.0  ;;  %v891_v30 = vpop.f32.mrf.mxu0  ;;  %v1147_v31 = vpop.f32.mrf.mxu1 }
 0x123   : > { %1777 = vst [vmem:[%s2411_s14 + $0x2d0] sm:$0xff] %v1649_v25  ;;  %v1519_v29 = vmul.f32 0.01, %v1145_v21  ;;  %vm1330_vm4 = vcmp.ge.f32.partialorder %v900_v26, 0.0  ;;  %v1458_v32 = vmul.f32 0.01, %v900_v26  ;;  %v892_v36 = vadd.f32 %v2403_v8, %v891_v30 }
 0x124   : > { %vm1394_vm5 = vcmp.ge.f32.partialorder %v1156_v27, 0.0  ;;  %v1522_v33 = vmul.f32 0.01, %v1156_v27  ;;  %v1583_v34 = vsel %vm1327_vm2, %v889_v20, %v1455_v28  ;;  %v1148_v37 = vadd.f32 %v2403_v8, %v1147_v31  ;;  %v2073_v38 = vpop.f32.mrf.mxu0  ;;  %v2137_v39 = vpop.f32.mrf.mxu1 }
 0x125   : > { %v1647_v35 = vsel %vm1391_vm3, %v1145_v21, %v1519_v29  ;;  %1711 = vst [vmem:[%s2411_s14 + $0xc0] sm:$0xff] %v1583_v34  ;;  %v1586_v40 = vsel %vm1330_vm4, %v900_v26, %v1458_v32  ;;  %v913_v42 = vadd.f32 %v2073_v38, %v2403_v8  ;;  %v1169_v43 = vadd.f32 %v2137_v39, %v2403_v8 }
 0x126   : > { %1775 = vst [vmem:[%s2411_s14 + $0x2c0] sm:$0xff] %v1647_v35  ;;  %v1650_v41 = vsel %vm1394_vm5, %v1156_v27, %v1522_v33  ;;  %1714 = vst [vmem:[%s2411_s14 + $0xd8] sm:$0xff] %v1586_v40  ;;  %vm1328_vm6 = vcmp.ge.f32.partialorder %v892_v36, 0.0  ;;  %v1456_v44 = vmul.f32 0.01, %v892_v36  ;;  %vm1392_vm7 = vcmp.ge.f32.partialorder %v1148_v37, 0.0  ;;  %v904_v46 = vpop.f32.mrf.mxu0  ;;  %v1160_v47 = vpop.f32.mrf.mxu1 }
 0x127   : > { %1778 = vst [vmem:[%s2411_s14 + $0x2d8] sm:$0xff] %v1650_v41  ;;  %v1520_v45 = vmul.f32 0.01, %v1148_v37  ;;  %vm1333_vm8 = vcmp.ge.f32.partialorder %v913_v42, 0.0  ;;  %v1461_v48 = vmul.f32 0.01, %v913_v42  ;;  %v905_v52 = vadd.f32 %v2403_v8, %v904_v46 }
 0x128   : > { %vm1397_vm9 = vcmp.ge.f32.partialorder %v1169_v43, 0.0  ;;  %v1525_v49 = vmul.f32 0.01, %v1169_v43  ;;  %v1584_v50 = vsel %vm1328_vm6, %v892_v36, %v1456_v44  ;;  %v1161_v53 = vadd.f32 %v2403_v8, %v1160_v47  ;;  %v2074_v54 = vpop.f32.mrf.mxu0  ;;  %v2138_v55 = vpop.f32.mrf.mxu1 }
 0x129   : > { %v1648_v51 = vsel %vm1392_vm7, %v1148_v37, %v1520_v45  ;;  %1712 = vst [vmem:[%s2411_s14 + $0xc8] sm:$0xff] %v1584_v50  ;;  %v1589_v56 = vsel %vm1333_vm8, %v913_v42, %v1461_v48  ;;  %v916_v58 = vadd.f32 %v2074_v54, %v2403_v8  ;;  %v1172_v59 = vadd.f32 %v2138_v55, %v2403_v8 }
 0x12a   : > { %1776 = vst [vmem:[%s2411_s14 + $0x2c8] sm:$0xff] %v1648_v51  ;;  %v1653_v57 = vsel %vm1397_vm9, %v1169_v43, %v1525_v49  ;;  %1717 = vst [vmem:[%s2411_s14 + $0xf0] sm:$0xff] %v1589_v56  ;;  %vm1331_vm10 = vcmp.ge.f32.partialorder %v905_v52, 0.0  ;;  %v1459_v60 = vmul.f32 0.01, %v905_v52  ;;  %vm1395_vm11 = vcmp.ge.f32.partialorder %v1161_v53, 0.0  ;;  %v907_v62 = vpop.f32.mrf.mxu0  ;;  %v1163_v63 = vpop.f32.mrf.mxu1 }
 0x12b   : > { %1781 = vst [vmem:[%s2411_s14 + $0x2f0] sm:$0xff] %v1653_v57  ;;  %v1523_v61 = vmul.f32 0.01, %v1161_v53  ;;  %vm1334_vm12 = vcmp.ge.f32.partialorder %v916_v58, 0.0  ;;  %v1462_v0 = vmul.f32 0.01, %v916_v58  ;;  %v908_v4 = vadd.f32 %v2403_v8, %v907_v62 }
 0x12c   : > { %vm1398_vm13 = vcmp.ge.f32.partialorder %v1172_v59, 0.0  ;;  %v1526_v1 = vmul.f32 0.01, %v1172_v59  ;;  %v1587_v2 = vsel %vm1331_vm10, %v905_v52, %v1459_v60  ;;  %v1164_v5 = vadd.f32 %v2403_v8, %v1163_v63  ;;  %v2077_v6 = vpop.f32.mrf.mxu0  ;;  %v2141_v7 = vpop.f32.mrf.mxu1 }
 0x12d   : > { %v1651_v3 = vsel %vm1395_vm11, %v1161_v53, %v1523_v61  ;;  %1715 = vst [vmem:[%s2411_s14 + $0xe0] sm:$0xff] %v1587_v2  ;;  %v1590_v9 = vsel %vm1334_vm12, %v916_v58, %v1462_v0  ;;  %v929_v11 = vadd.f32 %v2077_v6, %v2403_v8  ;;  %v1185_v12 = vadd.f32 %v2141_v7, %v2403_v8 }
 0x12e   : > { %1779 = vst [vmem:[%s2411_s14 + $0x2e0] sm:$0xff] %v1651_v3  ;;  %v1654_v10 = vsel %vm1398_vm13, %v1172_v59, %v1526_v1  ;;  %1718 = vst [vmem:[%s2411_s14 + $0xf8] sm:$0xff] %v1590_v9  ;;  %vm1332_vm14 = vcmp.ge.f32.partialorder %v908_v4, 0.0  ;;  %v1460_v13 = vmul.f32 0.01, %v908_v4  ;;  %vm1396_vm15 = vcmp.ge.f32.partialorder %v1164_v5, 0.0  ;;  %v920_v15 = vpop.f32.mrf.mxu0  ;;  %v1176_v16 = vpop.f32.mrf.mxu1 }
 0x12f   : > { %1782 = vst [vmem:[%s2411_s14 + $0x2f8] sm:$0xff] %v1654_v10  ;;  %v1524_v14 = vmul.f32 0.01, %v1164_v5  ;;  %vm1337_vm0 = vcmp.ge.f32.partialorder %v929_v11, 0.0  ;;  %v1465_v17 = vmul.f32 0.01, %v929_v11  ;;  %v921_v21 = vadd.f32 %v2403_v8, %v920_v15 }
 0x130   : > { %vm1401_vm1 = vcmp.ge.f32.partialorder %v1185_v12, 0.0  ;;  %v1529_v18 = vmul.f32 0.01, %v1185_v12  ;;  %v1588_v19 = vsel %vm1332_vm14, %v908_v4, %v1460_v13  ;;  %v1177_v22 = vadd.f32 %v2403_v8, %v1176_v16  ;;  %v2078_v23 = vpop.f32.mrf.mxu0  ;;  %v2142_v24 = vpop.f32.mrf.mxu1 }
 0x131   : > { %v1652_v20 = vsel %vm1396_vm15, %v1164_v5, %v1524_v14  ;;  %1716 = vst [vmem:[%s2411_s14 + $0xe8] sm:$0xff] %v1588_v19  ;;  %v1593_v25 = vsel %vm1337_vm0, %v929_v11, %v1465_v17  ;;  %v932_v27 = vadd.f32 %v2078_v23, %v2403_v8  ;;  %v1188_v28 = vadd.f32 %v2142_v24, %v2403_v8 }
 0x132   : > { %1780 = vst [vmem:[%s2411_s14 + $0x2e8] sm:$0xff] %v1652_v20  ;;  %v1657_v26 = vsel %vm1401_vm1, %v1185_v12, %v1529_v18  ;;  %1721 = vst [vmem:[%s2411_s14 + $0x110] sm:$0xff] %v1593_v25  ;;  %vm1335_vm2 = vcmp.ge.f32.partialorder %v921_v21, 0.0  ;;  %v1463_v29 = vmul.f32 0.01, %v921_v21  ;;  %vm1399_vm3 = vcmp.ge.f32.partialorder %v1177_v22, 0.0  ;;  %v923_v31 = vpop.f32.mrf.mxu0  ;;  %v1179_v32 = vpop.f32.mrf.mxu1 }
 0x133   : > { %1785 = vst [vmem:[%s2411_s14 + $0x310] sm:$0xff] %v1657_v26  ;;  %v1527_v30 = vmul.f32 0.01, %v1177_v22  ;;  %vm1338_vm4 = vcmp.ge.f32.partialorder %v932_v27, 0.0  ;;  %v1466_v33 = vmul.f32 0.01, %v932_v27  ;;  %v924_v37 = vadd.f32 %v2403_v8, %v923_v31 }
 0x134   : > { %vm1402_vm5 = vcmp.ge.f32.partialorder %v1188_v28, 0.0  ;;  %v1530_v34 = vmul.f32 0.01, %v1188_v28  ;;  %v1591_v35 = vsel %vm1335_vm2, %v921_v21, %v1463_v29  ;;  %v1180_v38 = vadd.f32 %v2403_v8, %v1179_v32  ;;  %v2081_v39 = vpop.f32.mrf.mxu0  ;;  %v2145_v40 = vpop.f32.mrf.mxu1 }
 0x135   : > { %v1655_v36 = vsel %vm1399_vm3, %v1177_v22, %v1527_v30  ;;  %1719 = vst [vmem:[%s2411_s14 + $0x100] sm:$0xff] %v1591_v35  ;;  %v1594_v41 = vsel %vm1338_vm4, %v932_v27, %v1466_v33  ;;  %v945_v43 = vadd.f32 %v2081_v39, %v2403_v8  ;;  %v1201_v44 = vadd.f32 %v2145_v40, %v2403_v8 }
 0x136   : > { %1783 = vst [vmem:[%s2411_s14 + $0x300] sm:$0xff] %v1655_v36  ;;  %v1658_v42 = vsel %vm1402_vm5, %v1188_v28, %v1530_v34  ;;  %1722 = vst [vmem:[%s2411_s14 + $0x118] sm:$0xff] %v1594_v41  ;;  %vm1336_vm6 = vcmp.ge.f32.partialorder %v924_v37, 0.0  ;;  %v1464_v45 = vmul.f32 0.01, %v924_v37  ;;  %vm1400_vm7 = vcmp.ge.f32.partialorder %v1180_v38, 0.0  ;;  %v936_v47 = vpop.f32.mrf.mxu0  ;;  %v1192_v48 = vpop.f32.mrf.mxu1 }
 0x137   : > { %1786 = vst [vmem:[%s2411_s14 + $0x318] sm:$0xff] %v1658_v42  ;;  %v1528_v46 = vmul.f32 0.01, %v1180_v38  ;;  %vm1341_vm8 = vcmp.ge.f32.partialorder %v945_v43, 0.0  ;;  %v1469_v49 = vmul.f32 0.01, %v945_v43  ;;  %v937_v53 = vadd.f32 %v2403_v8, %v936_v47 }
 0x138   : > { %vm1405_vm9 = vcmp.ge.f32.partialorder %v1201_v44, 0.0  ;;  %v1533_v50 = vmul.f32 0.01, %v1201_v44  ;;  %v1592_v51 = vsel %vm1336_vm6, %v924_v37, %v1464_v45  ;;  %v1193_v54 = vadd.f32 %v2403_v8, %v1192_v48  ;;  %v2082_v55 = vpop.f32.mrf.mxu0  ;;  %v2146_v56 = vpop.f32.mrf.mxu1 }
 0x139   : > { %v1656_v52 = vsel %vm1400_vm7, %v1180_v38, %v1528_v46  ;;  %1720 = vst [vmem:[%s2411_s14 + $0x108] sm:$0xff] %v1592_v51  ;;  %v1597_v57 = vsel %vm1341_vm8, %v945_v43, %v1469_v49  ;;  %v948_v59 = vadd.f32 %v2082_v55, %v2403_v8  ;;  %v1204_v60 = vadd.f32 %v2146_v56, %v2403_v8 }
 0x13a   : > { %1784 = vst [vmem:[%s2411_s14 + $0x308] sm:$0xff] %v1656_v52  ;;  %v1661_v58 = vsel %vm1405_vm9, %v1201_v44, %v1533_v50  ;;  %1725 = vst [vmem:[%s2411_s14 + $0x130] sm:$0xff] %v1597_v57  ;;  %vm1339_vm10 = vcmp.ge.f32.partialorder %v937_v53, 0.0  ;;  %v1467_v61 = vmul.f32 0.01, %v937_v53  ;;  %vm1403_vm11 = vcmp.ge.f32.partialorder %v1193_v54, 0.0  ;;  %v939_v63 = vpop.f32.mrf.mxu0  ;;  %v1195_v0 = vpop.f32.mrf.mxu1 }
 0x13b   : > { %1789 = vst [vmem:[%s2411_s14 + $0x330] sm:$0xff] %v1661_v58  ;;  %v1531_v62 = vmul.f32 0.01, %v1193_v54  ;;  %vm1342_vm12 = vcmp.ge.f32.partialorder %v948_v59, 0.0  ;;  %v1470_v1 = vmul.f32 0.01, %v948_v59  ;;  %v940_v5 = vadd.f32 %v2403_v8, %v939_v63 }
 0x13c   : > { %vm1406_vm13 = vcmp.ge.f32.partialorder %v1204_v60, 0.0  ;;  %v1534_v2 = vmul.f32 0.01, %v1204_v60  ;;  %v1595_v3 = vsel %vm1339_vm10, %v937_v53, %v1467_v61  ;;  %v1196_v6 = vadd.f32 %v2403_v8, %v1195_v0  ;;  %v2085_v7 = vpop.f32.mrf.mxu0  ;;  %v2149_v9 = vpop.f32.mrf.mxu1 }
 0x13d   : > { %v1659_v4 = vsel %vm1403_vm11, %v1193_v54, %v1531_v62  ;;  %1723 = vst [vmem:[%s2411_s14 + $0x120] sm:$0xff] %v1595_v3  ;;  %v1598_v10 = vsel %vm1342_vm12, %v948_v59, %v1470_v1  ;;  %v961_v12 = vadd.f32 %v2085_v7, %v2403_v8  ;;  %v1217_v13 = vadd.f32 %v2149_v9, %v2403_v8 }
 0x13e   : > { %1787 = vst [vmem:[%s2411_s14 + $0x320] sm:$0xff] %v1659_v4  ;;  %v1662_v11 = vsel %vm1406_vm13, %v1204_v60, %v1534_v2  ;;  %1726 = vst [vmem:[%s2411_s14 + $0x138] sm:$0xff] %v1598_v10  ;;  %vm1340_vm14 = vcmp.ge.f32.partialorder %v940_v5, 0.0  ;;  %v1468_v14 = vmul.f32 0.01, %v940_v5  ;;  %vm1404_vm15 = vcmp.ge.f32.partialorder %v1196_v6, 0.0  ;;  %v952_v16 = vpop.f32.mrf.mxu0  ;;  %v1208_v17 = vpop.f32.mrf.mxu1 }
 0x13f   : > { %1790 = vst [vmem:[%s2411_s14 + $0x338] sm:$0xff] %v1662_v11  ;;  %v1532_v15 = vmul.f32 0.01, %v1196_v6  ;;  %vm1345_vm0 = vcmp.ge.f32.partialorder %v961_v12, 0.0  ;;  %v1473_v18 = vmul.f32 0.01, %v961_v12  ;;  %v953_v22 = vadd.f32 %v2403_v8, %v952_v16 }
 0x140   : > { %vm1409_vm1 = vcmp.ge.f32.partialorder %v1217_v13, 0.0  ;;  %v1537_v19 = vmul.f32 0.01, %v1217_v13  ;;  %v1596_v20 = vsel %vm1340_vm14, %v940_v5, %v1468_v14  ;;  %v1209_v23 = vadd.f32 %v2403_v8, %v1208_v17  ;;  %v2086_v24 = vpop.f32.mrf.mxu0  ;;  %v2150_v25 = vpop.f32.mrf.mxu1 }
 0x141   : > { %v1660_v21 = vsel %vm1404_vm15, %v1196_v6, %v1532_v15  ;;  %1724 = vst [vmem:[%s2411_s14 + $0x128] sm:$0xff] %v1596_v20  ;;  %v1601_v26 = vsel %vm1345_vm0, %v961_v12, %v1473_v18  ;;  %v964_v28 = vadd.f32 %v2086_v24, %v2403_v8  ;;  %v1220_v29 = vadd.f32 %v2150_v25, %v2403_v8  ;;  %v2582_v8 = vld [vmem:[%s2677_s2] ss:$0 sm:$0xff] }
 0x142   : > { %1788 = vst [vmem:[%s2411_s14 + $0x328] sm:$0xff] %v1660_v21  ;;  %v1665_v27 = vsel %vm1409_vm1, %v1217_v13, %v1537_v19  ;;  %1729 = vst [vmem:[%s2411_s14 + $0x150] sm:$0xff] %v1601_v26  ;;  %vm1343_vm2 = vcmp.ge.f32.partialorder %v953_v22, 0.0  ;;  %v1471_v30 = vmul.f32 0.01, %v953_v22  ;;  %vm1407_vm3 = vcmp.ge.f32.partialorder %v1209_v23, 0.0  ;;  %v955_v32 = vpop.f32.mrf.mxu0  ;;  %v1211_v33 = vpop.f32.mrf.mxu1 }
 0x143   : > { %1793 = vst [vmem:[%s2411_s14 + $0x350] sm:$0xff] %v1665_v27  ;;  %v1535_v31 = vmul.f32 0.01, %v1209_v23  ;;  %vm1346_vm4 = vcmp.ge.f32.partialorder %v964_v28, 0.0  ;;  %v1474_v34 = vmul.f32 0.01, %v964_v28  ;;  %v956_v38 = vadd.f32 %v2582_v8, %v955_v32 }
 0x144   : > { %vm1410_vm5 = vcmp.ge.f32.partialorder %v1220_v29, 0.0  ;;  %v1538_v35 = vmul.f32 0.01, %v1220_v29  ;;  %v1599_v36 = vsel %vm1343_vm2, %v953_v22, %v1471_v30  ;;  %v1212_v39 = vadd.f32 %v2582_v8, %v1211_v33  ;;  %v2089_v40 = vpop.f32.mrf.mxu0  ;;  %v2153_v41 = vpop.f32.mrf.mxu1 }
 0x145   : > { %v1663_v37 = vsel %vm1407_vm3, %v1209_v23, %v1535_v31  ;;  %1727 = vst [vmem:[%s2411_s14 + $0x140] sm:$0xff] %v1599_v36  ;;  %v1602_v42 = vsel %vm1346_vm4, %v964_v28, %v1474_v34  ;;  %v977_v44 = vadd.f32 %v2582_v8, %v2089_v40  ;;  %v1233_v45 = vadd.f32 %v2582_v8, %v2153_v41 }
 0x146   : > { %1791 = vst [vmem:[%s2411_s14 + $0x340] sm:$0xff] %v1663_v37  ;;  %v1666_v43 = vsel %vm1410_vm5, %v1220_v29, %v1538_v35  ;;  %1730 = vst [vmem:[%s2411_s14 + $0x158] sm:$0xff] %v1602_v42  ;;  %vm1344_vm6 = vcmp.ge.f32.partialorder %v956_v38, 0.0  ;;  %v1472_v46 = vmul.f32 0.01, %v956_v38  ;;  %vm1408_vm7 = vcmp.ge.f32.partialorder %v1212_v39, 0.0  ;;  %v968_v48 = vpop.f32.mrf.mxu0  ;;  %v1224_v49 = vpop.f32.mrf.mxu1 }
 0x147   : > { %1794 = vst [vmem:[%s2411_s14 + $0x358] sm:$0xff] %v1666_v43  ;;  %v1536_v47 = vmul.f32 0.01, %v1212_v39  ;;  %vm1349_vm8 = vcmp.ge.f32.partialorder %v977_v44, 0.0  ;;  %v1477_v50 = vmul.f32 0.01, %v977_v44  ;;  %v969_v54 = vadd.f32 %v2582_v8, %v968_v48 }
 0x148   : > { %vm1413_vm9 = vcmp.ge.f32.partialorder %v1233_v45, 0.0  ;;  %v1541_v51 = vmul.f32 0.01, %v1233_v45  ;;  %v1600_v52 = vsel %vm1344_vm6, %v956_v38, %v1472_v46  ;;  %v1225_v55 = vadd.f32 %v2582_v8, %v1224_v49  ;;  %v2090_v56 = vpop.f32.mrf.mxu0  ;;  %v2154_v57 = vpop.f32.mrf.mxu1 }
 0x149   : > { %v1664_v53 = vsel %vm1408_vm7, %v1212_v39, %v1536_v47  ;;  %1728 = vst [vmem:[%s2411_s14 + $0x148] sm:$0xff] %v1600_v52  ;;  %v1605_v58 = vsel %vm1349_vm8, %v977_v44, %v1477_v50  ;;  %v980_v60 = vadd.f32 %v2582_v8, %v2090_v56  ;;  %v1236_v61 = vadd.f32 %v2582_v8, %v2154_v57 }
 0x14a   : > { %1792 = vst [vmem:[%s2411_s14 + $0x348] sm:$0xff] %v1664_v53  ;;  %v1669_v59 = vsel %vm1413_vm9, %v1233_v45, %v1541_v51  ;;  %1733 = vst [vmem:[%s2411_s14 + $0x170] sm:$0xff] %v1605_v58  ;;  %vm1347_vm10 = vcmp.ge.f32.partialorder %v969_v54, 0.0  ;;  %v1475_v62 = vmul.f32 0.01, %v969_v54  ;;  %vm1411_vm11 = vcmp.ge.f32.partialorder %v1225_v55, 0.0  ;;  %v971_v0 = vpop.f32.mrf.mxu0  ;;  %v1227_v1 = vpop.f32.mrf.mxu1 }
 0x14b   : > { %1797 = vst [vmem:[%s2411_s14 + $0x370] sm:$0xff] %v1669_v59  ;;  %v1539_v63 = vmul.f32 0.01, %v1225_v55  ;;  %vm1350_vm12 = vcmp.ge.f32.partialorder %v980_v60, 0.0  ;;  %v1478_v2 = vmul.f32 0.01, %v980_v60  ;;  %v972_v6 = vadd.f32 %v2582_v8, %v971_v0 }
 0x14c   : > { %vm1414_vm13 = vcmp.ge.f32.partialorder %v1236_v61, 0.0  ;;  %v1542_v3 = vmul.f32 0.01, %v1236_v61  ;;  %v1603_v4 = vsel %vm1347_vm10, %v969_v54, %v1475_v62  ;;  %v1228_v7 = vadd.f32 %v2582_v8, %v1227_v1  ;;  %v2093_v9 = vpop.f32.mrf.mxu0  ;;  %v2157_v10 = vpop.f32.mrf.mxu1 }
 0x14d   : > { %v1667_v5 = vsel %vm1411_vm11, %v1225_v55, %v1539_v63  ;;  %1731 = vst [vmem:[%s2411_s14 + $0x160] sm:$0xff] %v1603_v4  ;;  %v1606_v11 = vsel %vm1350_vm12, %v980_v60, %v1478_v2  ;;  %v993_v13 = vadd.f32 %v2582_v8, %v2093_v9  ;;  %v1249_v14 = vadd.f32 %v2582_v8, %v2157_v10 }
 0x14e   : > { %1795 = vst [vmem:[%s2411_s14 + $0x360] sm:$0xff] %v1667_v5  ;;  %v1670_v12 = vsel %vm1414_vm13, %v1236_v61, %v1542_v3  ;;  %1734 = vst [vmem:[%s2411_s14 + $0x178] sm:$0xff] %v1606_v11  ;;  %vm1348_vm14 = vcmp.ge.f32.partialorder %v972_v6, 0.0  ;;  %v1476_v15 = vmul.f32 0.01, %v972_v6  ;;  %vm1412_vm15 = vcmp.ge.f32.partialorder %v1228_v7, 0.0  ;;  %v984_v17 = vpop.f32.mrf.mxu0  ;;  %v1240_v18 = vpop.f32.mrf.mxu1 }
 0x14f   : > { %1798 = vst [vmem:[%s2411_s14 + $0x378] sm:$0xff] %v1670_v12  ;;  %v1540_v16 = vmul.f32 0.01, %v1228_v7  ;;  %vm1353_vm0 = vcmp.ge.f32.partialorder %v993_v13, 0.0  ;;  %v1481_v19 = vmul.f32 0.01, %v993_v13  ;;  %v985_v23 = vadd.f32 %v2582_v8, %v984_v17 }
 0x150   : > { %vm1417_vm1 = vcmp.ge.f32.partialorder %v1249_v14, 0.0  ;;  %v1545_v20 = vmul.f32 0.01, %v1249_v14  ;;  %v1604_v21 = vsel %vm1348_vm14, %v972_v6, %v1476_v15  ;;  %v1241_v24 = vadd.f32 %v2582_v8, %v1240_v18  ;;  %v2094_v25 = vpop.f32.mrf.mxu0  ;;  %v2158_v26 = vpop.f32.mrf.mxu1 }
 0x151   : > { %v1668_v22 = vsel %vm1412_vm15, %v1228_v7, %v1540_v16  ;;  %1732 = vst [vmem:[%s2411_s14 + $0x168] sm:$0xff] %v1604_v21  ;;  %v1609_v27 = vsel %vm1353_vm0, %v993_v13, %v1481_v19  ;;  %v996_v29 = vadd.f32 %v2582_v8, %v2094_v25  ;;  %v1252_v30 = vadd.f32 %v2582_v8, %v2158_v26 }
 0x152   : > { %1796 = vst [vmem:[%s2411_s14 + $0x368] sm:$0xff] %v1668_v22  ;;  %v1673_v28 = vsel %vm1417_vm1, %v1249_v14, %v1545_v20  ;;  %1737 = vst [vmem:[%s2411_s14 + $0x190] sm:$0xff] %v1609_v27  ;;  %vm1351_vm2 = vcmp.ge.f32.partialorder %v985_v23, 0.0  ;;  %v1479_v31 = vmul.f32 0.01, %v985_v23  ;;  %vm1415_vm3 = vcmp.ge.f32.partialorder %v1241_v24, 0.0  ;;  %v987_v33 = vpop.f32.mrf.mxu0  ;;  %v1243_v34 = vpop.f32.mrf.mxu1 }
 0x153   : > { %1801 = vst [vmem:[%s2411_s14 + $0x390] sm:$0xff] %v1673_v28  ;;  %v1543_v32 = vmul.f32 0.01, %v1241_v24  ;;  %vm1354_vm4 = vcmp.ge.f32.partialorder %v996_v29, 0.0  ;;  %v1482_v35 = vmul.f32 0.01, %v996_v29  ;;  %v988_v39 = vadd.f32 %v2582_v8, %v987_v33 }
 0x154   : > { %vm1418_vm5 = vcmp.ge.f32.partialorder %v1252_v30, 0.0  ;;  %v1546_v36 = vmul.f32 0.01, %v1252_v30  ;;  %v1607_v37 = vsel %vm1351_vm2, %v985_v23, %v1479_v31  ;;  %v1244_v40 = vadd.f32 %v2582_v8, %v1243_v34  ;;  %v2097_v41 = vpop.f32.mrf.mxu0  ;;  %v2161_v42 = vpop.f32.mrf.mxu1 }
 0x155   : > { %v1671_v38 = vsel %vm1415_vm3, %v1241_v24, %v1543_v32  ;;  %1735 = vst [vmem:[%s2411_s14 + $0x180] sm:$0xff] %v1607_v37  ;;  %v1610_v43 = vsel %vm1354_vm4, %v996_v29, %v1482_v35  ;;  %v1009_v45 = vadd.f32 %v2582_v8, %v2097_v41  ;;  %v1265_v46 = vadd.f32 %v2582_v8, %v2161_v42 }
 0x156   : > { %1799 = vst [vmem:[%s2411_s14 + $0x380] sm:$0xff] %v1671_v38  ;;  %v1674_v44 = vsel %vm1418_vm5, %v1252_v30, %v1546_v36  ;;  %1738 = vst [vmem:[%s2411_s14 + $0x198] sm:$0xff] %v1610_v43  ;;  %vm1352_vm6 = vcmp.ge.f32.partialorder %v988_v39, 0.0  ;;  %v1480_v47 = vmul.f32 0.01, %v988_v39  ;;  %vm1416_vm7 = vcmp.ge.f32.partialorder %v1244_v40, 0.0  ;;  %v1000_v49 = vpop.f32.mrf.mxu0  ;;  %v1256_v50 = vpop.f32.mrf.mxu1 }
 0x157   : > { %1802 = vst [vmem:[%s2411_s14 + $0x398] sm:$0xff] %v1674_v44  ;;  %v1544_v48 = vmul.f32 0.01, %v1244_v40  ;;  %vm1357_vm8 = vcmp.ge.f32.partialorder %v1009_v45, 0.0  ;;  %v1485_v51 = vmul.f32 0.01, %v1009_v45  ;;  %v1001_v55 = vadd.f32 %v2582_v8, %v1000_v49 }
 0x158   : > { %vm1421_vm9 = vcmp.ge.f32.partialorder %v1265_v46, 0.0  ;;  %v1549_v52 = vmul.f32 0.01, %v1265_v46  ;;  %v1608_v53 = vsel %vm1352_vm6, %v988_v39, %v1480_v47  ;;  %v1257_v56 = vadd.f32 %v2582_v8, %v1256_v50  ;;  %v2098_v57 = vpop.f32.mrf.mxu0  ;;  %v2162_v58 = vpop.f32.mrf.mxu1 }
 0x159   : > { %v1672_v54 = vsel %vm1416_vm7, %v1244_v40, %v1544_v48  ;;  %1736 = vst [vmem:[%s2411_s14 + $0x188] sm:$0xff] %v1608_v53  ;;  %v1613_v59 = vsel %vm1357_vm8, %v1009_v45, %v1485_v51  ;;  %v1012_v61 = vadd.f32 %v2582_v8, %v2098_v57  ;;  %v1268_v62 = vadd.f32 %v2582_v8, %v2162_v58 }
 0x15a   : > { %1800 = vst [vmem:[%s2411_s14 + $0x388] sm:$0xff] %v1672_v54  ;;  %v1677_v60 = vsel %vm1421_vm9, %v1265_v46, %v1549_v52  ;;  %1741 = vst [vmem:[%s2411_s14 + $0x1b0] sm:$0xff] %v1613_v59  ;;  %vm1355_vm10 = vcmp.ge.f32.partialorder %v1001_v55, 0.0  ;;  %v1483_v63 = vmul.f32 0.01, %v1001_v55  ;;  %vm1419_vm11 = vcmp.ge.f32.partialorder %v1257_v56, 0.0  ;;  %v1003_v1 = vpop.f32.mrf.mxu0  ;;  %v1259_v2 = vpop.f32.mrf.mxu1 }
 0x15b   : > { %1805 = vst [vmem:[%s2411_s14 + $0x3b0] sm:$0xff] %v1677_v60  ;;  %v1547_v0 = vmul.f32 0.01, %v1257_v56  ;;  %vm1358_vm12 = vcmp.ge.f32.partialorder %v1012_v61, 0.0  ;;  %v1486_v3 = vmul.f32 0.01, %v1012_v61  ;;  %v1004_v7 = vadd.f32 %v2582_v8, %v1003_v1 }
 0x15c   : > { %vm1422_vm13 = vcmp.ge.f32.partialorder %v1268_v62, 0.0  ;;  %v1550_v4 = vmul.f32 0.01, %v1268_v62  ;;  %v1611_v5 = vsel %vm1355_vm10, %v1001_v55, %v1483_v63  ;;  %v1260_v9 = vadd.f32 %v2582_v8, %v1259_v2  ;;  %v2101_v10 = vpop.f32.mrf.mxu0  ;;  %v2165_v11 = vpop.f32.mrf.mxu1 }
 0x15d   : > { %v1675_v6 = vsel %vm1419_vm11, %v1257_v56, %v1547_v0  ;;  %1739 = vst [vmem:[%s2411_s14 + $0x1a0] sm:$0xff] %v1611_v5  ;;  %v1614_v12 = vsel %vm1358_vm12, %v1012_v61, %v1486_v3  ;;  %v1025_v14 = vadd.f32 %v2582_v8, %v2101_v10  ;;  %v1281_v15 = vadd.f32 %v2582_v8, %v2165_v11 }
 0x15e   : > { %1803 = vst [vmem:[%s2411_s14 + $0x3a0] sm:$0xff] %v1675_v6  ;;  %v1678_v13 = vsel %vm1422_vm13, %v1268_v62, %v1550_v4  ;;  %1742 = vst [vmem:[%s2411_s14 + $0x1b8] sm:$0xff] %v1614_v12  ;;  %vm1356_vm14 = vcmp.ge.f32.partialorder %v1004_v7, 0.0  ;;  %v1484_v16 = vmul.f32 0.01, %v1004_v7  ;;  %vm1420_vm15 = vcmp.ge.f32.partialorder %v1260_v9, 0.0  ;;  %v1016_v18 = vpop.f32.mrf.mxu0  ;;  %v1272_v19 = vpop.f32.mrf.mxu1 }
 0x15f   : > { %1806 = vst [vmem:[%s2411_s14 + $0x3b8] sm:$0xff] %v1678_v13  ;;  %v1548_v17 = vmul.f32 0.01, %v1260_v9  ;;  %vm1361_vm0 = vcmp.ge.f32.partialorder %v1025_v14, 0.0  ;;  %v1489_v20 = vmul.f32 0.01, %v1025_v14  ;;  %v1017_v24 = vadd.f32 %v2582_v8, %v1016_v18 }
 0x160   : > { %vm1425_vm1 = vcmp.ge.f32.partialorder %v1281_v15, 0.0  ;;  %v1553_v21 = vmul.f32 0.01, %v1281_v15  ;;  %v1612_v22 = vsel %vm1356_vm14, %v1004_v7, %v1484_v16  ;;  %v1273_v25 = vadd.f32 %v2582_v8, %v1272_v19  ;;  %v2102_v26 = vpop.f32.mrf.mxu0  ;;  %v2166_v27 = vpop.f32.mrf.mxu1 }
 0x161   : > { %v1676_v23 = vsel %vm1420_vm15, %v1260_v9, %v1548_v17  ;;  %1740 = vst [vmem:[%s2411_s14 + $0x1a8] sm:$0xff] %v1612_v22  ;;  %v1617_v28 = vsel %vm1361_vm0, %v1025_v14, %v1489_v20  ;;  %v1028_v30 = vadd.f32 %v2582_v8, %v2102_v26  ;;  %v1284_v31 = vadd.f32 %v2582_v8, %v2166_v27 }
 0x162   : > { %1804 = vst [vmem:[%s2411_s14 + $0x3a8] sm:$0xff] %v1676_v23  ;;  %v1681_v29 = vsel %vm1425_vm1, %v1281_v15, %v1553_v21  ;;  %1745 = vst [vmem:[%s2411_s14 + $0x1d0] sm:$0xff] %v1617_v28  ;;  %vm1359_vm2 = vcmp.ge.f32.partialorder %v1017_v24, 0.0  ;;  %v1487_v32 = vmul.f32 0.01, %v1017_v24  ;;  %vm1423_vm3 = vcmp.ge.f32.partialorder %v1273_v25, 0.0  ;;  %v1019_v34 = vpop.f32.mrf.mxu0  ;;  %v1275_v35 = vpop.f32.mrf.mxu1 }
 0x163   : > { %1809 = vst [vmem:[%s2411_s14 + $0x3d0] sm:$0xff] %v1681_v29  ;;  %v1551_v33 = vmul.f32 0.01, %v1273_v25  ;;  %vm1362_vm4 = vcmp.ge.f32.partialorder %v1028_v30, 0.0  ;;  %v1490_v36 = vmul.f32 0.01, %v1028_v30  ;;  %v1020_v40 = vadd.f32 %v2582_v8, %v1019_v34 }
 0x164   : > { %vm1426_vm5 = vcmp.ge.f32.partialorder %v1284_v31, 0.0  ;;  %v1554_v37 = vmul.f32 0.01, %v1284_v31  ;;  %v1615_v38 = vsel %vm1359_vm2, %v1017_v24, %v1487_v32  ;;  %v1276_v41 = vadd.f32 %v2582_v8, %v1275_v35  ;;  %v2105_v42 = vpop.f32.mrf.mxu0  ;;  %v2169_v43 = vpop.f32.mrf.mxu1 }
 0x165   : > { %v1679_v39 = vsel %vm1423_vm3, %v1273_v25, %v1551_v33  ;;  %1743 = vst [vmem:[%s2411_s14 + $0x1c0] sm:$0xff] %v1615_v38  ;;  %v1618_v44 = vsel %vm1362_vm4, %v1028_v30, %v1490_v36  ;;  %v1041_v46 = vadd.f32 %v2582_v8, %v2105_v42  ;;  %v1297_v47 = vadd.f32 %v2582_v8, %v2169_v43 }
 0x166   : > { %1807 = vst [vmem:[%s2411_s14 + $0x3c0] sm:$0xff] %v1679_v39  ;;  %v1682_v45 = vsel %vm1426_vm5, %v1284_v31, %v1554_v37  ;;  %1746 = vst [vmem:[%s2411_s14 + $0x1d8] sm:$0xff] %v1618_v44  ;;  %vm1360_vm6 = vcmp.ge.f32.partialorder %v1020_v40, 0.0  ;;  %v1488_v48 = vmul.f32 0.01, %v1020_v40  ;;  %vm1424_vm7 = vcmp.ge.f32.partialorder %v1276_v41, 0.0  ;;  %v1032_v50 = vpop.f32.mrf.mxu0  ;;  %v1288_v51 = vpop.f32.mrf.mxu1 }
 0x167   : > { %1810 = vst [vmem:[%s2411_s14 + $0x3d8] sm:$0xff] %v1682_v45  ;;  %v1552_v49 = vmul.f32 0.01, %v1276_v41  ;;  %vm1365_vm8 = vcmp.ge.f32.partialorder %v1041_v46, 0.0  ;;  %v1493_v52 = vmul.f32 0.01, %v1041_v46  ;;  %v1033_v56 = vadd.f32 %v2582_v8, %v1032_v50 }
 0x168   : > { %vm1429_vm9 = vcmp.ge.f32.partialorder %v1297_v47, 0.0  ;;  %v1557_v53 = vmul.f32 0.01, %v1297_v47  ;;  %v1616_v54 = vsel %vm1360_vm6, %v1020_v40, %v1488_v48  ;;  %v1289_v57 = vadd.f32 %v2582_v8, %v1288_v51  ;;  %v2106_v58 = vpop.f32.mrf.mxu0  ;;  %v2170_v59 = vpop.f32.mrf.mxu1 }
 0x169   : > { %v1680_v55 = vsel %vm1424_vm7, %v1276_v41, %v1552_v49  ;;  %1744 = vst [vmem:[%s2411_s14 + $0x1c8] sm:$0xff] %v1616_v54  ;;  %v1621_v60 = vsel %vm1365_vm8, %v1041_v46, %v1493_v52  ;;  %v1044_v62 = vadd.f32 %v2582_v8, %v2106_v58  ;;  %v1300_v63 = vadd.f32 %v2582_v8, %v2170_v59 }
 0x16a   : > { %1808 = vst [vmem:[%s2411_s14 + $0x3c8] sm:$0xff] %v1680_v55  ;;  %v1685_v61 = vsel %vm1429_vm9, %v1297_v47, %v1557_v53  ;;  %1749 = vst [vmem:[%s2411_s14 + $0x1f0] sm:$0xff] %v1621_v60  ;;  %vm1363_vm10 = vcmp.ge.f32.partialorder %v1033_v56, 0.0  ;;  %v1491_v0 = vmul.f32 0.01, %v1033_v56  ;;  %vm1427_vm11 = vcmp.ge.f32.partialorder %v1289_v57, 0.0  ;;  %v1035_v2 = vpop.f32.mrf.mxu0  ;;  %v1291_v3 = vpop.f32.mrf.mxu1 }
 0x16b   : > { %1813 = vst [vmem:[%s2411_s14 + $0x3f0] sm:$0xff] %v1685_v61  ;;  %v1555_v1 = vmul.f32 0.01, %v1289_v57  ;;  %vm1366_vm12 = vcmp.ge.f32.partialorder %v1044_v62, 0.0  ;;  %v1494_v4 = vmul.f32 0.01, %v1044_v62  ;;  %v1036_v9 = vadd.f32 %v2582_v8, %v1035_v2 }
 0x16c   : > { %vm1430_vm13 = vcmp.ge.f32.partialorder %v1300_v63, 0.0  ;;  %v1558_v5 = vmul.f32 0.01, %v1300_v63  ;;  %v1619_v6 = vsel %vm1363_vm10, %v1033_v56, %v1491_v0  ;;  %v1292_v10 = vadd.f32 %v2582_v8, %v1291_v3 }
 0x16d   : > { %v1683_v7 = vsel %vm1427_vm11, %v1289_v57, %v1555_v1  ;;  %1747 = vst [vmem:[%s2411_s14 + $0x1e0] sm:$0xff] %v1619_v6  ;;  %v1622_v11 = vsel %vm1366_vm12, %v1044_v62, %v1494_v4  ;;  %vm1364_vm14 = vcmp.ge.f32.partialorder %v1036_v9, 0.0  ;;  %v1492_v13 = vmul.f32 0.01, %v1036_v9 }
 0x16e   : > { %1811 = vst [vmem:[%s2411_s14 + $0x3e0] sm:$0xff] %v1683_v7  ;;  %v1686_v12 = vsel %vm1430_vm13, %v1300_v63, %v1558_v5  ;;  %1750 = vst [vmem:[%s2411_s14 + $0x1f8] sm:$0xff] %v1622_v11  ;;  %vm1428_vm15 = vcmp.ge.f32.partialorder %v1292_v10, 0.0  ;;  %v1556_v14 = vmul.f32 0.01, %v1292_v10 }
 0x16f   : > { %1814 = vst [vmem:[%s2411_s14 + $0x3f8] sm:$0xff] %v1686_v12  ;;  %v1620_v15 = vsel %vm1364_vm14, %v1036_v9, %v1492_v13 }
 0x170   : > { %v1684_v16 = vsel %vm1428_vm15, %v1292_v10, %v1556_v14  ;;  %1748 = vst [vmem:[%s2411_s14 + $0x1e8] sm:$0xff] %v1620_v15 }
 0x171   : > { %1812 = vst [vmem:[%s2411_s14 + $0x3e8] sm:$0xff] %v1684_v16 }
 0x172 PF: > { %s13_s12 = sadd.s32 1, %s2274_s12  }
 0x173   : > { %p10_p4 = scmp.ge.s32.totalorder %s13_s12, 10  }
 0x175   :  { %12 = sbr.rel (!%p10_p4) target bundleno = 1 (0x1), region = 62 }

</bundles_post_ra>
